<compile_context>
chip_gen: v6e
topology: v6e:2x2x1
jax: 0.10.0
libtpu: 0.0.40
codegen_flags: <defaults>
</compile_context>

<pallas_src>
import functools

import numpy as np

import jax
import jax.numpy as jnp
from jax import lax
from jax.experimental import pallas as pl
from jax.experimental.pallas import tpu as pltpu


def _round_up(x, m):
    return (x + m - 1) // m * m


# ----------------------------- Linear -------------------------------------- #
def _linear_kernel(z_ref, w_ref, b_ref, o_ref):
    o_ref[...] = (
        jnp.dot(z_ref[...], w_ref[...], preferred_element_type=jnp.float32)
        + b_ref[...]
    )


def linear(z, w, b):
    # z: (B, K) bf16, w: (K, N) bf16 (columns pre-permuted to NHWC order),
    # b: (1, N) f32 -> (B, N) f32
    B, K = z.shape
    N = w.shape[1]
    return pl.pallas_call(
        _linear_kernel,
        out_shape=jax.ShapeDtypeStruct((B, N), jnp.float32),
        grid=(1,),
        in_specs=[
            pl.BlockSpec((B, K), lambda i: (0, 0)),
            pl.BlockSpec((K, N), lambda i: (0, 0)),
            pl.BlockSpec((1, N), lambda i: (0, 0)),
        ],
        out_specs=pl.BlockSpec((B, N), lambda i: (0, 0)),
        compiler_params=pltpu.CompilerParams(dimension_semantics=("arbitrary",)),
    )(z, w, b)


# ------------- fused BN (+LeakyReLU) -> upsample+pad -> 3x3 conv ------------ #
def _fused_conv_kernel(x_ref, s_ref, w_ref, b_ref, scale_ref, shift_ref,
                       mask_ref, o_ref, *rest, M, Wp, neg_slope, apply_tanh,
                       with_stats):
    if with_stats:
        st_ref, xf_ref = rest
    else:
        (xf_ref,) = rest

    # 1) BatchNorm of the input (precomputed scale/shift) + optional LeakyReLU.
    x = x_ref[0].astype(jnp.float32)                       # (P_in, Cin)
    y = x * scale_ref[...] + shift_ref[...]
    if neg_slope is not None:
        y = jnp.where(y >= 0, y, neg_slope * y)
    y = y.astype(jnp.bfloat16)

    # 2) nearest-2x upsample + zero pad + flatten over the padded width, realized
    #    as a single 0/1 selection matmul -> flat (R, Cin) f32 buffer in VMEM.
    xf_ref[...] = jnp.dot(s_ref[...], y, preferred_element_type=jnp.float32)

    # 3) 3x3 conv = 9 contiguous-row-slice matmuls over the flat padded buffer
    #    (tap (kh,kw) starts at row kh*Wp + kw; bf16 operands, f32 accumulation).
    Cout = o_ref.shape[-1]
    acc = jnp.zeros((M, Cout), jnp.float32)
    for kh in range(3):
        for kw in range(3):
            off = kh * Wp + kw
            xs = xf_ref[off:off + M, :].astype(jnp.bfloat16)
            acc = acc + jnp.dot(xs, w_ref[kh, kw],
                                preferred_element_type=jnp.float32)
    acc = acc + b_ref[...]
    if apply_tanh:
        acc = jnp.tanh(acc)          # f32 tanh input
    o_ref[0] = acc.astype(o_ref.dtype)

    # 4) per-channel sum / sum-of-squares of the conv output over *valid* columns
    #    (the flat layout carries 2 junk columns per row); feeds the next BN.
    if with_stats:
        av = acc * mask_ref[...]
        ssum = jnp.sum(av, axis=0, keepdims=True)
        ssq = jnp.sum(av * acc, axis=0, keepdims=True)
        st_ref[0] = jnp.concatenate([ssum, ssq], axis=0)


def fused_conv_block(x, sel, mask, w, b, scale, shift, *, M, Wp, neg_slope,
                     apply_tanh, out_dtype, with_stats):
    """One generator stage.

    x     : (B, P_in, Cin)   bf16 flat (possibly width-padded) NHWC activation
    sel   : (R, P_in)        bf16 0/1 upsample+pad selection matrix
    mask  : (M, 1)           f32 validity mask of the flat output rows
    w     : (3, 3, Cin, Cout) bf16 ; b: (Cout,) f32
    scale, shift : (Cin,)    f32 BatchNorm scale/shift of the *input*
    returns (B, M, Cout) [, (B, 2, Cout) sum/sumsq stats]
    """
    B, P_in, Cin = x.shape
    Cout = w.shape[-1]
    R = sel.shape[0]
    assert R >= M + 2 * Wp + 2

    kernel = functools.partial(
        _fused_conv_kernel, M=M, Wp=Wp, neg_slope=neg_slope,
        apply_tanh=apply_tanh, with_stats=with_stats)

    if with_stats:
        out_shape = (jax.ShapeDtypeStruct((B, M, Cout), out_dtype),
                     jax.ShapeDtypeStruct((B, 2, Cout), jnp.float32))
        out_specs = (pl.BlockSpec((1, M, Cout), lambda i: (i, 0, 0)),
                     pl.BlockSpec((1, 2, Cout), lambda i: (i, 0, 0)))
    else:
        out_shape = jax.ShapeDtypeStruct((B, M, Cout), out_dtype)
        out_specs = pl.BlockSpec((1, M, Cout), lambda i: (i, 0, 0))

    # NOTE: constant-index blocks (sel/w/b/scale/shift/mask) are not re-fetched
    # when the block index is unchanged between grid steps; at B=2 this is
    # negligible either way.
    return pl.pallas_call(
        kernel,
        out_shape=out_shape,
        grid=(B,),
        in_specs=[
            pl.BlockSpec((1, P_in, Cin), lambda i: (i, 0, 0)),
            pl.BlockSpec((R, P_in), lambda i: (0, 0)),
            pl.BlockSpec((3, 3, Cin, Cout), lambda i: (0, 0, 0, 0)),
            pl.BlockSpec((1, Cout), lambda i: (0, 0)),
            pl.BlockSpec((1, Cin), lambda i: (0, 0)),
            pl.BlockSpec((1, Cin), lambda i: (0, 0)),
            pl.BlockSpec((M, 1), lambda i: (0, 0)),
        ],
        out_specs=out_specs,
        scratch_shapes=[pltpu.VMEM((R, Cin), jnp.float32)],
        compiler_params=pltpu.CompilerParams(
            dimension_semantics=("parallel",)),   # v7x: shard batch over 2 TCs
    )(x, sel, w, b.reshape(1, Cout), scale.reshape(1, Cin),
      shift.reshape(1, Cin), mask)


# ------------------------ stage geometry (trace-time) ----------------------- #
def _build_stage_geometry(h_src, w_src, src_pitch, upsample):
    """0/1 selection matrix realizing (optional nearest-2x upsample) + 1px zero
    pad, flattened over the padded width Wp = W + 2, with zero slack rows so the
    9 conv-tap row slices never run out of bounds.  Also returns the validity
    mask of the H*Wp flat output rows."""
    H = 2 * h_src if upsample else h_src
    W = 2 * w_src if upsample else w_src
    Wp = W + 2
    R = _round_up((H + 2) * Wp + 2, 8)
    S = np.zeros((R, h_src * src_pitch), np.float32)
    for a in range(H + 2):
        h = a - 1
        if h < 0 or h >= H:
            continue
        hs = h // 2 if upsample else h
        for bcol in range(Wp):
            w = bcol - 1
            if w < 0 or w >= W:
                continue
            ws = w // 2 if upsample else w
            S[a * Wp + bcol, hs * src_pitch + ws] = 1.0
    M = H * Wp
    mask = np.zeros((M, 1), np.float32)
    for p in range(M):
        mask[p, 0] = 1.0 if (p % Wp) < W else 0.0
    return S, mask, H, W, Wp


# ------------------------------ parameters ---------------------------------- #
def init_params(key, input_dim, img_size, channels):
    """Parameters in PyTorch layouts (Linear: (N,K); Conv: (Cout,Cin,3,3))."""
    s = img_size // 4
    ks = jax.random.split(key, 8)
    n_l1 = 128 * s * s
    return {
        "l1_w": 0.05 * jax.random.normal(ks[0], (n_l1, input_dim), jnp.float32),
        "l1_b": 0.05 * jax.random.normal(ks[1], (n_l1,), jnp.float32),
        "bn0_g": jnp.ones((128,), jnp.float32), "bn0_b": jnp.zeros((128,), jnp.float32),
        "bn1_g": jnp.ones((128,), jnp.float32), "bn1_b": jnp.zeros((128,), jnp.float32),
        "bn2_g": jnp.ones((64,), jnp.float32),  "bn2_b": jnp.zeros((64,), jnp.float32),
        "c1_w": 0.05 * jax.random.normal(ks[2], (128, 128, 3, 3), jnp.float32),
        "c1_b": 0.05 * jax.random.normal(ks[3], (128,), jnp.float32),
        "c2_w": 0.05 * jax.random.normal(ks[4], (64, 128, 3, 3), jnp.float32),
        "c2_b": 0.05 * jax.random.normal(ks[5], (64,), jnp.float32),
        "c3_w": 0.05 * jax.random.normal(ks[6], (channels, 64, 3, 3), jnp.float32),
        "c3_b": 0.05 * jax.random.normal(ks[7], (channels,), jnp.float32),
    }


def prepare_params(p, img_size, channels):
    """Offline conversion to kernel-friendly layouts (done once, not per forward):
    - Linear columns permuted from NCHW-flat (c,h,w) to NHWC-flat (h,w,c) order
      so the kernel emits NHWC directly (no post-linear transpose).
    - Conv weights to (3,3,Cin,Cout) bf16; final conv lane-padded to Cout=128.
    """
    s = img_size // 4
    K = p["l1_w"].shape[1]
    w_nhwc = (p["l1_w"].T.reshape(K, 128, s, s)
              .transpose(0, 2, 3, 1).reshape(K, s * s * 128))
    b_nhwc = p["l1_b"].reshape(128, s, s).transpose(1, 2, 0).reshape(1, s * s * 128)

    def conv_w(w):            # (Cout, Cin, 3, 3) -> (3, 3, Cin, Cout) bf16
        return jnp.transpose(w, (2, 3, 1, 0)).astype(jnp.bfloat16)

    lane_pad = 128 - channels
    return {
        "l1_w": w_nhwc.astype(jnp.bfloat16),
        "l1_b": b_nhwc.astype(jnp.float32),
        "bn0_g": p["bn0_g"], "bn0_b": p["bn0_b"],
        "bn1_g": p["bn1_g"], "bn1_b": p["bn1_b"],
        "bn2_g": p["bn2_g"], "bn2_b": p["bn2_b"],
        "c1_w": conv_w(p["c1_w"]), "c1_b": p["c1_b"].astype(jnp.float32),
        "c2_w": conv_w(p["c2_w"]), "c2_b": p["c2_b"].astype(jnp.float32),
        "c3_w": jnp.pad(conv_w(p["c3_w"]), ((0, 0), (0, 0), (0, 0), (0, lane_pad))),
        "c3_b": jnp.pad(p["c3_b"], (0, lane_pad)).astype(jnp.float32),
    }


# ------------------------------- forward ------------------------------------ #
@functools.partial(jax.jit, static_argnames=("img_size", "channels"))
def generator_forward(z, params, *, img_size, channels):
    s = img_size // 4
    B = z.shape[0]

    # l1 (weight columns pre-permuted -> output is already NHWC-flat)
    lin = linear(z.astype(jnp.bfloat16), params["l1_w"], params["l1_b"])  # (B, s*s*128) f32
    x0 = lin.reshape(B, s * s, 128)

    # BatchNorm0 statistics (train mode, biased var, f32) — tensor is tiny (s x s)
    n0 = B * s * s
    mean0 = jnp.sum(x0, axis=(0, 1)) / n0
    var0 = jnp.maximum(jnp.sum(x0 * x0, axis=(0, 1)) / n0 - mean0 * mean0, 0.0)
    scale0 = params["bn0_g"] * lax.rsqrt(var0 + 1e-5)
    shift0 = params["bn0_b"] - mean0 * scale0

    def bn_coeffs(st, gamma, beta, count, eps):
        ssum = jnp.sum(st[:, 0, :], axis=0)
        ssq = jnp.sum(st[:, 1, :], axis=0)
        mean = ssum / count
        var = jnp.maximum(ssq / count - mean * mean, 0.0)
        scale = gamma * lax.rsqrt(var + eps)
        return scale, beta - mean * scale

    # stage 1: BN0 -> up2x -> conv1 (128->128); emits conv1 output stats
    S1, m1, H1, W1, Wp1 = _build_stage_geometry(s, s, s, upsample=True)
    y1, st1 = fused_conv_block(
        x0.astype(jnp.bfloat16), jnp.asarray(S1, jnp.bfloat16),
        jnp.asarray(m1, jnp.float32),
        params["c1_w"], params["c1_b"], scale0, shift0,
        M=H1 * Wp1, Wp=Wp1, neg_slope=None, apply_tanh=False,
        out_dtype=jnp.bfloat16, with_stats=True)
    scale1, shift1 = bn_coeffs(st1, params["bn1_g"], params["bn1_b"],
                               B * H1 * W1, 0.8)   # eps=0.8 (positional-arg quirk)

    # stage 2: BN1 + LeakyReLU -> up2x -> conv2 (128->64); emits conv2 stats
    S2, m2, H2, W2, Wp2 = _build_stage_geometry(H1, W1, Wp1, upsample=True)
    y2, st2 = fused_conv_block(
        y1, jnp.asarray(S2, jnp.bfloat16), jnp.asarray(m2, jnp.float32),
        params["c2_w"], params["c2_b"], scale1, shift1,
        M=H2 * Wp2, Wp=Wp2, neg_slope=0.2, apply_tanh=False,
        out_dtype=jnp.bfloat16, with_stats=True)
    scale2, shift2 = bn_coeffs(st2, params["bn2_g"], params["bn2_b"],
                               B * H2 * W2, 0.8)

    # stage 3: BN2 + LeakyReLU -> conv3 (64->channels, lane-padded to 128) -> tanh
    S3, m3, H3, W3, Wp3 = _build_stage_geometry(H2, W2, Wp2, upsample=False)
    y3 = fused_conv_block(
        y2, jnp.asarray(S3, jnp.bfloat16), jnp.asarray(m3, jnp.float32),
        params["c3_w"], params["c3_b"], scale2, shift2,
        M=H3 * Wp3, Wp=Wp3, neg_slope=0.2, apply_tanh=True,
        out_dtype=jnp.float32, with_stats=False)

    # drop the width-pad junk columns and lane padding, return NCHW
    img = y3.reshape(B, H3, Wp3, y3.shape[-1])[:, :, :W3, :channels]
    return jnp.transpose(img, (0, 3, 1, 2))


if __name__ == "__main__":
    key = jax.random.PRNGKey(0)
    k_param, k_z = jax.random.split(key)

    B, input_dim, img_size, channels = 2, 32, 16, 3
    params_pt = init_params(k_param, input_dim, img_size, channels)
    params = prepare_params(params_pt, img_size, channels)   # offline relayout
    z = jax.random.normal(k_z, (B, input_dim), jnp.float32)

    img = generator_forward(z, params, img_size=img_size, channels=channels)
    jax.block_until_ready(img)

    assert img.shape == (B, channels, img_size, img_size), img.shape
    assert img.dtype == jnp.float32
    assert bool(jnp.all(jnp.isfinite(img)))
    assert bool(jnp.all(jnp.abs(img) <= 1.0))  # tanh output range

    print("KERNEL_OK")
</pallas_src>

<mosaic_0001>
module attributes {stable_mosaic.version = 11 : i64} {
  func.func @_linear_kernel(%arg0: i32, %arg1: memref<2x32xbf16, #tpu.memory_space<vmem>>, %arg2: memref<32x2048xbf16, #tpu.memory_space<vmem>>, %arg3: memref<1x2048xf32, #tpu.memory_space<vmem>>, %arg4: memref<2x2048xf32, #tpu.memory_space<vmem>>) attributes {dimension_semantics = [#tpu.dimension_semantics<arbitrary>], iteration_bounds = array<i64: 1>, scalar_prefetch = 0 : i64, scratch_operands = 0 : i64, tpu.core_type = #tpu.core_type<tc>, window_params = [{pipeline_mode = #tpu.pipeline_mode<synchronous>, transform_indices = @transform_0, window_bounds = array<i64: 2, 32>}, {pipeline_mode = #tpu.pipeline_mode<synchronous>, transform_indices = @transform_1, window_bounds = array<i64: 32, 2048>}, {pipeline_mode = #tpu.pipeline_mode<synchronous>, transform_indices = @transform_2, window_bounds = array<i64: 1, 2048>}, {pipeline_mode = #tpu.pipeline_mode<synchronous>, transform_indices = @transform_3, window_bounds = array<i64: 2, 2048>}]} {
    %c0 = arith.constant 0 : index
    %c0_0 = arith.constant 0 : index
    %0 = vector.load %arg1[%c0, %c0_0] : memref<2x32xbf16, #tpu.memory_space<vmem>>, vector<2x32xbf16>
    %c0_1 = arith.constant 0 : index
    %c0_2 = arith.constant 0 : index
    %1 = vector.load %arg2[%c0_1, %c0_2] : memref<32x2048xbf16, #tpu.memory_space<vmem>>, vector<32x2048xbf16>
    %cst = arith.constant dense<0.000000e+00> : vector<2x2048xf32>
    %2 = tpu.matmul %0, %1, %cst {dimension_numbers = #tpu.dot_dimension_numbers<[1], [0], [0], [1], [0, 0, 1, 1], [], []>} : vector<2x32xbf16>, vector<32x2048xbf16>, vector<2x2048xf32> -> vector<2x2048xf32>
    %c0_3 = arith.constant 0 : index
    %c0_4 = arith.constant 0 : index
    %3 = vector.load %arg3[%c0_3, %c0_4] : memref<1x2048xf32, #tpu.memory_space<vmem>>, vector<1x2048xf32>
    %4 = vector.broadcast %3 : vector<1x2048xf32> to vector<2x2048xf32>
    %5 = arith.addf %2, %4 : vector<2x2048xf32>
    %c0_5 = arith.constant 0 : index
    %c0_6 = arith.constant 0 : index
    %6 = vector.load %arg4[%c0_5, %c0_6] : memref<2x2048xf32, #tpu.memory_space<vmem>>, vector<2x2048xf32>
    tpu.vector_store %arg4[%c0_5, %c0_6], %5 {strides = array<i32>} : memref<2x2048xf32, #tpu.memory_space<vmem>>, vector<2x2048xf32>,
    return
  }
  func.func @transform_0(%arg0: i32) -> (i32, i32) {
    %c0_i32 = arith.constant 0 : i32
    %c0_i32_0 = arith.constant 0 : i32
    %c0_i32_1 = arith.constant 0 : i32
    return %c0_i32, %c0_i32_0 : i32, i32
  }
  func.func @transform_1(%arg0: i32) -> (i32, i32) {
    %c0_i32 = arith.constant 0 : i32
    %c0_i32_0 = arith.constant 0 : i32
    %c0_i32_1 = arith.constant 0 : i32
    return %c0_i32, %c0_i32_0 : i32, i32
  }
  func.func @transform_2(%arg0: i32) -> (i32, i32) {
    %c0_i32 = arith.constant 0 : i32
    %c0_i32_0 = arith.constant 0 : i32
    %c0_i32_1 = arith.constant 0 : i32
    return %c0_i32, %c0_i32_0 : i32, i32
  }
  func.func @transform_3(%arg0: i32) -> (i32, i32) {
    %c0_i32 = arith.constant 0 : i32
    %c0_i32_0 = arith.constant 0 : i32
    %c0_i32_1 = arith.constant 0 : i32
    return %c0_i32, %c0_i32_0 : i32, i32
  }
}

module attributes {stable_mosaic.version = 11 : i64} {
  func.func @_fused_conv_kernel(%arg0: i32, %arg1: memref<1x16x128xbf16, #tpu.memory_space<vmem>>, %arg2: memref<104x16xbf16, #tpu.memory_space<vmem>>, %arg3: memref<3x3x128x128xbf16, #tpu.memory_space<vmem>>, %arg4: memref<1x128xf32, #tpu.memory_space<vmem>>, %arg5: memref<1x128xf32, #tpu.memory_space<vmem>>, %arg6: memref<1x128xf32, #tpu.memory_space<vmem>>, %arg7: memref<80x1xf32, #tpu.memory_space<vmem>>, %arg8: memref<1x80x128xbf16, #tpu.memory_space<vmem>>, %arg9: memref<1x2x128xf32, #tpu.memory_space<vmem>>, %arg10: memref<104x128xf32, #tpu.memory_space<vmem>>) attributes {dimension_semantics = [#tpu.dimension_semantics<parallel>], iteration_bounds = array<i64: 2>, scalar_prefetch = 0 : i64, scratch_operands = 1 : i64, tpu.core_type = #tpu.core_type<tc>, window_params = [{transform_indices = @transform_0, window_bounds = array<i64: 1, 16, 128>}, {pipeline_mode = #tpu.pipeline_mode<synchronous>, transform_indices = @transform_1, window_bounds = array<i64: 104, 16>}, {pipeline_mode = #tpu.pipeline_mode<synchronous>, transform_indices = @transform_2, window_bounds = array<i64: 3, 3, 128, 128>}, {pipeline_mode = #tpu.pipeline_mode<synchronous>, transform_indices = @transform_3, window_bounds = array<i64: 1, 128>}, {pipeline_mode = #tpu.pipeline_mode<synchronous>, transform_indices = @transform_4, window_bounds = array<i64: 1, 128>}, {pipeline_mode = #tpu.pipeline_mode<synchronous>, transform_indices = @transform_5, window_bounds = array<i64: 1, 128>}, {pipeline_mode = #tpu.pipeline_mode<synchronous>, transform_indices = @transform_6, window_bounds = array<i64: 80, 1>}, {transform_indices = @transform_7, window_bounds = array<i64: 1, 80, 128>}, {transform_indices = @transform_8, window_bounds = array<i64: 1, 2, 128>}]} {
    %c0 = arith.constant 0 : index
    %c0_0 = arith.constant 0 : index
    %c0_1 = arith.constant 0 : index
    %0 = vector.load %arg1[%c0, %c0_0, %c0_1] : memref<1x16x128xbf16, #tpu.memory_space<vmem>>, vector<1x16x128xbf16>
    %1 = vector.shape_cast %0 : vector<1x16x128xbf16> to vector<16x128xbf16>
    %2 = arith.extf %1 : vector<16x128xbf16> to vector<16x128xf32>
    %c0_2 = arith.constant 0 : index
    %c0_3 = arith.constant 0 : index
    %3 = vector.load %arg5[%c0_2, %c0_3] : memref<1x128xf32, #tpu.memory_space<vmem>>, vector<1x128xf32>
    %4 = vector.broadcast %3 : vector<1x128xf32> to vector<16x128xf32>
    %5 = arith.mulf %2, %4 : vector<16x128xf32>
    %c0_4 = arith.constant 0 : index
    %c0_5 = arith.constant 0 : index
    %6 = vector.load %arg6[%c0_4, %c0_5] : memref<1x128xf32, #tpu.memory_space<vmem>>, vector<1x128xf32>
    %7 = vector.broadcast %6 : vector<1x128xf32> to vector<16x128xf32>
    %8 = arith.addf %5, %7 : vector<16x128xf32>
    %9 = arith.truncf %8 : vector<16x128xf32> to vector<16x128xbf16>
    %c0_6 = arith.constant 0 : index
    %c0_7 = arith.constant 0 : index
    %10 = vector.load %arg2[%c0_6, %c0_7] : memref<104x16xbf16, #tpu.memory_space<vmem>>, vector<104x16xbf16>
    %cst = arith.constant dense<0.000000e+00> : vector<104x128xf32>
    %11 = tpu.matmul %10, %9, %cst {dimension_numbers = #tpu.dot_dimension_numbers<[1], [0], [0], [1], [0, 0, 1, 1], [], []>} : vector<104x16xbf16>, vector<16x128xbf16>, vector<104x128xf32> -> vector<104x128xf32>
    %c0_8 = arith.constant 0 : index
    %c0_9 = arith.constant 0 : index
    %12 = vector.load %arg10[%c0_8, %c0_9] : memref<104x128xf32, #tpu.memory_space<vmem>>, vector<104x128xf32>
    tpu.vector_store %arg10[%c0_8, %c0_9], %11 {strides = array<i32>} : memref<104x128xf32, #tpu.memory_space<vmem>>, vector<104x128xf32>,
    %cst_10 = arith.constant 0.000000e+00 : f32
    %13 = vector.broadcast %cst_10 : f32 to vector<80x128xf32>
    %c0_11 = arith.constant 0 : index
    %c0_12 = arith.constant 0 : index
    %14 = vector.load %arg10[%c0_11, %c0_12] : memref<104x128xf32, #tpu.memory_space<vmem>>, vector<80x128xf32>
    %15 = arith.truncf %14 : vector<80x128xf32> to vector<80x128xbf16>
    %c0_13 = arith.constant 0 : index
    %c0_14 = arith.constant 0 : index
    %c0_15 = arith.constant 0 : index
    %c0_16 = arith.constant 0 : index
    %16 = vector.load %arg3[%c0_13, %c0_14, %c0_15, %c0_16] : memref<3x3x128x128xbf16, #tpu.memory_space<vmem>>, vector<1x1x128x128xbf16>
    %17 = vector.shape_cast %16 : vector<1x1x128x128xbf16> to vector<128x128xbf16>
    %cst_17 = arith.constant dense<0.000000e+00> : vector<80x128xf32>
    %18 = tpu.matmul %15, %17, %cst_17 {dimension_numbers = #tpu.dot_dimension_numbers<[1], [0], [0], [1], [0, 0, 1, 1], [], []>} : vector<80x128xbf16>, vector<128x128xbf16>, vector<80x128xf32> -> vector<80x128xf32>
    %19 = arith.addf %13, %18 : vector<80x128xf32>
    %c1 = arith.constant 1 : index
    %c0_18 = arith.constant 0 : index
    %20 = vector.load %arg10[%c1, %c0_18] : memref<104x128xf32, #tpu.memory_space<vmem>>, vector<80x128xf32>
    %21 = arith.truncf %20 : vector<80x128xf32> to vector<80x128xbf16>
    %c0_19 = arith.constant 0 : index
    %c1_20 = arith.constant 1 : index
    %c0_21 = arith.constant 0 : index
    %c0_22 = arith.constant 0 : index
    %22 = vector.load %arg3[%c0_19, %c1_20, %c0_21, %c0_22] : memref<3x3x128x128xbf16, #tpu.memory_space<vmem>>, vector<1x1x128x128xbf16>
    %23 = vector.shape_cast %22 : vector<1x1x128x128xbf16> to vector<128x128xbf16>
    %cst_23 = arith.constant dense<0.000000e+00> : vector<80x128xf32>
    %24 = tpu.matmul %21, %23, %cst_23 {dimension_numbers = #tpu.dot_dimension_numbers<[1], [0], [0], [1], [0, 0, 1, 1], [], []>} : vector<80x128xbf16>, vector<128x128xbf16>, vector<80x128xf32> -> vector<80x128xf32>
    %25 = arith.addf %19, %24 : vector<80x128xf32>
    %c2 = arith.constant 2 : index
    %c0_24 = arith.constant 0 : index
    %26 = vector.load %arg10[%c2, %c0_24] : memref<104x128xf32, #tpu.memory_space<vmem>>, vector<80x128xf32>
    %27 = arith.truncf %26 : vector<80x128xf32> to vector<80x128xbf16>
    %c0_25 = arith.constant 0 : index
    %c2_26 = arith.constant 2 : index
    %c0_27 = arith.constant 0 : index
    %c0_28 = arith.constant 0 : index
    %28 = vector.load %arg3[%c0_25, %c2_26, %c0_27, %c0_28] : memref<3x3x128x128xbf16, #tpu.memory_space<vmem>>, vector<1x1x128x128xbf16>
    %29 = vector.shape_cast %28 : vector<1x1x128x128xbf16> to vector<128x128xbf16>
    %cst_29 = arith.constant dense<0.000000e+00> : vector<80x128xf32>
    %30 = tpu.matmul %27, %29, %cst_29 {dimension_numbers = #tpu.dot_dimension_numbers<[1], [0], [0], [1], [0, 0, 1, 1], [], []>} : vector<80x128xbf16>, vector<128x128xbf16>, vector<80x128xf32> -> vector<80x128xf32>
    %31 = arith.addf %25, %30 : vector<80x128xf32>
    %c10 = arith.constant 10 : index
    %c0_30 = arith.constant 0 : index
    %32 = vector.load %arg10[%c10, %c0_30] : memref<104x128xf32, #tpu.memory_space<vmem>>, vector<80x128xf32>
    %33 = arith.truncf %32 : vector<80x128xf32> to vector<80x128xbf16>
    %c1_31 = arith.constant 1 : index
    %c0_32 = arith.constant 0 : index
    %c0_33 = arith.constant 0 : index
    %c0_34 = arith.constant 0 : index
    %34 = vector.load %arg3[%c1_31, %c0_32, %c0_33, %c0_34] : memref<3x3x128x128xbf16, #tpu.memory_space<vmem>>, vector<1x1x128x128xbf16>
    %35 = vector.shape_cast %34 : vector<1x1x128x128xbf16> to vector<128x128xbf16>
    %cst_35 = arith.constant dense<0.000000e+00> : vector<80x128xf32>
    %36 = tpu.matmul %33, %35, %cst_35 {dimension_numbers = #tpu.dot_dimension_numbers<[1], [0], [0], [1], [0, 0, 1, 1], [], []>} : vector<80x128xbf16>, vector<128x128xbf16>, vector<80x128xf32> -> vector<80x128xf32>
    %37 = arith.addf %31, %36 : vector<80x128xf32>
    %c11 = arith.constant 11 : index
    %c0_36 = arith.constant 0 : index
    %38 = vector.load %arg10[%c11, %c0_36] : memref<104x128xf32, #tpu.memory_space<vmem>>, vector<80x128xf32>
    %39 = arith.truncf %38 : vector<80x128xf32> to vector<80x128xbf16>
    %c1_37 = arith.constant 1 : index
    %c1_38 = arith.constant 1 : index
    %c0_39 = arith.constant 0 : index
    %c0_40 = arith.constant 0 : index
    %40 = vector.load %arg3[%c1_37, %c1_38, %c0_39, %c0_40] : memref<3x3x128x128xbf16, #tpu.memory_space<vmem>>, vector<1x1x128x128xbf16>
    %41 = vector.shape_cast %40 : vector<1x1x128x128xbf16> to vector<128x128xbf16>
    %cst_41 = arith.constant dense<0.000000e+00> : vector<80x128xf32>
    %42 = tpu.matmul %39, %41, %cst_41 {dimension_numbers = #tpu.dot_dimension_numbers<[1], [0], [0], [1], [0, 0, 1, 1], [], []>} : vector<80x128xbf16>, vector<128x128xbf16>, vector<80x128xf32> -> vector<80x128xf32>
    %43 = arith.addf %37, %42 : vector<80x128xf32>
    %c12 = arith.constant 12 : index
    %c0_42 = arith.constant 0 : index
    %44 = vector.load %arg10[%c12, %c0_42] : memref<104x128xf32, #tpu.memory_space<vmem>>, vector<80x128xf32>
    %45 = arith.truncf %44 : vector<80x128xf32> to vector<80x128xbf16>
    %c1_43 = arith.constant 1 : index
    %c2_44 = arith.constant 2 : index
    %c0_45 = arith.constant 0 : index
    %c0_46 = arith.constant 0 : index
    %46 = vector.load %arg3[%c1_43, %c2_44, %c0_45, %c0_46] : memref<3x3x128x128xbf16, #tpu.memory_space<vmem>>, vector<1x1x128x128xbf16>
    %47 = vector.shape_cast %46 : vector<1x1x128x128xbf16> to vector<128x128xbf16>
    %cst_47 = arith.constant dense<0.000000e+00> : vector<80x128xf32>
    %48 = tpu.matmul %45, %47, %cst_47 {dimension_numbers = #tpu.dot_dimension_numbers<[1], [0], [0], [1], [0, 0, 1, 1], [], []>} : vector<80x128xbf16>, vector<128x128xbf16>, vector<80x128xf32> -> vector<80x128xf32>
    %49 = arith.addf %43, %48 : vector<80x128xf32>
    %c20 = arith.constant 20 : index
    %c0_48 = arith.constant 0 : index
    %50 = vector.load %arg10[%c20, %c0_48] : memref<104x128xf32, #tpu.memory_space<vmem>>, vector<80x128xf32>
    %51 = arith.truncf %50 : vector<80x128xf32> to vector<80x128xbf16>
    %c2_49 = arith.constant 2 : index
    %c0_50 = arith.constant 0 : index
    %c0_51 = arith.constant 0 : index
    %c0_52 = arith.constant 0 : index
    %52 = vector.load %arg3[%c2_49, %c0_50, %c0_51, %c0_52] : memref<3x3x128x128xbf16, #tpu.memory_space<vmem>>, vector<1x1x128x128xbf16>
    %53 = vector.shape_cast %52 : vector<1x1x128x128xbf16> to vector<128x128xbf16>
    %cst_53 = arith.constant dense<0.000000e+00> : vector<80x128xf32>
    %54 = tpu.matmul %51, %53, %cst_53 {dimension_numbers = #tpu.dot_dimension_numbers<[1], [0], [0], [1], [0, 0, 1, 1], [], []>} : vector<80x128xbf16>, vector<128x128xbf16>, vector<80x128xf32> -> vector<80x128xf32>
    %55 = arith.addf %49, %54 : vector<80x128xf32>
    %c21 = arith.constant 21 : index
    %c0_54 = arith.constant 0 : index
    %56 = vector.load %arg10[%c21, %c0_54] : memref<104x128xf32, #tpu.memory_space<vmem>>, vector<80x128xf32>
    %57 = arith.truncf %56 : vector<80x128xf32> to vector<80x128xbf16>
    %c2_55 = arith.constant 2 : index
    %c1_56 = arith.constant 1 : index
    %c0_57 = arith.constant 0 : index
    %c0_58 = arith.constant 0 : index
    %58 = vector.load %arg3[%c2_55, %c1_56, %c0_57, %c0_58] : memref<3x3x128x128xbf16, #tpu.memory_space<vmem>>, vector<1x1x128x128xbf16>
    %59 = vector.shape_cast %58 : vector<1x1x128x128xbf16> to vector<128x128xbf16>
    %cst_59 = arith.constant dense<0.000000e+00> : vector<80x128xf32>
    %60 = tpu.matmul %57, %59, %cst_59 {dimension_numbers = #tpu.dot_dimension_numbers<[1], [0], [0], [1], [0, 0, 1, 1], [], []>} : vector<80x128xbf16>, vector<128x128xbf16>, vector<80x128xf32> -> vector<80x128xf32>
    %61 = arith.addf %55, %60 : vector<80x128xf32>
    %c22 = arith.constant 22 : index
    %c0_60 = arith.constant 0 : index
    %62 = vector.load %arg10[%c22, %c0_60] : memref<104x128xf32, #tpu.memory_space<vmem>>, vector<80x128xf32>
    %63 = arith.truncf %62 : vector<80x128xf32> to vector<80x128xbf16>
    %c2_61 = arith.constant 2 : index
    %c2_62 = arith.constant 2 : index
    %c0_63 = arith.constant 0 : index
    %c0_64 = arith.constant 0 : index
    %64 = vector.load %arg3[%c2_61, %c2_62, %c0_63, %c0_64] : memref<3x3x128x128xbf16, #tpu.memory_space<vmem>>, vector<1x1x128x128xbf16>
    %65 = vector.shape_cast %64 : vector<1x1x128x128xbf16> to vector<128x128xbf16>
    %cst_65 = arith.constant dense<0.000000e+00> : vector<80x128xf32>
    %66 = tpu.matmul %63, %65, %cst_65 {dimension_numbers = #tpu.dot_dimension_numbers<[1], [0], [0], [1], [0, 0, 1, 1], [], []>} : vector<80x128xbf16>, vector<128x128xbf16>, vector<80x128xf32> -> vector<80x128xf32>
    %67 = arith.addf %61, %66 : vector<80x128xf32>
    %c0_66 = arith.constant 0 : index
    %c0_67 = arith.constant 0 : index
    %68 = vector.load %arg4[%c0_66, %c0_67] : memref<1x128xf32, #tpu.memory_space<vmem>>, vector<1x128xf32>
    %69 = vector.broadcast %68 : vector<1x128xf32> to vector<80x128xf32>
    %70 = arith.addf %67, %69 : vector<80x128xf32>
    %71 = arith.truncf %70 : vector<80x128xf32> to vector<80x128xbf16>
    %c0_68 = arith.constant 0 : index
    %c0_69 = arith.constant 0 : index
    %c0_70 = arith.constant 0 : index
    %72 = vector.load %arg8[%c0_68, %c0_69, %c0_70] : memref<1x80x128xbf16, #tpu.memory_space<vmem>>, vector<1x80x128xbf16>
    %73 = vector.shape_cast %72 : vector<1x80x128xbf16> to vector<80x128xbf16>
    %74 = vector.shape_cast %71 : vector<80x128xbf16> to vector<1x80x128xbf16>
    tpu.vector_store %arg8[%c0_68, %c0_69, %c0_70], %74 {strides = array<i32>} : memref<1x80x128xbf16, #tpu.memory_space<vmem>>, vector<1x80x128xbf16>,
    %c0_71 = arith.constant 0 : index
    %c0_72 = arith.constant 0 : index
    %75 = vector.load %arg7[%c0_71, %c0_72] : memref<80x1xf32, #tpu.memory_space<vmem>>, vector<80x1xf32>
    %76 = vector.broadcast %75 : vector<80x1xf32> to vector<80x128xf32>
    %77 = arith.mulf %70, %76 : vector<80x128xf32>
    %cst_73 = arith.constant dense<0.000000e+00> : vector<128xf32>
    %78 = vector.multi_reduction <add>, %77, %cst_73 [0] : vector<80x128xf32> to vector<128xf32>
    %79 = vector.shape_cast %78 : vector<128xf32> to vector<1x128xf32>
    %80 = arith.mulf %77, %70 : vector<80x128xf32>
    %cst_74 = arith.constant dense<0.000000e+00> : vector<128xf32>
    %81 = vector.multi_reduction <add>, %80, %cst_74 [0] : vector<80x128xf32> to vector<128xf32>
    %82 = vector.shape_cast %81 : vector<128xf32> to vector<1x128xf32>
    %83 = tpu.concatenate %79, %82 in 0 : vector<1x128xf32>, vector<1x128xf32> -> vector<2x128xf32>
    %c0_75 = arith.constant 0 : index
    %c0_76 = arith.constant 0 : index
    %c0_77 = arith.constant 0 : index
    %84 = vector.load %arg9[%c0_75, %c0_76, %c0_77] : memref<1x2x128xf32, #tpu.memory_space<vmem>>, vector<1x2x128xf32>
    %85 = vector.shape_cast %84 : vector<1x2x128xf32> to vector<2x128xf32>
    %86 = vector.shape_cast %83 : vector<2x128xf32> to vector<1x2x128xf32>
    tpu.vector_store %arg9[%c0_75, %c0_76, %c0_77], %86 {strides = array<i32>} : memref<1x2x128xf32, #tpu.memory_space<vmem>>, vector<1x2x128xf32>,
    return
  }
  func.func @transform_0(%arg0: i32) -> (i32, i32, i32) {
    %c0_i32 = arith.constant 0 : i32
    %c0_i32_0 = arith.constant 0 : i32
    %c0_i32_1 = arith.constant 0 : i32
    return %arg0, %c0_i32, %c0_i32_0 : i32, i32, i32
  }
  func.func @transform_1(%arg0: i32) -> (i32, i32) {
    %c0_i32 = arith.constant 0 : i32
    %c0_i32_0 = arith.constant 0 : i32
    %c0_i32_1 = arith.constant 0 : i32
    return %c0_i32, %c0_i32_0 : i32, i32
  }
  func.func @transform_2(%arg0: i32) -> (i32, i32, i32, i32) {
    %c0_i32 = arith.constant 0 : i32
    %c0_i32_0 = arith.constant 0 : i32
    %c0_i32_1 = arith.constant 0 : i32
    %c0_i32_2 = arith.constant 0 : i32
    %c0_i32_3 = arith.constant 0 : i32
    return %c0_i32, %c0_i32_0, %c0_i32_1, %c0_i32_2 : i32, i32, i32, i32
  }
  func.func @transform_3(%arg0: i32) -> (i32, i32) {
    %c0_i32 = arith.constant 0 : i32
    %c0_i32_0 = arith.constant 0 : i32
    %c0_i32_1 = arith.constant 0 : i32
    return %c0_i32, %c0_i32_0 : i32, i32
  }
  func.func @transform_4(%arg0: i32) -> (i32, i32) {
    %c0_i32 = arith.constant 0 : i32
    %c0_i32_0 = arith.constant 0 : i32
    %c0_i32_1 = arith.constant 0 : i32
    return %c0_i32, %c0_i32_0 : i32, i32
  }
  func.func @transform_5(%arg0: i32) -> (i32, i32) {
    %c0_i32 = arith.constant 0 : i32
    %c0_i32_0 = arith.constant 0 : i32
    %c0_i32_1 = arith.constant 0 : i32
    return %c0_i32, %c0_i32_0 : i32, i32
  }
  func.func @transform_6(%arg0: i32) -> (i32, i32) {
    %c0_i32 = arith.constant 0 : i32
    %c0_i32_0 = arith.constant 0 : i32
    %c0_i32_1 = arith.constant 0 : i32
    return %c0_i32, %c0_i32_0 : i32, i32
  }
  func.func @transform_7(%arg0: i32) -> (i32, i32, i32) {
    %c0_i32 = arith.constant 0 : i32
    %c0_i32_0 = arith.constant 0 : i32
    %c0_i32_1 = arith.constant 0 : i32
    return %arg0, %c0_i32, %c0_i32_0 : i32, i32, i32
  }
  func.func @transform_8(%arg0: i32) -> (i32, i32, i32) {
    %c0_i32 = arith.constant 0 : i32
    %c0_i32_0 = arith.constant 0 : i32
    %c0_i32_1 = arith.constant 0 : i32
    return %arg0, %c0_i32, %c0_i32_0 : i32, i32, i32
  }
}

module attributes {stable_mosaic.version = 11 : i64} {
  func.func @_fused_conv_kernel(%arg0: i32, %arg1: memref<1x80x128xbf16, #tpu.memory_space<vmem>>, %arg2: memref<328x80xbf16, #tpu.memory_space<vmem>>, %arg3: memref<3x3x128x64xbf16, #tpu.memory_space<vmem>>, %arg4: memref<1x64xf32, #tpu.memory_space<vmem>>, %arg5: memref<1x128xf32, #tpu.memory_space<vmem>>, %arg6: memref<1x128xf32, #tpu.memory_space<vmem>>, %arg7: memref<288x1xf32, #tpu.memory_space<vmem>>, %arg8: memref<1x288x64xbf16, #tpu.memory_space<vmem>>, %arg9: memref<1x2x64xf32, #tpu.memory_space<vmem>>, %arg10: memref<328x128xf32, #tpu.memory_space<vmem>>) attributes {dimension_semantics = [#tpu.dimension_semantics<parallel>], iteration_bounds = array<i64: 2>, scalar_prefetch = 0 : i64, scratch_operands = 1 : i64, tpu.core_type = #tpu.core_type<tc>, window_params = [{transform_indices = @transform_0, window_bounds = array<i64: 1, 80, 128>}, {pipeline_mode = #tpu.pipeline_mode<synchronous>, transform_indices = @transform_1, window_bounds = array<i64: 328, 80>}, {pipeline_mode = #tpu.pipeline_mode<synchronous>, transform_indices = @transform_2, window_bounds = array<i64: 3, 3, 128, 64>}, {pipeline_mode = #tpu.pipeline_mode<synchronous>, transform_indices = @transform_3, window_bounds = array<i64: 1, 64>}, {pipeline_mode = #tpu.pipeline_mode<synchronous>, transform_indices = @transform_4, window_bounds = array<i64: 1, 128>}, {pipeline_mode = #tpu.pipeline_mode<synchronous>, transform_indices = @transform_5, window_bounds = array<i64: 1, 128>}, {pipeline_mode = #tpu.pipeline_mode<synchronous>, transform_indices = @transform_6, window_bounds = array<i64: 288, 1>}, {transform_indices = @transform_7, window_bounds = array<i64: 1, 288, 64>}, {transform_indices = @transform_8, window_bounds = array<i64: 1, 2, 64>}]} {
    %c0 = arith.constant 0 : index
    %c0_0 = arith.constant 0 : index
    %c0_1 = arith.constant 0 : index
    %0 = vector.load %arg1[%c0, %c0_0, %c0_1] : memref<1x80x128xbf16, #tpu.memory_space<vmem>>, vector<1x80x128xbf16>
    %1 = vector.shape_cast %0 : vector<1x80x128xbf16> to vector<80x128xbf16>
    %2 = arith.extf %1 : vector<80x128xbf16> to vector<80x128xf32>
    %c0_2 = arith.constant 0 : index
    %c0_3 = arith.constant 0 : index
    %3 = vector.load %arg5[%c0_2, %c0_3] : memref<1x128xf32, #tpu.memory_space<vmem>>, vector<1x128xf32>
    %4 = vector.broadcast %3 : vector<1x128xf32> to vector<80x128xf32>
    %5 = arith.mulf %2, %4 : vector<80x128xf32>
    %c0_4 = arith.constant 0 : index
    %c0_5 = arith.constant 0 : index
    %6 = vector.load %arg6[%c0_4, %c0_5] : memref<1x128xf32, #tpu.memory_space<vmem>>, vector<1x128xf32>
    %7 = vector.broadcast %6 : vector<1x128xf32> to vector<80x128xf32>
    %8 = arith.addf %5, %7 : vector<80x128xf32>
    %cst = arith.constant 0.000000e+00 : f32
    %9 = vector.broadcast %cst : f32 to vector<80x128xf32>
    %10 = arith.cmpf oge, %8, %9 : vector<80x128xf32>
    %cst_6 = arith.constant 2.000000e-01 : f32
    %11 = vector.broadcast %cst_6 : f32 to vector<80x128xf32>
    %12 = arith.mulf %11, %8 : vector<80x128xf32>
    %13 = arith.select %10, %8, %12 : vector<80x128xi1>, vector<80x128xf32>
    %14 = arith.truncf %13 : vector<80x128xf32> to vector<80x128xbf16>
    %c0_7 = arith.constant 0 : index
    %c0_8 = arith.constant 0 : index
    %15 = vector.load %arg2[%c0_7, %c0_8] : memref<328x80xbf16, #tpu.memory_space<vmem>>, vector<328x80xbf16>
    %cst_9 = arith.constant dense<0.000000e+00> : vector<328x128xf32>
    %16 = tpu.matmul %15, %14, %cst_9 {dimension_numbers = #tpu.dot_dimension_numbers<[1], [0], [0], [1], [0, 0, 1, 1], [], []>} : vector<328x80xbf16>, vector<80x128xbf16>, vector<328x128xf32> -> vector<328x128xf32>
    %c0_10 = arith.constant 0 : index
    %c0_11 = arith.constant 0 : index
    %17 = vector.load %arg10[%c0_10, %c0_11] : memref<328x128xf32, #tpu.memory_space<vmem>>, vector<328x128xf32>
    tpu.vector_store %arg10[%c0_10, %c0_11], %16 {strides = array<i32>} : memref<328x128xf32, #tpu.memory_space<vmem>>, vector<328x128xf32>,
    %cst_12 = arith.constant 0.000000e+00 : f32
    %18 = vector.broadcast %cst_12 : f32 to vector<288x64xf32>
    %c0_13 = arith.constant 0 : index
    %c0_14 = arith.constant 0 : index
    %19 = vector.load %arg10[%c0_13, %c0_14] : memref<328x128xf32, #tpu.memory_space<vmem>>, vector<288x128xf32>
    %20 = arith.truncf %19 : vector<288x128xf32> to vector<288x128xbf16>
    %c0_15 = arith.constant 0 : index
    %c0_16 = arith.constant 0 : index
    %c0_17 = arith.constant 0 : index
    %c0_18 = arith.constant 0 : index
    %21 = vector.load %arg3[%c0_15, %c0_16, %c0_17, %c0_18] : memref<3x3x128x64xbf16, #tpu.memory_space<vmem>>, vector<1x1x128x64xbf16>
    %22 = vector.shape_cast %21 : vector<1x1x128x64xbf16> to vector<128x64xbf16>
    %cst_19 = arith.constant dense<0.000000e+00> : vector<288x64xf32>
    %23 = tpu.matmul %20, %22, %cst_19 {dimension_numbers = #tpu.dot_dimension_numbers<[1], [0], [0], [1], [0, 0, 1, 1], [], []>} : vector<288x128xbf16>, vector<128x64xbf16>, vector<288x64xf32> -> vector<288x64xf32>
    %24 = arith.addf %18, %23 : vector<288x64xf32>
    %c1 = arith.constant 1 : index
    %c0_20 = arith.constant 0 : index
    %25 = vector.load %arg10[%c1, %c0_20] : memref<328x128xf32, #tpu.memory_space<vmem>>, vector<288x128xf32>
    %26 = arith.truncf %25 : vector<288x128xf32> to vector<288x128xbf16>
    %c0_21 = arith.constant 0 : index
    %c1_22 = arith.constant 1 : index
    %c0_23 = arith.constant 0 : index
    %c0_24 = arith.constant 0 : index
    %27 = vector.load %arg3[%c0_21, %c1_22, %c0_23, %c0_24] : memref<3x3x128x64xbf16, #tpu.memory_space<vmem>>, vector<1x1x128x64xbf16>
    %28 = vector.shape_cast %27 : vector<1x1x128x64xbf16> to vector<128x64xbf16>
    %cst_25 = arith.constant dense<0.000000e+00> : vector<288x64xf32>
    %29 = tpu.matmul %26, %28, %cst_25 {dimension_numbers = #tpu.dot_dimension_numbers<[1], [0], [0], [1], [0, 0, 1, 1], [], []>} : vector<288x128xbf16>, vector<128x64xbf16>, vector<288x64xf32> -> vector<288x64xf32>
    %30 = arith.addf %24, %29 : vector<288x64xf32>
    %c2 = arith.constant 2 : index
    %c0_26 = arith.constant 0 : index
    %31 = vector.load %arg10[%c2, %c0_26] : memref<328x128xf32, #tpu.memory_space<vmem>>, vector<288x128xf32>
    %32 = arith.truncf %31 : vector<288x128xf32> to vector<288x128xbf16>
    %c0_27 = arith.constant 0 : index
    %c2_28 = arith.constant 2 : index
    %c0_29 = arith.constant 0 : index
    %c0_30 = arith.constant 0 : index
    %33 = vector.load %arg3[%c0_27, %c2_28, %c0_29, %c0_30] : memref<3x3x128x64xbf16, #tpu.memory_space<vmem>>, vector<1x1x128x64xbf16>
    %34 = vector.shape_cast %33 : vector<1x1x128x64xbf16> to vector<128x64xbf16>
    %cst_31 = arith.constant dense<0.000000e+00> : vector<288x64xf32>
    %35 = tpu.matmul %32, %34, %cst_31 {dimension_numbers = #tpu.dot_dimension_numbers<[1], [0], [0], [1], [0, 0, 1, 1], [], []>} : vector<288x128xbf16>, vector<128x64xbf16>, vector<288x64xf32> -> vector<288x64xf32>
    %36 = arith.addf %30, %35 : vector<288x64xf32>
    %c18 = arith.constant 18 : index
    %c0_32 = arith.constant 0 : index
    %37 = vector.load %arg10[%c18, %c0_32] : memref<328x128xf32, #tpu.memory_space<vmem>>, vector<288x128xf32>
    %38 = arith.truncf %37 : vector<288x128xf32> to vector<288x128xbf16>
    %c1_33 = arith.constant 1 : index
    %c0_34 = arith.constant 0 : index
    %c0_35 = arith.constant 0 : index
    %c0_36 = arith.constant 0 : index
    %39 = vector.load %arg3[%c1_33, %c0_34, %c0_35, %c0_36] : memref<3x3x128x64xbf16, #tpu.memory_space<vmem>>, vector<1x1x128x64xbf16>
    %40 = vector.shape_cast %39 : vector<1x1x128x64xbf16> to vector<128x64xbf16>
    %cst_37 = arith.constant dense<0.000000e+00> : vector<288x64xf32>
    %41 = tpu.matmul %38, %40, %cst_37 {dimension_numbers = #tpu.dot_dimension_numbers<[1], [0], [0], [1], [0, 0, 1, 1], [], []>} : vector<288x128xbf16>, vector<128x64xbf16>, vector<288x64xf32> -> vector<288x64xf32>
    %42 = arith.addf %36, %41 : vector<288x64xf32>
    %c19 = arith.constant 19 : index
    %c0_38 = arith.constant 0 : index
    %43 = vector.load %arg10[%c19, %c0_38] : memref<328x128xf32, #tpu.memory_space<vmem>>, vector<288x128xf32>
    %44 = arith.truncf %43 : vector<288x128xf32> to vector<288x128xbf16>
    %c1_39 = arith.constant 1 : index
    %c1_40 = arith.constant 1 : index
    %c0_41 = arith.constant 0 : index
    %c0_42 = arith.constant 0 : index
    %45 = vector.load %arg3[%c1_39, %c1_40, %c0_41, %c0_42] : memref<3x3x128x64xbf16, #tpu.memory_space<vmem>>, vector<1x1x128x64xbf16>
    %46 = vector.shape_cast %45 : vector<1x1x128x64xbf16> to vector<128x64xbf16>
    %cst_43 = arith.constant dense<0.000000e+00> : vector<288x64xf32>
    %47 = tpu.matmul %44, %46, %cst_43 {dimension_numbers = #tpu.dot_dimension_numbers<[1], [0], [0], [1], [0, 0, 1, 1], [], []>} : vector<288x128xbf16>, vector<128x64xbf16>, vector<288x64xf32> -> vector<288x64xf32>
    %48 = arith.addf %42, %47 : vector<288x64xf32>
    %c20 = arith.constant 20 : index
    %c0_44 = arith.constant 0 : index
    %49 = vector.load %arg10[%c20, %c0_44] : memref<328x128xf32, #tpu.memory_space<vmem>>, vector<288x128xf32>
    %50 = arith.truncf %49 : vector<288x128xf32> to vector<288x128xbf16>
    %c1_45 = arith.constant 1 : index
    %c2_46 = arith.constant 2 : index
    %c0_47 = arith.constant 0 : index
    %c0_48 = arith.constant 0 : index
    %51 = vector.load %arg3[%c1_45, %c2_46, %c0_47, %c0_48] : memref<3x3x128x64xbf16, #tpu.memory_space<vmem>>, vector<1x1x128x64xbf16>
    %52 = vector.shape_cast %51 : vector<1x1x128x64xbf16> to vector<128x64xbf16>
    %cst_49 = arith.constant dense<0.000000e+00> : vector<288x64xf32>
    %53 = tpu.matmul %50, %52, %cst_49 {dimension_numbers = #tpu.dot_dimension_numbers<[1], [0], [0], [1], [0, 0, 1, 1], [], []>} : vector<288x128xbf16>, vector<128x64xbf16>, vector<288x64xf32> -> vector<288x64xf32>
    %54 = arith.addf %48, %53 : vector<288x64xf32>
    %c36 = arith.constant 36 : index
    %c0_50 = arith.constant 0 : index
    %55 = vector.load %arg10[%c36, %c0_50] : memref<328x128xf32, #tpu.memory_space<vmem>>, vector<288x128xf32>
    %56 = arith.truncf %55 : vector<288x128xf32> to vector<288x128xbf16>
    %c2_51 = arith.constant 2 : index
    %c0_52 = arith.constant 0 : index
    %c0_53 = arith.constant 0 : index
    %c0_54 = arith.constant 0 : index
    %57 = vector.load %arg3[%c2_51, %c0_52, %c0_53, %c0_54] : memref<3x3x128x64xbf16, #tpu.memory_space<vmem>>, vector<1x1x128x64xbf16>
    %58 = vector.shape_cast %57 : vector<1x1x128x64xbf16> to vector<128x64xbf16>
    %cst_55 = arith.constant dense<0.000000e+00> : vector<288x64xf32>
    %59 = tpu.matmul %56, %58, %cst_55 {dimension_numbers = #tpu.dot_dimension_numbers<[1], [0], [0], [1], [0, 0, 1, 1], [], []>} : vector<288x128xbf16>, vector<128x64xbf16>, vector<288x64xf32> -> vector<288x64xf32>
    %60 = arith.addf %54, %59 : vector<288x64xf32>
    %c37 = arith.constant 37 : index
    %c0_56 = arith.constant 0 : index
    %61 = vector.load %arg10[%c37, %c0_56] : memref<328x128xf32, #tpu.memory_space<vmem>>, vector<288x128xf32>
    %62 = arith.truncf %61 : vector<288x128xf32> to vector<288x128xbf16>
    %c2_57 = arith.constant 2 : index
    %c1_58 = arith.constant 1 : index
    %c0_59 = arith.constant 0 : index
    %c0_60 = arith.constant 0 : index
    %63 = vector.load %arg3[%c2_57, %c1_58, %c0_59, %c0_60] : memref<3x3x128x64xbf16, #tpu.memory_space<vmem>>, vector<1x1x128x64xbf16>
    %64 = vector.shape_cast %63 : vector<1x1x128x64xbf16> to vector<128x64xbf16>
    %cst_61 = arith.constant dense<0.000000e+00> : vector<288x64xf32>
    %65 = tpu.matmul %62, %64, %cst_61 {dimension_numbers = #tpu.dot_dimension_numbers<[1], [0], [0], [1], [0, 0, 1, 1], [], []>} : vector<288x128xbf16>, vector<128x64xbf16>, vector<288x64xf32> -> vector<288x64xf32>
    %66 = arith.addf %60, %65 : vector<288x64xf32>
    %c38 = arith.constant 38 : index
    %c0_62 = arith.constant 0 : index
    %67 = vector.load %arg10[%c38, %c0_62] : memref<328x128xf32, #tpu.memory_space<vmem>>, vector<288x128xf32>
    %68 = arith.truncf %67 : vector<288x128xf32> to vector<288x128xbf16>
    %c2_63 = arith.constant 2 : index
    %c2_64 = arith.constant 2 : index
    %c0_65 = arith.constant 0 : index
    %c0_66 = arith.constant 0 : index
    %69 = vector.load %arg3[%c2_63, %c2_64, %c0_65, %c0_66] : memref<3x3x128x64xbf16, #tpu.memory_space<vmem>>, vector<1x1x128x64xbf16>
    %70 = vector.shape_cast %69 : vector<1x1x128x64xbf16> to vector<128x64xbf16>
    %cst_67 = arith.constant dense<0.000000e+00> : vector<288x64xf32>
    %71 = tpu.matmul %68, %70, %cst_67 {dimension_numbers = #tpu.dot_dimension_numbers<[1], [0], [0], [1], [0, 0, 1, 1], [], []>} : vector<288x128xbf16>, vector<128x64xbf16>, vector<288x64xf32> -> vector<288x64xf32>
    %72 = arith.addf %66, %71 : vector<288x64xf32>
    %c0_68 = arith.constant 0 : index
    %c0_69 = arith.constant 0 : index
    %73 = vector.load %arg4[%c0_68, %c0_69] : memref<1x64xf32, #tpu.memory_space<vmem>>, vector<1x64xf32>
    %74 = vector.broadcast %73 : vector<1x64xf32> to vector<288x64xf32>
    %75 = arith.addf %72, %74 : vector<288x64xf32>
    %76 = arith.truncf %75 : vector<288x64xf32> to vector<288x64xbf16>
    %c0_70 = arith.constant 0 : index
    %c0_71 = arith.constant 0 : index
    %c0_72 = arith.constant 0 : index
    %77 = vector.load %arg8[%c0_70, %c0_71, %c0_72] : memref<1x288x64xbf16, #tpu.memory_space<vmem>>, vector<1x288x64xbf16>
    %78 = vector.shape_cast %77 : vector<1x288x64xbf16> to vector<288x64xbf16>
    %79 = vector.shape_cast %76 : vector<288x64xbf16> to vector<1x288x64xbf16>
    tpu.vector_store %arg8[%c0_70, %c0_71, %c0_72], %79 {strides = array<i32>} : memref<1x288x64xbf16, #tpu.memory_space<vmem>>, vector<1x288x64xbf16>,
    %c0_73 = arith.constant 0 : index
    %c0_74 = arith.constant 0 : index
    %80 = vector.load %arg7[%c0_73, %c0_74] : memref<288x1xf32, #tpu.memory_space<vmem>>, vector<288x1xf32>
    %81 = vector.broadcast %80 : vector<288x1xf32> to vector<288x64xf32>
    %82 = arith.mulf %75, %81 : vector<288x64xf32>
    %cst_75 = arith.constant dense<0.000000e+00> : vector<64xf32>
    %83 = vector.multi_reduction <add>, %82, %cst_75 [0] : vector<288x64xf32> to vector<64xf32>
    %84 = vector.shape_cast %83 : vector<64xf32> to vector<1x64xf32>
    %85 = arith.mulf %82, %75 : vector<288x64xf32>
    %cst_76 = arith.constant dense<0.000000e+00> : vector<64xf32>
    %86 = vector.multi_reduction <add>, %85, %cst_76 [0] : vector<288x64xf32> to vector<64xf32>
    %87 = vector.shape_cast %86 : vector<64xf32> to vector<1x64xf32>
    %88 = tpu.concatenate %84, %87 in 0 : vector<1x64xf32>, vector<1x64xf32> -> vector<2x64xf32>
    %c0_77 = arith.constant 0 : index
    %c0_78 = arith.constant 0 : index
    %c0_79 = arith.constant 0 : index
    %89 = vector.load %arg9[%c0_77, %c0_78, %c0_79] : memref<1x2x64xf32, #tpu.memory_space<vmem>>, vector<1x2x64xf32>
    %90 = vector.shape_cast %89 : vector<1x2x64xf32> to vector<2x64xf32>
    %91 = vector.shape_cast %88 : vector<2x64xf32> to vector<1x2x64xf32>
    tpu.vector_store %arg9[%c0_77, %c0_78, %c0_79], %91 {strides = array<i32>} : memref<1x2x64xf32, #tpu.memory_space<vmem>>, vector<1x2x64xf32>,
    return
  }
  func.func @transform_0(%arg0: i32) -> (i32, i32, i32) {
    %c0_i32 = arith.constant 0 : i32
    %c0_i32_0 = arith.constant 0 : i32
    %c0_i32_1 = arith.constant 0 : i32
    return %arg0, %c0_i32, %c0_i32_0 : i32, i32, i32
  }
  func.func @transform_1(%arg0: i32) -> (i32, i32) {
    %c0_i32 = arith.constant 0 : i32
    %c0_i32_0 = arith.constant 0 : i32
    %c0_i32_1 = arith.constant 0 : i32
    return %c0_i32, %c0_i32_0 : i32, i32
  }
  func.func @transform_2(%arg0: i32) -> (i32, i32, i32, i32) {
    %c0_i32 = arith.constant 0 : i32
    %c0_i32_0 = arith.constant 0 : i32
    %c0_i32_1 = arith.constant 0 : i32
    %c0_i32_2 = arith.constant 0 : i32
    %c0_i32_3 = arith.constant 0 : i32
    return %c0_i32, %c0_i32_0, %c0_i32_1, %c0_i32_2 : i32, i32, i32, i32
  }
  func.func @transform_3(%arg0: i32) -> (i32, i32) {
    %c0_i32 = arith.constant 0 : i32
    %c0_i32_0 = arith.constant 0 : i32
    %c0_i32_1 = arith.constant 0 : i32
    return %c0_i32, %c0_i32_0 : i32, i32
  }
  func.func @transform_4(%arg0: i32) -> (i32, i32) {
    %c0_i32 = arith.constant 0 : i32
    %c0_i32_0 = arith.constant 0 : i32
    %c0_i32_1 = arith.constant 0 : i32
    return %c0_i32, %c0_i32_0 : i32, i32
  }
  func.func @transform_5(%arg0: i32) -> (i32, i32) {
    %c0_i32 = arith.constant 0 : i32
    %c0_i32_0 = arith.constant 0 : i32
    %c0_i32_1 = arith.constant 0 : i32
    return %c0_i32, %c0_i32_0 : i32, i32
  }
  func.func @transform_6(%arg0: i32) -> (i32, i32) {
    %c0_i32 = arith.constant 0 : i32
    %c0_i32_0 = arith.constant 0 : i32
    %c0_i32_1 = arith.constant 0 : i32
    return %c0_i32, %c0_i32_0 : i32, i32
  }
  func.func @transform_7(%arg0: i32) -> (i32, i32, i32) {
    %c0_i32 = arith.constant 0 : i32
    %c0_i32_0 = arith.constant 0 : i32
    %c0_i32_1 = arith.constant 0 : i32
    return %arg0, %c0_i32, %c0_i32_0 : i32, i32, i32
  }
  func.func @transform_8(%arg0: i32) -> (i32, i32, i32) {
    %c0_i32 = arith.constant 0 : i32
    %c0_i32_0 = arith.constant 0 : i32
    %c0_i32_1 = arith.constant 0 : i32
    return %arg0, %c0_i32, %c0_i32_0 : i32, i32, i32
  }
}

module attributes {stable_mosaic.version = 11 : i64} {
  func.func @_fused_conv_kernel(%arg0: i32, %arg1: memref<1x288x64xbf16, #tpu.memory_space<vmem>>, %arg2: memref<328x288xbf16, #tpu.memory_space<vmem>>, %arg3: memref<3x3x64x128xbf16, #tpu.memory_space<vmem>>, %arg4: memref<1x128xf32, #tpu.memory_space<vmem>>, %arg5: memref<1x64xf32, #tpu.memory_space<vmem>>, %arg6: memref<1x64xf32, #tpu.memory_space<vmem>>, %arg7: memref<288x1xf32, #tpu.memory_space<vmem>>, %arg8: memref<1x288x128xf32, #tpu.memory_space<vmem>>, %arg9: memref<328x64xf32, #tpu.memory_space<vmem>>) attributes {dimension_semantics = [#tpu.dimension_semantics<parallel>], iteration_bounds = array<i64: 2>, scalar_prefetch = 0 : i64, scratch_operands = 1 : i64, tpu.core_type = #tpu.core_type<tc>, window_params = [{transform_indices = @transform_0, window_bounds = array<i64: 1, 288, 64>}, {pipeline_mode = #tpu.pipeline_mode<synchronous>, transform_indices = @transform_1, window_bounds = array<i64: 328, 288>}, {pipeline_mode = #tpu.pipeline_mode<synchronous>, transform_indices = @transform_2, window_bounds = array<i64: 3, 3, 64, 128>}, {pipeline_mode = #tpu.pipeline_mode<synchronous>, transform_indices = @transform_3, window_bounds = array<i64: 1, 128>}, {pipeline_mode = #tpu.pipeline_mode<synchronous>, transform_indices = @transform_4, window_bounds = array<i64: 1, 64>}, {pipeline_mode = #tpu.pipeline_mode<synchronous>, transform_indices = @transform_5, window_bounds = array<i64: 1, 64>}, {pipeline_mode = #tpu.pipeline_mode<synchronous>, transform_indices = @transform_6, window_bounds = array<i64: 288, 1>}, {transform_indices = @transform_7, window_bounds = array<i64: 1, 288, 128>}]} {
    %c0 = arith.constant 0 : index
    %c0_0 = arith.constant 0 : index
    %c0_1 = arith.constant 0 : index
    %0 = vector.load %arg1[%c0, %c0_0, %c0_1] : memref<1x288x64xbf16, #tpu.memory_space<vmem>>, vector<1x288x64xbf16>
    %1 = vector.shape_cast %0 : vector<1x288x64xbf16> to vector<288x64xbf16>
    %2 = arith.extf %1 : vector<288x64xbf16> to vector<288x64xf32>
    %c0_2 = arith.constant 0 : index
    %c0_3 = arith.constant 0 : index
    %3 = vector.load %arg5[%c0_2, %c0_3] : memref<1x64xf32, #tpu.memory_space<vmem>>, vector<1x64xf32>
    %4 = vector.broadcast %3 : vector<1x64xf32> to vector<288x64xf32>
    %5 = arith.mulf %2, %4 : vector<288x64xf32>
    %c0_4 = arith.constant 0 : index
    %c0_5 = arith.constant 0 : index
    %6 = vector.load %arg6[%c0_4, %c0_5] : memref<1x64xf32, #tpu.memory_space<vmem>>, vector<1x64xf32>
    %7 = vector.broadcast %6 : vector<1x64xf32> to vector<288x64xf32>
    %8 = arith.addf %5, %7 : vector<288x64xf32>
    %cst = arith.constant 0.000000e+00 : f32
    %9 = vector.broadcast %cst : f32 to vector<288x64xf32>
    %10 = arith.cmpf oge, %8, %9 : vector<288x64xf32>
    %cst_6 = arith.constant 2.000000e-01 : f32
    %11 = vector.broadcast %cst_6 : f32 to vector<288x64xf32>
    %12 = arith.mulf %11, %8 : vector<288x64xf32>
    %13 = arith.select %10, %8, %12 : vector<288x64xi1>, vector<288x64xf32>
    %14 = arith.truncf %13 : vector<288x64xf32> to vector<288x64xbf16>
    %c0_7 = arith.constant 0 : index
    %c0_8 = arith.constant 0 : index
    %15 = vector.load %arg2[%c0_7, %c0_8] : memref<328x288xbf16, #tpu.memory_space<vmem>>, vector<328x288xbf16>
    %cst_9 = arith.constant dense<0.000000e+00> : vector<328x64xf32>
    %16 = tpu.matmul %15, %14, %cst_9 {dimension_numbers = #tpu.dot_dimension_numbers<[1], [0], [0], [1], [0, 0, 1, 1], [], []>} : vector<328x288xbf16>, vector<288x64xbf16>, vector<328x64xf32> -> vector<328x64xf32>
    %c0_10 = arith.constant 0 : index
    %c0_11 = arith.constant 0 : index
    %17 = vector.load %arg9[%c0_10, %c0_11] : memref<328x64xf32, #tpu.memory_space<vmem>>, vector<328x64xf32>
    tpu.vector_store %arg9[%c0_10, %c0_11], %16 {strides = array<i32>} : memref<328x64xf32, #tpu.memory_space<vmem>>, vector<328x64xf32>,
    %cst_12 = arith.constant 0.000000e+00 : f32
    %18 = vector.broadcast %cst_12 : f32 to vector<288x128xf32>
    %c0_13 = arith.constant 0 : index
    %c0_14 = arith.constant 0 : index
    %19 = vector.load %arg9[%c0_13, %c0_14] : memref<328x64xf32, #tpu.memory_space<vmem>>, vector<288x64xf32>
    %20 = arith.truncf %19 : vector<288x64xf32> to vector<288x64xbf16>
    %c0_15 = arith.constant 0 : index
    %c0_16 = arith.constant 0 : index
    %c0_17 = arith.constant 0 : index
    %c0_18 = arith.constant 0 : index
    %21 = vector.load %arg3[%c0_15, %c0_16, %c0_17, %c0_18] : memref<3x3x64x128xbf16, #tpu.memory_space<vmem>>, vector<1x1x64x128xbf16>
    %22 = vector.shape_cast %21 : vector<1x1x64x128xbf16> to vector<64x128xbf16>
    %cst_19 = arith.constant dense<0.000000e+00> : vector<288x128xf32>
    %23 = tpu.matmul %20, %22, %cst_19 {dimension_numbers = #tpu.dot_dimension_numbers<[1], [0], [0], [1], [0, 0, 1, 1], [], []>} : vector<288x64xbf16>, vector<64x128xbf16>, vector<288x128xf32> -> vector<288x128xf32>
    %24 = arith.addf %18, %23 : vector<288x128xf32>
    %c1 = arith.constant 1 : index
    %c0_20 = arith.constant 0 : index
    %25 = vector.load %arg9[%c1, %c0_20] : memref<328x64xf32, #tpu.memory_space<vmem>>, vector<288x64xf32>
    %26 = arith.truncf %25 : vector<288x64xf32> to vector<288x64xbf16>
    %c0_21 = arith.constant 0 : index
    %c1_22 = arith.constant 1 : index
    %c0_23 = arith.constant 0 : index
    %c0_24 = arith.constant 0 : index
    %27 = vector.load %arg3[%c0_21, %c1_22, %c0_23, %c0_24] : memref<3x3x64x128xbf16, #tpu.memory_space<vmem>>, vector<1x1x64x128xbf16>
    %28 = vector.shape_cast %27 : vector<1x1x64x128xbf16> to vector<64x128xbf16>
    %cst_25 = arith.constant dense<0.000000e+00> : vector<288x128xf32>
    %29 = tpu.matmul %26, %28, %cst_25 {dimension_numbers = #tpu.dot_dimension_numbers<[1], [0], [0], [1], [0, 0, 1, 1], [], []>} : vector<288x64xbf16>, vector<64x128xbf16>, vector<288x128xf32> -> vector<288x128xf32>
    %30 = arith.addf %24, %29 : vector<288x128xf32>
    %c2 = arith.constant 2 : index
    %c0_26 = arith.constant 0 : index
    %31 = vector.load %arg9[%c2, %c0_26] : memref<328x64xf32, #tpu.memory_space<vmem>>, vector<288x64xf32>
    %32 = arith.truncf %31 : vector<288x64xf32> to vector<288x64xbf16>
    %c0_27 = arith.constant 0 : index
    %c2_28 = arith.constant 2 : index
    %c0_29 = arith.constant 0 : index
    %c0_30 = arith.constant 0 : index
    %33 = vector.load %arg3[%c0_27, %c2_28, %c0_29, %c0_30] : memref<3x3x64x128xbf16, #tpu.memory_space<vmem>>, vector<1x1x64x128xbf16>
    %34 = vector.shape_cast %33 : vector<1x1x64x128xbf16> to vector<64x128xbf16>
    %cst_31 = arith.constant dense<0.000000e+00> : vector<288x128xf32>
    %35 = tpu.matmul %32, %34, %cst_31 {dimension_numbers = #tpu.dot_dimension_numbers<[1], [0], [0], [1], [0, 0, 1, 1], [], []>} : vector<288x64xbf16>, vector<64x128xbf16>, vector<288x128xf32> -> vector<288x128xf32>
    %36 = arith.addf %30, %35 : vector<288x128xf32>
    %c18 = arith.constant 18 : index
    %c0_32 = arith.constant 0 : index
    %37 = vector.load %arg9[%c18, %c0_32] : memref<328x64xf32, #tpu.memory_space<vmem>>, vector<288x64xf32>
    %38 = arith.truncf %37 : vector<288x64xf32> to vector<288x64xbf16>
    %c1_33 = arith.constant 1 : index
    %c0_34 = arith.constant 0 : index
    %c0_35 = arith.constant 0 : index
    %c0_36 = arith.constant 0 : index
    %39 = vector.load %arg3[%c1_33, %c0_34, %c0_35, %c0_36] : memref<3x3x64x128xbf16, #tpu.memory_space<vmem>>, vector<1x1x64x128xbf16>
    %40 = vector.shape_cast %39 : vector<1x1x64x128xbf16> to vector<64x128xbf16>
    %cst_37 = arith.constant dense<0.000000e+00> : vector<288x128xf32>
    %41 = tpu.matmul %38, %40, %cst_37 {dimension_numbers = #tpu.dot_dimension_numbers<[1], [0], [0], [1], [0, 0, 1, 1], [], []>} : vector<288x64xbf16>, vector<64x128xbf16>, vector<288x128xf32> -> vector<288x128xf32>
    %42 = arith.addf %36, %41 : vector<288x128xf32>
    %c19 = arith.constant 19 : index
    %c0_38 = arith.constant 0 : index
    %43 = vector.load %arg9[%c19, %c0_38] : memref<328x64xf32, #tpu.memory_space<vmem>>, vector<288x64xf32>
    %44 = arith.truncf %43 : vector<288x64xf32> to vector<288x64xbf16>
    %c1_39 = arith.constant 1 : index
    %c1_40 = arith.constant 1 : index
    %c0_41 = arith.constant 0 : index
    %c0_42 = arith.constant 0 : index
    %45 = vector.load %arg3[%c1_39, %c1_40, %c0_41, %c0_42] : memref<3x3x64x128xbf16, #tpu.memory_space<vmem>>, vector<1x1x64x128xbf16>
    %46 = vector.shape_cast %45 : vector<1x1x64x128xbf16> to vector<64x128xbf16>
    %cst_43 = arith.constant dense<0.000000e+00> : vector<288x128xf32>
    %47 = tpu.matmul %44, %46, %cst_43 {dimension_numbers = #tpu.dot_dimension_numbers<[1], [0], [0], [1], [0, 0, 1, 1], [], []>} : vector<288x64xbf16>, vector<64x128xbf16>, vector<288x128xf32> -> vector<288x128xf32>
    %48 = arith.addf %42, %47 : vector<288x128xf32>
    %c20 = arith.constant 20 : index
    %c0_44 = arith.constant 0 : index
    %49 = vector.load %arg9[%c20, %c0_44] : memref<328x64xf32, #tpu.memory_space<vmem>>, vector<288x64xf32>
    %50 = arith.truncf %49 : vector<288x64xf32> to vector<288x64xbf16>
    %c1_45 = arith.constant 1 : index
    %c2_46 = arith.constant 2 : index
    %c0_47 = arith.constant 0 : index
    %c0_48 = arith.constant 0 : index
    %51 = vector.load %arg3[%c1_45, %c2_46, %c0_47, %c0_48] : memref<3x3x64x128xbf16, #tpu.memory_space<vmem>>, vector<1x1x64x128xbf16>
    %52 = vector.shape_cast %51 : vector<1x1x64x128xbf16> to vector<64x128xbf16>
    %cst_49 = arith.constant dense<0.000000e+00> : vector<288x128xf32>
    %53 = tpu.matmul %50, %52, %cst_49 {dimension_numbers = #tpu.dot_dimension_numbers<[1], [0], [0], [1], [0, 0, 1, 1], [], []>} : vector<288x64xbf16>, vector<64x128xbf16>, vector<288x128xf32> -> vector<288x128xf32>
    %54 = arith.addf %48, %53 : vector<288x128xf32>
    %c36 = arith.constant 36 : index
    %c0_50 = arith.constant 0 : index
    %55 = vector.load %arg9[%c36, %c0_50] : memref<328x64xf32, #tpu.memory_space<vmem>>, vector<288x64xf32>
    %56 = arith.truncf %55 : vector<288x64xf32> to vector<288x64xbf16>
    %c2_51 = arith.constant 2 : index
    %c0_52 = arith.constant 0 : index
    %c0_53 = arith.constant 0 : index
    %c0_54 = arith.constant 0 : index
    %57 = vector.load %arg3[%c2_51, %c0_52, %c0_53, %c0_54] : memref<3x3x64x128xbf16, #tpu.memory_space<vmem>>, vector<1x1x64x128xbf16>
    %58 = vector.shape_cast %57 : vector<1x1x64x128xbf16> to vector<64x128xbf16>
    %cst_55 = arith.constant dense<0.000000e+00> : vector<288x128xf32>
    %59 = tpu.matmul %56, %58, %cst_55 {dimension_numbers = #tpu.dot_dimension_numbers<[1], [0], [0], [1], [0, 0, 1, 1], [], []>} : vector<288x64xbf16>, vector<64x128xbf16>, vector<288x128xf32> -> vector<288x128xf32>
    %60 = arith.addf %54, %59 : vector<288x128xf32>
    %c37 = arith.constant 37 : index
    %c0_56 = arith.constant 0 : index
    %61 = vector.load %arg9[%c37, %c0_56] : memref<328x64xf32, #tpu.memory_space<vmem>>, vector<288x64xf32>
    %62 = arith.truncf %61 : vector<288x64xf32> to vector<288x64xbf16>
    %c2_57 = arith.constant 2 : index
    %c1_58 = arith.constant 1 : index
    %c0_59 = arith.constant 0 : index
    %c0_60 = arith.constant 0 : index
    %63 = vector.load %arg3[%c2_57, %c1_58, %c0_59, %c0_60] : memref<3x3x64x128xbf16, #tpu.memory_space<vmem>>, vector<1x1x64x128xbf16>
    %64 = vector.shape_cast %63 : vector<1x1x64x128xbf16> to vector<64x128xbf16>
    %cst_61 = arith.constant dense<0.000000e+00> : vector<288x128xf32>
    %65 = tpu.matmul %62, %64, %cst_61 {dimension_numbers = #tpu.dot_dimension_numbers<[1], [0], [0], [1], [0, 0, 1, 1], [], []>} : vector<288x64xbf16>, vector<64x128xbf16>, vector<288x128xf32> -> vector<288x128xf32>
    %66 = arith.addf %60, %65 : vector<288x128xf32>
    %c38 = arith.constant 38 : index
    %c0_62 = arith.constant 0 : index
    %67 = vector.load %arg9[%c38, %c0_62] : memref<328x64xf32, #tpu.memory_space<vmem>>, vector<288x64xf32>
    %68 = arith.truncf %67 : vector<288x64xf32> to vector<288x64xbf16>
    %c2_63 = arith.constant 2 : index
    %c2_64 = arith.constant 2 : index
    %c0_65 = arith.constant 0 : index
    %c0_66 = arith.constant 0 : index
    %69 = vector.load %arg3[%c2_63, %c2_64, %c0_65, %c0_66] : memref<3x3x64x128xbf16, #tpu.memory_space<vmem>>, vector<1x1x64x128xbf16>
    %70 = vector.shape_cast %69 : vector<1x1x64x128xbf16> to vector<64x128xbf16>
    %cst_67 = arith.constant dense<0.000000e+00> : vector<288x128xf32>
    %71 = tpu.matmul %68, %70, %cst_67 {dimension_numbers = #tpu.dot_dimension_numbers<[1], [0], [0], [1], [0, 0, 1, 1], [], []>} : vector<288x64xbf16>, vector<64x128xbf16>, vector<288x128xf32> -> vector<288x128xf32>
    %72 = arith.addf %66, %71 : vector<288x128xf32>
    %c0_68 = arith.constant 0 : index
    %c0_69 = arith.constant 0 : index
    %73 = vector.load %arg4[%c0_68, %c0_69] : memref<1x128xf32, #tpu.memory_space<vmem>>, vector<1x128xf32>
    %74 = vector.broadcast %73 : vector<1x128xf32> to vector<288x128xf32>
    %75 = arith.addf %72, %74 : vector<288x128xf32>
    %76 = math.tanh %75 : vector<288x128xf32>
    %c0_70 = arith.constant 0 : index
    %c0_71 = arith.constant 0 : index
    %c0_72 = arith.constant 0 : index
    %77 = vector.load %arg8[%c0_70, %c0_71, %c0_72] : memref<1x288x128xf32, #tpu.memory_space<vmem>>, vector<1x288x128xf32>
    %78 = vector.shape_cast %77 : vector<1x288x128xf32> to vector<288x128xf32>
    %79 = vector.shape_cast %76 : vector<288x128xf32> to vector<1x288x128xf32>
    tpu.vector_store %arg8[%c0_70, %c0_71, %c0_72], %79 {strides = array<i32>} : memref<1x288x128xf32, #tpu.memory_space<vmem>>, vector<1x288x128xf32>,
    return
  }
  func.func @transform_0(%arg0: i32) -> (i32, i32, i32) {
    %c0_i32 = arith.constant 0 : i32
    %c0_i32_0 = arith.constant 0 : i32
    %c0_i32_1 = arith.constant 0 : i32
    return %arg0, %c0_i32, %c0_i32_0 : i32, i32, i32
  }
  func.func @transform_1(%arg0: i32) -> (i32, i32) {
    %c0_i32 = arith.constant 0 : i32
    %c0_i32_0 = arith.constant 0 : i32
    %c0_i32_1 = arith.constant 0 : i32
    return %c0_i32, %c0_i32_0 : i32, i32
  }
  func.func @transform_2(%arg0: i32) -> (i32, i32, i32, i32) {
    %c0_i32 = arith.constant 0 : i32
    %c0_i32_0 = arith.constant 0 : i32
    %c0_i32_1 = arith.constant 0 : i32
    %c0_i32_2 = arith.constant 0 : i32
    %c0_i32_3 = arith.constant 0 : i32
    return %c0_i32, %c0_i32_0, %c0_i32_1, %c0_i32_2 : i32, i32, i32, i32
  }
  func.func @transform_3(%arg0: i32) -> (i32, i32) {
    %c0_i32 = arith.constant 0 : i32
    %c0_i32_0 = arith.constant 0 : i32
    %c0_i32_1 = arith.constant 0 : i32
    return %c0_i32, %c0_i32_0 : i32, i32
  }
  func.func @transform_4(%arg0: i32) -> (i32, i32) {
    %c0_i32 = arith.constant 0 : i32
    %c0_i32_0 = arith.constant 0 : i32
    %c0_i32_1 = arith.constant 0 : i32
    return %c0_i32, %c0_i32_0 : i32, i32
  }
  func.func @transform_5(%arg0: i32) -> (i32, i32) {
    %c0_i32 = arith.constant 0 : i32
    %c0_i32_0 = arith.constant 0 : i32
    %c0_i32_1 = arith.constant 0 : i32
    return %c0_i32, %c0_i32_0 : i32, i32
  }
  func.func @transform_6(%arg0: i32) -> (i32, i32) {
    %c0_i32 = arith.constant 0 : i32
    %c0_i32_0 = arith.constant 0 : i32
    %c0_i32_1 = arith.constant 0 : i32
    return %c0_i32, %c0_i32_0 : i32, i32
  }
  func.func @transform_7(%arg0: i32) -> (i32, i32, i32) {
    %c0_i32 = arith.constant 0 : i32
    %c0_i32_0 = arith.constant 0 : i32
    %c0_i32_1 = arith.constant 0 : i32
    return %arg0, %c0_i32, %c0_i32_0 : i32, i32, i32
  }
}

</mosaic_0001>

<bundles_post_ra>
// kernel: generator_forward.4
= control target key start
LH: loop header
LB: loop body
LE: loop exit
PB: predicated region body
PF: predicated region fallthrough
CT: control target
= control target key end

     0   :  { %8 = vsyncpa [#allocation3], 0  ;;  %s802_s12 = smov [#allocation2]   ;;  %s898_s0 = inlined_call_operand.vmem [shape: bf16[2,32], index: 0, kind: input, shape index: {}]   ;;  %s899_s1 = inlined_call_operand.hbm [shape: bf16[32,2048], index: 1, kind: input, shape index: {}]   ;;  %s900_s2 = inlined_call_operand.vmem [shape: f32[1,2048], index: 2, kind: input, shape index: {}]   ;;  %s901_s3 = inlined_call_operand.vmem [shape: f32[2,2048], index: 3, kind: output, shape index: {}]  }
   0x1   :  { %s16_s13 = sshll.u32 %s802_s12, 4  ;;  %s17_s13 = int_to_ptr.vmem [resolvable:$true] %s16_s13 }
   0x2   :  { %s788_s14 = scalar_lea.vmem %s17_s13, 4096  ;;  %p793_p1 = scmp.lt.s32.totalorder %s17_s13, %s17_s13 }
   0x3   :  { %p789_p0 = scmp.ne.s32.totalorder %s17_s13, %s788_s14  ;;  %p794_p2 = scmp.lt.s32.totalorder %s788_s14, %s788_s14 }
   0x5   :  { %p795_p3 = por %p794_p2, %p793_p1 }
   0x7   :  { %p796_p4 = pnand %p795_p3, %p789_p0 }
   0x9   :  { %799 = shalt.err (!%p796_p4)
}
   0xa   :  { %s803_s15 = smov 1024   ;;  %s804_s16 = smov 64  }
   0xb   :  { %22 = dma.hbm_to_vmem [thread:$0]  %s899_s1, 4096, %s17_s13, [#allocation3], %s803_s15, %s803_s15, %s804_s16  }
   0xc   :  { %800 = dma.done.wait [#allocation3], 4096  }
   0xd   :  { %801 = vsyncadd [#allocation3], 4294963200  ;;  %v805_v0 = vmov 0   ;;  %v46_v1 = vld [vmem:[#allocation2 + $0x80] sm:$0xff]  ;;  %v47_v3 = vld [vmem:[#allocation2 + $0x88] sm:$0xff]  ;;  %vm306_vm0 = vcmask 261120  }
   0xe   :  { %342 = vmatprep.mubr.bf16.mxu0 %v805_v0  ;;  %383 = vmatprep.mubr.bf16.mxu1 %v805_v0  ;;  %v54_v2 = vld [vmem:[#allocation2 + $0xc0] sm:$0xff]  ;;  %v55_v5 = vld [vmem:[#allocation2 + $0xc8] sm:$0xff]  ;;  %v48_v15 = vld [vmem:[#allocation2 + $0x90] sm:$0xff] }
   0xf   :  { %v752_v4 = vcombine.high %v46_v1, %v54_v2  ;;  %v751_v6 = vcombine.low %v46_v1, %v54_v2  ;;  %v30_v7 = vld [vmem:[#allocation2] sm:$0xff]  ;;  %v754_v9 = vcombine.high %v47_v3, %v55_v5  ;;  %v753_v10 = vcombine.low %v47_v3, %v55_v5  ;;  %v31_v12 = vld [vmem:[#allocation2 + $0x8] sm:$0xff]  ;;  %v56_v16 = vld [vmem:[#allocation2 + $0xd0] sm:$0xff] }
  0x10   :  { %v38_v8 = vld [vmem:[#allocation2 + $0x40] sm:$0xff]  ;;  %v39_v13 = vld [vmem:[#allocation2 + $0x48] sm:$0xff]  ;;  %v49_v17 = vld [vmem:[#allocation2 + $0x98] sm:$0xff]  ;;  %v756_v21 = vcombine.high %v48_v15, %v56_v16  ;;  %v755_v28 = vcombine.low %v48_v15, %v56_v16  ;;  %v66_v3 = vlaneseq  ;;  %v806_v5 = vmov 1983009808  }
  0x11   :  { %v736_v11 = vcombine.high %v30_v7, %v38_v8  ;;  %322 = vmatprep.subr.bf16.mxu0 %v752_v4  ;;  %v738_v14 = vcombine.high %v31_v12, %v39_v13  ;;  %363 = vmatprep.subr.bf16.mxu1 %v754_v9  ;;  %v735_v18 = vcombine.low %v30_v7, %v38_v8  ;;  %v57_v19 = vld [vmem:[#allocation2 + $0xd8] sm:$0xff]  ;;  %v32_v23 = vld [vmem:[#allocation2 + $0x10] sm:$0xff]  ;;  %v835_v27 = vld [vmem:[%s898_s0] sm:$0x1] }
  0x12   :  { %323 = vmatpush1.bf16.msra.mxu0 %v751_v6  ;;  %364 = vmatpush1.bf16.msra.mxu1 %v753_v10  ;;  %v737_v20 = vcombine.low %v31_v12, %v39_v13  ;;  %v758_v22 = vcombine.high %v49_v17, %v57_v19  ;;  %v40_v24 = vld [vmem:[#allocation2 + $0x50] sm:$0xff]  ;;  %v33_v25 = vld [vmem:[#allocation2 + $0x18] sm:$0xff]  ;;  %v757_v29 = vcombine.low %v49_v17, %v57_v19  ;;  %v50_v32 = vld [vmem:[#allocation2 + $0xa0] sm:$0xff]  ;;  %v859_v4 = vshrl.u32 %v66_v3, 7 }
  0x13   :  { %324 = vmatprep.subr.bf16.mxu0 %v736_v11  ;;  %365 = vmatprep.subr.bf16.mxu1 %v738_v14  ;;  %v41_v26 = vld [vmem:[#allocation2 + $0x58] sm:$0xff]  ;;  %v740_v30 = vcombine.high %v32_v23, %v40_v24  ;;  %v58_v33 = vld [vmem:[#allocation2 + $0xe0] sm:$0xff]  ;;  %v51_v34 = vld [vmem:[#allocation2 + $0xa8] sm:$0xff]  ;;  %v739_v36 = vcombine.low %v32_v23, %v40_v24  ;;  %v657_v6 = vunpack.c.l.s4 %v806_v5 }
  0x14   :  { %v742_v31 = vcombine.high %v33_v25, %v41_v26  ;;  %v59_v35 = vld [vmem:[#allocation2 + $0xe8] sm:$0xff]  ;;  %v741_v37 = vcombine.low %v33_v25, %v41_v26  ;;  %v760_v38 = vcombine.high %v50_v32, %v58_v33  ;;  %v34_v40 = vld [vmem:[#allocation2 + $0x20] sm:$0xff]  ;;  %v759_v44 = vcombine.low %v50_v32, %v58_v33  ;;  %v52_v48 = vld [vmem:[#allocation2 + $0xb0] sm:$0xff] }
  0x15   :  { %v762_v39 = vcombine.high %v51_v34, %v59_v35  ;;  %v42_v41 = vld [vmem:[#allocation2 + $0x60] sm:$0xff]  ;;  %v35_v42 = vld [vmem:[#allocation2 + $0x28] sm:$0xff]  ;;  %v761_v45 = vcombine.low %v51_v34, %v59_v35  ;;  %v60_v49 = vld [vmem:[#allocation2 + $0xf0] sm:$0xff]  ;;  %v68_v7 = vsub.s32 0, %v859_v4  ;;  %v72_v8 = vsub.s32 1, %v859_v4 }
  0x16   :  { %325 = vmatpush1.bf16.msra.mxu0 %v735_v18  ;;  %366 = vmatpush1.bf16.msra.mxu1 %v737_v20  ;;  %v43_v43 = vld [vmem:[#allocation2 + $0x68] sm:$0xff]  ;;  %v744_v46 = vcombine.high %v34_v40, %v42_v41  ;;  %v53_v50 = vld [vmem:[#allocation2 + $0xb8] sm:$0xff]  ;;  %v743_v52 = vcombine.low %v34_v40, %v42_v41  ;;  %v764_v54 = vcombine.high %v52_v48, %v60_v49  ;;  %v36_v56 = vld [vmem:[#allocation2 + $0x30] sm:$0xff]  ;;  %v76_v9 = vsub.s32 2, %v859_v4 }
  0x17   :  { %404 = vmatprep.subr.bf16.mxu0 %v756_v21  ;;  %445 = vmatprep.subr.bf16.mxu1 %v758_v22  ;;  %v746_v47 = vcombine.high %v35_v42, %v43_v43  ;;  %v61_v51 = vld [vmem:[#allocation2 + $0xf8] sm:$0xff]  ;;  %v745_v53 = vcombine.low %v35_v42, %v43_v43  ;;  %v44_v57 = vld [vmem:[#allocation2 + $0x70] sm:$0xff]  ;;  %v763_v60 = vcombine.low %v52_v48, %v60_v49  ;;  %v80_v10 = vsub.s32 3, %v859_v4 }
  0x18   :  { %v766_v55 = vcombine.high %v53_v50, %v61_v51  ;;  %v37_v58 = vld [vmem:[#allocation2 + $0x38] sm:$0xff]  ;;  %v765_v61 = vcombine.low %v53_v50, %v61_v51  ;;  %v748_v62 = vcombine.high %v36_v56, %v44_v57  ;;  %v747_v1 = vcombine.low %v36_v56, %v44_v57  ;;  %v63_v51 = vld [vmem:[%s900_s2 + $0x8] sm:$0xff] }
  0x19   :  { %767 = vmatmul.mubr.msk.bf16.vlgmr.msra.gmra.mxu0 %vm306_vm0, %v835_v27  ;;  %768 = vmatmul.mubr.msk.bf16.vlgmr.msra.gmra.mxu1 %vm306_vm0, %v835_v27  ;;  %v45_v59 = vld [vmem:[#allocation2 + $0x78] sm:$0xff]  ;;  %v658_v11 = vunpack.c.0.s8 %v657_v6  ;;  %v84_v23 = vsub.s32 4, %v859_v4  ;;  %v88_v24 = vsub.s32 5, %v859_v4 }
  0x1a   :  { %405 = vmatpush1.bf16.msra.mxu0 %v755_v28  ;;  %446 = vmatpush1.bf16.msra.mxu1 %v757_v29  ;;  %v750_v63 = vcombine.high %v37_v58, %v45_v59  ;;  %v749_v2 = vcombine.low %v37_v58, %v45_v59  ;;  %v92_v28 = vsub.s32 6, %v859_v4  ;;  %v96_v29 = vsub.s32 7, %v859_v4 }
  0x1b   :  { %406 = vmatprep.subr.bf16.mxu0 %v740_v30  ;;  %447 = vmatprep.subr.bf16.mxu1 %v742_v31  ;;  %v869_v19 = vsub.s32 %v658_v11, %v859_v4  ;;  %v101_v58 = vrot.slane %v63_v51, %v68_v7  ;;  %v105_v59 = vrot.slane %v63_v51, %v72_v8 }
  0x1c   :  { %424 = vmatprep.mubr.bf16.mxu0 %v805_v0  ;;  %465 = vmatprep.mubr.bf16.mxu1 %v805_v0 }
  0x1e   :  { %407 = vmatpush1.bf16.msra.mxu0 %v739_v36  ;;  %448 = vmatpush1.bf16.msra.mxu1 %v741_v37 }
  0x1f   :  { %486 = vmatprep.subr.bf16.mxu0 %v760_v38  ;;  %527 = vmatprep.subr.bf16.mxu1 %v762_v39 }
  0x21   :  { %769 = vmatmul.mubr.msk.bf16.vlgmr.msra.gmra.mxu0 %vm306_vm0, %v835_v27  ;;  %770 = vmatmul.mubr.msk.bf16.vlgmr.msra.gmra.mxu1 %vm306_vm0, %v835_v27 }
  0x22   :  { %487 = vmatpush1.bf16.msra.mxu0 %v759_v44  ;;  %528 = vmatpush1.bf16.msra.mxu1 %v761_v45 }
  0x23   :  { %488 = vmatprep.subr.bf16.mxu0 %v744_v46  ;;  %529 = vmatprep.subr.bf16.mxu1 %v746_v47 }
  0x24   :  { %506 = vmatprep.mubr.bf16.mxu0 %v805_v0  ;;  %547 = vmatprep.mubr.bf16.mxu1 %v805_v0 }
  0x26   :  { %489 = vmatpush1.bf16.msra.mxu0 %v743_v52  ;;  %530 = vmatpush1.bf16.msra.mxu1 %v745_v53 }
  0x27   :  { %568 = vmatprep.subr.bf16.mxu0 %v764_v54  ;;  %609 = vmatprep.subr.bf16.mxu1 %v766_v55 }
  0x29   :  { %771 = vmatmul.mubr.msk.bf16.vlgmr.msra.gmra.mxu0 %vm306_vm0, %v835_v27  ;;  %772 = vmatmul.mubr.msk.bf16.vlgmr.msra.gmra.mxu1 %vm306_vm0, %v835_v27 }
  0x2a   :  { %569 = vmatpush1.bf16.msra.mxu0 %v763_v60  ;;  %610 = vmatpush1.bf16.msra.mxu1 %v765_v61 }
  0x2b   :  { %570 = vmatprep.subr.bf16.mxu0 %v748_v62  ;;  %611 = vmatprep.subr.bf16.mxu1 %v750_v63  ;;  %v109_v62 = vrot.slane %v63_v51, %v76_v9  ;;  %v113_v63 = vrot.slane %v63_v51, %v80_v10 }
  0x2c   :  { %588 = vmatprep.mubr.bf16.mxu0 %v805_v0  ;;  %629 = vmatprep.mubr.bf16.mxu1 %v805_v0  ;;  %v62_v0 = vld [vmem:[%s900_s2] sm:$0xff] }
  0x2d   :  { %v69_v12 = vrot.slane %v62_v0, %v68_v7  ;;  %v73_v13 = vrot.slane %v62_v0, %v72_v8  ;;  %v77_v15 = vrot.slane %v62_v0, %v76_v9  ;;  %v81_v16 = vrot.slane %v62_v0, %v80_v10 }
  0x2e   :  { %571 = vmatpush1.bf16.msra.mxu0 %v747_v1  ;;  %612 = vmatpush1.bf16.msra.mxu1 %v749_v2  ;;  %v85_v36 = vrot.slane %v62_v0, %v84_v23  ;;  %v89_v37 = vrot.slane %v62_v0, %v88_v24  ;;  %v93_v40 = vrot.slane %v62_v0, %v92_v28 }
  0x2f   :  { %v97_v41 = vrot.slane %v62_v0, %v96_v29 }
  0x31   :  { %773 = vmatmul.mubr.msk.bf16.vlgmr.msra.gmra.mxu0 %vm306_vm0, %v835_v27  ;;  %774 = vmatmul.mubr.msk.bf16.vlgmr.msra.gmra.mxu1 %vm306_vm0, %v835_v27 }
  0xd9   :  { %v344_v14 = vpop.f32.mrf.mxu0  ;;  %v385_v17 = vpop.f32.mrf.mxu1 }
  0xda   :  { %v345_v20 = vadd.f32 %v344_v14, %v69_v12  ;;  %v386_v25 = vadd.f32 %v385_v17, %v77_v15  ;;  %v117_v15 = vrot.slane %v63_v51, %v84_v23 }
  0xdb   :  { %v346_v18 = vpop.f32.mrf.mxu0  ;;  %v387_v22 = vpop.f32.mrf.mxu1 }
  0xdc   :  { %v347_v21 = vadd.f32 %v346_v18, %v73_v13  ;;  %v388_v26 = vadd.f32 %v387_v22, %v81_v16  ;;  %v121_v16 = vrot.slane %v63_v51, %v88_v24 }
  0xdd   :  { %v348_v27 = vpop.f32.mrf.mxu0  ;;  %v389_v31 = vpop.f32.mrf.mxu1 }
  0xde   :  { %v654_v30 = vcombine.low %v345_v20, %v347_v21  ;;  %v655_v32 = vcombine.low %v386_v25, %v388_v26  ;;  %v125_v20 = vrot.slane %v63_v51, %v92_v28  ;;  %v129_v21 = vrot.slane %v63_v51, %v96_v29 }
  0xdf   :  { %v349_v33 = vpop.f32.mrf.mxu0  ;;  %v390_v35 = vpop.f32.mrf.mxu1 }
  0xe0   :  { %v662_v34 = vrot.slane %v654_v30, %v869_v19  ;;  %v669_v38 = vrot.slane %v655_v32, %v869_v19 }
  0xe1   :  { %v426_v39 = vpop.f32.mrf.mxu0  ;;  %v467_v42 = vpop.f32.mrf.mxu1 }
  0xe2   :  { %v670_v43 = vcombine.low %v662_v34, %v669_v38  ;;  %v427_v45 = vadd.f32 %v426_v39, %v85_v36  ;;  %v468_v48 = vadd.f32 %v467_v42, %v93_v40 }
  0xe3   :  { %v428_v44 = vpop.f32.mrf.mxu0  ;;  %v469_v47 = vpop.f32.mrf.mxu1 }
  0xe4   :  { %v429_v46 = vadd.f32 %v428_v44, %v89_v37  ;;  %726 = vst [vmem:[%s901_s3] sm:$0xff] %v670_v43  ;;  %v470_v49 = vadd.f32 %v469_v47, %v97_v41 }
  0xe5   :  { %v430_v50 = vpop.f32.mrf.mxu0  ;;  %v471_v53 = vpop.f32.mrf.mxu1 }
  0xe6   :  { %v671_v52 = vcombine.low %v427_v45, %v429_v46  ;;  %v672_v54 = vcombine.low %v468_v48, %v470_v49 }
  0xe7   :  { %v431_v55 = vpop.f32.mrf.mxu0  ;;  %v472_v57 = vpop.f32.mrf.mxu1 }
  0xe8   :  { %v679_v56 = vrot.slane %v671_v52, %v869_v19  ;;  %v686_v60 = vrot.slane %v672_v54, %v869_v19 }
  0xe9   :  { %v508_v61 = vpop.f32.mrf.mxu0  ;;  %v549_v1 = vpop.f32.mrf.mxu1 }
  0xea   :  { %v687_v2 = vcombine.low %v679_v56, %v686_v60  ;;  %v509_v4 = vadd.f32 %v508_v61, %v101_v58  ;;  %v550_v0 = vadd.f32 %v549_v1, %v109_v62 }
  0xeb   :  { %v510_v3 = vpop.f32.mrf.mxu0  ;;  %v551_v6 = vpop.f32.mrf.mxu1 }
  0xec   :  { %v511_v5 = vadd.f32 %v510_v3, %v105_v59  ;;  %727 = vst [vmem:[%s901_s3 + $0x8] sm:$0xff] %v687_v2  ;;  %v552_v11 = vadd.f32 %v551_v6, %v113_v63 }
  0xed   :  { %v512_v12 = vpop.f32.mrf.mxu0  ;;  %v553_v8 = vpop.f32.mrf.mxu1 }
  0xee   :  { %v688_v7 = vcombine.low %v509_v4, %v511_v5  ;;  %v689_v13 = vcombine.low %v550_v0, %v552_v11 }
  0xef   :  { %v513_v14 = vpop.f32.mrf.mxu0  ;;  %v554_v10 = vpop.f32.mrf.mxu1 }
  0xf0   :  { %v696_v9 = vrot.slane %v688_v7, %v869_v19  ;;  %v703_v17 = vrot.slane %v689_v13, %v869_v19 }
  0xf1   :  { %v590_v18 = vpop.f32.mrf.mxu0  ;;  %v631_v22 = vpop.f32.mrf.mxu1 }
  0xf2   :  { %v704_v25 = vcombine.low %v696_v9, %v703_v17  ;;  %v591_v27 = vadd.f32 %v590_v18, %v117_v15  ;;  %v632_v32 = vadd.f32 %v631_v22, %v125_v20 }
  0xf3   :  { %v592_v26 = vpop.f32.mrf.mxu0  ;;  %v633_v31 = vpop.f32.mrf.mxu1 }
  0xf4   :  { %v593_v30 = vadd.f32 %v592_v26, %v121_v16  ;;  %728 = vst [vmem:[%s901_s3 + $0x10] sm:$0xff] %v704_v25  ;;  %v634_v33 = vadd.f32 %v633_v31, %v129_v21 }
  0xf5   :  { %v594_v34 = vpop.f32.mrf.mxu0  ;;  %v635_v24 = vpop.f32.mrf.mxu1 }
  0xf6   :  { %v705_v23 = vcombine.low %v591_v27, %v593_v30  ;;  %v706_v35 = vcombine.low %v632_v32, %v634_v33 }
  0xf7   :  { %v595_v36 = vpop.f32.mrf.mxu0  ;;  %v636_v29 = vpop.f32.mrf.mxu1 }
  0xf8   :  { %v713_v28 = vrot.slane %v705_v23, %v869_v19  ;;  %v720_v37 = vrot.slane %v706_v35, %v869_v19 }
  0xfa   :  { %v721_v38 = vcombine.low %v713_v28, %v720_v37 }
  0xfc   :  { %729 = vst [vmem:[%s901_s3 + $0x18] sm:$0xff] %v721_v38 }
  0xfd   :  { %734 = vsyncpa [#allocation3], 1 }

// kernel: generator_forward.5
= control target key start
LH: loop header
LB: loop body
LE: loop exit
PB: predicated region body
PF: predicated region fallthrough
CT: control target
= control target key end

     0   :  { %14 = vsyncpa [#allocation4], 0  ;;  %s3079_s27 = smov 0   ;;  %s3486_s0 = inlined_call_operand.vmem [shape: bf16[2,16,128], index: 0, kind: input, shape index: {}]   ;;  %s3487_s1 = inlined_call_operand.vmem [shape: bf16[104,16], index: 1, kind: input, shape index: {}]   ;;  %s3488_s2 = inlined_call_operand.hbm [shape: bf16[3,3,128,128], index: 2, kind: input, shape index: {}]   ;;  %s3489_s3 = inlined_call_operand.vmem [shape: f32[1,128], index: 3, kind: input, shape index: {}]   ;;  %s3490_s4 = inlined_call_operand.vmem [shape: f32[1,128], index: 4, kind: input, shape index: {}]   ;;  %s3491_s5 = inlined_call_operand.vmem [shape: f32[1,128], index: 5, kind: input, shape index: {}]   ;;  %s3492_s6 = inlined_call_operand.vmem [shape: f32[80,1], index: 6, kind: input, shape index: {}]   ;;  %s3493_s7 = inlined_call_operand.vmem [shape: bf16[2,80,128], index: 7, kind: output, shape index: {0}]   ;;  %s3494_s8 = inlined_call_operand.vmem [shape: f32[2,2,128], index: 8, kind: output, shape index: {1}]  }
   0x1 LB: > { %s3085_s28 = sadd.s32 4294967295, %s3026_s27   ;;  %p2251_p0 = scmp.ge.s32.totalorder %s3026_s27, 1  ;;  %s3026_s27 = sphi %s3079_s27, %s20_s27  }
   0x2   : > { %p229_p1 = scmp.lt.s32.totalorder %s3026_s27, 3  ;;  %s3028_s29 = smov [#allocation3]  }
   0x3   : > { %s244_s30 = sshll.u32 %s3028_s29, 4  ;;  %p2893_p3 = scmp.eq.s32.totalorder %s3085_s28, 0  ;;  %s245_s30 = int_to_ptr.vmem [resolvable:$true] %s244_s30 }
   0x4   : > { %p3089_p2 = pnand %p2251_p0, %p229_p1  ;;  %s3001_s10 = scalar_lea.vmem %s245_s30, 9216 }
   0x5   : > { %p3002_p7 = scmp.ne.s32.totalorder %s245_s30, %s3001_s10  ;;  %p3009_p10 = scmp.lt.s32.totalorder %s245_s30, %s245_s30 }
   0x6   : > { %p2889_p4 = pneg %p3089_p2  ;;  %p3010_p11 = scmp.lt.s32.totalorder %s3001_s10, %s3001_s10 }
   0x8   : > { %p2890_p5 = pnand %p2893_p3, %p2889_p4  ;;  %p3011_p12 = por %p3010_p11, %p3009_p10 }
   0xa   : > { %p2992_p6 = pneg %p2890_p5 }
   0xc   : > { %p3004_p8 = pnand %p3002_p7, %p2992_p6 }
   0xe   : > { %p3005_p9 = pneg %p3004_p8 }
  0x10   : > { %p3012_p13 = pnand %p3011_p12, %p3005_p9 }
  0x12   : > { %3015 = shalt.err (!%p3012_p13)
}
  0x13   : > { %s3029_s11 = smov 64   ;;  %s3030_s12 = smov 4  }
  0x14   : > { %2892 = dma.hbm_to_vmem [thread:$0]  (!%p2890_p5), %s3488_s2, 9216, %s245_s30, [#allocation4], %s3029_s11, %s3029_s11, %s3030_s12  }
  0x15   : > { %280 = sbr.rel (%p3089_p2) target bundleno = 668 (0x29c), region = 48 }
  0x1a   : > { %3021 = dma.done.wait (%p2893_p3), [#allocation4], 9216  }
  0x1b   : > { %3023 = vsyncadd (%p2893_p3), [#allocation4], 4294958080  ;;  %p318_p0 = scmp.lt.s32.totalorder %s3085_s28, 1  ;;  %v3031_v0 = vmov 0.0   ;;  %vm3032_vm0 = vmmov 0   ;;  %v2911_v11 = vld [vmem:[%s3487_s1] sm:$0xff]  }
  0x1c   : > { %2530 = vmatprep.subr.bf16.mxu0 %v3031_v0  ;;  %2532 = vmatprep.mubr.msk.bf16.mxu0 %vm3032_vm0, %v3031_v0  ;;  %v2260_v2 = vld [vmem:[%s3490_s4] ss:$0 sm:$0xff]  ;;  %vm402_vm1 = vcmask 130048   ;;  %v2921_v14 = vld [vmem:[#allocation3 + $0x70] sm:$0xff]   ;;  %v2912_v16 = vld [vmem:[%s3487_s1 + $0x8] sm:$0xff]   ;;  %vm2148_vm2 = vcmask 1040384  }
  0x1d   : > { %s3497_s28 = smov (!%p318_p0, %s3085_s28), 1  ;;  %2560 = vmatprep.subr.bf16.mxu1 %v3031_v0  ;;  %2576 = vmatprep.mubr.msk.bf16.mxu1 %vm3032_vm0, %v3031_v0  ;;  %v2261_v5 = vld [vmem:[%s3491_s5] ss:$0 sm:$0xff]  ;;  %v2920_v15 = vld [vmem:[#allocation3 + $0x30] sm:$0xff]   ;;  %v2922_v17 = vld [vmem:[#allocation3 + $0x28] sm:$0xff]  }
  0x1e   : > { %s2361_s15 = sshll.u32 %s3497_s28, 3  ;;  %v2918_v12 = vld [vmem:[#allocation3 + $0x38] sm:$0xff]   ;;  %v2923_v18 = vld [vmem:[#allocation3 + $0x68] sm:$0xff]   ;;  %v2925_v19 = vld [vmem:[#allocation3 + $0x60] sm:$0xff]   ;;  %s2884_s19 = smul.u32 40, %s3497_s28 }
  0x1f   : > { %s322_s18 = scalar_lea.vmem %s3486_s0, %s2361_s15  ;;  %v2919_v13 = vld [vmem:[#allocation3 + $0x78] sm:$0xff]   ;;  %v2924_v20 = vld [vmem:[#allocation3 + $0x20] sm:$0xff]   ;;  %v2913_v21 = vld [vmem:[%s3487_s1 + $0x10] sm:$0xff]   ;;  %s2259_s23 = sshll.u32 %s3497_s28, 1 }
  0x20   : > { %v2373_v1 = vld [vmem:[%s322_s18] sm:$0xff]   ;;  %2561 = vmatpush3.bf16.msra.mxu1 %v2919_v13  ;;  %v2914_v22 = vld [vmem:[%s3487_s1 + $0x18] sm:$0xff]   ;;  %v2916_v24 = vld [vmem:[%s3487_s1 + $0x28] sm:$0xff]   ;;  %s3449_s22 = scalar_lea.vmem %s3493_s7, %s2884_s19  ;;  %s331_s26 = scalar_lea.vmem %s3494_s8, %s2259_s23 }
  0x21   : > { %v2374_v3 = vunpack.c.l.bf16 %v2373_v1  ;;  %v2375_v4 = vunpack.c.h.bf16 %v2373_v1  ;;  %2562 = vmatprep.subr.bf16.mxu1 %v3031_v0  ;;  %v2915_v23 = vld [vmem:[%s3487_s1 + $0x20] sm:$0xff]   ;;  %v2917_v25 = vld [vmem:[%s3487_s1 + $0x30] ss:$0 sps:$4 sm:$0xff]   ;;  %v2928_v27 = vld [vmem:[#allocation3 + $0x10] sm:$0xff]  }
  0x22   : > { %v2926_v26 = vld [vmem:[#allocation3 + $0x18] sm:$0xff]   ;;  %v2930_v28 = vld [vmem:[#allocation3 + $0x8] sm:$0xff]   ;;  %v2932_v30 = vld [vmem:[#allocation3] sm:$0xff]  }
  0x23   : > { %v344_v6 = vmul.f32 %v2374_v3, %v2260_v2  ;;  %v345_v7 = vmul.f32 %v2375_v4, %v2260_v2  ;;  %v2927_v29 = vld [vmem:[#allocation3 + $0x58] sm:$0xff]   ;;  %v2929_v31 = vld [vmem:[#allocation3 + $0x50] sm:$0xff]   ;;  %v2931_v32 = vld [vmem:[#allocation3 + $0x48] sm:$0xff]  }
  0x24   : > { %2563 = vmatpush3.bf16.msra.mxu1 %v2921_v14  ;;  %v2933_v33 = vld [vmem:[#allocation3 + $0x40] sm:$0xff]   ;;  %v2936_v37 = vld [vmem:[#allocation3 + $0xf8] sm:$0xff]   ;;  %v2937_v41 = vld [vmem:[#allocation3 + $0xf0] sm:$0xff]  }
  0x25   : > { %v353_v8 = vadd.f32 %v2261_v5, %v344_v6  ;;  %v354_v9 = vadd.f32 %v2261_v5, %v345_v7  ;;  %2564 = vmatprep.subr.bf16.mxu1 %v3031_v0  ;;  %v2939_v44 = vld [vmem:[#allocation3 + $0xe8] sm:$0xff]   ;;  %v2934_v50 = vld [vmem:[#allocation3 + $0xb8] sm:$0xff]   ;;  %v2941_v52 = vld [vmem:[#allocation3 + $0xe0] sm:$0xff]  }
  0x26   : > { %v2935_v55 = vld [vmem:[#allocation3 + $0xb0] sm:$0xff]   ;;  %v2943_v57 = vld [vmem:[#allocation3 + $0xd8] sm:$0xff]   ;;  %v2938_v62 = vld [vmem:[#allocation3 + $0xa8] sm:$0xff]  }
  0x27   : > { %v355_v10 = vpack.c.bf16 %v354_v9, %v353_v8  ;;  %v2945_v1 = vld [vmem:[#allocation3 + $0xd0] sm:$0xff]   ;;  %v2940_v4 = vld [vmem:[#allocation3 + $0xa0] sm:$0xff]   ;;  %v2946_v6 = vld [vmem:[#allocation3 + $0xc8] sm:$0xff]  }
  0x28   : > { %2565 = vmatpush3.bf16.msra.mxu1 %v2923_v18  ;;  %v2948_v13 = vld [vmem:[#allocation3 + $0xc0] sm:$0xff]  }
  0x29   : > { %2531 = vmatpush3.bf16.msra.mxu0 %v355_v10  ;;  %2566 = vmatprep.subr.bf16.mxu1 %v3031_v0 }
  0x2a   : > { %2596 = vmatprep.subr.bf16.mxu0 %v3031_v0 }
  0x2c   : > { %2533 = vmatmul.mubr.msk.bf16.vlgmr.msra.gmra.mxu0 %vm402_vm1, %v2911_v11  ;;  %2567 = vmatpush3.bf16.msra.mxu1 %v2925_v19  ;;  %v2942_v11 = vld [vmem:[#allocation3 + $0x98] sm:$0xff]  }
  0x2d   : > { %2536 = vmatprep.mubr.msk.bf16.mxu0 %vm3032_vm0, %v3031_v0  ;;  %2597 = vmatpush3.bf16.msra.mxu0 %v2918_v12 }
  0x2e   : > { %2598 = vmatprep.subr.bf16.mxu0 %v3031_v0  ;;  %2568 = vmatprep.subr.bf16.mxu1 %v3031_v0 }
  0x30   : > { %2569 = vmatpush3.bf16.msra.mxu1 %v2927_v29 }
  0x31   : > { %2599 = vmatpush3.bf16.msra.mxu0 %v2920_v15  ;;  %2570 = vmatprep.subr.bf16.mxu1 %v3031_v0 }
  0x32   : > { %2600 = vmatprep.subr.bf16.mxu0 %v3031_v0 }
  0x34   : > { %2537 = vmatmul.mubr.msk.bf16.gmra.mxu0 %vm402_vm1, %v2912_v16  ;;  %2571 = vmatpush3.bf16.msra.mxu1 %v2929_v31  ;;  %v2944_v16 = vld [vmem:[#allocation3 + $0x90] sm:$0xff]  }
  0x35   : > { %2540 = vmatprep.mubr.msk.bf16.mxu0 %vm3032_vm0, %v3031_v0  ;;  %2601 = vmatpush3.bf16.msra.mxu0 %v2922_v17 }
  0x36   : > { %2602 = vmatprep.subr.bf16.mxu0 %v3031_v0  ;;  %2572 = vmatprep.subr.bf16.mxu1 %v3031_v0 }
  0x38   : > { %2573 = vmatpush3.bf16.msra.mxu1 %v2931_v32 }
  0x39   : > { %2603 = vmatpush3.bf16.msra.mxu0 %v2924_v20  ;;  %2574 = vmatprep.subr.bf16.mxu1 %v3031_v0 }
  0x3a   : > { %2604 = vmatprep.subr.bf16.mxu0 %v3031_v0 }
  0x3c   : > { %2541 = vmatmul.mubr.msk.bf16.gmra.mxu0 %vm402_vm1, %v2913_v21  ;;  %2575 = vmatpush3.bf16.msra.mxu1 %v2933_v33 }
  0x3d   : > { %2544 = vmatprep.mubr.msk.bf16.mxu0 %vm3032_vm0, %v3031_v0  ;;  %2605 = vmatpush3.bf16.msra.mxu0 %v2926_v26 }
  0x3e   : > { %2606 = vmatprep.subr.bf16.mxu0 %v3031_v0  ;;  %2632 = vmatprep.subr.bf16.mxu1 %v3031_v0 }
  0x41   : > { %2607 = vmatpush3.bf16.msra.mxu0 %v2928_v27  ;;  %v2949_v27 = vld [vmem:[#allocation3 + $0x80] sm:$0xff]  }
  0x42   : > { %2608 = vmatprep.subr.bf16.mxu0 %v3031_v0 }
  0x44   : > { %2545 = vmatmul.mubr.msk.bf16.gmra.mxu0 %vm402_vm1, %v2914_v22  ;;  %v2947_v22 = vld [vmem:[#allocation3 + $0x88] sm:$0xff]  }
  0x45   : > { %2548 = vmatprep.mubr.msk.bf16.mxu0 %vm3032_vm0, %v3031_v0  ;;  %2609 = vmatpush3.bf16.msra.mxu0 %v2930_v28 }
  0x46   : > { %2610 = vmatprep.subr.bf16.mxu0 %v3031_v0 }
  0x49   : > { %2611 = vmatpush3.bf16.msra.mxu0 %v2932_v30  ;;  %v2952_v30 = vld [vmem:[#allocation3 + $0x178] sm:$0xff]  }
  0x4a   : > { %2668 = vmatprep.subr.bf16.mxu0 %v3031_v0 }
  0x4c   : > { %2549 = vmatmul.mubr.msk.bf16.gmra.mxu0 %vm402_vm1, %v2915_v23 }
  0x4d   : > { %2552 = vmatprep.mubr.msk.bf16.mxu0 %vm3032_vm0, %v3031_v0 }
  0x54   : > { %2553 = vmatmul.mubr.msk.bf16.gmra.mxu0 %vm402_vm1, %v2916_v24 }
  0x55   : > { %2556 = vmatprep.mubr.msk.bf16.mxu0 %vm3032_vm0, %v3031_v0 }
  0x5c   : > { %2557 = vmatmul.mubr.msk.bf16.gmra.mxu0 %vm402_vm1, %v2917_v25 }
  0x5d   : > { %2612 = vmatprep.mubr.msk.bf16.mxu0 %vm3032_vm0, %v3031_v0 }
  0xec   : > { %v458_v34 = vpop.f32.mrf.mxu0 }
  0xed   : > { %512 = vst [vmem:[#allocation2] sm:$0xff] %v458_v34 }
  0xee   : > { %v2534_v35 = vpop.f32.mrf.mxu0 }
  0xf0   : > { %v461_v36 = vpop.f32.mrf.mxu0 }
  0xf1   : > { %513 = vst [vmem:[#allocation2 + $0x8] sm:$0xff] %v461_v36  ;;  %v535_v38 = vpack.c.bf16 %v461_v36, %v458_v34  ;;  %v2953_v36 = vld [vmem:[#allocation3 + $0x170] sm:$0xff]  }
  0xf2   : > { %v2535_v39 = vpop.f32.mrf.mxu0 }
  0xf3   : > { %2613 = vmatmul.mubr.bf16.vlgmr.msra.gmra.mxu0 %v535_v38 }
  0xf4   : > { %v466_v40 = vpop.f32.mrf.mxu0  ;;  %2616 = vmatprep.mubr.msk.bf16.mxu0 %vm3032_vm0, %v3031_v0  ;;  %2669 = vmatpush3.bf16.msra.mxu0 %v2936_v37 }
  0xf5   : > { %514 = vst [vmem:[#allocation2 + $0x10] sm:$0xff] %v466_v40  ;;  %2670 = vmatprep.subr.bf16.mxu0 %v3031_v0 }
  0xf6   : > { %v2538_v42 = vpop.f32.mrf.mxu0 }
  0xf7   : > { %v2955_v42 = vld [vmem:[#allocation3 + $0x168] sm:$0xff]  }
  0xf8   : > { %v469_v43 = vpop.f32.mrf.mxu0  ;;  %2671 = vmatpush3.bf16.msra.mxu0 %v2937_v41  ;;  %v556_v48 = vld [vmem:[#allocation2 + $0x1] sm:$0xff] }
  0xf9   : > { %515 = vst [vmem:[#allocation2 + $0x18] sm:$0xff] %v469_v43  ;;  %v536_v45 = vpack.c.bf16 %v469_v43, %v466_v40  ;;  %2672 = vmatprep.subr.bf16.mxu0 %v3031_v0 }
  0xfa   : > { %v2539_v46 = vpop.f32.mrf.mxu0 }
  0xfb   : > { %2617 = vmatmul.mubr.bf16.gmra.mxu0 %v536_v45  ;;  %v2950_v45 = vld [vmem:[#allocation3 + $0x138] sm:$0xff]  }
  0xfc   : > { %v474_v47 = vpop.f32.mrf.mxu0  ;;  %v557_v49 = vld [vmem:[#allocation2 + $0x9] sm:$0xff]  ;;  %2620 = vmatprep.mubr.msk.bf16.mxu0 %vm3032_vm0, %v3031_v0  ;;  %2673 = vmatpush3.bf16.msra.mxu0 %v2939_v44 }
  0xfd   : > { %516 = vst [vmem:[#allocation2 + $0x20] sm:$0xff] %v474_v47  ;;  %v566_v51 = vpack.c.bf16 %v557_v49, %v556_v48  ;;  %2674 = vmatprep.subr.bf16.mxu0 %v3031_v0  ;;  %v993_v28 = vld [vmem:[#allocation2 + $0xa] sm:$0xff]  ;;  %v830_v44 = vld [vmem:[#allocation2 + $0x2] sm:$0xff]  ;;  %v2951_v49 = vld [vmem:[#allocation3 + $0x130] sm:$0xff]  }
  0xfe   : > { %v2542_v53 = vpop.f32.mrf.mxu0  ;;  %v840_v46 = vpack.c.bf16 %v993_v28, %v830_v44  ;;  %v2976_v44 = vld [vmem:[#allocation3 + $0x190] sm:$0xff]  }
  0xff   : > { %2577 = vmatmul.mubr.bf16.vlgmr.msra.gmra.mxu1 %v566_v51  ;;  %v2954_v53 = vld [vmem:[#allocation3 + $0x128] sm:$0xff]  }
 0x100   : > { %2633 = vmatpush3.bf16.msra.mxu1 %v2934_v50  ;;  %v477_v54 = vpop.f32.mrf.mxu0  ;;  %2580 = vmatprep.mubr.msk.bf16.mxu1 %vm3032_vm0, %v3031_v0  ;;  %v558_v60 = vld [vmem:[#allocation2 + $0x11] sm:$0xff] }
 0x101   : > { %517 = vst [vmem:[#allocation2 + $0x28] sm:$0xff] %v477_v54  ;;  %2634 = vmatprep.subr.bf16.mxu1 %v3031_v0  ;;  %v537_v56 = vpack.c.bf16 %v477_v54, %v474_v47  ;;  %2675 = vmatpush3.bf16.msra.mxu0 %v2941_v52  ;;  %v3216_v25 = vld [vmem:[#allocation2 + $0x12] sm:$0xff]  ;;  %v2957_v47 = vld [vmem:[#allocation3 + $0x160] sm:$0xff]   ;;  %v2959_v52 = vld [vmem:[#allocation3 + $0x158] sm:$0xff]  }
 0x102   : > { %v2543_v58 = vpop.f32.mrf.mxu0  ;;  %2676 = vmatprep.subr.bf16.mxu0 %v3031_v0  ;;  %v1003_v29 = vpack.c.bf16 %v3216_v25, %v993_v28 }
 0x103   : > { %2621 = vmatmul.mubr.bf16.gmra.mxu0 %v537_v56 }
 0x104   : > { %v482_v59 = vpop.f32.mrf.mxu0  ;;  %2635 = vmatpush3.bf16.msra.mxu1 %v2935_v55  ;;  %v559_v61 = vld [vmem:[#allocation2 + $0x19] sm:$0xff]  ;;  %2624 = vmatprep.mubr.msk.bf16.mxu0 %vm3032_vm0, %v3031_v0 }
 0x105   : > { %518 = vst [vmem:[#allocation2 + $0x30] sm:$0xff] %v482_v59  ;;  %v567_v63 = vpack.c.bf16 %v559_v61, %v558_v60  ;;  %2636 = vmatprep.subr.bf16.mxu1 %v3031_v0  ;;  %2677 = vmatpush3.bf16.msra.mxu0 %v2943_v57  ;;  %v995_v39 = vld [vmem:[#allocation2 + $0x1a] sm:$0xff]  ;;  %v2956_v57 = vld [vmem:[#allocation3 + $0x120] sm:$0xff]   ;;  %v2962_v60 = vld [vmem:[#allocation3 + $0x148] sm:$0xff]  }
 0x106   : > { %v2546_v2 = vpop.f32.mrf.mxu0  ;;  %2678 = vmatprep.subr.bf16.mxu0 %v3031_v0  ;;  %v841_v54 = vpack.c.bf16 %v995_v39, %v3216_v25  ;;  %v2961_v55 = vld [vmem:[#allocation3 + $0x150] sm:$0xff]   ;;  %v2958_v61 = vld [vmem:[#allocation3 + $0x118] sm:$0xff]  }
 0x107   : > { %2581 = vmatmul.mubr.bf16.gmra.mxu1 %v567_v63  ;;  %v2964_v63 = vld [vmem:[#allocation3 + $0x140] sm:$0xff]   ;;  %v2960_v2 = vld [vmem:[#allocation3 + $0x110] sm:$0xff]  }
 0x108   : > { %v485_v3 = vpop.f32.mrf.mxu0  ;;  %2637 = vmatpush3.bf16.msra.mxu1 %v2938_v62  ;;  %2584 = vmatprep.mubr.msk.bf16.mxu1 %vm3032_vm0, %v3031_v0  ;;  %v560_v9 = vld [vmem:[#allocation2 + $0x21] sm:$0xff] }
 0x109   : > { %519 = vst [vmem:[#allocation2 + $0x38] sm:$0xff] %v485_v3  ;;  %2638 = vmatprep.subr.bf16.mxu1 %v3031_v0  ;;  %v538_v5 = vpack.c.bf16 %v485_v3, %v482_v59  ;;  %2679 = vmatpush3.bf16.msra.mxu0 %v2945_v1  ;;  %v996_v37 = vld [vmem:[#allocation2 + $0x22] sm:$0xff] }
 0x10a   : > { %v2547_v7 = vpop.f32.mrf.mxu0  ;;  %2680 = vmatprep.subr.bf16.mxu0 %v3031_v0  ;;  %v1004_v41 = vpack.c.bf16 %v996_v37, %v995_v39  ;;  %v1159_v28 = vld [vmem:[#allocation2 + $0x23] sm:$0xff] }
 0x10b   : > { %2625 = vmatmul.mubr.bf16.gmra.mxu0 %v538_v5  ;;  %v2963_v5 = vld [vmem:[#allocation3 + $0x108] sm:$0xff]  }
 0x10c   : > { %v490_v8 = vpop.f32.mrf.mxu0  ;;  %2639 = vmatpush3.bf16.msra.mxu1 %v2940_v4  ;;  %v561_v10 = vld [vmem:[#allocation2 + $0x29] sm:$0xff]  ;;  %2628 = vmatprep.mubr.msk.bf16.mxu0 %vm3032_vm0, %v3031_v0  ;;  %v3256_v7 = vld [vmem:[#allocation2 + $0x14] sm:$0xff] }
 0x10d   : > { %520 = vst [vmem:[#allocation2 + $0x40] sm:$0xff] %v490_v8  ;;  %v568_v12 = vpack.c.bf16 %v561_v10, %v560_v9  ;;  %2640 = vmatprep.subr.bf16.mxu1 %v3031_v0  ;;  %2681 = vmatpush3.bf16.msra.mxu0 %v2946_v6  ;;  %v997_v50 = vld [vmem:[#allocation2 + $0x2a] sm:$0xff] }
 0x10e   : > { %v2550_v14 = vpop.f32.mrf.mxu0  ;;  %2682 = vmatprep.subr.bf16.mxu0 %v3031_v0  ;;  %v842_v62 = vpack.c.bf16 %v997_v50, %v996_v37  ;;  %v1319_v9 = vld [vmem:[#allocation2 + $0xc] sm:$0xff] }
 0x10f   : > { %2585 = vmatmul.mubr.bf16.gmra.mxu1 %v568_v12  ;;  %v1329_v10 = vpack.c.bf16 %v3256_v7, %v1319_v9  ;;  %v3265_v14 = vld [vmem:[#allocation2 + $0x24] sm:$0xff]  ;;  %v3282_v25 = vld [vmem:[#allocation2 + $0x2c] sm:$0xff] }
 0x110   : > { %v493_v15 = vpop.f32.mrf.mxu0  ;;  %2641 = vmatpush3.bf16.msra.mxu1 %v2942_v11  ;;  %2588 = vmatprep.mubr.msk.bf16.mxu1 %vm3032_vm0, %v3031_v0  ;;  %v562_v20 = vld [vmem:[#allocation2 + $0x31] sm:$0xff]  ;;  %v2968_v11 = vld [vmem:[#allocation3 + $0x1f8] sm:$0xff]  }
 0x111   : > { %521 = vst [vmem:[#allocation2 + $0x48] sm:$0xff] %v493_v15  ;;  %2642 = vmatprep.subr.bf16.mxu1 %v3031_v0  ;;  %v539_v17 = vpack.c.bf16 %v493_v15, %v490_v8  ;;  %2683 = vmatpush3.bf16.msra.mxu0 %v2948_v13  ;;  %v998_v48 = vld [vmem:[#allocation2 + $0x32] sm:$0xff]  ;;  %v2965_v8 = vld [vmem:[#allocation3 + $0x100] sm:$0xff]   ;;  %v3270_v15 = vld [vmem:[#allocation2 + $0x1c] sm:$0xff] }
 0x112   : > { %v2551_v18 = vpop.f32.mrf.mxu0  ;;  %2740 = vmatprep.subr.bf16.mxu0 %v3031_v0  ;;  %v1005_v51 = vpack.c.bf16 %v998_v48, %v997_v50  ;;  %v2969_v13 = vld [vmem:[#allocation3 + $0x1f0] sm:$0xff]   ;;  %v2978_v37 = vld [vmem:[#allocation3 + $0x1c8] sm:$0xff]  }
 0x113   : > { %2629 = vmatmul.mubr.bf16.gmra.mxu0 %v539_v17  ;;  %v2971_v17 = vld [vmem:[#allocation3 + $0x1e8] sm:$0xff]  }
 0x114   : > { %v498_v19 = vpop.f32.mrf.mxu0  ;;  %v563_v21 = vld [vmem:[#allocation2 + $0x39] sm:$0xff]  ;;  %2643 = vmatpush3.bf16.msra.mxu1 %v2944_v16  ;;  %2684 = vmatprep.mubr.msk.bf16.mxu0 %vm3032_vm0, %v3031_v0  ;;  %v1330_v16 = vpack.c.bf16 %v3265_v14, %v3270_v15  ;;  %v1160_v39 = vld [vmem:[#allocation2 + $0x2b] sm:$0xff] }
 0x115   : > { %522 = vst [vmem:[#allocation2 + $0x50] sm:$0xff] %v498_v19  ;;  %v569_v23 = vpack.c.bf16 %v563_v21, %v562_v20  ;;  %2644 = vmatprep.subr.bf16.mxu1 %v3031_v0  ;;  %v999_v58 = vld [vmem:[#allocation2 + $0x3a] sm:$0xff]  ;;  %v1156_v19 = vld [vmem:[#allocation2 + $0xb] sm:$0xff] }
 0x116   : > { %v2554_v24 = vpop.f32.mrf.mxu0  ;;  %v843_v6 = vpack.c.bf16 %v999_v58, %v998_v48  ;;  %v1157_v18 = vld [vmem:[#allocation2 + $0x13] sm:$0xff]  ;;  %v2966_v20 = vld [vmem:[#allocation3 + $0x1b8] sm:$0xff]  }
 0x117   : > { %2589 = vmatmul.mubr.bf16.gmra.mxu1 %v569_v23  ;;  %v1166_v21 = vpack.c.bf16 %v1157_v18, %v1156_v19  ;;  %v3277_v23 = vld [vmem:[#allocation2 + $0x34] sm:$0xff]  ;;  %v1650_v9 = vld [vmem:[#allocation2 + $0x3d] sm:$0xff]  ;;  %v2985_v19 = vld [vmem:[#allocation3 + $0x220] sm:$0xff]  }
 0x118   : > { %v501_v26 = vpop.f32.mrf.mxu0  ;;  %2645 = vmatpush3.bf16.msra.mxu1 %v2947_v22  ;;  %2592 = vmatprep.mubr.msk.bf16.mxu1 %vm3032_vm0, %v3031_v0  ;;  %v564_v33 = vld [vmem:[#allocation2 + $0x41] sm:$0xff]  ;;  %v2967_v24 = vld [vmem:[#allocation3 + $0x1b0] sm:$0xff]  }
 0x119   : > { %523 = vst [vmem:[#allocation2 + $0x58] sm:$0xff] %v501_v26  ;;  %2646 = vmatprep.subr.bf16.mxu1 %v3031_v0  ;;  %v1000_v56 = vld [vmem:[#allocation2 + $0x42] sm:$0xff]  ;;  %v1331_v26 = vpack.c.bf16 %v3277_v23, %v3282_v25 }
 0x11a   : > { %v2555_v31 = vpop.f32.mrf.mxu0  ;;  %v1006_v59 = vpack.c.bf16 %v1000_v56, %v999_v58  ;;  %v2973_v22 = vld [vmem:[#allocation3 + $0x1e0] sm:$0xff]   ;;  %v1162_v48 = vld [vmem:[#allocation2 + $0x3b] sm:$0xff] }
 0x11b   : > { %2685 = vmatmul.mubr.bf16.vlgmr.msra.gmra.mxu0 %v1003_v29  ;;  %v1158_v29 = vld [vmem:[#allocation2 + $0x1b] sm:$0xff] }
 0x11c   : > { %v506_v32 = vpop.f32.mrf.mxu0  ;;  %v565_v34 = vld [vmem:[#allocation2 + $0x49] sm:$0xff]  ;;  %2647 = vmatpush3.bf16.msra.mxu1 %v2949_v27  ;;  %2688 = vmatprep.mubr.msk.bf16.mxu0 %vm3032_vm0, %v3031_v0  ;;  %v2975_v27 = vld [vmem:[#allocation3 + $0x1d8] sm:$0xff]   ;;  %v1167_v31 = vpack.c.bf16 %v1159_v28, %v1158_v29 }
 0x11d   : > { %524 = vst [vmem:[#allocation2 + $0x60] sm:$0xff] %v506_v32  ;;  %v570_v35 = vpack.c.bf16 %v565_v34, %v564_v33  ;;  %2704 = vmatprep.subr.bf16.mxu1 %v3031_v0  ;;  %2741 = vmatpush3.bf16.msra.mxu0 %v2952_v30  ;;  %v1001_v3 = vld [vmem:[#allocation2 + $0x4a] sm:$0xff]  ;;  %v2977_v32 = vld [vmem:[#allocation3 + $0x1d0] sm:$0xff]  }
 0x11e   : > { %2742 = vmatprep.subr.bf16.mxu0 %v3031_v0  ;;  %v2558_v38 = vpop.f32.mrf.mxu0  ;;  %v844_v12 = vpack.c.bf16 %v1001_v3, %v1000_v56  ;;  %v2970_v30 = vld [vmem:[#allocation3 + $0x1a8] sm:$0xff]   ;;  %v3291_v33 = vld [vmem:[#allocation2 + $0x44] sm:$0xff] }
 0x11f   : > { %2593 = vmatmul.mubr.bf16.gmra.mxu1 %v570_v35  ;;  %v2972_v34 = vld [vmem:[#allocation3 + $0x1a0] sm:$0xff]   ;;  %v3296_v35 = vld [vmem:[#allocation2 + $0x3c] sm:$0xff]  ;;  %v1161_v38 = vld [vmem:[#allocation2 + $0x33] sm:$0xff] }
 0x120   : > { %2648 = vmatprep.mubr.msk.bf16.mxu1 %vm3032_vm0, %v3031_v0  ;;  %v509_v40 = vpop.f32.mrf.mxu0  ;;  %v1002_v1 = vld [vmem:[#allocation2 + $0x52] sm:$0xff] }
 0x121   : > { %2743 = vmatpush3.bf16.msra.mxu0 %v2953_v36  ;;  %v1007_v4 = vpack.c.bf16 %v1002_v1, %v1001_v3  ;;  %v1332_v36 = vpack.c.bf16 %v3291_v33, %v3296_v35  ;;  %v2974_v40 = vld [vmem:[#allocation3 + $0x198] sm:$0xff]   ;;  %v1164_v58 = vld [vmem:[#allocation2 + $0x4b] sm:$0xff]  ;;  %v2041_v1 = vld [vmem:[%s3492_s6 + $0x18] sm:$0xff] }
 0x122   : > { %2744 = vmatprep.subr.bf16.mxu0 %v3031_v0  ;;  %v2559_v43 = vpop.f32.mrf.mxu0  ;;  %v1652_v18 = vld [vmem:[#allocation2 + $0x4d] sm:$0xff] }
 0x123   : > { %2689 = vmatmul.mubr.bf16.gmra.mxu0 %v1004_v41  ;;  %v1168_v41 = vpack.c.bf16 %v1161_v38, %v1160_v39  ;;  %v3305_v43 = vld [vmem:[#allocation2 + $0x54] sm:$0xff]  ;;  %v1813_v38 = vld [vmem:[#allocation2 + $0x3e] sm:$0xff] }
 0x124   : > { %2692 = vmatprep.mubr.msk.bf16.mxu0 %vm3032_vm0, %v3031_v0  ;;  %v2988_v28 = vld [vmem:[#allocation3 + $0x208] sm:$0xff]  }
 0x125   : > { %2745 = vmatpush3.bf16.msra.mxu0 %v2955_v42  ;;  %v2980_v42 = vld [vmem:[#allocation3 + $0x1c0] sm:$0xff]   ;;  %v1812_v39 = vld [vmem:[#allocation2 + $0x36] sm:$0xff] }
 0x126   : > { %2746 = vmatprep.subr.bf16.mxu0 %v3031_v0 }
 0x127   : > { %2649 = vmatmul.mubr.bf16.vlgmr.msra.gmra.mxu1 %v840_v46 }
 0x128   : > { %2705 = vmatpush3.bf16.msra.mxu1 %v2950_v45  ;;  %2652 = vmatprep.mubr.msk.bf16.mxu1 %vm3032_vm0, %v3031_v0  ;;  %v3310_v45 = vld [vmem:[#allocation2 + $0x4c] sm:$0xff] }
 0x129   : > { %2706 = vmatprep.subr.bf16.mxu1 %v3031_v0  ;;  %2747 = vmatpush3.bf16.msra.mxu0 %v2957_v47  ;;  %v1333_v46 = vpack.c.bf16 %v3305_v43, %v3310_v45  ;;  %v1163_v47 = vld [vmem:[#allocation2 + $0x43] sm:$0xff]  ;;  %v1495_v29 = vpack.c.bf16 %v3310_v45, %v3291_v33  ;;  %v1808_v33 = vld [vmem:[#allocation2 + $0x16] sm:$0xff] }
 0x12a   : > { %2748 = vmatprep.subr.bf16.mxu0 %v3031_v0  ;;  %v1169_v50 = vpack.c.bf16 %v1163_v47, %v1162_v48  ;;  %v1817_v48 = vld [vmem:[#allocation2 + $0x5e] sm:$0xff] }
 0x12b   : > { %2693 = vmatmul.mubr.bf16.gmra.mxu0 %v1005_v51  ;;  %v1646_v51 = vld [vmem:[#allocation2 + $0x1d] sm:$0xff] }
 0x12c   : > { %2707 = vmatpush3.bf16.msra.mxu1 %v2951_v49  ;;  %2696 = vmatprep.mubr.msk.bf16.mxu0 %vm3032_vm0, %v3031_v0  ;;  %v2979_v49 = vld [vmem:[#allocation3 + $0x188] sm:$0xff]  }
 0x12d   : > { %2708 = vmatprep.subr.bf16.mxu1 %v3031_v0  ;;  %2749 = vmatpush3.bf16.msra.mxu0 %v2959_v52  ;;  %v3033_v52 = vmov 0  }
 0x12e   : > { %2750 = vmatprep.subr.bf16.mxu0 %v3031_v0  ;;  %2909 = vset.pattern.permute.xlu0 %v3033_v52 }
 0x12f   : > { %2653 = vmatmul.mubr.bf16.gmra.mxu1 %v841_v54  ;;  %2910 = vset.pattern.permute.xlu1 %v3033_v52  ;;  %v1645_v54 = vld [vmem:[#allocation2 + $0x15] sm:$0xff] }
 0x130   : > { %2709 = vmatpush3.bf16.msra.mxu1 %v2954_v53  ;;  %2656 = vmatprep.mubr.msk.bf16.mxu1 %vm3032_vm0, %v3031_v0  ;;  %v2981_v53 = vld [vmem:[#allocation3 + $0x180] sm:$0xff]   ;;  %v1655_v56 = vpack.c.bf16 %v1646_v51, %v1645_v54 }
 0x131   : > { %2710 = vmatprep.subr.bf16.mxu1 %v3031_v0  ;;  %2751 = vmatpush3.bf16.msra.mxu0 %v2961_v55  ;;  %v2038_v55 = vld [vmem:[%s3492_s6] sm:$0xff] }
 0x132   : > { %2752 = vmatprep.subr.bf16.mxu0 %v3031_v0  ;;  %2050 = vperm.xlu0 %2909, %v2038_v55  }
 0x133   : > { %2697 = vmatmul.mubr.bf16.gmra.mxu0 %v1006_v59  ;;  %v2040_v59 = vld [vmem:[%s3492_s6 + $0x10] sm:$0xff] }
 0x134   : > { %2711 = vmatpush3.bf16.msra.mxu1 %v2956_v57  ;;  %2700 = vmatprep.mubr.msk.bf16.mxu0 %vm3032_vm0, %v3031_v0  ;;  %v1165_v57 = vld [vmem:[#allocation2 + $0x53] sm:$0xff] }
 0x135   : > { %2712 = vmatprep.subr.bf16.mxu1 %v3031_v0  ;;  %2753 = vmatpush3.bf16.msra.mxu0 %v2962_v60  ;;  %v2039_v60 = vld [vmem:[%s3492_s6 + $0x8] sm:$0xff] }
 0x136   : > { %2754 = vmatprep.subr.bf16.mxu0 %v3031_v0  ;;  %2060 = vperm.xlu1 %2910, %v2040_v59  }
 0x137   : > { %2657 = vmatmul.mubr.bf16.gmra.mxu1 %v842_v62  ;;  %v1648_v62 = vld [vmem:[#allocation2 + $0x2d] sm:$0xff]  ;;  %2055 = vperm.xlu0 %2909, %v2039_v60  }
 0x138   : > { %2713 = vmatpush3.bf16.msra.mxu1 %v2958_v61  ;;  %2660 = vmatprep.mubr.msk.bf16.mxu1 %vm3032_vm0, %v3031_v0  ;;  %v1170_v61 = vpack.c.bf16 %v1165_v57, %v1164_v58 }
 0x139   : > { %2714 = vmatprep.subr.bf16.mxu1 %v3031_v0  ;;  %2755 = vmatpush3.bf16.msra.mxu0 %v2964_v63  ;;  %v1647_v63 = vld [vmem:[#allocation2 + $0x25] sm:$0xff] }
 0x13a   : > { %2812 = vmatprep.subr.bf16.mxu0 %v3031_v0  ;;  %v1656_v3 = vpack.c.bf16 %v1648_v62, %v1647_v63  ;;  %2065 = vperm.xlu1 %2910, %v2041_v1  }
 0x13b   : > { %2701 = vmatmul.mubr.bf16.gmra.mxu0 %v1007_v4  ;;  %v2982_v4 = vld [vmem:[#allocation3 + $0x238] sm:$0xff]  }
 0x13c   : > { %2715 = vmatpush3.bf16.msra.mxu1 %v2960_v2  ;;  %2756 = vmatprep.mubr.msk.bf16.mxu0 %vm3032_vm0, %v3031_v0  ;;  %v2042_v2 = vld [vmem:[%s3492_s6 + $0x20] sm:$0xff] }
 0x13d   : > { %2716 = vmatprep.subr.bf16.mxu1 %v3031_v0  ;;  %2070 = vperm.xlu0 %2909, %v2042_v2  }
 0x13f   : > { %2661 = vmatmul.mubr.bf16.gmra.mxu1 %v843_v6  ;;  %v2044_v6 = vld [vmem:[%s3492_s6 + $0x30] sm:$0xff] }
 0x140   : > { %2717 = vmatpush3.bf16.msra.mxu1 %v2963_v5  ;;  %2664 = vmatprep.mubr.msk.bf16.mxu1 %vm3032_vm0, %v3031_v0  ;;  %v2043_v5 = vld [vmem:[%s3492_s6 + $0x28] sm:$0xff] }
 0x141   : > { %2718 = vmatprep.subr.bf16.mxu1 %v3031_v0  ;;  %2075 = vperm.xlu1 %2910, %v2043_v5  }
 0x142   : > { %2080 = vperm.xlu0 %2909, %v2044_v6  }
 0x143   : > { %2757 = vmatmul.mubr.bf16.vlgmr.msra.gmra.mxu0 %v1329_v10  ;;  %v2983_v10 = vld [vmem:[#allocation3 + $0x230] sm:$0xff]  }
 0x144   : > { %2719 = vmatpush3.bf16.msra.mxu1 %v2965_v8  ;;  %2760 = vmatprep.mubr.msk.bf16.mxu0 %vm3032_vm0, %v3031_v0  ;;  %v1492_v8 = vpack.c.bf16 %v3270_v15, %v3256_v7  ;;  %v2984_v15 = vld [vmem:[#allocation3 + $0x228] sm:$0xff]  }
 0x145   : > { %2776 = vmatprep.subr.bf16.mxu1 %v3031_v0  ;;  %2813 = vmatpush3.bf16.msra.mxu0 %v2968_v11  ;;  %v1649_v11 = vld [vmem:[#allocation2 + $0x35] sm:$0xff] }
 0x146   : > { %2814 = vmatprep.subr.bf16.mxu0 %v3031_v0  ;;  %v1657_v7 = vpack.c.bf16 %v1650_v9, %v1649_v11 }
 0x147   : > { %2665 = vmatmul.mubr.bf16.gmra.mxu1 %v844_v12  ;;  %v2045_v12 = vld [vmem:[%s3492_s6 + $0x38] sm:$0xff] }
 0x148   : > { %2720 = vmatprep.mubr.msk.bf16.mxu1 %vm3032_vm0, %v3031_v0  ;;  %2085 = vperm.xlu1 %2910, %v2045_v12  }
 0x149   : > { %2815 = vmatpush3.bf16.msra.mxu0 %v2969_v13  ;;  %v2046_v13 = vld [vmem:[%s3492_s6 + $0x40] sm:$0xff] }
 0x14a   : > { %2816 = vmatprep.subr.bf16.mxu0 %v3031_v0  ;;  %2090 = vperm.xlu0 %2909, %v2046_v13  }
 0x14b   : > { %2761 = vmatmul.mubr.bf16.gmra.mxu0 %v1330_v16  ;;  %v2047_v16 = vld [vmem:[%s3492_s6 + $0x48] sm:$0xff] }
 0x14c   : > { %2764 = vmatprep.mubr.msk.bf16.mxu0 %vm3032_vm0, %v3031_v0  ;;  %2095 = vperm.xlu1 %2910, %v2047_v16  }
 0x14d   : > { %2817 = vmatpush3.bf16.msra.mxu0 %v2971_v17  ;;  %v1493_v17 = vpack.c.bf16 %v3282_v25, %v3265_v14  ;;  %v1494_v14 = vpack.c.bf16 %v3296_v35, %v3277_v23  ;;  %v2987_v25 = vld [vmem:[#allocation3 + $0x210] sm:$0xff]   ;;  %v2989_v23 = vld [vmem:[#allocation3 + $0x200] sm:$0xff]  }
 0x14e   : > { %2818 = vmatprep.subr.bf16.mxu0 %v3031_v0  ;;  %v1811_v35 = vld [vmem:[#allocation2 + $0x2e] sm:$0xff] }
 0x14f   : > { %2721 = vmatmul.mubr.bf16.vlgmr.msra.gmra.mxu1 %v1166_v21 }
 0x150   : > { %2777 = vmatpush3.bf16.msra.mxu1 %v2966_v20  ;;  %2724 = vmatprep.mubr.msk.bf16.mxu1 %vm3032_vm0, %v3031_v0  ;;  %v1651_v20 = vld [vmem:[#allocation2 + $0x45] sm:$0xff] }
 0x151   : > { %2778 = vmatprep.subr.bf16.mxu1 %v3031_v0  ;;  %2819 = vmatpush3.bf16.msra.mxu0 %v2973_v22  ;;  %v1658_v21 = vpack.c.bf16 %v1652_v18, %v1651_v20  ;;  %v2986_v22 = vld [vmem:[#allocation3 + $0x218] sm:$0xff]  }
 0x152   : > { %2820 = vmatprep.subr.bf16.mxu0 %v3031_v0 }
 0x153   : > { %2765 = vmatmul.mubr.bf16.gmra.mxu0 %v1331_v26  ;;  %v1653_v26 = vld [vmem:[#allocation2 + $0x55] sm:$0xff] }
 0x154   : > { %2779 = vmatpush3.bf16.msra.mxu1 %v2967_v24  ;;  %2768 = vmatprep.mubr.msk.bf16.mxu0 %vm3032_vm0, %v3031_v0  ;;  %v1654_v24 = vld [vmem:[#allocation2 + $0x5d] sm:$0xff] }
 0x155   : > { %2780 = vmatprep.subr.bf16.mxu1 %v3031_v0  ;;  %2821 = vmatpush3.bf16.msra.mxu0 %v2975_v27  ;;  %v1659_v27 = vpack.c.bf16 %v1654_v24, %v1653_v26 }
 0x156   : > { %2822 = vmatprep.subr.bf16.mxu0 %v3031_v0 }
 0x157   : > { %2725 = vmatmul.mubr.bf16.gmra.mxu1 %v1167_v31 }
 0x158   : > { %2781 = vmatpush3.bf16.msra.mxu1 %v2970_v30  ;;  %2728 = vmatprep.mubr.msk.bf16.mxu1 %vm3032_vm0, %v3031_v0  ;;  %v1491_v30 = vld [vmem:[#allocation2 + $0x5c] sm:$0xff] }
 0x159   : > { %2782 = vmatprep.subr.bf16.mxu1 %v3031_v0  ;;  %2823 = vmatpush3.bf16.msra.mxu0 %v2977_v32  ;;  %v1496_v31 = vpack.c.bf16 %v1491_v30, %v3305_v43  ;;  %v1809_v32 = vld [vmem:[#allocation2 + $0x1e] sm:$0xff]  ;;  %v1814_v43 = vld [vmem:[#allocation2 + $0x46] sm:$0xff] }
 0x15a   : > { %2824 = vmatprep.subr.bf16.mxu0 %v3031_v0 }
 0x15b   : > { %2769 = vmatmul.mubr.bf16.gmra.mxu0 %v1332_v36  ;;  %v1810_v36 = vld [vmem:[#allocation2 + $0x26] sm:$0xff] }
 0x15c   : > { %2783 = vmatpush3.bf16.msra.mxu1 %v2972_v34  ;;  %2772 = vmatprep.mubr.msk.bf16.mxu0 %vm3032_vm0, %v3031_v0  ;;  %v1818_v34 = vpack.c.bf16 %v1809_v32, %v1808_v33 }
 0x15d   : > { %2784 = vmatprep.subr.bf16.mxu1 %v3031_v0  ;;  %2825 = vmatpush3.bf16.msra.mxu0 %v2978_v37  ;;  %v1819_v37 = vpack.c.bf16 %v1811_v35, %v1810_v36 }
 0x15e   : > { %2826 = vmatprep.subr.bf16.mxu0 %v3031_v0 }
 0x15f   : > { %2729 = vmatmul.mubr.bf16.gmra.mxu1 %v1168_v41  ;;  %v1815_v41 = vld [vmem:[#allocation2 + $0x4e] sm:$0xff] }
 0x160   : > { %2785 = vmatpush3.bf16.msra.mxu1 %v2974_v40  ;;  %2732 = vmatprep.mubr.msk.bf16.mxu1 %vm3032_vm0, %v3031_v0  ;;  %v1820_v40 = vpack.c.bf16 %v1813_v38, %v1812_v39 }
 0x161   : > { %2786 = vmatprep.subr.bf16.mxu1 %v3031_v0  ;;  %2827 = vmatpush3.bf16.msra.mxu0 %v2980_v42 }
 0x163   : > { %2773 = vmatmul.mubr.bf16.gmra.mxu0 %v1333_v46 }
 0x164   : > { %2787 = vmatpush3.bf16.msra.mxu1 %v2976_v44  ;;  %2828 = vmatprep.mubr.msk.bf16.mxu0 %vm3032_vm0, %v3031_v0  ;;  %v1821_v44 = vpack.c.bf16 %v1815_v41, %v1814_v43 }
 0x165   : > { %2788 = vmatprep.subr.bf16.mxu1 %v3031_v0 }
 0x167   : > { %2733 = vmatmul.mubr.bf16.gmra.mxu1 %v1169_v50  ;;  %v1816_v50 = vld [vmem:[#allocation2 + $0x56] sm:$0xff] }
 0x168   : > { %2789 = vmatpush3.bf16.msra.mxu1 %v2979_v49  ;;  %2736 = vmatprep.mubr.msk.bf16.mxu1 %vm3032_vm0, %v3031_v0  ;;  %v1822_v51 = vpack.c.bf16 %v1817_v48, %v1816_v50 }
 0x169   : > { %2790 = vmatprep.subr.bf16.mxu1 %v3031_v0 }
 0x16b   : > { %2829 = vmatmul.mubr.bf16.vlgmr.msra.gmra.mxu0 %v1655_v56 }
 0x16c   : > { %2791 = vmatpush3.bf16.msra.mxu1 %v2981_v53  ;;  %2832 = vmatprep.mubr.msk.bf16.mxu0 %vm3032_vm0, %v3031_v0 }
 0x16d   : > { %2848 = vmatprep.subr.bf16.mxu1 %v3031_v0 }
 0x16f   : > { %2737 = vmatmul.mubr.bf16.gmra.mxu1 %v1170_v61 }
 0x170   : > { %2792 = vmatprep.mubr.msk.bf16.mxu1 %vm3032_vm0, %v3031_v0 }
 0x173   : > { %2833 = vmatmul.mubr.bf16.gmra.mxu0 %v1656_v3 }
 0x174   : > { %2836 = vmatprep.mubr.msk.bf16.mxu0 %vm3032_vm0, %v3031_v0 }
 0x177   : > { %2793 = vmatmul.mubr.bf16.vlgmr.msra.gmra.mxu1 %v1492_v8 }
 0x178   : > { %2849 = vmatpush3.bf16.msra.mxu1 %v2982_v4  ;;  %2796 = vmatprep.mubr.msk.bf16.mxu1 %vm3032_vm0, %v3031_v0 }
 0x179   : > { %2850 = vmatprep.subr.bf16.mxu1 %v3031_v0 }
 0x17b   : > { %2837 = vmatmul.mubr.bf16.gmra.mxu0 %v1657_v7 }
 0x17c   : > { %2851 = vmatpush3.bf16.msra.mxu1 %v2983_v10  ;;  %2840 = vmatprep.mubr.msk.bf16.mxu0 %vm3032_vm0, %v3031_v0 }
 0x17d   : > { %2852 = vmatprep.subr.bf16.mxu1 %v3031_v0 }
 0x17f   : > { %2797 = vmatmul.mubr.bf16.gmra.mxu1 %v1493_v17 }
 0x180   : > { %2853 = vmatpush3.bf16.msra.mxu1 %v2984_v15  ;;  %2800 = vmatprep.mubr.msk.bf16.mxu1 %vm3032_vm0, %v3031_v0 }
 0x181   : > { %2854 = vmatprep.subr.bf16.mxu1 %v3031_v0 }
 0x183   : > { %2841 = vmatmul.mubr.bf16.gmra.mxu0 %v1658_v21 }
 0x184   : > { %2855 = vmatpush3.bf16.msra.mxu1 %v2985_v19  ;;  %2844 = vmatprep.mubr.msk.bf16.mxu0 %vm3032_vm0, %v3031_v0 }
 0x185   : > { %2856 = vmatprep.subr.bf16.mxu1 %v3031_v0 }
 0x187   : > { %2801 = vmatmul.mubr.bf16.gmra.mxu1 %v1494_v14 }
 0x188   : > { %2857 = vmatpush3.bf16.msra.mxu1 %v2986_v22  ;;  %2804 = vmatprep.mubr.msk.bf16.mxu1 %vm3032_vm0, %v3031_v0 }
 0x189   : > { %2858 = vmatprep.subr.bf16.mxu1 %v3031_v0 }
 0x18b   : > { %2845 = vmatmul.mubr.bf16.gmra.mxu0 %v1659_v27 }
 0x18c   : > { %2859 = vmatpush3.bf16.msra.mxu1 %v2987_v25 }
 0x18d   : > { %2860 = vmatprep.subr.bf16.mxu1 %v3031_v0 }
 0x18f   : > { %2805 = vmatmul.mubr.bf16.gmra.mxu1 %v1495_v29 }
 0x190   : > { %2861 = vmatpush3.bf16.msra.mxu1 %v2988_v28  ;;  %2808 = vmatprep.mubr.msk.bf16.mxu1 %vm3032_vm0, %v3031_v0 }
 0x191   : > { %2862 = vmatprep.subr.bf16.mxu1 %v3031_v0 }
 0x194   : > { %2863 = vmatpush3.bf16.msra.mxu1 %v2989_v23 }
 0x197   : > { %2809 = vmatmul.mubr.bf16.gmra.mxu1 %v1496_v31 }
 0x198   : > { %2864 = vmatprep.mubr.msk.bf16.mxu1 %vm3032_vm0, %v3031_v0 }
 0x19f   : > { %2865 = vmatmul.mubr.bf16.vlgmr.msra.gmra.mxu1 %v1818_v34 }
 0x1a0   : > { %2868 = vmatprep.mubr.msk.bf16.mxu1 %vm3032_vm0, %v3031_v0 }
 0x1a7   : > { %2869 = vmatmul.mubr.bf16.gmra.mxu1 %v1819_v37 }
 0x1a8   : > { %2872 = vmatprep.mubr.msk.bf16.mxu1 %vm3032_vm0, %v3031_v0 }
 0x1af   : > { %2873 = vmatmul.mubr.bf16.gmra.mxu1 %v1820_v40 }
 0x1b0   : > { %2876 = vmatprep.mubr.msk.bf16.mxu1 %vm3032_vm0, %v3031_v0 }
 0x1b3   : > { %v791_v42 = vpop.f32.mrf.mxu0 }
 0x1b5   : > { %v2614_v45 = vpop.f32.mrf.mxu0 }
 0x1b7   : > { %2877 = vmatmul.mubr.bf16.gmra.mxu1 %v1821_v44  ;;  %v794_v46 = vpop.f32.mrf.mxu0 }
 0x1b8   : > { %2880 = vmatprep.mubr.msk.bf16.mxu1 %vm3032_vm0, %v3031_v0 }
 0x1b9   : > { %v2615_v47 = vpop.f32.mrf.mxu0 }
 0x1bb   : > { %v799_v49 = vpop.f32.mrf.mxu0 }
 0x1bd   : > { %v2618_v52 = vpop.f32.mrf.mxu0 }
 0x1bf   : > { %v670_v53 = vpop.f32.mrf.mxu1  ;;  %2881 = vmatmul.mubr.bf16.gmra.mxu1 %v1822_v51  ;;  %v802_v54 = vpop.f32.mrf.mxu0 }
 0x1c0   : > { %v792_v55 = vadd.f32 %v791_v42, %v670_v53 }
 0x1c1   : > { %v2578_v56 = vpop.f32.mrf.mxu1  ;;  %v2619_v57 = vpop.f32.mrf.mxu0 }
 0x1c3   : > { %v673_v58 = vpop.f32.mrf.mxu1  ;;  %v807_v59 = vpop.f32.mrf.mxu0 }
 0x1c4   : > { %v795_v60 = vadd.f32 %v794_v46, %v673_v58 }
 0x1c5   : > { %v2579_v61 = vpop.f32.mrf.mxu1  ;;  %v2622_v62 = vpop.f32.mrf.mxu0 }
 0x1c7   : > { %v678_v63 = vpop.f32.mrf.mxu1  ;;  %v810_v1 = vpop.f32.mrf.mxu0 }
 0x1c8   : > { %v800_v0 = vadd.f32 %v799_v49, %v678_v63 }
 0x1c9   : > { %v2582_v2 = vpop.f32.mrf.mxu1  ;;  %v2623_v3 = vpop.f32.mrf.mxu0 }
 0x1cb   : > { %v681_v4 = vpop.f32.mrf.mxu1  ;;  %v815_v5 = vpop.f32.mrf.mxu0 }
 0x1cc   : > { %v803_v6 = vadd.f32 %v802_v54, %v681_v4 }
 0x1cd   : > { %v2583_v8 = vpop.f32.mrf.mxu1  ;;  %v2626_v9 = vpop.f32.mrf.mxu0 }
 0x1cf   : > { %v686_v10 = vpop.f32.mrf.mxu1  ;;  %v818_v11 = vpop.f32.mrf.mxu0 }
 0x1d0   : > { %v808_v12 = vadd.f32 %v807_v59, %v686_v10 }
 0x1d1   : > { %v2586_v13 = vpop.f32.mrf.mxu1  ;;  %v2627_v7 = vpop.f32.mrf.mxu0 }
 0x1d3   : > { %v689_v15 = vpop.f32.mrf.mxu1  ;;  %v823_v16 = vpop.f32.mrf.mxu0 }
 0x1d4   : > { %v811_v17 = vadd.f32 %v810_v1, %v689_v15 }
 0x1d5   : > { %v2587_v18 = vpop.f32.mrf.mxu1  ;;  %v2630_v19 = vpop.f32.mrf.mxu0 }
 0x1d7   : > { %v694_v20 = vpop.f32.mrf.mxu1  ;;  %v826_v21 = vpop.f32.mrf.mxu0 }
 0x1d8   : > { %v816_v22 = vadd.f32 %v815_v5, %v694_v20 }
 0x1d9   : > { %v2590_v14 = vpop.f32.mrf.mxu1  ;;  %v2631_v24 = vpop.f32.mrf.mxu0 }
 0x1db   : > { %v697_v25 = vpop.f32.mrf.mxu1  ;;  %v1107_v26 = vpop.f32.mrf.mxu0 }
 0x1dc   : > { %v819_v27 = vadd.f32 %v818_v11, %v697_v25 }
 0x1dd   : > { %v2591_v28 = vpop.f32.mrf.mxu1  ;;  %v2686_v29 = vpop.f32.mrf.mxu0 }
 0x1df   : > { %v702_v23 = vpop.f32.mrf.mxu1  ;;  %v1110_v30 = vpop.f32.mrf.mxu0 }
 0x1e0   : > { %v824_v31 = vadd.f32 %v823_v16, %v702_v23 }
 0x1e1   : > { %v2594_v32 = vpop.f32.mrf.mxu1  ;;  %v2687_v33 = vpop.f32.mrf.mxu0 }
 0x1e3   : > { %v705_v34 = vpop.f32.mrf.mxu1  ;;  %v1115_v35 = vpop.f32.mrf.mxu0 }
 0x1e4   : > { %v827_v36 = vadd.f32 %v826_v21, %v705_v34 }
 0x1e5   : > { %v2595_v37 = vpop.f32.mrf.mxu1  ;;  %v2690_v38 = vpop.f32.mrf.mxu0 }
 0x1e7   : > { %v944_v39 = vpop.f32.mrf.mxu1  ;;  %v1118_v40 = vpop.f32.mrf.mxu0 }
 0x1e8   : > { %v983_v41 = vadd.f32 %v944_v39, %v792_v55 }
 0x1e9   : > { %v2650_v42 = vpop.f32.mrf.mxu1  ;;  %v2691_v43 = vpop.f32.mrf.mxu0 }
 0x1ea   : > { %v1146_v44 = vadd.f32 %v1107_v26, %v983_v41 }
 0x1eb   : > { %v947_v45 = vpop.f32.mrf.mxu1  ;;  %v1123_v46 = vpop.f32.mrf.mxu0 }
 0x1ec   : > { %v984_v47 = vadd.f32 %v947_v45, %v795_v60 }
 0x1ed   : > { %v2651_v48 = vpop.f32.mrf.mxu1  ;;  %v2694_v49 = vpop.f32.mrf.mxu0 }
 0x1ee   : > { %v1147_v50 = vadd.f32 %v1110_v30, %v984_v47 }
 0x1ef   : > { %v952_v51 = vpop.f32.mrf.mxu1  ;;  %v1126_v52 = vpop.f32.mrf.mxu0 }
 0x1f0   : > { %v985_v53 = vadd.f32 %v952_v51, %v800_v0 }
 0x1f1   : > { %v2654_v54 = vpop.f32.mrf.mxu1  ;;  %v2695_v56 = vpop.f32.mrf.mxu0 }
 0x1f2   : > { %v1148_v57 = vadd.f32 %v1115_v35, %v985_v53 }
 0x1f3   : > { %v955_v58 = vpop.f32.mrf.mxu1  ;;  %v1131_v59 = vpop.f32.mrf.mxu0 }
 0x1f4   : > { %v986_v61 = vadd.f32 %v955_v58, %v803_v6 }
 0x1f5   : > { %v2655_v62 = vpop.f32.mrf.mxu1  ;;  %v2698_v55 = vpop.f32.mrf.mxu0 }
 0x1f6   : > { %v1149_v63 = vadd.f32 %v1118_v40, %v986_v61 }
 0x1f7   : > { %v960_v1 = vpop.f32.mrf.mxu1  ;;  %v1134_v2 = vpop.f32.mrf.mxu0 }
 0x1f8   : > { %v987_v3 = vadd.f32 %v960_v1, %v808_v12 }
 0x1f9   : > { %v2658_v4 = vpop.f32.mrf.mxu1  ;;  %v2699_v60 = vpop.f32.mrf.mxu0 }
 0x1fa   : > { %v1150_v5 = vadd.f32 %v1123_v46, %v987_v3 }
 0x1fb   : > { %v963_v8 = vpop.f32.mrf.mxu1  ;;  %v1139_v9 = vpop.f32.mrf.mxu0 }
 0x1fc   : > { %v988_v10 = vadd.f32 %v963_v8, %v811_v17 }
 0x1fd   : > { %v2659_v11 = vpop.f32.mrf.mxu1  ;;  %v2702_v0 = vpop.f32.mrf.mxu0 }
 0x1fe   : > { %v1151_v13 = vadd.f32 %v1126_v52, %v988_v10 }
 0x1ff   : > { %v968_v7 = vpop.f32.mrf.mxu1  ;;  %v1142_v15 = vpop.f32.mrf.mxu0 }
 0x200   : > { %v989_v16 = vadd.f32 %v968_v7, %v816_v22 }
 0x201   : > { %v2662_v18 = vpop.f32.mrf.mxu1  ;;  %v2703_v6 = vpop.f32.mrf.mxu0 }
 0x202   : > { %v1152_v19 = vadd.f32 %v1131_v59, %v989_v16 }
 0x203   : > { %v971_v20 = vpop.f32.mrf.mxu1  ;;  %v1433_v21 = vpop.f32.mrf.mxu0 }
 0x204   : > { %v990_v14 = vadd.f32 %v971_v20, %v819_v27 }
 0x205   : > { %v2663_v24 = vpop.f32.mrf.mxu1  ;;  %v2758_v12 = vpop.f32.mrf.mxu0 }
 0x206   : > { %v1153_v25 = vadd.f32 %v1134_v2, %v990_v14 }
 0x207   : > { %v976_v26 = vpop.f32.mrf.mxu1  ;;  %v1436_v28 = vpop.f32.mrf.mxu0 }
 0x208   : > { %v991_v29 = vadd.f32 %v976_v26, %v824_v31 }
 0x209   : > { %v2666_v23 = vpop.f32.mrf.mxu1  ;;  %v2759_v17 = vpop.f32.mrf.mxu0 }
 0x20a   : > { %v1154_v30 = vadd.f32 %v1139_v9, %v991_v29 }
 0x20b   : > { %v979_v32 = vpop.f32.mrf.mxu1  ;;  %v1441_v33 = vpop.f32.mrf.mxu0 }
 0x20c   : > { %v992_v34 = vadd.f32 %v979_v32, %v827_v36 }
 0x20d   : > { %v2667_v35 = vpop.f32.mrf.mxu1  ;;  %v2762_v22 = vpop.f32.mrf.mxu0 }
 0x20e   : > { %v1155_v37 = vadd.f32 %v1142_v15, %v992_v34 }
 0x20f   : > { %v1270_v38 = vpop.f32.mrf.mxu1  ;;  %v1444_v39 = vpop.f32.mrf.mxu0 }
 0x210   : > { %v1309_v40 = vadd.f32 %v1270_v38, %v1146_v44 }
 0x211   : > { %v2722_v41 = vpop.f32.mrf.mxu1  ;;  %v2763_v27 = vpop.f32.mrf.mxu0 }
 0x212   : > { %v3396_v42 = vadd.f32 %v1433_v21, %v1309_v40 }
 0x213   : > { %v1273_v43 = vpop.f32.mrf.mxu1  ;;  %v1449_v45 = vpop.f32.mrf.mxu0 }
 0x214   : > { %v1310_v46 = vadd.f32 %v1273_v43, %v1147_v50 }
 0x215   : > { %v2723_v31 = vpop.f32.mrf.mxu1  ;;  %v2766_v47 = vpop.f32.mrf.mxu0 }
 0x216   : > { %v3398_v48 = vadd.f32 %v1436_v28, %v1310_v46 }
 0x217   : > { %v1278_v49 = vpop.f32.mrf.mxu1  ;;  %v1452_v51 = vpop.f32.mrf.mxu0 }
 0x218   : > { %v1311_v36 = vadd.f32 %v1278_v49, %v1148_v57 }
 0x219   : > { %v2726_v52 = vpop.f32.mrf.mxu1  ;;  %v2767_v53 = vpop.f32.mrf.mxu0 }
 0x21a   : > { %v3400_v54 = vadd.f32 %v1441_v33, %v1311_v36 }
 0x21b   : > { %v1281_v56 = vpop.f32.mrf.mxu1  ;;  %v1457_v44 = vpop.f32.mrf.mxu0 }
 0x21c   : > { %v1312_v58 = vadd.f32 %v1281_v56, %v1149_v63 }
 0x21d   : > { %v2727_v59 = vpop.f32.mrf.mxu1  ;;  %v2770_v61 = vpop.f32.mrf.mxu0 }
 0x21e   : > { %v3402_v62 = vadd.f32 %v1444_v39, %v1312_v58 }
 0x21f   : > { %v1286_v55 = vpop.f32.mrf.mxu1  ;;  %v1460_v50 = vpop.f32.mrf.mxu0 }
 0x220   : > { %v1313_v1 = vadd.f32 %v1286_v55, %v1150_v5 }
 0x221   : > { %v2730_v2 = vpop.f32.mrf.mxu1  ;;  %v2771_v3 = vpop.f32.mrf.mxu0 }
 0x222   : > { %v3404_v4 = vadd.f32 %v1449_v45, %v1313_v1 }
 0x223   : > { %v1289_v60 = vpop.f32.mrf.mxu1  ;;  %v1465_v57 = vpop.f32.mrf.mxu0 }
 0x224   : > { %v1314_v8 = vadd.f32 %v1289_v60, %v1151_v13 }
 0x225   : > { %v2731_v9 = vpop.f32.mrf.mxu1  ;;  %v2774_v10 = vpop.f32.mrf.mxu0 }
 0x226   : > { %v3406_v11 = vadd.f32 %v1452_v51, %v1314_v8 }
 0x227   : > { %v1294_v0 = vpop.f32.mrf.mxu1  ;;  %v1468_v63 = vpop.f32.mrf.mxu0 }
 0x228   : > { %v1315_v7 = vadd.f32 %v1294_v0, %v1152_v19 }
 0x229   : > { %v2734_v15 = vpop.f32.mrf.mxu1  ;;  %v2775_v16 = vpop.f32.mrf.mxu0 }
 0x22a   : > { %v3408_v18 = vadd.f32 %v1457_v44, %v1315_v7  ;;  %v3439_v16 = vld [vmem:[%s3489_s3] ss:$0 sm:$0xff] }
 0x22b   : > { %v1297_v6 = vpop.f32.mrf.mxu1  ;;  %v1759_v5 = vpop.f32.mrf.mxu0 }
 0x22c   : > { %v1316_v20 = vadd.f32 %v1297_v6, %v1153_v25  ;;  %v2051_v6 = vpop.permute.xlu0 %2050 }
 0x22d   : > { %v2735_v21 = vpop.f32.mrf.mxu1  ;;  %v2830_v14 = vpop.f32.mrf.mxu0 }
 0x22e   : > { %v3410_v24 = vadd.f32 %v1460_v50, %v1316_v20 }
 0x22f   : > { %v1302_v12 = vpop.f32.mrf.mxu1  ;;  %v1762_v13 = vpop.f32.mrf.mxu0 }
 0x230   : > { %v1317_v26 = vadd.f32 %v1302_v12, %v1154_v30 }
 0x231   : > { %v2738_v28 = vpop.f32.mrf.mxu1  ;;  %v2831_v29 = vpop.f32.mrf.mxu0 }
 0x232   : > { %v3412_v23 = vadd.f32 %v1465_v57, %v1317_v26  ;;  %v2056_v29 = vpop.permute.xlu0 %2055 }
 0x233   : > { %v1305_v17 = vpop.f32.mrf.mxu1  ;;  %v1767_v19 = vpop.f32.mrf.mxu0 }
 0x234   : > { %v1318_v32 = vadd.f32 %v1305_v17, %v1155_v37 }
 0x235   : > { %v2739_v33 = vpop.f32.mrf.mxu1  ;;  %v2834_v34 = vpop.f32.mrf.mxu0 }
 0x236   : > { %v3414_v35 = vadd.f32 %v1468_v63, %v1318_v32 }
 0x237   : > { %v1596_v22 = vpop.f32.mrf.mxu1  ;;  %v1770_v25 = vpop.f32.mrf.mxu0 }
 0x238   : > { %v1635_v9 = vadd.f32 %v1596_v22, %v3396_v42 }
 0x239   : > { %v2794_v38 = vpop.f32.mrf.mxu1  ;;  %v2835_v39 = vpop.f32.mrf.mxu0 }
 0x23a   : > { %v1798_v7 = vadd.f32 %v1759_v5, %v1635_v9  ;;  %v2061_v39 = vpop.permute.xlu1 %2060 }
 0x23b   : > { %v1599_v40 = vpop.f32.mrf.mxu1  ;;  %v3416_v41 = vpop.f32.mrf.mxu0 }
 0x23c   : > { %v1636_v63 = vadd.f32 %v1599_v40, %v3398_v48 }
 0x23d   : > { %v2795_v27 = vpop.f32.mrf.mxu1  ;;  %v2838_v30 = vpop.f32.mrf.mxu0 }
 0x23e   : > { %v1799_v42 = vadd.f32 %v1762_v13, %v1636_v63 }
 0x23f   : > { %v1604_v43 = vpop.f32.mrf.mxu1  ;;  %v3418_v45 = vpop.f32.mrf.mxu0 }
 0x240   : > { %v1637_v14 = vadd.f32 %v1604_v43, %v3400_v54 }
 0x241   : > { %v2798_v46 = vpop.f32.mrf.mxu1  ;;  %v2839_v31 = vpop.f32.mrf.mxu0 }
 0x242   : > { %v1800_v33 = vadd.f32 %v1767_v19, %v1637_v14 }
 0x243   : > { %v1607_v47 = vpop.f32.mrf.mxu1  ;;  %v3420_v37 = vpop.f32.mrf.mxu0 }
 0x244   : > { %v1638_v48 = vadd.f32 %v1607_v47, %v3402_v62 }
 0x245   : > { %v2799_v49 = vpop.f32.mrf.mxu1  ;;  %v2842_v51 = vpop.f32.mrf.mxu0 }
 0x246   : > { %v1801_v40 = vadd.f32 %v1770_v25, %v1638_v48 }
 0x247   : > { %v1612_v36 = vpop.f32.mrf.mxu1  ;;  %v3422_v52 = vpop.f32.mrf.mxu0 }
 0x248   : > { %v1639_v38 = vadd.f32 %v1612_v36, %v3404_v4 }
 0x249   : > { %v2802_v53 = vpop.f32.mrf.mxu1  ;;  %v2843_v56 = vpop.f32.mrf.mxu0 }
 0x24a   : > { %v1802_v53 = vadd.f32 %v3416_v41, %v1639_v38 }
 0x24b   : > { %v1615_v44 = vpop.f32.mrf.mxu1  ;;  %v3424_v58 = vpop.f32.mrf.mxu0 }
 0x24c   : > { %v1640_v56 = vadd.f32 %v1615_v44, %v3406_v11  ;;  %v2071_v44 = vpop.permute.xlu0 %2070 }
 0x24d   : > { %v2803_v59 = vpop.f32.mrf.mxu1  ;;  %v2846_v61 = vpop.f32.mrf.mxu0 }
 0x24e   : > { %v2066_v59 = vpop.permute.xlu1 %2065  ;;  %v1803_v11 = vadd.f32 %v3418_v45, %v1640_v56 }
 0x24f   : > { %v1620_v55 = vpop.f32.mrf.mxu1  ;;  %v3426_v50 = vpop.f32.mrf.mxu0 }
 0x250   : > { %v1641_v9 = vadd.f32 %v1620_v55, %v3408_v18 }
 0x251   : > { %v2806_v1 = vpop.f32.mrf.mxu1  ;;  %v2847_v2 = vpop.f32.mrf.mxu0 }
 0x253   : > { %v3428_v3 = vpop.f32.mrf.mxu1 }
 0x254   : > { %v1642_v18 = vadd.f32 %v3428_v3, %v3410_v24  ;;  %v2081_v3 = vpop.permute.xlu0 %2080 }
 0x255   : > { %v2807_v60 = vpop.f32.mrf.mxu1 }
 0x256   : > { %v1805_v24 = vadd.f32 %v3422_v52, %v1642_v18 }
 0x257   : > { %v3430_v57 = vpop.f32.mrf.mxu1 }
 0x259   : > { %v2810_v8 = vpop.f32.mrf.mxu1 }
 0x25b   : > { %v3433_v10 = vpop.f32.mrf.mxu1 }
 0x25d   : > { %v2811_v0 = vpop.f32.mrf.mxu1 }
 0x25f   : > { %v1922_v15 = vpop.f32.mrf.mxu1 }
 0x260   : > { %v1961_v20 = vadd.f32 %v1922_v15, %v1798_v7 }
 0x261   : > { %v2866_v21 = vpop.f32.mrf.mxu1 }
 0x262   : > { %v1978_v12 = vadd.f32 %v3439_v16, %v1961_v20 }
 0x263   : > { %v1925_v26 = vpop.f32.mrf.mxu1 }
 0x264   : > { %v1962_v28 = vadd.f32 %v1925_v26, %v1799_v42  ;;  %v2098_v17 = vmul.f32 %v2051_v6, %v1978_v12 }
 0x265   : > { %v2867_v5 = vpop.f32.mrf.mxu1 }
 0x266   : > { %v1979_v32 = vadd.f32 %v3439_v16, %v1962_v28  ;;  %v2123_v27 = vmul.f32 %v2098_v17, %v1978_v12  ;;  %v2076_v28 = vpop.permute.xlu1 %2075 }
 0x267   : > { %v1930_v54 = vpop.f32.mrf.mxu1 }
 0x268   : > { %v2379_v34 = vpack.c.bf16 %v1979_v32, %v1978_v12  ;;  %v2099_v13 = vmul.f32 %v2056_v29, %v1979_v32  ;;  %v1963_v22 = vadd.f32 %v1930_v54, %v1800_v33  ;;  %v1804_v12 = vadd.f32 %v3420_v37, %v1641_v9 }
 0x269   : > { %v2870_v62 = vpop.f32.mrf.mxu1 }
 0x26a   : > { %2380 = vst [vmem:[%s3449_s22] sm:$0xff] %v2379_v34   ;;  %v2108_v30 = vadd.f32 %v2099_v13, %v2098_v17  ;;  %v2124_v43 = vmul.f32 %v2099_v13, %v1979_v32  ;;  %v1980_v19 = vadd.f32 %v3439_v16, %v1963_v22  ;;  %v1643_v32 = vadd.f32 %v3430_v57, %v3412_v23 }
 0x26b   : > { %v1933_v46 = vpop.f32.mrf.mxu1  ;;  %v1644_v23 = vadd.f32 %v3433_v10, %v3414_v35  ;;  %v2091_v35 = vpop.permute.xlu0 %2090 }
 0x26c   : > { %v2133_v31 = vadd.f32 %v2124_v43, %v2123_v27  ;;  %v2100_v47 = vmul.f32 %v2061_v39, %v1980_v19  ;;  %v1964_v49 = vadd.f32 %v1933_v46, %v1801_v40  ;;  %v1806_v40 = vadd.f32 %v3424_v58, %v1643_v32  ;;  %v2086_v43 = vpop.permute.xlu1 %2085 }
 0x26d   : > { %v2871_v51 = vpop.f32.mrf.mxu1  ;;  %v1807_v56 = vadd.f32 %v3426_v50, %v1644_v23 }
 0x26e   : > { %v2109_v4 = vadd.f32 %v2108_v30, %v2100_v47  ;;  %v2125_v36 = vmul.f32 %v2100_v47, %v1980_v19  ;;  %v1981_v25 = vadd.f32 %v3439_v16, %v1964_v49 }
 0x26f   : > { %v1938_v61 = vpop.f32.mrf.mxu1 }
 0x270   : > { %v2134_v1 = vadd.f32 %v2133_v31, %v2125_v36  ;;  %v2384_v2 = vpack.c.bf16 %v1981_v25, %v1980_v19  ;;  %v2101_v60 = vmul.f32 %v2066_v59, %v1981_v25  ;;  %v1965_v8 = vadd.f32 %v1938_v61, %v1802_v53 }
 0x271   : > { %v2874_v0 = vpop.f32.mrf.mxu1 }
 0x272   : > { %2401 = vst [vmem:[%s3449_s22 + $0x8] sm:$0xff] %v2384_v2   ;;  %v2110_v63 = vadd.f32 %v2109_v4, %v2101_v60  ;;  %v2126_v7 = vmul.f32 %v2101_v60, %v1981_v25  ;;  %v1982_v41 = vadd.f32 %v3439_v16, %v1965_v8  ;;  %v2096_v60 = vpop.permute.xlu1 %2095 }
 0x273   : > { %v1941_v15 = vpop.f32.mrf.mxu1 }
 0x274   : > { %v2135_v6 = vadd.f32 %v2134_v1, %v2126_v7  ;;  %v2102_v20 = vmul.f32 %v2071_v44, %v1982_v41  ;;  %v1966_v21 = vadd.f32 %v1941_v15, %v1803_v11 }
 0x275   : > { %v2875_v14 = vpop.f32.mrf.mxu1 }
 0x276   : > { %v2111_v55 = vadd.f32 %v2110_v63, %v2102_v20  ;;  %v2127_v42 = vmul.f32 %v2102_v20, %v1982_v41  ;;  %v1983_v26 = vadd.f32 %v3439_v16, %v1966_v21 }
 0x277   : > { %v1946_v48 = vpop.f32.mrf.mxu1 }
 0x278   : > { %v2136_v5 = vadd.f32 %v2135_v6, %v2127_v42  ;;  %v2389_v45 = vpack.c.bf16 %v1983_v26, %v1982_v41  ;;  %v2103_v29 = vmul.f32 %v2076_v28, %v1983_v26  ;;  %v1967_v17 = vadd.f32 %v1946_v48, %v1804_v12 }
 0x279   : > { %v2878_v33 = vpop.f32.mrf.mxu1 }
 0x27a   : > { %2402 = vst [vmem:[%s3449_s22 + $0x10] sm:$0xff] %v2389_v45   ;;  %v2112_v54 = vadd.f32 %v2111_v55, %v2103_v29  ;;  %v2128_v37 = vmul.f32 %v2103_v29, %v1983_v26  ;;  %v1984_v34 = vadd.f32 %v3439_v16, %v1967_v17 }
 0x27b   : > { %v1949_v13 = vpop.f32.mrf.mxu1 }
 0x27c   : > { %v2137_v22 = vadd.f32 %v2136_v5, %v2128_v37  ;;  %v2104_v38 = vmul.f32 %v2081_v3, %v1984_v34  ;;  %v1968_v39 = vadd.f32 %v1949_v13, %v1805_v24 }
 0x27d   : > { %v2879_v62 = vpop.f32.mrf.mxu1 }
 0x27e   : > { %v2113_v57 = vadd.f32 %v2112_v54, %v2104_v38  ;;  %v2129_v27 = vmul.f32 %v2104_v38, %v1984_v34  ;;  %v1985_v30 = vadd.f32 %v3439_v16, %v1968_v39 }
 0x27f   : > { %v1954_v19 = vpop.f32.mrf.mxu1 }
 0x280   : > { %v2138_v46 = vadd.f32 %v2137_v22, %v2129_v27  ;;  %v2394_v52 = vpack.c.bf16 %v1985_v30, %v1984_v34  ;;  %v2105_v31 = vmul.f32 %v2086_v43, %v1985_v30  ;;  %v1969_v47 = vadd.f32 %v1954_v19, %v1806_v40 }
 0x281   : > { %v2882_v49 = vpop.f32.mrf.mxu1 }
 0x282   : > { %2403 = vst [vmem:[%s3449_s22 + $0x18] sm:$0xff] %v2394_v52   ;;  %v2114_v51 = vadd.f32 %v2113_v57, %v2105_v31  ;;  %v2130_v53 = vmul.f32 %v2105_v31, %v1985_v30  ;;  %v1986_v58 = vadd.f32 %v3439_v16, %v1969_v47 }
 0x283   : > { %v1957_v10 = vpop.f32.mrf.mxu1 }
 0x284   : > { %v2139_v4 = vadd.f32 %v2138_v46, %v2130_v53  ;;  %v2106_v36 = vmul.f32 %v2091_v35, %v1986_v58  ;;  %v1970_v25 = vadd.f32 %v1957_v10, %v1807_v56 }
 0x285   : > { %v2883_v59 = vpop.f32.mrf.mxu1 }
 0x286   : > { %v2115_v61 = vadd.f32 %v2114_v51, %v2106_v36  ;;  %v2131_v1 = vmul.f32 %v2106_v36, %v1986_v58  ;;  %v1987_v2 = vadd.f32 %v3439_v16, %v1970_v25 }
 0x288   : > { %v2140_v8 = vadd.f32 %v2139_v4, %v2131_v1  ;;  %v2399_v9 = vpack.c.bf16 %v1987_v2, %v1986_v58  ;;  %v2107_v0 = vmul.f32 %v2096_v60, %v1987_v2 }
 0x28a   : > { %2404 = vst [vmem:[%s3449_s22 + $0x20] sm:$0xff] %v2399_v9   ;;  %v2116_v63 = vadd.f32 %v2115_v61, %v2107_v0  ;;  %v2132_v7 = vmul.f32 %v2107_v0, %v1987_v2 }
 0x28c   : > { %v2117_v41 = vrot.slane %v2116_v63, 4  ;;  %v2141_v50 = vadd.f32 %v2140_v8, %v2132_v7 }
 0x28e   : > { %v2118_v11 = vadd.f32 %v2117_v41, %v2116_v63  ;;  %v2142_v44 = vrot.slane %v2141_v50, 4 }
 0x290   : > { %v2119_v15 = vrot.slane %v2118_v11, 2  ;;  %v2143_v6 = vadd.f32 %v2142_v44, %v2141_v50 }
 0x292   : > { %v2120_v20 = vadd.f32 %v2119_v15, %v2118_v11  ;;  %v2144_v21 = vrot.slane %v2143_v6, 2 }
 0x294   : > { %v2121_v14 = vrot.slane %v2120_v20, 1  ;;  %v2145_v12 = vadd.f32 %v2144_v21, %v2143_v6 }
 0x296   : > { %v2146_v16 = vrot.slane %v2145_v12, 1  ;;  %v2122_v18 = vadd.f32 %v2121_v14, %v2120_v20 }
 0x298   : > { %v2147_v55 = vadd.f32 %v2146_v16, %v2145_v12 }
 0x29a   : > { %v2149_v42 = vsel %vm2148_vm2, %v2122_v18, %v2147_v55 }
 0x29b   : > { %2150 = vst [vmem:[%s331_s26] sm:$0x3] %v2149_v42 }
 0x29c PF: > { %s20_s27 = sadd.s32 1, %s3026_s27  }
 0x29d   : > { %p17_p1 = scmp.ge.s32.totalorder %s20_s27, 4  }
 0x29f   :  { %19 = sbr.rel (!%p17_p1) target bundleno = 1 (0x1), region = 103 }
 0x2a4   :  { %2186 = vsyncpa [#allocation4], 1 }
 0x2a5   :  { %2188 = vsyncpa [#allocation4 + $0x1], 1 }

// kernel: generator_forward.6
= control target key start
LH: loop header
LB: loop body
LE: loop exit
PB: predicated region body
PF: predicated region fallthrough
CT: control target
= control target key end

     0   :  { %s5883_s27 = smov 0   ;;  %s7761_s0 = inlined_call_operand.vmem [shape: bf16[2,80,128], index: 0, kind: input, shape index: {}]   ;;  %s7762_s1 = inlined_call_operand.vmem [shape: bf16[328,80], index: 1, kind: input, shape index: {}]   ;;  %s7763_s2 = inlined_call_operand.vmem [shape: bf16[3,3,128,64], index: 2, kind: input, shape index: {}]   ;;  %s7764_s3 = inlined_call_operand.vmem [shape: f32[1,64], index: 3, kind: input, shape index: {}]   ;;  %s7765_s4 = inlined_call_operand.vmem [shape: f32[1,128], index: 4, kind: input, shape index: {}]   ;;  %s7766_s5 = inlined_call_operand.vmem [shape: f32[1,128], index: 5, kind: input, shape index: {}]   ;;  %s7767_s6 = inlined_call_operand.vmem [shape: f32[288,1], index: 6, kind: input, shape index: {}]   ;;  %s7768_s7 = inlined_call_operand.vmem [shape: bf16[2,288,64], index: 7, kind: output, shape index: {0}]   ;;  %s7769_s8 = inlined_call_operand.vmem [shape: f32[2,2,64], index: 8, kind: output, shape index: {1}]  }
   0x1 LB: > { %s4528_s28 = sadd.s32 4294967295, %s5833_s27   ;;  %p4532_p0 = scmp.ge.s32.totalorder %s5833_s27, 1  ;;  %s5833_s27 = sphi %s5883_s27, %s19_s27  }
   0x2   : > { %p265_p1 = scmp.lt.s32.totalorder %s5833_s27, 3 }
   0x4   : > { %p266_p2 = pnand %p4532_p0, %p265_p1 }
   0x6   : > { %269 = sbr.rel (%p266_p2) target bundleno = 964 (0x3c4), region = 48 }
   0xb   : > { %p303_p3 = scmp.lt.s32.totalorder %s4528_s28, 1  ;;  %v5835_v0 = vmov 0.0   ;;  %vm5836_vm0 = vmmov 0   ;;  %v4536_v1 = vld [vmem:[%s7765_s4] ss:$0 sm:$0xff]  ;;  %vm551_vm11 = vcmask 654336  }
   0xc   : > { %5139 = vmatprep.subr.bf16.mxu0 %v5835_v0  ;;  %5149 = vmatprep.mubr.msk.bf16.mxu0 %vm5836_vm0, %v5835_v0  ;;  %v4537_v10 = vld [vmem:[%s7766_s5] ss:$0 sm:$0xff]  ;;  %vm3958_vm12 = vcmask 519168   ;;  %vm4247_vm13 = vcmask 523264   ;;  %vm4438_vm14 = vcmask 1040384   ;;  %vm4440_vm15 = vcmask 517120  }
   0xd   : > { %s8026_s28 = smov (!%p303_p3, %s4528_s28), 1  ;;  %v5732_v63 = vld [vmem:[%s7762_s1] sm:$0xff]  }
   0xe   : > { %s5717_s29 = smul.u32 40, %s8026_s28  ;;  %s4535_s23 = sshll.u32 %s8026_s28, 1 }
   0xf   : > { %s5718_s15 = smul.u32 144, %s8026_s28  ;;  %s316_s26 = scalar_lea.vmem %s7769_s8, %s4535_s23 }
  0x10   : > { %s5903_s12 = scalar_lea.vmem %s7761_s0, %s5717_s29 }
  0x11   : > { %v4878_v2 = vld [vmem:[%s5903_s12 + $0x20] sm:$0xff]   ;;  %v4877_v3 = vld [vmem:[%s5903_s12 + $0x18] sm:$0xff]   ;;  %v4876_v4 = vld [vmem:[%s5903_s12 + $0x10] sm:$0xff]   ;;  %s7314_s20 = scalar_lea.vmem %s7768_s7, %s5718_s15 }
  0x12   : > { %v4873_v5 = vunpack.c.l.bf16 %v4878_v2  ;;  %v4874_v6 = vunpack.c.h.bf16 %v4878_v2  ;;  %v4869_v7 = vunpack.c.l.bf16 %v4877_v3  ;;  %v4870_v8 = vunpack.c.h.bf16 %v4877_v3  ;;  %v4875_v9 = vld [vmem:[%s5903_s12 + $0x8] sm:$0xff]   ;;  %v4856_v33 = vld [vmem:[%s5903_s12] sm:$0xff]   ;;  %v5734_v2 = vld [vmem:[%s7762_s1 + $0x10] sm:$0xff]  }
  0x13   : > { %v4865_v11 = vunpack.c.l.bf16 %v4876_v4  ;;  %v4866_v12 = vunpack.c.h.bf16 %v4876_v4  ;;  %v4861_v13 = vunpack.c.l.bf16 %v4875_v9  ;;  %v4862_v14 = vunpack.c.h.bf16 %v4875_v9  ;;  %v5735_v3 = vld [vmem:[%s7762_s1 + $0x18] sm:$0xff]  }
  0x14   : > { %v353_v15 = vmul.f32 %v4873_v5, %v4536_v1  ;;  %v354_v16 = vmul.f32 %v4874_v6, %v4536_v1  ;;  %v351_v17 = vmul.f32 %v4869_v7, %v4536_v1  ;;  %v352_v18 = vmul.f32 %v4870_v8, %v4536_v1  ;;  %v5752_v4 = vld [vmem:[%s7763_s2 + $0x78] sm:$0xff]   ;;  %v5753_v5 = vld [vmem:[%s7763_s2 + $0x70] sm:$0xff]   ;;  %v5736_v6 = vld [vmem:[%s7762_s1 + $0x20] sm:$0xff]  }
  0x15   : > { %v349_v19 = vmul.f32 %v4865_v11, %v4536_v1  ;;  %v350_v20 = vmul.f32 %v4866_v12, %v4536_v1  ;;  %v347_v21 = vmul.f32 %v4861_v13, %v4536_v1  ;;  %v348_v22 = vmul.f32 %v4862_v14, %v4536_v1  ;;  %5233 = vmatprep.subr.bf16.mxu1 %v5752_v4  ;;  %v5737_v7 = vld [vmem:[%s7762_s1 + $0x28] sm:$0xff]   ;;  %v5738_v8 = vld [vmem:[%s7762_s1 + $0x30] sm:$0xff]   ;;  %v5739_v9 = vld [vmem:[%s7762_s1 + $0x38] sm:$0xff]  }
  0x16   : > { %v370_v23 = vadd.f32 %v4537_v10, %v353_v15  ;;  %v371_v24 = vadd.f32 %v4537_v10, %v354_v16  ;;  %v368_v25 = vadd.f32 %v4537_v10, %v351_v17  ;;  %v369_v26 = vadd.f32 %v4537_v10, %v352_v18  ;;  %5234 = vmatpush3.bf16.msra.mxu1 %v5752_v4  ;;  %v5754_v11 = vld [vmem:[%s7763_s2 + $0x68] sm:$0xff]   ;;  %v5755_v12 = vld [vmem:[%s7763_s2 + $0xf8] sm:$0xff]   ;;  %v5756_v14 = vld [vmem:[%s7763_s2 + $0x60] sm:$0xff]  }
  0x17   : > { %v366_v27 = vadd.f32 %v4537_v10, %v349_v19  ;;  %v367_v28 = vadd.f32 %v4537_v10, %v350_v20  ;;  %v364_v29 = vadd.f32 %v4537_v10, %v347_v21  ;;  %v365_v30 = vadd.f32 %v4537_v10, %v348_v22  ;;  %5235 = vmatprep.subr.bf16.mxu1 %v5753_v5  ;;  %v5741_v13 = vld [vmem:[%s7762_s1 + $0x48] sm:$0xff]   ;;  %v5757_v15 = vld [vmem:[%s7763_s2 + $0xf0] sm:$0xff]   ;;  %v5758_v16 = vld [vmem:[%s7763_s2 + $0x58] sm:$0xff]  }
  0x18   : > { %vm380_vm1 = vcmp.ge.f32.partialorder %v370_v23, 0.0  ;;  %vm381_vm2 = vcmp.ge.f32.partialorder %v371_v24, 0.0  ;;  %v390_v31 = vmul.f32 0.2, %v370_v23  ;;  %v391_v32 = vmul.f32 0.2, %v371_v24 }
  0x19   : > { %vm378_vm3 = vcmp.ge.f32.partialorder %v368_v25, 0.0  ;;  %vm379_vm4 = vcmp.ge.f32.partialorder %v369_v26, 0.0  ;;  %v388_v34 = vmul.f32 0.2, %v368_v25  ;;  %v389_v35 = vmul.f32 0.2, %v369_v26 }
  0x1a   : > { %v400_v36 = vsel %vm380_vm1, %v370_v23, %v390_v31  ;;  %v401_v37 = vsel %vm381_vm2, %v371_v24, %v391_v32  ;;  %vm376_vm5 = vcmp.ge.f32.partialorder %v366_v27, 0.0  ;;  %vm377_vm6 = vcmp.ge.f32.partialorder %v367_v28, 0.0  ;;  %5236 = vmatpush3.bf16.msra.mxu1 %v5753_v5  ;;  %v5759_v17 = vld [vmem:[%s7763_s2 + $0xe8] sm:$0xff]   ;;  %v5742_v18 = vld [vmem:[%s7762_s1 + $0x50] sm:$0xff]   ;;  %v5761_v20 = vld [vmem:[%s7763_s2 + $0xe0] sm:$0xff]  }
  0x1b   : > { %v406_v38 = vpack.c.bf16 %v401_v37, %v400_v36  ;;  %v398_v39 = vsel %vm378_vm3, %v368_v25, %v388_v34  ;;  %v399_v40 = vsel %vm379_vm4, %v369_v26, %v389_v35  ;;  %v386_v41 = vmul.f32 0.2, %v366_v27  ;;  %5237 = vmatprep.subr.bf16.mxu1 %v5754_v11  ;;  %v5760_v19 = vld [vmem:[%s7763_s2 + $0x50] sm:$0xff]   ;;  %v5762_v21 = vld [vmem:[%s7763_s2 + $0x48] sm:$0xff]   ;;  %v5763_v22 = vld [vmem:[%s7763_s2 + $0xd8] sm:$0xff]  }
  0x1c   : > { %v387_v42 = vmul.f32 0.2, %v367_v28  ;;  %v405_v43 = vpack.c.bf16 %v399_v40, %v398_v39  ;;  %v384_v44 = vmul.f32 0.2, %v364_v29  ;;  %v4857_v45 = vunpack.c.l.bf16 %v4856_v33  ;;  %v5743_v23 = vld [vmem:[%s7762_s1 + $0x58] sm:$0xff]   ;;  %v5764_v24 = vld [vmem:[%s7763_s2 + $0x40] sm:$0xff]  }
  0x1d   : > { %5140 = vmatpush3.bf16.msra.mxu0 %v406_v38  ;;  %v396_v46 = vsel %vm376_vm5, %v366_v27, %v386_v41  ;;  %v385_v48 = vmul.f32 0.2, %v365_v30  ;;  %v4858_v49 = vunpack.c.h.bf16 %v4856_v33  ;;  %vm374_vm7 = vcmp.ge.f32.partialorder %v364_v29, 0.0  ;;  %v5765_v25 = vld [vmem:[%s7763_s2 + $0xd0] sm:$0xff]   ;;  %v5767_v26 = vld [vmem:[%s7763_s2 + $0xc8] sm:$0xff]   ;;  %v5744_v27 = vld [vmem:[%s7762_s1 + $0x60] sm:$0xff]  }
  0x1e   : > { %5141 = vmatprep.subr.bf16.mxu0 %v5835_v0  ;;  %v397_v47 = vsel %vm377_vm6, %v367_v28, %v387_v42  ;;  %vm375_vm8 = vcmp.ge.f32.partialorder %v365_v30, 0.0  ;;  %v345_v50 = vmul.f32 %v4857_v45, %v4536_v1  ;;  %v394_v54 = vsel %vm374_vm7, %v364_v29, %v384_v44  ;;  %5238 = vmatpush3.bf16.msra.mxu1 %v5754_v11  ;;  %v5768_v28 = vld [vmem:[%s7763_s2 + $0xc0] sm:$0xff]   ;;  %v5745_v29 = vld [vmem:[%s7762_s1 + $0x68] sm:$0xff]   ;;  %v5747_v31 = vld [vmem:[%s7762_s1 + $0x78] sm:$0xff]  }
  0x1f   : > { %v346_v51 = vmul.f32 %v4858_v49, %v4536_v1  ;;  %v404_v52 = vpack.c.bf16 %v397_v47, %v396_v46  ;;  %v395_v55 = vsel %vm375_vm8, %v365_v30, %v385_v48  ;;  %v5733_v1 = vld [vmem:[%s7762_s1 + $0x8] sm:$0xff]   ;;  %5239 = vmatprep.subr.bf16.mxu1 %v5756_v14  ;;  %v5746_v30 = vld [vmem:[%s7762_s1 + $0x70] sm:$0xff]   ;;  %v5748_v32 = vld [vmem:[%s7762_s1 + $0x80] sm:$0xff]  }
  0x20   : > { %v362_v53 = vadd.f32 %v4537_v10, %v345_v50  ;;  %v403_v59 = vpack.c.bf16 %v395_v55, %v394_v54  ;;  %v5749_v33 = vld [vmem:[%s7762_s1 + $0x88] sm:$0xff]   ;;  %v5750_v34 = vld [vmem:[%s7762_s1 + $0x90] sm:$0xff]   ;;  %v5751_v35 = vld [vmem:[%s7762_s1 + $0x98] sm:$0xff]  }
  0x21   : > { %5142 = vmatpush3.bf16.msra.mxu0 %v405_v43  ;;  %v363_v56 = vadd.f32 %v4537_v10, %v346_v51  ;;  %v5740_v10 = vld [vmem:[%s7762_s1 + $0x40] sm:$0xff]   ;;  %v5769_v36 = vld [vmem:[%s7763_s2 + $0x38] sm:$0xff]  }
  0x22   : > { %5143 = vmatprep.subr.bf16.mxu0 %v5835_v0  ;;  %vm372_vm9 = vcmp.ge.f32.partialorder %v362_v53, 0.0  ;;  %v382_v57 = vmul.f32 0.2, %v362_v53  ;;  %5240 = vmatpush3.bf16.msra.mxu1 %v5756_v14  ;;  %v5766_v37 = vld [vmem:[%s7762_s1 + $0xa0] ss:$0 sps:$4 sm:$0xff]   ;;  %v5775_v43 = vld [vmem:[%s7763_s2 + $0x178] sm:$0xff]  }
  0x23   : > { %vm373_vm10 = vcmp.ge.f32.partialorder %v363_v56, 0.0  ;;  %v383_v58 = vmul.f32 0.2, %v363_v56  ;;  %5241 = vmatprep.subr.bf16.mxu1 %v5758_v16  ;;  %v5776_v14 = vld [vmem:[%s7763_s2 + $0x170] sm:$0xff]  }
  0x24   : > { %v392_v60 = vsel %vm372_vm9, %v362_v53, %v382_v57 }
  0x25   : > { %5144 = vmatpush3.bf16.msra.mxu0 %v404_v52  ;;  %v393_v61 = vsel %vm373_vm10, %v363_v56, %v383_v58 }
  0x26   : > { %5145 = vmatprep.subr.bf16.mxu0 %v5835_v0  ;;  %v402_v62 = vpack.c.bf16 %v393_v61, %v392_v60  ;;  %5242 = vmatpush3.bf16.msra.mxu1 %v5758_v16 }
  0x27   : > { %5243 = vmatprep.subr.bf16.mxu1 %v5760_v19 }
  0x29   : > { %5146 = vmatpush3.bf16.msra.mxu0 %v403_v59 }
  0x2a   : > { %5147 = vmatprep.subr.bf16.mxu0 %v5835_v0  ;;  %5244 = vmatpush3.bf16.msra.mxu1 %v5760_v19 }
  0x2b   : > { %5245 = vmatprep.subr.bf16.mxu1 %v5762_v21 }
  0x2d   : > { %5148 = vmatpush3.bf16.msra.mxu0 %v402_v62 }
  0x2e   : > { %5389 = vmatprep.subr.bf16.mxu0 %v5755_v12  ;;  %5246 = vmatpush3.bf16.msra.mxu1 %v5762_v21 }
  0x2f   : > { %5247 = vmatprep.subr.bf16.mxu1 %v5764_v24 }
  0x30   : > { %5150 = vmatmul.mubr.msk.bf16.vlgmr.msra.gmra.mxu0 %vm551_vm11, %v5732_v63  ;;  %v5770_v63 = vld [vmem:[%s7763_s2 + $0x30] sm:$0xff]  }
  0x31   : > { %5153 = vmatprep.mubr.msk.bf16.mxu0 %vm5836_vm0, %v5835_v0  ;;  %5390 = vmatpush3.bf16.msra.mxu0 %v5755_v12 }
  0x32   : > { %5391 = vmatprep.subr.bf16.mxu0 %v5757_v15  ;;  %5248 = vmatpush3.bf16.msra.mxu1 %v5764_v24 }
  0x33   : > { %5285 = vmatprep.subr.bf16.mxu1 %v5769_v36 }
  0x35   : > { %5392 = vmatpush3.bf16.msra.mxu0 %v5757_v15 }
  0x36   : > { %5393 = vmatprep.subr.bf16.mxu0 %v5759_v17 }
  0x38   : > { %5154 = vmatmul.mubr.msk.bf16.gmra.mxu0 %vm551_vm11, %v5733_v1 }
  0x39   : > { %5157 = vmatprep.mubr.msk.bf16.mxu0 %vm5836_vm0, %v5835_v0  ;;  %5394 = vmatpush3.bf16.msra.mxu0 %v5759_v17  ;;  %v5773_v17 = vld [vmem:[%s7763_s2 + $0x18] sm:$0xff]  }
  0x3a   : > { %5395 = vmatprep.subr.bf16.mxu0 %v5761_v20 }
  0x3d   : > { %5396 = vmatpush3.bf16.msra.mxu0 %v5761_v20 }
  0x3e   : > { %5397 = vmatprep.subr.bf16.mxu0 %v5763_v22 }
  0x40   : > { %5158 = vmatmul.mubr.msk.bf16.gmra.mxu0 %vm551_vm11, %v5734_v2 }
  0x41   : > { %5161 = vmatprep.mubr.msk.bf16.mxu0 %vm5836_vm0, %v5835_v0  ;;  %5398 = vmatpush3.bf16.msra.mxu0 %v5763_v22 }
  0x42   : > { %5399 = vmatprep.subr.bf16.mxu0 %v5765_v25 }
  0x45   : > { %5400 = vmatpush3.bf16.msra.mxu0 %v5765_v25 }
  0x46   : > { %5401 = vmatprep.subr.bf16.mxu0 %v5767_v26 }
  0x48   : > { %5162 = vmatmul.mubr.msk.bf16.gmra.mxu0 %vm551_vm11, %v5735_v3  ;;  %v5771_v3 = vld [vmem:[%s7763_s2 + $0x28] sm:$0xff]  }
  0x49   : > { %5165 = vmatprep.mubr.msk.bf16.mxu0 %vm5836_vm0, %v5835_v0  ;;  %5402 = vmatpush3.bf16.msra.mxu0 %v5767_v26 }
  0x4a   : > { %5403 = vmatprep.subr.bf16.mxu0 %v5768_v28 }
  0x4d   : > { %5404 = vmatpush3.bf16.msra.mxu0 %v5768_v28  ;;  %v5774_v28 = vld [vmem:[%s7763_s2 + $0x10] sm:$0xff]  }
  0x4e   : > { %5493 = vmatprep.subr.bf16.mxu0 %v5775_v43 }
  0x50   : > { %5166 = vmatmul.mubr.msk.bf16.gmra.mxu0 %vm551_vm11, %v5736_v6 }
  0x51   : > { %5169 = vmatprep.mubr.msk.bf16.mxu0 %vm5836_vm0, %v5835_v0 }
  0x58   : > { %5170 = vmatmul.mubr.msk.bf16.gmra.mxu0 %vm551_vm11, %v5737_v7 }
  0x59   : > { %5173 = vmatprep.mubr.msk.bf16.mxu0 %vm5836_vm0, %v5835_v0 }
  0x60   : > { %5174 = vmatmul.mubr.msk.bf16.gmra.mxu0 %vm551_vm11, %v5738_v8 }
  0x61   : > { %5177 = vmatprep.mubr.msk.bf16.mxu0 %vm5836_vm0, %v5835_v0 }
  0x68   : > { %5178 = vmatmul.mubr.msk.bf16.gmra.mxu0 %vm551_vm11, %v5739_v9 }
  0x69   : > { %5181 = vmatprep.mubr.msk.bf16.mxu0 %vm5836_vm0, %v5835_v0 }
  0x70   : > { %5182 = vmatmul.mubr.msk.bf16.gmra.mxu0 %vm551_vm11, %v5740_v10 }
  0x71   : > { %5185 = vmatprep.mubr.msk.bf16.mxu0 %vm5836_vm0, %v5835_v0 }
  0x78   : > { %5186 = vmatmul.mubr.msk.bf16.gmra.mxu0 %vm551_vm11, %v5741_v13  ;;  %v5772_v13 = vld [vmem:[%s7763_s2 + $0x20] sm:$0xff]  }
  0x79   : > { %5189 = vmatprep.mubr.msk.bf16.mxu0 %vm5836_vm0, %v5835_v0 }
  0x80   : > { %5190 = vmatmul.mubr.msk.bf16.gmra.mxu0 %vm551_vm11, %v5742_v18  ;;  %v5778_v18 = vld [vmem:[%s7763_s2 + $0x168] sm:$0xff]  }
  0x81   : > { %5193 = vmatprep.mubr.msk.bf16.mxu0 %vm5836_vm0, %v5835_v0 }
  0x88   : > { %5194 = vmatmul.mubr.msk.bf16.gmra.mxu0 %vm551_vm11, %v5743_v23 }
  0x89   : > { %5197 = vmatprep.mubr.msk.bf16.mxu0 %vm5836_vm0, %v5835_v0 }
  0x90   : > { %5198 = vmatmul.mubr.msk.bf16.gmra.mxu0 %vm551_vm11, %v5744_v27 }
  0x91   : > { %5201 = vmatprep.mubr.msk.bf16.mxu0 %vm5836_vm0, %v5835_v0 }
  0x98   : > { %5202 = vmatmul.mubr.msk.bf16.gmra.mxu0 %vm551_vm11, %v5745_v29  ;;  %v5779_v29 = vld [vmem:[%s7763_s2 + $0x160] sm:$0xff]  }
  0x99   : > { %5205 = vmatprep.mubr.msk.bf16.mxu0 %vm5836_vm0, %v5835_v0 }
  0xa0   : > { %5206 = vmatmul.mubr.msk.bf16.gmra.mxu0 %vm551_vm11, %v5746_v30 }
  0xa1   : > { %5209 = vmatprep.mubr.msk.bf16.mxu0 %vm5836_vm0, %v5835_v0 }
  0xa8   : > { %5210 = vmatmul.mubr.msk.bf16.gmra.mxu0 %vm551_vm11, %v5747_v31 }
  0xa9   : > { %5213 = vmatprep.mubr.msk.bf16.mxu0 %vm5836_vm0, %v5835_v0 }
  0xb0   : > { %5214 = vmatmul.mubr.msk.bf16.gmra.mxu0 %vm551_vm11, %v5748_v32  ;;  %v5777_v32 = vld [vmem:[%s7763_s2 + $0x8] sm:$0xff]  }
  0xb1   : > { %5217 = vmatprep.mubr.msk.bf16.mxu0 %vm5836_vm0, %v5835_v0 }
  0xb8   : > { %5218 = vmatmul.mubr.msk.bf16.gmra.mxu0 %vm551_vm11, %v5749_v33  ;;  %v5781_v33 = vld [vmem:[%s7763_s2 + $0x158] sm:$0xff]  }
  0xb9   : > { %5221 = vmatprep.mubr.msk.bf16.mxu0 %vm5836_vm0, %v5835_v0 }
  0xc0   : > { %5222 = vmatmul.mubr.msk.bf16.gmra.mxu0 %vm551_vm11, %v5750_v34 }
  0xc1   : > { %5225 = vmatprep.mubr.msk.bf16.mxu0 %vm5836_vm0, %v5835_v0 }
  0xc8   : > { %5226 = vmatmul.mubr.msk.bf16.gmra.mxu0 %vm551_vm11, %v5751_v35 }
  0xc9   : > { %5229 = vmatprep.mubr.msk.bf16.mxu0 %vm5836_vm0, %v5835_v0 }
  0xd0   : > { %5230 = vmatmul.mubr.msk.bf16.gmra.mxu0 %vm551_vm11, %v5766_v37 }
  0xf0   : > { %v6092_v38 = vpop.f32.mrf.mxu0 }
  0xf1   : > { %815 = vst [vmem:[#allocation2] sm:$0xff] %v6092_v38 }
  0xf2   : > { %v5151_v39 = vpop.f32.mrf.mxu0 }
  0xf4   : > { %v6095_v40 = vpop.f32.mrf.mxu0 }
  0xf5   : > { %816 = vst [vmem:[#allocation2 + $0x8] sm:$0xff] %v6095_v40  ;;  %v892_v0 = vpack.c.bf16 %v6095_v40, %v6092_v38 }
  0xf6   : > { %v5152_v41 = vpop.f32.mrf.mxu0 }
  0xf8   : > { %v6100_v42 = vpop.f32.mrf.mxu0 }
  0xf9   : > { %817 = vst [vmem:[#allocation2 + $0x10] sm:$0xff] %v6100_v42 }
  0xfa   : > { %v5155_v44 = vpop.f32.mrf.mxu0 }
  0xfc   : > { %v6106_v45 = vpop.f32.mrf.mxu0  ;;  %v926_v49 = vld [vmem:[#allocation2 + $0x1] sm:$0xff] }
  0xfd   : > { %818 = vst [vmem:[#allocation2 + $0x18] sm:$0xff] %v6106_v45  ;;  %v893_v46 = vpack.c.bf16 %v6106_v45, %v6100_v42 }
  0xfe   : > { %v5156_v47 = vpop.f32.mrf.mxu0 }
 0x100   : > { %v6111_v48 = vpop.f32.mrf.mxu0  ;;  %v927_v50 = vld [vmem:[#allocation2 + $0x9] sm:$0xff] }
 0x101   : > { %819 = vst [vmem:[#allocation2 + $0x20] sm:$0xff] %v6111_v48  ;;  %v962_v51 = vpack.c.bf16 %v927_v50, %v926_v49  ;;  %v5780_v49 = vld [vmem:[%s7763_s2] sm:$0xff]   ;;  %v5782_v50 = vld [vmem:[%s7763_s2 + $0x150] sm:$0xff]  }
 0x102   : > { %v5159_v52 = vpop.f32.mrf.mxu0 }
 0x103   : > { %5249 = vmatprep.mubr.bf16.mxu1 %v962_v51 }
 0x104   : > { %v6114_v53 = vpop.f32.mrf.mxu0  ;;  %v928_v56 = vld [vmem:[#allocation2 + $0x11] sm:$0xff] }
 0x105   : > { %820 = vst [vmem:[#allocation2 + $0x28] sm:$0xff] %v6114_v53  ;;  %v894_v54 = vpack.c.bf16 %v6114_v53, %v6111_v48  ;;  %v1779_v59 = vld [vmem:[#allocation2 + $0x12] sm:$0xff]  ;;  %v5788_v48 = vld [vmem:[%s7763_s2 + $0xa0] sm:$0xff]  }
 0x106   : > { %v5160_v55 = vpop.f32.mrf.mxu0  ;;  %v5792_v53 = vld [vmem:[%s7763_s2 + $0x1f0] sm:$0xff]  }
 0x107   : > { %v6188_v55 = vld [vmem:[%s7763_s2 + $0xb8] sm:$0xff]  }
 0x108   : > { %v6119_v57 = vpop.f32.mrf.mxu0  ;;  %v929_v58 = vld [vmem:[#allocation2 + $0x19] sm:$0xff] }
 0x109   : > { %v1780_v60 = vld [vmem:[#allocation2 + $0x1a] sm:$0xff]  ;;  %821 = vst [vmem:[#allocation2 + $0x30] sm:$0xff] %v6119_v57  ;;  %v963_v61 = vpack.c.bf16 %v929_v58, %v928_v56  ;;  %v5784_v56 = vld [vmem:[%s7763_s2 + $0x148] sm:$0xff]  }
 0x10a   : > { %v1815_v62 = vpack.c.bf16 %v1780_v60, %v1779_v59  ;;  %v5163_v1 = vpop.f32.mrf.mxu0 }
 0x10b   : > { %5250 = vmatmul.mubr.bf16.vlgmr.msra.gmra.mxu1 %v963_v61 }
 0x10c   : > { %5405 = vmatprep.mubr.bf16.mxu0 %v1815_v62  ;;  %v6125_v2 = vpop.f32.mrf.mxu0  ;;  %5286 = vmatpush3.bf16.msra.mxu1 %v5769_v36  ;;  %v930_v6 = vld [vmem:[#allocation2 + $0x21] sm:$0xff] }
 0x10d   : > { %822 = vst [vmem:[#allocation2 + $0x38] sm:$0xff] %v6125_v2  ;;  %5287 = vmatprep.subr.bf16.mxu1 %v5770_v63  ;;  %v895_v4 = vpack.c.bf16 %v6125_v2, %v6119_v57  ;;  %v1781_v9 = vld [vmem:[#allocation2 + $0x22] sm:$0xff] }
 0x10e   : > { %v5164_v5 = vpop.f32.mrf.mxu0  ;;  %v2445_v42 = vld [vmem:[#allocation2 + $0x24] sm:$0xff] }
 0x10f   : > { %v5794_v57 = vld [vmem:[%s7763_s2 + $0x1e8] sm:$0xff]  }
 0x110   : > { %v6133_v7 = vpop.f32.mrf.mxu0  ;;  %v931_v8 = vld [vmem:[#allocation2 + $0x29] sm:$0xff]  ;;  %5288 = vmatpush3.bf16.msra.mxu1 %v5770_v63 }
 0x111   : > { %v1782_v10 = vld [vmem:[#allocation2 + $0x2a] sm:$0xff]  ;;  %823 = vst [vmem:[#allocation2 + $0x40] sm:$0xff] %v6133_v7  ;;  %v964_v11 = vpack.c.bf16 %v931_v8, %v930_v6  ;;  %5289 = vmatprep.subr.bf16.mxu1 %v5771_v3  ;;  %v5785_v6 = vld [vmem:[%s7763_s2 + $0x140] sm:$0xff]  }
 0x112   : > { %v1816_v12 = vpack.c.bf16 %v1782_v10, %v1781_v9  ;;  %v5167_v15 = vpop.f32.mrf.mxu0 }
 0x113   : > { %5253 = vmatprep.mubr.bf16.mxu1 %v964_v11 }
 0x114   : > { %5406 = vmatmul.mubr.bf16.vlgmr.msra.gmra.mxu0 %v1816_v12  ;;  %v6142_v16 = vpop.f32.mrf.mxu0  ;;  %5290 = vmatpush3.bf16.msra.mxu1 %v5771_v3  ;;  %v932_v21 = vld [vmem:[#allocation2 + $0x31] sm:$0xff] }
 0x115   : > { %5494 = vmatpush3.bf16.msra.mxu0 %v5775_v43  ;;  %824 = vst [vmem:[#allocation2 + $0x48] sm:$0xff] %v6142_v16  ;;  %5291 = vmatprep.subr.bf16.mxu1 %v5772_v13  ;;  %v896_v19 = vpack.c.bf16 %v6142_v16, %v6133_v7  ;;  %v1783_v24 = vld [vmem:[#allocation2 + $0x32] sm:$0xff] }
 0x116   : > { %5495 = vmatprep.subr.bf16.mxu0 %v5776_v14  ;;  %v5168_v20 = vpop.f32.mrf.mxu0 }
 0x118   : > { %v6153_v22 = vpop.f32.mrf.mxu0  ;;  %v933_v23 = vld [vmem:[#allocation2 + $0x39] sm:$0xff]  ;;  %5292 = vmatpush3.bf16.msra.mxu1 %v5772_v13 }
 0x119   : > { %v1784_v25 = vld [vmem:[#allocation2 + $0x3a] sm:$0xff]  ;;  %5496 = vmatpush3.bf16.msra.mxu0 %v5776_v14  ;;  %825 = vst [vmem:[#allocation2 + $0x50] sm:$0xff] %v6153_v22  ;;  %v965_v26 = vpack.c.bf16 %v933_v23, %v932_v21  ;;  %5293 = vmatprep.subr.bf16.mxu1 %v5773_v17 }
 0x11a   : > { %v1817_v27 = vpack.c.bf16 %v1784_v25, %v1783_v24  ;;  %5497 = vmatprep.subr.bf16.mxu0 %v5778_v18  ;;  %v5171_v30 = vpop.f32.mrf.mxu0 }
 0x11b   : > { %5254 = vmatmul.mubr.bf16.gmra.mxu1 %v965_v26 }
 0x11c   : > { %5409 = vmatprep.mubr.bf16.mxu0 %v1817_v27  ;;  %v6162_v31 = vpop.f32.mrf.mxu0  ;;  %5294 = vmatpush3.bf16.msra.mxu1 %v5773_v17  ;;  %v934_v36 = vld [vmem:[#allocation2 + $0x41] sm:$0xff] }
 0x11d   : > { %5498 = vmatpush3.bf16.msra.mxu0 %v5778_v18  ;;  %826 = vst [vmem:[#allocation2 + $0x58] sm:$0xff] %v6162_v31  ;;  %5295 = vmatprep.subr.bf16.mxu1 %v5774_v28  ;;  %v897_v34 = vpack.c.bf16 %v6162_v31, %v6153_v22  ;;  %v1785_v41 = vld [vmem:[#allocation2 + $0x42] sm:$0xff]  ;;  %v5797_v22 = vld [vmem:[%s7763_s2 + $0x1d8] sm:$0xff]  }
 0x11e   : > { %5499 = vmatprep.subr.bf16.mxu0 %v5779_v29  ;;  %v5172_v35 = vpop.f32.mrf.mxu0 }
 0x120   : > { %v6173_v37 = vpop.f32.mrf.mxu0  ;;  %v935_v39 = vld [vmem:[#allocation2 + $0x49] sm:$0xff]  ;;  %5296 = vmatpush3.bf16.msra.mxu1 %v5774_v28 }
 0x121   : > { %v1786_v43 = vld [vmem:[#allocation2 + $0x4a] sm:$0xff]  ;;  %5500 = vmatpush3.bf16.msra.mxu0 %v5779_v29  ;;  %827 = vst [vmem:[#allocation2 + $0x60] sm:$0xff] %v6173_v37  ;;  %v966_v44 = vpack.c.bf16 %v935_v39, %v934_v36  ;;  %5297 = vmatprep.subr.bf16.mxu1 %v5777_v32 }
 0x122   : > { %v1818_v47 = vpack.c.bf16 %v1786_v43, %v1785_v41  ;;  %5501 = vmatprep.subr.bf16.mxu0 %v5781_v33  ;;  %v5175_v51 = vpop.f32.mrf.mxu0 }
 0x123   : > { %5257 = vmatprep.mubr.bf16.mxu1 %v966_v44 }
 0x124   : > { %5410 = vmatmul.mubr.bf16.gmra.mxu0 %v1818_v47  ;;  %v6182_v52 = vpop.f32.mrf.mxu0  ;;  %5298 = vmatpush3.bf16.msra.mxu1 %v5777_v32  ;;  %v936_v60 = vld [vmem:[#allocation2 + $0x51] sm:$0xff] }
 0x125   : > { %5502 = vmatpush3.bf16.msra.mxu0 %v5781_v33  ;;  %828 = vst [vmem:[#allocation2 + $0x68] sm:$0xff] %v6182_v52  ;;  %5299 = vmatprep.subr.bf16.mxu1 %v5780_v49  ;;  %v898_v58 = vpack.c.bf16 %v6182_v52, %v6173_v37  ;;  %v1787_v63 = vld [vmem:[#allocation2 + $0x52] sm:$0xff]  ;;  %v5796_v52 = vld [vmem:[%s7763_s2 + $0x80] sm:$0xff]  }
 0x126   : > { %5503 = vmatprep.subr.bf16.mxu0 %v5782_v50  ;;  %v5176_v59 = vpop.f32.mrf.mxu0  ;;  %v2451_v7 = vld [vmem:[#allocation2 + $0x54] sm:$0xff] }
 0x128   : > { %v6195_v61 = vpop.f32.mrf.mxu0  ;;  %v937_v62 = vld [vmem:[#allocation2 + $0x59] sm:$0xff]  ;;  %5300 = vmatpush3.bf16.msra.mxu1 %v5780_v49 }
 0x129   : > { %v1788_v1 = vld [vmem:[#allocation2 + $0x5a] sm:$0xff]  ;;  %5504 = vmatpush3.bf16.msra.mxu0 %v5782_v50  ;;  %829 = vst [vmem:[#allocation2 + $0x70] sm:$0xff] %v6195_v61  ;;  %v967_v3 = vpack.c.bf16 %v937_v62, %v936_v60  ;;  %5337 = vmatprep.subr.bf16.mxu1 %v6188_v55 }
 0x12a   : > { %v1819_v5 = vpack.c.bf16 %v1788_v1, %v1787_v63  ;;  %5505 = vmatprep.subr.bf16.mxu0 %v5784_v56  ;;  %v5179_v8 = vpop.f32.mrf.mxu0  ;;  %v6229_v60 = vld [vmem:[%s7763_s2 + $0x1f8] sm:$0xff]  }
 0x12b   : > { %5258 = vmatmul.mubr.bf16.gmra.mxu1 %v967_v3  ;;  %v2452_v2 = vld [vmem:[#allocation2 + $0x5c] sm:$0xff] }
 0x12c   : > { %5413 = vmatprep.mubr.bf16.mxu0 %v1819_v5  ;;  %v6202_v9 = vpop.f32.mrf.mxu0  ;;  %v938_v12 = vld [vmem:[#allocation2 + $0x61] sm:$0xff]  ;;  %v2483_v16 = vpack.c.bf16 %v2452_v2, %v2451_v7 }
 0x12d   : > { %5506 = vmatpush3.bf16.msra.mxu0 %v5784_v56  ;;  %830 = vst [vmem:[#allocation2 + $0x78] sm:$0xff] %v6202_v9  ;;  %v1789_v15 = vld [vmem:[#allocation2 + $0x62] sm:$0xff] }
 0x12e   : > { %5507 = vmatprep.subr.bf16.mxu0 %v5785_v6  ;;  %v5180_v11 = vpop.f32.mrf.mxu0 }
 0x130   : > { %v6207_v13 = vpop.f32.mrf.mxu0  ;;  %v939_v14 = vld [vmem:[#allocation2 + $0x69] sm:$0xff] }
 0x131   : > { %v1790_v17 = vld [vmem:[#allocation2 + $0x6a] sm:$0xff]  ;;  %5508 = vmatpush3.bf16.msra.mxu0 %v5785_v6  ;;  %831 = vst [vmem:[#allocation2 + $0x80] sm:$0xff] %v6207_v13  ;;  %v968_v18 = vpack.c.bf16 %v939_v14, %v938_v12 }
 0x132   : > { %v1820_v20 = vpack.c.bf16 %v1790_v17, %v1789_v15  ;;  %v5183_v21 = vpop.f32.mrf.mxu0  ;;  %5597 = vmatprep.subr.bf16.mxu0 %v6229_v60 }
 0x133   : > { %5261 = vmatprep.mubr.bf16.mxu1 %v968_v18 }
 0x134   : > { %5414 = vmatmul.mubr.bf16.gmra.mxu0 %v1820_v20  ;;  %v6210_v23 = vpop.f32.mrf.mxu0  ;;  %v940_v26 = vld [vmem:[#allocation2 + $0x71] sm:$0xff] }
 0x135   : > { %832 = vst [vmem:[#allocation2 + $0x88] sm:$0xff] %v6210_v23  ;;  %v1791_v29 = vld [vmem:[#allocation2 + $0x72] sm:$0xff] }
 0x136   : > { %v5184_v25 = vpop.f32.mrf.mxu0 }
 0x138   : > { %v6215_v27 = vpop.f32.mrf.mxu0  ;;  %v941_v28 = vld [vmem:[#allocation2 + $0x79] sm:$0xff] }
 0x139   : > { %v1792_v30 = vld [vmem:[#allocation2 + $0x7a] sm:$0xff]  ;;  %833 = vst [vmem:[#allocation2 + $0x90] sm:$0xff] %v6215_v27  ;;  %v969_v32 = vpack.c.bf16 %v941_v28, %v940_v26 }
 0x13a   : > { %v1821_v33 = vpack.c.bf16 %v1792_v30, %v1791_v29  ;;  %v5187_v35 = vpop.f32.mrf.mxu0  ;;  %v2456_v31 = vld [vmem:[#allocation2 + $0x7c] sm:$0xff] }
 0x13b   : > { %5262 = vmatmul.mubr.bf16.gmra.mxu1 %v969_v32 }
 0x13c   : > { %5417 = vmatprep.mubr.bf16.mxu0 %v1821_v33  ;;  %v6218_v36 = vpop.f32.mrf.mxu0  ;;  %v942_v43 = vld [vmem:[#allocation2 + $0x81] sm:$0xff] }
 0x13d   : > { %834 = vst [vmem:[#allocation2 + $0x98] sm:$0xff] %v6218_v36  ;;  %v1793_v49 = vld [vmem:[#allocation2 + $0x82] sm:$0xff] }
 0x13e   : > { %v5188_v41 = vpop.f32.mrf.mxu0 }
 0x140   : > { %v6223_v44 = vpop.f32.mrf.mxu0  ;;  %v943_v47 = vld [vmem:[#allocation2 + $0x89] sm:$0xff] }
 0x141   : > { %v1794_v50 = vld [vmem:[#allocation2 + $0x8a] sm:$0xff]  ;;  %835 = vst [vmem:[#allocation2 + $0xa0] sm:$0xff] %v6223_v44  ;;  %v970_v51 = vpack.c.bf16 %v943_v47, %v942_v43 }
 0x142   : > { %v1822_v56 = vpack.c.bf16 %v1794_v50, %v1793_v49  ;;  %v5191_v59 = vpop.f32.mrf.mxu0 }
 0x143   : > { %5265 = vmatprep.mubr.bf16.mxu1 %v970_v51 }
 0x144   : > { %5418 = vmatmul.mubr.bf16.gmra.mxu0 %v1822_v56  ;;  %v6231_v62 = vpop.f32.mrf.mxu0  ;;  %v944_v3 = vld [vmem:[#allocation2 + $0x91] sm:$0xff] }
 0x145   : > { %836 = vst [vmem:[#allocation2 + $0xa8] sm:$0xff] %v6231_v62  ;;  %v1795_v8 = vld [vmem:[#allocation2 + $0x92] sm:$0xff] }
 0x146   : > { %v5192_v1 = vpop.f32.mrf.mxu0 }
 0x148   : > { %v6237_v5 = vpop.f32.mrf.mxu0  ;;  %v945_v6 = vld [vmem:[#allocation2 + $0x99] sm:$0xff] }
 0x149   : > { %v1796_v11 = vld [vmem:[#allocation2 + $0x9a] sm:$0xff]  ;;  %837 = vst [vmem:[#allocation2 + $0xb0] sm:$0xff] %v6237_v5  ;;  %v971_v12 = vpack.c.bf16 %v945_v6, %v944_v3 }
 0x14a   : > { %v1823_v14 = vpack.c.bf16 %v1796_v11, %v1795_v8  ;;  %v5195_v15 = vpop.f32.mrf.mxu0 }
 0x14b   : > { %5266 = vmatmul.mubr.bf16.gmra.mxu1 %v971_v12 }
 0x14c   : > { %5421 = vmatprep.mubr.bf16.mxu0 %v1823_v14  ;;  %v6240_v17 = vpop.f32.mrf.mxu0  ;;  %v946_v21 = vld [vmem:[#allocation2 + $0xa1] sm:$0xff] }
 0x14d   : > { %838 = vst [vmem:[#allocation2 + $0xb8] sm:$0xff] %v6240_v17  ;;  %v1797_v28 = vld [vmem:[#allocation2 + $0xa2] sm:$0xff] }
 0x14e   : > { %v5196_v20 = vpop.f32.mrf.mxu0 }
 0x150   : > { %v6245_v25 = vpop.f32.mrf.mxu0  ;;  %v947_v26 = vld [vmem:[#allocation2 + $0xa9] sm:$0xff] }
 0x151   : > { %v1798_v29 = vld [vmem:[#allocation2 + $0xaa] sm:$0xff]  ;;  %839 = vst [vmem:[#allocation2 + $0xc0] sm:$0xff] %v6245_v25  ;;  %v972_v30 = vpack.c.bf16 %v947_v26, %v946_v21 }
 0x152   : > { %v1824_v32 = vpack.c.bf16 %v1798_v29, %v1797_v28  ;;  %v5199_v33 = vpop.f32.mrf.mxu0 }
 0x153   : > { %5269 = vmatprep.mubr.bf16.mxu1 %v972_v30 }
 0x154   : > { %5422 = vmatmul.mubr.bf16.gmra.mxu0 %v1824_v32  ;;  %v6248_v35 = vpop.f32.mrf.mxu0  ;;  %v948_v47 = vld [vmem:[#allocation2 + $0xb1] sm:$0xff] }
 0x155   : > { %840 = vst [vmem:[#allocation2 + $0xc8] sm:$0xff] %v6248_v35  ;;  %v1799_v51 = vld [vmem:[#allocation2 + $0xb2] sm:$0xff] }
 0x156   : > { %v5200_v43 = vpop.f32.mrf.mxu0 }
 0x158   : > { %v6253_v49 = vpop.f32.mrf.mxu0  ;;  %v949_v50 = vld [vmem:[#allocation2 + $0xb9] sm:$0xff] }
 0x159   : > { %v1800_v56 = vld [vmem:[#allocation2 + $0xba] sm:$0xff]  ;;  %841 = vst [vmem:[#allocation2 + $0xd0] sm:$0xff] %v6253_v49  ;;  %v973_v59 = vpack.c.bf16 %v949_v50, %v948_v47 }
 0x15a   : > { %v1825_v1 = vpack.c.bf16 %v1800_v56, %v1799_v51  ;;  %v5203_v3 = vpop.f32.mrf.mxu0 }
 0x15b   : > { %5270 = vmatmul.mubr.bf16.gmra.mxu1 %v973_v59 }
 0x15c   : > { %5425 = vmatprep.mubr.bf16.mxu0 %v1825_v1  ;;  %v6256_v6 = vpop.f32.mrf.mxu0  ;;  %v950_v12 = vld [vmem:[#allocation2 + $0xc1] sm:$0xff] }
 0x15d   : > { %842 = vst [vmem:[#allocation2 + $0xd8] sm:$0xff] %v6256_v6  ;;  %v1801_v20 = vld [vmem:[#allocation2 + $0xc2] sm:$0xff] }
 0x15e   : > { %v5204_v11 = vpop.f32.mrf.mxu0 }
 0x160   : > { %v6261_v14 = vpop.f32.mrf.mxu0  ;;  %v951_v15 = vld [vmem:[#allocation2 + $0xc9] sm:$0xff] }
 0x161   : > { %v1802_v21 = vld [vmem:[#allocation2 + $0xca] sm:$0xff]  ;;  %843 = vst [vmem:[#allocation2 + $0xe0] sm:$0xff] %v6261_v14  ;;  %v974_v26 = vpack.c.bf16 %v951_v15, %v950_v12 }
 0x162   : > { %v1826_v28 = vpack.c.bf16 %v1802_v21, %v1801_v20  ;;  %v5207_v29 = vpop.f32.mrf.mxu0 }
 0x163   : > { %5273 = vmatprep.mubr.bf16.mxu1 %v974_v26 }
 0x164   : > { %5426 = vmatmul.mubr.bf16.gmra.mxu0 %v1826_v28  ;;  %v6264_v30 = vpop.f32.mrf.mxu0  ;;  %v952_v43 = vld [vmem:[#allocation2 + $0xd1] sm:$0xff] }
 0x165   : > { %844 = vst [vmem:[#allocation2 + $0xe8] sm:$0xff] %v6264_v30  ;;  %v1803_v51 = vld [vmem:[#allocation2 + $0xd2] sm:$0xff] }
 0x166   : > { %v5208_v33 = vpop.f32.mrf.mxu0 }
 0x168   : > { %v6269_v47 = vpop.f32.mrf.mxu0  ;;  %v953_v50 = vld [vmem:[#allocation2 + $0xd9] sm:$0xff] }
 0x169   : > { %v1804_v56 = vld [vmem:[#allocation2 + $0xda] sm:$0xff]  ;;  %845 = vst [vmem:[#allocation2 + $0xf0] sm:$0xff] %v6269_v47  ;;  %v975_v59 = vpack.c.bf16 %v953_v50, %v952_v43 }
 0x16a   : > { %v1827_v1 = vpack.c.bf16 %v1804_v56, %v1803_v51  ;;  %v5211_v3 = vpop.f32.mrf.mxu0 }
 0x16b   : > { %5274 = vmatmul.mubr.bf16.gmra.mxu1 %v975_v59 }
 0x16c   : > { %5429 = vmatprep.mubr.bf16.mxu0 %v1827_v1  ;;  %v6272_v11 = vpop.f32.mrf.mxu0  ;;  %v954_v20 = vld [vmem:[#allocation2 + $0xe1] sm:$0xff] }
 0x16d   : > { %846 = vst [vmem:[#allocation2 + $0xf8] sm:$0xff] %v6272_v11  ;;  %v1805_v28 = vld [vmem:[#allocation2 + $0xe2] sm:$0xff]  ;;  %v7778_v7 = vpack.c.bf16 %v6272_v11, %v6269_v47  ;;  %v1450_v47 = vld [vmem:[#allocation2 + $0x1a] sm:$0xff] }
 0x16e   : > { %v5212_v15 = vpop.f32.mrf.mxu0 }
 0x170   : > { %v6277_v21 = vpop.f32.mrf.mxu0  ;;  %v955_v26 = vld [vmem:[#allocation2 + $0xe9] sm:$0xff] }
 0x171   : > { %v1806_v29 = vld [vmem:[#allocation2 + $0xea] sm:$0xff]  ;;  %847 = vst [vmem:[#allocation2 + $0x100] sm:$0xff] %v6277_v21  ;;  %v976_v33 = vpack.c.bf16 %v955_v26, %v954_v20 }
 0x172   : > { %v6280_v43 = vpack.c.bf16 %v1806_v29, %v1805_v28  ;;  %v5215_v50 = vpop.f32.mrf.mxu0 }
 0x173   : > { %5277 = vmatprep.mubr.bf16.mxu1 %v976_v33 }
 0x174   : > { %5430 = vmatmul.mubr.bf16.gmra.mxu0 %v6280_v43  ;;  %v6283_v51 = vpop.f32.mrf.mxu0  ;;  %v956_v1 = vld [vmem:[#allocation2 + $0xf1] sm:$0xff] }
 0x175   : > { %848 = vst [vmem:[#allocation2 + $0x108] sm:$0xff] %v6283_v51  ;;  %v1807_v12 = vld [vmem:[#allocation2 + $0xf2] sm:$0xff] }
 0x176   : > { %v5216_v59 = vpop.f32.mrf.mxu0 }
 0x178   : > { %v6288_v3 = vpop.f32.mrf.mxu0  ;;  %v957_v15 = vld [vmem:[#allocation2 + $0xf9] sm:$0xff] }
 0x179   : > { %v1808_v20 = vld [vmem:[#allocation2 + $0xfa] sm:$0xff]  ;;  %849 = vst [vmem:[#allocation2 + $0x110] sm:$0xff] %v6288_v3  ;;  %v977_v26 = vpack.c.bf16 %v957_v15, %v956_v1 }
 0x17a   : > { %v6291_v28 = vpack.c.bf16 %v1808_v20, %v1807_v12  ;;  %v5219_v29 = vpop.f32.mrf.mxu0 }
 0x17b   : > { %5278 = vmatmul.mubr.bf16.gmra.mxu1 %v977_v26 }
 0x17c   : > { %5433 = vmatprep.mubr.bf16.mxu0 %v6291_v28  ;;  %v6294_v33 = vpop.f32.mrf.mxu0  ;;  %v958_v56 = vld [vmem:[#allocation2 + $0x101] sm:$0xff] }
 0x17d   : > { %850 = vst [vmem:[#allocation2 + $0x118] sm:$0xff] %v6294_v33  ;;  %v1809_v41 = vld [vmem:[#allocation2 + $0x102] sm:$0xff] }
 0x17e   : > { %v5220_v59 = vpop.f32.mrf.mxu0 }
 0x180   : > { %v793_v32 = vpop.f32.mrf.mxu0  ;;  %v959_v8 = vld [vmem:[#allocation2 + $0x109] sm:$0xff] }
 0x181   : > { %v1810_v18 = vld [vmem:[#allocation2 + $0x10a] sm:$0xff]  ;;  %851 = vst [vmem:[#allocation2 + $0x120] sm:$0xff] %v793_v32  ;;  %v978_v12 = vpack.c.bf16 %v959_v8, %v958_v56 }
 0x182   : > { %v6299_v1 = vpack.c.bf16 %v1810_v18, %v1809_v41  ;;  %v5223_v15 = vpop.f32.mrf.mxu0 }
 0x183   : > { %5281 = vmatprep.mubr.bf16.mxu1 %v978_v12  ;;  %v2444_v12 = vld [vmem:[#allocation2 + $0x1c] sm:$0xff] }
 0x184   : > { %5434 = vmatmul.mubr.bf16.gmra.mxu0 %v6299_v1  ;;  %v796_v20 = vpop.f32.mrf.mxu0  ;;  %v960_v29 = vld [vmem:[#allocation2 + $0x111] sm:$0xff] }
 0x185   : > { %852 = vst [vmem:[#allocation2 + $0x128] sm:$0xff] %v796_v20  ;;  %v1811_v59 = vld [vmem:[#allocation2 + $0x112] sm:$0xff] }
 0x186   : > { %v5224_v26 = vpop.f32.mrf.mxu0 }
 0x188   : > { %v801_v63 = vpop.f32.mrf.mxu0  ;;  %v961_v50 = vld [vmem:[#allocation2 + $0x119] sm:$0xff] }
 0x189   : > { %v1812_v39 = vld [vmem:[#allocation2 + $0x11a] sm:$0xff]  ;;  %853 = vst [vmem:[#allocation2 + $0x130] sm:$0xff] %v801_v63  ;;  %v979_v24 = vpack.c.bf16 %v961_v50, %v960_v29  ;;  %v2446_v50 = vld [vmem:[#allocation2 + $0x2c] sm:$0xff] }
 0x18a   : > { %v6302_v10 = vpack.c.bf16 %v1812_v39, %v1811_v59  ;;  %v5227_v32 = vpop.f32.mrf.mxu0  ;;  %v5786_v39 = vld [vmem:[%s7763_s2 + $0xb0] sm:$0xff]   ;;  %v2448_v29 = vld [vmem:[#allocation2 + $0x3c] sm:$0xff]  ;;  %v2480_v45 = vpack.c.bf16 %v2446_v50, %v2445_v42  ;;  %v2461_v42 = vld [vmem:[#allocation2 + $0xa4] sm:$0xff] }
 0x18b   : > { %5282 = vmatmul.mubr.bf16.gmra.mxu1 %v979_v24  ;;  %v2443_v24 = vld [vmem:[#allocation2 + $0x14] sm:$0xff]  ;;  %v2462_v50 = vld [vmem:[#allocation2 + $0xac] sm:$0xff] }
 0x18c   : > { %5437 = vmatprep.mubr.bf16.mxu0 %v6302_v10  ;;  %5301 = vmatprep.mubr.bf16.mxu1 %v892_v0  ;;  %v804_v18 = vpop.f32.mrf.mxu0  ;;  %v1813_v8 = vld [vmem:[#allocation2 + $0x122] sm:$0xff]  ;;  %v2479_v38 = vpack.c.bf16 %v2444_v12, %v2443_v24  ;;  %v5789_v59 = vld [vmem:[%s7763_s2 + $0x98] sm:$0xff]   ;;  %v7770_v12 = vpack.c.bf16 %v6202_v9, %v6195_v61 }
 0x18d   : > { %854 = vst [vmem:[#allocation2 + $0x138] sm:$0xff] %v804_v18  ;;  %v5787_v0 = vld [vmem:[%s7763_s2 + $0xa8] sm:$0xff]   ;;  %v2460_v9 = vld [vmem:[#allocation2 + $0x9c] sm:$0xff] }
 0x18e   : > { %v5228_v41 = vpop.f32.mrf.mxu0  ;;  %v2454_v18 = vld [vmem:[#allocation2 + $0x6c] sm:$0xff]  ;;  %v2457_v24 = vld [vmem:[#allocation2 + $0x84] sm:$0xff] }
 0x18f   : > { %v5793_v41 = vld [vmem:[%s7763_s2 + $0x88] sm:$0xff]  }
 0x190   : > { %v1814_v56 = vld [vmem:[#allocation2 + $0x12a] sm:$0xff]  ;;  %v809_v15 = vpop.f32.mrf.mxu0 }
 0x191   : > { %v1832_v20 = vpack.c.bf16 %v1814_v56, %v1813_v8  ;;  %855 = vst [vmem:[#allocation2 + $0x140] sm:$0xff] %v809_v15  ;;  %v2455_v56 = vld [vmem:[#allocation2 + $0x74] sm:$0xff]  ;;  %v7771_v15 = vpack.c.bf16 %v6210_v23, %v6207_v13  ;;  %v5800_v61 = vld [vmem:[%s7763_s2 + $0x1c8] sm:$0xff]  }
 0x192   : > { %v5231_v63 = vpop.f32.mrf.mxu0  ;;  %v2485_v37 = vpack.c.bf16 %v2456_v31, %v2455_v56  ;;  %v2459_v13 = vld [vmem:[#allocation2 + $0x94] sm:$0xff]  ;;  %v7780_v31 = vpack.c.bf16 %v6294_v33, %v6288_v3  ;;  %v2478_v11 = vld [vmem:[#allocation2 + $0x12c] sm:$0xff] }
 0x193   : > { %5302 = vmatmul.mubr.bf16.vlgmr.msra.gmra.mxu1 %v893_v46  ;;  %5438 = vmatmul.mubr.bf16.gmra.mxu0 %v1832_v20  ;;  %v2447_v46 = vld [vmem:[#allocation2 + $0x34] sm:$0xff]  ;;  %v2458_v20 = vld [vmem:[#allocation2 + $0x8c] sm:$0xff]  ;;  %v2487_v23 = vpack.c.bf16 %v2460_v9, %v2459_v13  ;;  %v3110_v9 = vld [vmem:[#allocation2 + $0x3d] sm:$0xff] }
 0x194   : > { %5338 = vmatpush3.bf16.msra.mxu1 %v6188_v55  ;;  %5305 = vmatprep.mubr.bf16.mxu1 %v894_v54  ;;  %v812_v40 = vpop.f32.mrf.mxu0  ;;  %v2481_v55 = vpack.c.bf16 %v2448_v29, %v2447_v46  ;;  %v2450_v54 = vld [vmem:[#allocation2 + $0x4c] sm:$0xff]  ;;  %v2486_v63 = vpack.c.bf16 %v2458_v20, %v2457_v24  ;;  %v2464_v29 = vld [vmem:[#allocation2 + $0xbc] sm:$0xff]  ;;  %v2463_v46 = vld [vmem:[#allocation2 + $0xb4] sm:$0xff] }
 0x195   : > { %5509 = vmatprep.mubr.bf16.mxu0 %v2479_v38  ;;  %5339 = vmatprep.subr.bf16.mxu1 %v5786_v39  ;;  %v5801_v38 = vld [vmem:[%s7763_s2 + $0x1c0] sm:$0xff]   ;;  %v7772_v40 = vpack.c.bf16 %v6218_v36, %v6215_v27  ;;  %v2489_v27 = vpack.c.bf16 %v2464_v29, %v2463_v46  ;;  %v7774_v36 = vpack.c.bf16 %v6240_v17, %v6237_v5  ;;  %v2470_v17 = vld [vmem:[#allocation2 + $0xec] sm:$0xff] }
 0x196   : > { %v5232_v26 = vpop.f32.mrf.mxu0  ;;  %v7777_v5 = vpack.c.bf16 %v6264_v30, %v6261_v14  ;;  %v1448_v14 = vld [vmem:[#allocation2 + $0xa] sm:$0xff]  ;;  %v2476_v30 = vld [vmem:[#allocation2 + $0x11c] sm:$0xff] }
 0x197   : > { %v6391_v26 = vld [vmem:[%s7763_s2 + $0x238] sm:$0xff]   ;;  %v5803_v20 = vld [vmem:[%s7763_s2 + $0x128] sm:$0xff]   ;;  %v6432_v46 = vld [vmem:[%s7763_s2 + $0x230] sm:$0xff]  }
 0x198   : > { %5340 = vmatpush3.bf16.msra.mxu1 %v5786_v39  ;;  %v6373_v39 = vld [vmem:[%s7763_s2 + $0x138] sm:$0xff]   ;;  %v3112_v13 = vld [vmem:[#allocation2 + $0x4d] sm:$0xff] }
 0x199   : > { %5341 = vmatprep.subr.bf16.mxu1 %v5787_v0 }
 0x19b   : > { %5306 = vmatmul.mubr.bf16.gmra.mxu1 %v895_v4  ;;  %5510 = vmatmul.mubr.bf16.vlgmr.msra.gmra.mxu0 %v2480_v45  ;;  %v2449_v4 = vld [vmem:[#allocation2 + $0x44] sm:$0xff]  ;;  %v2488_v45 = vpack.c.bf16 %v2462_v50, %v2461_v42 }
 0x19c   : > { %5309 = vmatprep.mubr.bf16.mxu1 %v896_v19  ;;  %5513 = vmatprep.mubr.bf16.mxu0 %v2481_v55  ;;  %v2482_v32 = vpack.c.bf16 %v2450_v54, %v2449_v4  ;;  %v5790_v19 = vld [vmem:[%s7763_s2 + $0x90] sm:$0xff]   ;;  %v2468_v55 = vld [vmem:[#allocation2 + $0xdc] sm:$0xff] }
 0x19d   : > { %5342 = vmatpush3.bf16.msra.mxu1 %v5787_v0  ;;  %5598 = vmatpush3.bf16.msra.mxu0 %v6229_v60  ;;  %v5795_v60 = vld [vmem:[%s7763_s2 + $0x1e0] sm:$0xff]   ;;  %v7773_v0 = vpack.c.bf16 %v6231_v62, %v6223_v44  ;;  %v7775_v44 = vpack.c.bf16 %v6248_v35, %v6245_v25  ;;  %v2466_v62 = vld [vmem:[#allocation2 + $0xcc] sm:$0xff]  ;;  %v2467_v54 = vld [vmem:[#allocation2 + $0xd4] sm:$0xff] }
 0x19e   : > { %5343 = vmatprep.subr.bf16.mxu1 %v5788_v48  ;;  %5599 = vmatprep.subr.bf16.mxu0 %v5792_v53  ;;  %v2472_v25 = vld [vmem:[#allocation2 + $0xfc] sm:$0xff]  ;;  %v2469_v35 = vld [vmem:[#allocation2 + $0xe4] sm:$0xff]  ;;  %v2471_v4 = vld [vmem:[#allocation2 + $0xf4] sm:$0xff] }
 0x19f   : > { %v2492_v2 = vpack.c.bf16 %v2470_v17, %v2469_v35  ;;  %v1455_v50 = vld [vmem:[#allocation2 + $0x42] sm:$0xff]  ;;  %v3113_v17 = vld [vmem:[#allocation2 + $0x55] sm:$0xff] }
 0x1a1   : > { %5344 = vmatpush3.bf16.msra.mxu1 %v5788_v48  ;;  %5600 = vmatpush3.bf16.msra.mxu0 %v5792_v53  ;;  %v2465_v48 = vld [vmem:[#allocation2 + $0xc4] sm:$0xff] }
 0x1a2   : > { %5345 = vmatprep.subr.bf16.mxu1 %v5789_v59  ;;  %5601 = vmatprep.subr.bf16.mxu0 %v5794_v57  ;;  %v2490_v53 = vpack.c.bf16 %v2466_v62, %v2465_v48  ;;  %v3114_v62 = vld [vmem:[#allocation2 + $0x5d] sm:$0xff]  ;;  %v6446_v48 = vld [vmem:[%s7763_s2 + $0x228] sm:$0xff]  }
 0x1a3   : > { %5310 = vmatmul.mubr.bf16.gmra.mxu1 %v897_v34  ;;  %5514 = vmatmul.mubr.bf16.gmra.mxu0 %v2482_v32  ;;  %v2453_v34 = vld [vmem:[#allocation2 + $0x64] sm:$0xff]  ;;  %v2493_v32 = vpack.c.bf16 %v2472_v25, %v2471_v4 }
 0x1a4   : > { %5313 = vmatprep.mubr.bf16.mxu1 %v898_v58  ;;  %5517 = vmatprep.mubr.bf16.mxu0 %v2483_v16  ;;  %v2484_v8 = vpack.c.bf16 %v2454_v18, %v2453_v34  ;;  %v5798_v58 = vld [vmem:[%s7763_s2 + $0x1d0] sm:$0xff]   ;;  %v2473_v16 = vld [vmem:[#allocation2 + $0x104] sm:$0xff] }
 0x1a5   : > { %5346 = vmatpush3.bf16.msra.mxu1 %v5789_v59  ;;  %5602 = vmatpush3.bf16.msra.mxu0 %v5794_v57  ;;  %v2491_v59 = vpack.c.bf16 %v2468_v55, %v2467_v54  ;;  %v7776_v57 = vpack.c.bf16 %v6256_v6, %v6253_v49  ;;  %v7779_v49 = vpack.c.bf16 %v6283_v51, %v6277_v21  ;;  %v2474_v6 = vld [vmem:[#allocation2 + $0x10c] sm:$0xff]  ;;  %v2475_v18 = vld [vmem:[#allocation2 + $0x114] sm:$0xff]  ;;  %v2477_v34 = vld [vmem:[#allocation2 + $0x124] sm:$0xff] }
 0x1a6   : > { %5347 = vmatprep.subr.bf16.mxu1 %v5790_v19  ;;  %5603 = vmatprep.subr.bf16.mxu0 %v5795_v60  ;;  %v1452_v21 = vld [vmem:[#allocation2 + $0x2a] sm:$0xff]  ;;  %v1449_v51 = vld [vmem:[#allocation2 + $0x12] sm:$0xff]  ;;  %v1459_v4 = vld [vmem:[#allocation2 + $0x62] sm:$0xff] }
 0x1a7   : > { %v1484_v56 = vpack.c.bf16 %v1450_v47, %v1449_v51  ;;  %v5805_v55 = vld [vmem:[%s7763_s2 + $0x118] sm:$0xff]   ;;  %v3120_v47 = vld [vmem:[#allocation2 + $0x8d] sm:$0xff] }
 0x1a9   : > { %5348 = vmatpush3.bf16.msra.mxu1 %v5790_v19  ;;  %5604 = vmatpush3.bf16.msra.mxu0 %v5795_v60  ;;  %v2494_v19 = vpack.c.bf16 %v2474_v6, %v2473_v16  ;;  %v1447_v60 = vld [vmem:[#allocation2 + $0x2] sm:$0xff]  ;;  %v5806_v6 = vld [vmem:[%s7763_s2 + $0x110] sm:$0xff]  }
 0x1aa   : > { %5349 = vmatprep.subr.bf16.mxu1 %v5793_v41  ;;  %5605 = vmatprep.subr.bf16.mxu0 %v5797_v22 }
 0x1ab   : > { %5314 = vmatmul.mubr.bf16.gmra.mxu1 %v7770_v12  ;;  %5518 = vmatmul.mubr.bf16.gmra.mxu0 %v2484_v8  ;;  %v3108_v8 = vld [vmem:[#allocation2 + $0x2d] sm:$0xff] }
 0x1ac   : > { %5317 = vmatprep.mubr.bf16.mxu1 %v7771_v15  ;;  %5521 = vmatprep.mubr.bf16.mxu0 %v2485_v37  ;;  %v2496_v37 = vpack.c.bf16 %v2478_v11, %v2477_v34  ;;  %v3107_v15 = vld [vmem:[#allocation2 + $0x25] sm:$0xff]  ;;  %v1461_v11 = vld [vmem:[#allocation2 + $0x72] sm:$0xff] }
 0x1ad   : > { %5350 = vmatpush3.bf16.msra.mxu1 %v5793_v41  ;;  %5606 = vmatpush3.bf16.msra.mxu0 %v5797_v22  ;;  %v1483_v41 = vpack.c.bf16 %v1448_v14, %v1447_v60  ;;  %v2495_v22 = vpack.c.bf16 %v2476_v30, %v2475_v18  ;;  %v3143_v33 = vpack.c.bf16 %v3108_v8, %v3107_v15  ;;  %v6462_v14 = vld [vmem:[%s7763_s2 + $0x220] sm:$0xff]   ;;  %v5809_v18 = vld [vmem:[%s7763_s2 + $0x108] sm:$0xff]  }
 0x1ae   : > { %5351 = vmatprep.subr.bf16.mxu1 %v5796_v52  ;;  %5607 = vmatprep.subr.bf16.mxu0 %v5798_v58  ;;  %v3118_v60 = vld [vmem:[#allocation2 + $0x7d] sm:$0xff] }
 0x1af   : > { %v5812_v15 = vld [vmem:[%s7763_s2 + $0x100] sm:$0xff]  }
 0x1b1   : > { %5352 = vmatpush3.bf16.msra.mxu1 %v5796_v52  ;;  %5608 = vmatpush3.bf16.msra.mxu0 %v5798_v58  ;;  %v1451_v52 = vld [vmem:[#allocation2 + $0x22] sm:$0xff]  ;;  %v5802_v58 = vld [vmem:[%s7763_s2 + $0x130] sm:$0xff]  }
 0x1b2   : > { %5441 = vmatprep.subr.bf16.mxu1 %v6373_v39  ;;  %5609 = vmatprep.subr.bf16.mxu0 %v5800_v61  ;;  %v1485_v12 = vpack.c.bf16 %v1452_v21, %v1451_v52  ;;  %v3117_v21 = vld [vmem:[#allocation2 + $0x75] sm:$0xff]  ;;  %v3119_v52 = vld [vmem:[#allocation2 + $0x85] sm:$0xff] }
 0x1b3   : > { %5318 = vmatmul.mubr.bf16.gmra.mxu1 %v7772_v40  ;;  %5522 = vmatmul.mubr.bf16.gmra.mxu0 %v2486_v63  ;;  %v1456_v63 = vld [vmem:[#allocation2 + $0x4a] sm:$0xff] }
 0x1b4   : > { %5321 = vmatprep.mubr.bf16.mxu1 %v7773_v0  ;;  %5525 = vmatprep.mubr.bf16.mxu0 %v2487_v23  ;;  %v1453_v23 = vld [vmem:[#allocation2 + $0x32] sm:$0xff]  ;;  %v1487_v29 = vpack.c.bf16 %v1456_v63, %v1455_v50  ;;  %v3122_v63 = vld [vmem:[#allocation2 + $0x9d] sm:$0xff] }
 0x1b5   : > { %5610 = vmatpush3.bf16.msra.mxu0 %v5800_v61  ;;  %v1454_v61 = vld [vmem:[#allocation2 + $0x3a] sm:$0xff]  ;;  %v1465_v50 = vld [vmem:[#allocation2 + $0x92] sm:$0xff] }
 0x1b6   : > { %5611 = vmatprep.subr.bf16.mxu0 %v5801_v38  ;;  %v1486_v40 = vpack.c.bf16 %v1454_v61, %v1453_v23  ;;  %v6508_v23 = vld [vmem:[%s7763_s2 + $0x208] sm:$0xff]  }
 0x1b9   : > { %5612 = vmatpush3.bf16.msra.mxu0 %v5801_v38  ;;  %v3109_v38 = vld [vmem:[#allocation2 + $0x35] sm:$0xff] }
 0x1ba   : > { %5649 = vmatprep.subr.bf16.mxu0 %v6391_v26  ;;  %v3144_v0 = vpack.c.bf16 %v3110_v9, %v3109_v38  ;;  %v1466_v9 = vld [vmem:[#allocation2 + $0x9a] sm:$0xff] }
 0x1bb   : > { %5322 = vmatmul.mubr.bf16.gmra.mxu1 %v7774_v36  ;;  %5526 = vmatmul.mubr.bf16.gmra.mxu0 %v2488_v45  ;;  %v5804_v45 = vld [vmem:[%s7763_s2 + $0x120] sm:$0xff]  }
 0x1bc   : > { %5325 = vmatprep.mubr.bf16.mxu1 %v7775_v44  ;;  %5529 = vmatprep.mubr.bf16.mxu0 %v2489_v27  ;;  %v1458_v44 = vld [vmem:[#allocation2 + $0x5a] sm:$0xff] }
 0x1c3   : > { %5326 = vmatmul.mubr.bf16.gmra.mxu1 %v7776_v57  ;;  %5530 = vmatmul.mubr.bf16.gmra.mxu0 %v2490_v53  ;;  %v3116_v57 = vld [vmem:[#allocation2 + $0x6d] sm:$0xff] }
 0x1c4   : > { %5329 = vmatprep.mubr.bf16.mxu1 %v7777_v5  ;;  %5533 = vmatprep.mubr.bf16.mxu0 %v2491_v59  ;;  %v1460_v59 = vld [vmem:[#allocation2 + $0x6a] sm:$0xff]  ;;  %v1457_v5 = vld [vmem:[#allocation2 + $0x52] sm:$0xff] }
 0x1c5   : > { %v1488_v35 = vpack.c.bf16 %v1458_v44, %v1457_v5  ;;  %v1467_v44 = vld [vmem:[#allocation2 + $0xa2] sm:$0xff] }
 0x1cb   : > { %5330 = vmatmul.mubr.bf16.gmra.mxu1 %v7778_v7  ;;  %5534 = vmatmul.mubr.bf16.gmra.mxu0 %v2492_v2  ;;  %v6418_v3 = vpop.f32.mrf.mxu1  ;;  %v3146_v2 = vpack.c.bf16 %v3114_v62, %v3113_v17  ;;  %v1489_v7 = vpack.c.bf16 %v1460_v59, %v1459_v4  ;;  %v3123_v62 = vld [vmem:[#allocation2 + $0xa5] sm:$0xff] }
 0x1cc   : > { %5333 = vmatprep.mubr.bf16.mxu1 %v7779_v49  ;;  %5537 = vmatprep.mubr.bf16.mxu0 %v2493_v32  ;;  %v3115_v32 = vld [vmem:[#allocation2 + $0x65] sm:$0xff] }
 0x1cd   : > { %v6424_v24 = vpop.f32.mrf.mxu1  ;;  %v3147_v49 = vpack.c.bf16 %v3116_v57, %v3115_v32  ;;  %v6520_v57 = vld [vmem:[%s7763_s2 + $0x200] sm:$0xff]  }
 0x1cf   : > { %v6434_v27 = vpop.f32.mrf.mxu1 }
 0x1d1   : > { %v6448_v53 = vpop.f32.mrf.mxu1 }
 0x1d3   : > { %5334 = vmatmul.mubr.bf16.gmra.mxu1 %v7780_v31  ;;  %5538 = vmatmul.mubr.bf16.gmra.mxu0 %v2494_v19  ;;  %v1462_v19 = vld [vmem:[#allocation2 + $0x7a] sm:$0xff]  ;;  %v1464_v31 = vld [vmem:[#allocation2 + $0x8a] sm:$0xff] }
 0x1d4   : > { %5353 = vmatprep.mubr.bf16.mxu1 %v1483_v41  ;;  %5541 = vmatprep.mubr.bf16.mxu0 %v2495_v22  ;;  %v6436_v36 = vpop.f32.mrf.mxu0  ;;  %v6476_v41 = vld [vmem:[%s7763_s2 + $0x218] sm:$0xff]   ;;  %v1490_v8 = vpack.c.bf16 %v1462_v19, %v1461_v11 }
 0x1d5   : > { %7781 = vst [vmem:[#allocation3_spill] sm:$0xff] %v6436_v36  ;;  %v3125_v19 = vld [vmem:[#allocation2 + $0xb5] sm:$0xff]  ;;  %v4027_v36 = vld [vmem:[%s7767_s6 + $0x100] sm:$0xff] }
 0x1d6   : > { %v6450_v54 = vpop.f32.mrf.mxu0 }
 0x1d7   : > { %7782 = vst [vmem:[#allocation4_spill] sm:$0xff] %v6450_v54 }
 0x1d8   : > { %v6464_v30 = vpop.f32.mrf.mxu0 }
 0x1d9   : > { %7783 = vst [vmem:[#allocation5_spill] sm:$0xff] %v6464_v30  ;;  %v4026_v30 = vld [vmem:[%s7767_s6 + $0xf8] sm:$0xff] }
 0x1da   : > { %v6478_v22 = vpop.f32.mrf.mxu0 }
 0x1db   : > { %5354 = vmatmul.mubr.bf16.vlgmr.msra.gmra.mxu1 %v1484_v56  ;;  %5542 = vmatmul.mubr.bf16.gmra.mxu0 %v2496_v37  ;;  %v6452_v25 = vpop.f32.mrf.mxu1  ;;  %7784 = vst [vmem:[#allocation6_spill] sm:$0xff] %v6478_v22  ;;  %v3148_v56 = vpack.c.bf16 %v3118_v60, %v3117_v21  ;;  %v1463_v37 = vld [vmem:[#allocation2 + $0x82] sm:$0xff] }
 0x1dc   : > { %5442 = vmatpush3.bf16.msra.mxu1 %v6373_v39  ;;  %5357 = vmatprep.mubr.bf16.mxu1 %v1485_v12  ;;  %v3111_v39 = vld [vmem:[#allocation2 + $0x45] sm:$0xff]  ;;  %v3149_v12 = vpack.c.bf16 %v3120_v47, %v3119_v52  ;;  %v1474_v52 = vld [vmem:[#allocation2 + $0xda] sm:$0xff] }
 0x1dd   : > { %5613 = vmatprep.mubr.bf16.mxu0 %v3143_v33  ;;  %5443 = vmatprep.subr.bf16.mxu1 %v5802_v58  ;;  %v3145_v42 = vpack.c.bf16 %v3112_v13, %v3111_v39  ;;  %v6466_v16 = vpop.f32.mrf.mxu1  ;;  %v6492_v33 = vld [vmem:[%s7763_s2 + $0x210] sm:$0xff]   ;;  %v6503_v13 = vld [vmem:[%s7763_s2 + $0x1b8] sm:$0xff]   ;;  %v3127_v47 = vld [vmem:[#allocation2 + $0xc5] sm:$0xff] }
 0x1de   : > { %v3121_v39 = vld [vmem:[#allocation2 + $0x95] sm:$0xff] }
 0x1df   : > { %v6480_v51 = vpop.f32.mrf.mxu1 }
 0x1e0   : > { %5444 = vmatpush3.bf16.msra.mxu1 %v5802_v58  ;;  %v1491_v58 = vpack.c.bf16 %v1464_v31, %v1463_v37  ;;  %v1471_v31 = vld [vmem:[#allocation2 + $0xc2] sm:$0xff] }
 0x1e1   : > { %5445 = vmatprep.subr.bf16.mxu1 %v5803_v20 }
 0x1e3   : > { %5358 = vmatmul.mubr.bf16.gmra.mxu1 %v1486_v40  ;;  %5614 = vmatmul.mubr.bf16.vlgmr.msra.gmra.mxu0 %v3144_v0  ;;  %v1468_v40 = vld [vmem:[#allocation2 + $0xaa] sm:$0xff] }
 0x1e4   : > { %5361 = vmatprep.mubr.bf16.mxu1 %v1487_v29  ;;  %5617 = vmatprep.mubr.bf16.mxu0 %v3145_v42  ;;  %v6482_v34 = vpop.f32.mrf.mxu0  ;;  %v3124_v0 = vld [vmem:[#allocation2 + $0xad] sm:$0xff]  ;;  %v1492_v42 = vpack.c.bf16 %v1466_v9, %v1465_v50 }
 0x1e5   : > { %5446 = vmatpush3.bf16.msra.mxu1 %v5803_v20  ;;  %5650 = vmatpush3.bf16.msra.mxu0 %v6391_v26  ;;  %7785 = vst [vmem:[#allocation7_spill] sm:$0xff] %v6482_v34  ;;  %v6494_v20 = vpop.f32.mrf.mxu1  ;;  %v3151_v59 = vpack.c.bf16 %v3124_v0, %v3123_v62  ;;  %v1473_v9 = vld [vmem:[#allocation2 + $0xd2] sm:$0xff]  ;;  %v4023_v34 = vld [vmem:[%s7767_s6 + $0xe0] sm:$0xff] }
 0x1e6   : > { %5447 = vmatprep.subr.bf16.mxu1 %v5804_v45  ;;  %5651 = vmatprep.subr.bf16.mxu0 %v6432_v46  ;;  %v6496_v61 = vpop.f32.mrf.mxu0  ;;  %v1496_v0 = vpack.c.bf16 %v1474_v52, %v1473_v9  ;;  %v3139_v9 = vld [vmem:[#allocation2 + $0x125] sm:$0xff] }
 0x1e7   : > { %7786 = vst [vmem:[#allocation8_spill] sm:$0xff] %v6496_v61 }
 0x1e8   : > { %v6512_v29 = vpop.f32.mrf.mxu0 }
 0x1e9   : > { %5448 = vmatpush3.bf16.msra.mxu1 %v5804_v45  ;;  %5652 = vmatpush3.bf16.msra.mxu0 %v6432_v46  ;;  %7787 = vst [vmem:[#allocation9_spill] sm:$0xff] %v6512_v29  ;;  %v3150_v45 = vpack.c.bf16 %v3122_v63, %v3121_v39  ;;  %v3129_v63 = vld [vmem:[#allocation2 + $0xd5] sm:$0xff]  ;;  %v3131_v39 = vld [vmem:[#allocation2 + $0xe5] sm:$0xff] }
 0x1ea   : > { %5449 = vmatprep.subr.bf16.mxu1 %v5805_v55  ;;  %5653 = vmatprep.subr.bf16.mxu0 %v6446_v48  ;;  %v6524_v17 = vpop.f32.mrf.mxu0  ;;  %v4022_v29 = vld [vmem:[%s7767_s6 + $0xd8] sm:$0xff] }
 0x1eb   : > { %5362 = vmatmul.mubr.bf16.gmra.mxu1 %v1488_v35  ;;  %5618 = vmatmul.mubr.bf16.gmra.mxu0 %v3146_v2  ;;  %v6510_v38 = vpop.f32.mrf.mxu1  ;;  %7788 = vst [vmem:[#allocation10_spill] sm:$0xff] %v6524_v17  ;;  %v1470_v35 = vld [vmem:[#allocation2 + $0xba] sm:$0xff] }
 0x1ec   : > { %5365 = vmatprep.mubr.bf16.mxu1 %v1489_v7  ;;  %5621 = vmatprep.mubr.bf16.mxu0 %v3147_v49  ;;  %v3126_v2 = vld [vmem:[#allocation2 + $0xbd] sm:$0xff]  ;;  %v1472_v7 = vld [vmem:[#allocation2 + $0xca] sm:$0xff] }
 0x1ed   : > { %5450 = vmatpush3.bf16.msra.mxu1 %v5805_v55  ;;  %5654 = vmatpush3.bf16.msra.mxu0 %v6446_v48  ;;  %v1493_v55 = vpack.c.bf16 %v1468_v40, %v1467_v44  ;;  %v6522_v5 = vpop.f32.mrf.mxu1  ;;  %v3128_v49 = vld [vmem:[#allocation2 + $0xcd] sm:$0xff]  ;;  %v1495_v11 = vpack.c.bf16 %v1472_v7, %v1471_v31 }
 0x1ee   : > { %5451 = vmatprep.subr.bf16.mxu1 %v5806_v6  ;;  %5655 = vmatprep.subr.bf16.mxu0 %v6462_v14  ;;  %v3153_v21 = vpack.c.bf16 %v3128_v49, %v3127_v47  ;;  %v2112_v47 = vld [vmem:[#allocation2 + $0x1b] sm:$0xff] }
 0x1ef   : > { %v6528_v4 = vpop.f32.mrf.mxu1 }
 0x1f1   : > { %5452 = vmatpush3.bf16.msra.mxu1 %v5806_v6  ;;  %5656 = vmatpush3.bf16.msra.mxu0 %v6462_v14  ;;  %v1469_v6 = vld [vmem:[#allocation2 + $0xb2] sm:$0xff] }
 0x1f2   : > { %5453 = vmatprep.subr.bf16.mxu1 %v5809_v18  ;;  %5657 = vmatprep.subr.bf16.mxu0 %v6476_v41  ;;  %v1494_v60 = vpack.c.bf16 %v1470_v35, %v1469_v6  ;;  %v3133_v35 = vld [vmem:[#allocation2 + $0xf5] sm:$0xff]  ;;  %v3135_v6 = vld [vmem:[#allocation2 + $0x105] sm:$0xff] }
 0x1f3   : > { %5366 = vmatmul.mubr.bf16.gmra.mxu1 %v1490_v8  ;;  %5622 = vmatmul.mubr.bf16.gmra.mxu0 %v3148_v56  ;;  %v6533_v8 = vpop.f32.mrf.mxu1 }
 0x1f4   : > { %5369 = vmatprep.mubr.bf16.mxu1 %v1491_v58  ;;  %5625 = vmatprep.mubr.bf16.mxu0 %v3149_v12  ;;  %v6530_v32 = vpop.f32.mrf.mxu0  ;;  %v3130_v58 = vld [vmem:[#allocation2 + $0xdd] sm:$0xff] }
 0x1f5   : > { %5454 = vmatpush3.bf16.msra.mxu1 %v5809_v18  ;;  %5658 = vmatpush3.bf16.msra.mxu0 %v6476_v41  ;;  %7789 = vst [vmem:[#allocation11_spill] sm:$0xff] %v6530_v32  ;;  %v3152_v18 = vpack.c.bf16 %v3126_v2, %v3125_v19  ;;  %v3154_v50 = vpack.c.bf16 %v3130_v58, %v3129_v63 }
 0x1f6   : > { %5455 = vmatprep.subr.bf16.mxu1 %v5812_v15  ;;  %5659 = vmatprep.subr.bf16.mxu0 %v6492_v33  ;;  %v6535_v56 = vpop.f32.mrf.mxu0 }
 0x1f7   : > { %7790 = vst [vmem:[#allocation12_spill] sm:$0xff] %v6535_v56 }
 0x1f8   : > { %v6539_v12 = vpop.f32.mrf.mxu0 }
 0x1f9   : > { %5456 = vmatpush3.bf16.msra.mxu1 %v5812_v15  ;;  %5660 = vmatpush3.bf16.msra.mxu0 %v6492_v33  ;;  %7791 = vst [vmem:[#allocation13_spill] sm:$0xff] %v6539_v12  ;;  %v3132_v15 = vld [vmem:[#allocation2 + $0xed] sm:$0xff] }
 0x1fa   : > { %5545 = vmatprep.subr.bf16.mxu1 %v6503_v13  ;;  %5661 = vmatprep.subr.bf16.mxu0 %v6508_v23 }
 0x1fb   : > { %5370 = vmatmul.mubr.bf16.gmra.mxu1 %v1492_v42  ;;  %5626 = vmatmul.mubr.bf16.gmra.mxu0 %v3150_v45  ;;  %v6537_v37 = vpop.f32.mrf.mxu1  ;;  %v3155_v42 = vpack.c.bf16 %v3132_v15, %v3131_v39  ;;  %v6543_v45 = vpop.f32.mrf.mxu0  ;;  %v2111_v15 = vld [vmem:[#allocation2 + $0x13] sm:$0xff] }
 0x1fc   : > { %5373 = vmatprep.mubr.bf16.mxu1 %v1493_v55  ;;  %5629 = vmatprep.mubr.bf16.mxu0 %v3151_v59  ;;  %7792 = vst [vmem:[#allocation14_spill] sm:$0xff] %v6543_v45  ;;  %v3134_v55 = vld [vmem:[#allocation2 + $0xfd] sm:$0xff]  ;;  %v3136_v59 = vld [vmem:[#allocation2 + $0x10d] sm:$0xff]  ;;  %v2147_v63 = vpack.c.bf16 %v2112_v47, %v2111_v15  ;;  %v3141_v39 = vld [vmem:[#allocation2 + $0x135] sm:$0xff] }
 0x1fd   : > { %5662 = vmatpush3.bf16.msra.mxu0 %v6508_v23  ;;  %v6541_v40 = vpop.f32.mrf.mxu1  ;;  %v3156_v49 = vpack.c.bf16 %v3134_v55, %v3133_v35  ;;  %v3157_v19 = vpack.c.bf16 %v3136_v59, %v3135_v6  ;;  %v2116_v35 = vld [vmem:[#allocation2 + $0x3b] sm:$0xff]  ;;  %v3440_v6 = vld [vmem:[#allocation2 + $0x2e] sm:$0xff]  ;;  %v3439_v15 = vld [vmem:[#allocation2 + $0x26] sm:$0xff] }
 0x1fe   : > { %5663 = vmatprep.subr.bf16.mxu0 %v6520_v57 }
 0x1ff   : > { %v6546_v44 = vpop.f32.mrf.mxu1 }
 0x201   : > { %5664 = vmatpush3.bf16.msra.mxu0 %v6520_v57  ;;  %v6550_v2 = vpop.f32.mrf.mxu1 }
 0x203   : > { %5374 = vmatmul.mubr.bf16.gmra.mxu1 %v1494_v60  ;;  %5630 = vmatmul.mubr.bf16.gmra.mxu0 %v3152_v18  ;;  %v3138_v18 = vld [vmem:[#allocation2 + $0x11d] sm:$0xff] }
 0x204   : > { %5377 = vmatprep.mubr.bf16.mxu1 %v1495_v11  ;;  %5633 = vmatprep.mubr.bf16.mxu0 %v3153_v21  ;;  %v6548_v62 = vpop.f32.mrf.mxu0  ;;  %v3140_v11 = vld [vmem:[#allocation2 + $0x12d] sm:$0xff]  ;;  %v3137_v21 = vld [vmem:[#allocation2 + $0x115] sm:$0xff] }
 0x205   : > { %7793 = vst [vmem:[#allocation15_spill] sm:$0xff] %v6548_v62  ;;  %v3158_v58 = vpack.c.bf16 %v3138_v18, %v3137_v21  ;;  %v5837_v21 = vmov 0   ;;  %v4002_v62 = vld [vmem:[%s7767_s6 + $0x38] sm:$0xff] }
 0x206   : > { %v6552_v7 = vpop.f32.mrf.mxu0  ;;  %5730 = vset.pattern.permute.xlu0 %v5837_v21  ;;  %5731 = vset.pattern.permute.xlu1 %v5837_v21  ;;  %v3441_v21 = vld [vmem:[#allocation2 + $0x36] sm:$0xff] }
 0x207   : > { %7794 = vst [vmem:[#allocation16_spill] sm:$0xff] %v6552_v7  ;;  %v5822_v7 = vld [vmem:[%s7763_s2 + $0x190] sm:$0xff]  }
 0x20b   : > { %5378 = vmatmul.mubr.bf16.gmra.mxu1 %v1496_v0  ;;  %5634 = vmatmul.mubr.bf16.gmra.mxu0 %v3154_v50  ;;  %v6554_v60 = vpop.f32.mrf.mxu1  ;;  %v3159_v0 = vpack.c.bf16 %v3140_v11, %v3139_v9  ;;  %v2115_v11 = vld [vmem:[#allocation2 + $0x33] sm:$0xff] }
 0x20c   : > { %5381 = vmatprep.mubr.bf16.mxu1 %v6280_v43  ;;  %5637 = vmatprep.mubr.bf16.mxu0 %v3155_v42  ;;  %v6558_v43 = vpop.f32.mrf.mxu0  ;;  %v3142_v42 = vld [vmem:[#allocation2 + $0x13d] sm:$0xff] }
 0x20d   : > { %7795 = vst [vmem:[#allocation17_spill] sm:$0xff] %v6558_v43  ;;  %v6560_v31 = vpop.f32.mrf.mxu1  ;;  %v3160_v47 = vpack.c.bf16 %v3142_v42, %v3141_v39  ;;  %v5819_v39 = vld [vmem:[%s7763_s2 + $0x1a8] sm:$0xff]  }
 0x20e   : > { %v6562_v52 = vpop.f32.mrf.mxu0  ;;  %v2118_v42 = vld [vmem:[#allocation2 + $0x4b] sm:$0xff] }
 0x20f   : > { %7796 = vst [vmem:[#allocation18_spill] sm:$0xff] %v6562_v52 }
 0x213   : > { %5382 = vmatmul.mubr.bf16.gmra.mxu1 %v6291_v28  ;;  %5638 = vmatmul.mubr.bf16.gmra.mxu0 %v3156_v49  ;;  %v6564_v28 = vpop.f32.mrf.mxu1  ;;  %v2113_v49 = vld [vmem:[#allocation2 + $0x23] sm:$0xff] }
 0x214   : > { %5385 = vmatprep.mubr.bf16.mxu1 %v6299_v1  ;;  %5641 = vmatprep.mubr.bf16.mxu0 %v3157_v19  ;;  %v6566_v50 = vpop.f32.mrf.mxu0  ;;  %v2114_v1 = vld [vmem:[#allocation2 + $0x2b] sm:$0xff] }
 0x215   : > { %7797 = vst [vmem:[#allocation19_spill] sm:$0xff] %v6566_v50  ;;  %v6569_v55 = vpop.f32.mrf.mxu1  ;;  %v2148_v18 = vpack.c.bf16 %v2114_v1, %v2113_v49  ;;  %v3997_v49 = vld [vmem:[%s7767_s6 + $0x10] sm:$0xff] }
 0x216   : > { %v6571_v59 = vpop.f32.mrf.mxu0  ;;  %4043 = vperm.xlu1 %5731, %v3997_v49   ;;  %v5820_v49 = vld [vmem:[%s7763_s2 + $0x1a0] sm:$0xff]  }
 0x217   : > { %7798 = vst [vmem:[#allocation20_spill] sm:$0xff] %v6571_v59  ;;  %v3443_v59 = vld [vmem:[#allocation2 + $0x46] sm:$0xff] }
 0x218   : > { %v6578_v9 = vpop.f32.mrf.mxu0 }
 0x219   : > { %7799 = vst [vmem:[#allocation21_spill] sm:$0xff] %v6578_v9  ;;  %v2119_v9 = vld [vmem:[#allocation2 + $0x53] sm:$0xff] }
 0x21b   : > { %5386 = vmatmul.mubr.bf16.gmra.mxu1 %v6302_v10  ;;  %5642 = vmatmul.mubr.bf16.gmra.mxu0 %v3158_v58  ;;  %v6573_v19 = vpop.f32.mrf.mxu1  ;;  %v5818_v10 = vld [vmem:[%s7763_s2 + $0x1b0] sm:$0xff]   ;;  %v2149_v58 = vpack.c.bf16 %v2116_v35, %v2115_v11  ;;  %v3442_v35 = vld [vmem:[#allocation2 + $0x3e] sm:$0xff] }
 0x21c   : > { %5457 = vmatprep.mubr.bf16.mxu1 %v2147_v63  ;;  %5645 = vmatprep.mubr.bf16.mxu0 %v3159_v0  ;;  %v3475_v63 = vpack.c.bf16 %v3440_v6, %v3439_v15  ;;  %v3995_v0 = vld [vmem:[%s7767_s6] sm:$0xff]  ;;  %v6592_v6 = vpop.f32.mrf.mxu0 }
 0x21d   : > { %v6584_v1 = vpop.f32.mrf.mxu1  ;;  %4033 = vperm.xlu0 %5730, %v3995_v0   ;;  %7800 = vst [vmem:[#allocation22_spill] sm:$0xff] %v6592_v6  ;;  %v2117_v11 = vld [vmem:[#allocation2 + $0x43] sm:$0xff]  ;;  %v3476_v0 = vpack.c.bf16 %v3442_v35, %v3441_v21 }
 0x21e   : > { %v2121_v21 = vld [vmem:[#allocation2 + $0x63] sm:$0xff] }
 0x223   : > { %5458 = vmatmul.mubr.bf16.vlgmr.msra.gmra.mxu1 %v2148_v18  ;;  %5646 = vmatmul.mubr.bf16.gmra.mxu0 %v3160_v47  ;;  %v2120_v18 = vld [vmem:[#allocation2 + $0x5b] sm:$0xff]  ;;  %v3996_v47 = vld [vmem:[%s7767_s6 + $0x8] sm:$0xff] }
 0x224   : > { %5546 = vmatpush3.bf16.msra.mxu1 %v6503_v13  ;;  %5461 = vmatprep.mubr.bf16.mxu1 %v2149_v58  ;;  %v3444_v13 = vld [vmem:[#allocation2 + $0x4e] sm:$0xff]  ;;  %v6597_v58 = vpop.f32.mrf.mxu1  ;;  %v6599_v15 = vpop.f32.mrf.mxu0  ;;  %v2151_v6 = vpack.c.bf16 %v2120_v18, %v2119_v9  ;;  %v3446_v9 = vld [vmem:[#allocation2 + $0x5e] sm:$0xff] }
 0x225   : > { %5665 = vmatprep.mubr.bf16.mxu0 %v3475_v63  ;;  %5547 = vmatprep.subr.bf16.mxu1 %v5818_v10  ;;  %7801 = vst [vmem:[#allocation23_spill] sm:$0xff] %v6599_v15  ;;  %v2150_v63 = vpack.c.bf16 %v2118_v42, %v2117_v11  ;;  %v3477_v50 = vpack.c.bf16 %v3444_v13, %v3443_v59  ;;  %v3999_v42 = vld [vmem:[%s7767_s6 + $0x20] sm:$0xff]  ;;  %v2122_v18 = vld [vmem:[#allocation2 + $0x6b] sm:$0xff]  ;;  %v5821_v13 = vld [vmem:[%s7763_s2 + $0x198] sm:$0xff]  }
 0x226   : > { %4038 = vperm.xlu0 %5730, %v3996_v47   ;;  %v6610_v35 = vpop.f32.mrf.mxu1  ;;  %v6612_v59 = vpop.f32.mrf.mxu0  ;;  %v4000_v47 = vld [vmem:[%s7767_s6 + $0x28] sm:$0xff]  ;;  %v2123_v15 = vld [vmem:[#allocation2 + $0x73] sm:$0xff] }
 0x227   : > { %7802 = vst [vmem:[#allocation24_spill] sm:$0xff] %v6612_v59  ;;  %v3448_v11 = vld [vmem:[#allocation2 + $0x6e] sm:$0xff] }
 0x228   : > { %5548 = vmatpush3.bf16.msra.mxu1 %v5818_v10  ;;  %v3998_v10 = vld [vmem:[%s7767_s6 + $0x18] sm:$0xff] }
 0x229   : > { %5549 = vmatprep.subr.bf16.mxu1 %v5819_v39  ;;  %4048 = vperm.xlu1 %5731, %v3998_v10   ;;  %v2152_v10 = vpack.c.bf16 %v2122_v18, %v2121_v21  ;;  %v2126_v18 = vld [vmem:[#allocation2 + $0x8b] sm:$0xff] }
 0x22a   : > { %4053 = vperm.xlu0 %5730, %v3999_v42   ;;  %v3447_v42 = vld [vmem:[#allocation2 + $0x66] sm:$0xff] }
 0x22b   : > { %5462 = vmatmul.mubr.bf16.gmra.mxu1 %v2150_v63  ;;  %5666 = vmatmul.mubr.bf16.vlgmr.msra.gmra.mxu0 %v3476_v0  ;;  %v3445_v63 = vld [vmem:[#allocation2 + $0x56] sm:$0xff]  ;;  %v6625_v0 = vpop.f32.mrf.mxu0  ;;  %v3479_v43 = vpack.c.bf16 %v3448_v11, %v3447_v42  ;;  %v5824_v42 = vld [vmem:[%s7763_s2 + $0x180] sm:$0xff]  }
 0x22c   : > { %5465 = vmatprep.mubr.bf16.mxu1 %v2151_v6  ;;  %5669 = vmatprep.mubr.bf16.mxu0 %v3477_v50  ;;  %v6620_v6 = vpop.f32.mrf.mxu1  ;;  %v2124_v50 = vld [vmem:[#allocation2 + $0x7b] sm:$0xff]  ;;  %7803 = vst [vmem:[#allocation25_spill] sm:$0xff] %v6625_v0  ;;  %v3478_v59 = vpack.c.bf16 %v3446_v9, %v3445_v63  ;;  %v2127_v63 = vld [vmem:[#allocation2 + $0x93] sm:$0xff] }
 0x22d   : > { %5550 = vmatpush3.bf16.msra.mxu1 %v5819_v39  ;;  %v4001_v39 = vld [vmem:[%s7767_s6 + $0x30] sm:$0xff]  ;;  %4058 = vperm.xlu1 %5731, %v4000_v47   ;;  %v2153_v52 = vpack.c.bf16 %v2124_v50, %v2123_v15  ;;  %v6638_v15 = vpop.f32.mrf.mxu0  ;;  %v3450_v9 = vld [vmem:[#allocation2 + $0x7e] sm:$0xff]  ;;  %v5823_v47 = vld [vmem:[%s7763_s2 + $0x188] sm:$0xff]  }
 0x22e   : > { %5551 = vmatprep.subr.bf16.mxu1 %v5820_v49  ;;  %4063 = vperm.xlu0 %5730, %v4001_v39   ;;  %v6633_v45 = vpop.f32.mrf.mxu1  ;;  %7805 = vst [vmem:[#allocation27_spill] sm:$0xff] %v6638_v15  ;;  %v3449_v11 = vld [vmem:[#allocation2 + $0x76] sm:$0xff] }
 0x22f   : > { %7804 = vst [vmem:[#allocation26_spill] sm:$0xff] %v6633_v45  ;;  %v3480_v21 = vpack.c.bf16 %v3450_v9, %v3449_v11  ;;  %v2129_v11 = vld [vmem:[#allocation2 + $0xa3] sm:$0xff]  ;;  %v4018_v0 = vld [vmem:[%s7767_s6 + $0xb8] sm:$0xff] }
 0x230   : > { %v6646_v50 = vpop.f32.mrf.mxu1  ;;  %v2798_v45 = vld [vmem:[#allocation2 + $0xdc] sm:$0xff] }
 0x231   : > { %5552 = vmatpush3.bf16.msra.mxu1 %v5820_v49  ;;  %v4003_v49 = vld [vmem:[%s7767_s6 + $0x40] sm:$0xff]  ;;  %4068 = vperm.xlu1 %5731, %v4002_v62   ;;  %7806 = vst [vmem:[#allocation28_spill] sm:$0xff] %v6646_v50  ;;  %v4005_v62 = vld [vmem:[%s7767_s6 + $0x50] sm:$0xff] }
 0x232   : > { %5553 = vmatprep.subr.bf16.mxu1 %v5821_v13  ;;  %4073 = vperm.xlu0 %5730, %v4003_v49   ;;  %v4006_v49 = vld [vmem:[%s7767_s6 + $0x58] sm:$0xff] }
 0x233   : > { %5466 = vmatmul.mubr.bf16.gmra.mxu1 %v2152_v10  ;;  %5670 = vmatmul.mubr.bf16.gmra.mxu0 %v3478_v59  ;;  %v4004_v59 = vld [vmem:[%s7767_s6 + $0x48] sm:$0xff] }
 0x234   : > { %5469 = vmatprep.mubr.bf16.mxu1 %v2153_v52  ;;  %5673 = vmatprep.mubr.bf16.mxu0 %v3479_v43  ;;  %v6648_v52 = vpop.f32.mrf.mxu0  ;;  %v2128_v43 = vld [vmem:[#allocation2 + $0x9b] sm:$0xff] }
 0x235   : > { %5554 = vmatpush3.bf16.msra.mxu1 %v5821_v13  ;;  %7807 = vst [vmem:[#allocation29_spill] sm:$0xff] %v6648_v52  ;;  %v2125_v13 = vld [vmem:[#allocation2 + $0x83] sm:$0xff]  ;;  %4078 = vperm.xlu1 %5731, %v4004_v59   ;;  %v2155_v10 = vpack.c.bf16 %v2128_v43, %v2127_v63  ;;  %v6659_v52 = vpop.f32.mrf.mxu1 }
 0x236   : > { %5555 = vmatprep.subr.bf16.mxu1 %v5822_v7  ;;  %v2154_v39 = vpack.c.bf16 %v2126_v18, %v2125_v13  ;;  %4083 = vperm.xlu0 %5730, %v4005_v62   ;;  %7808 = vst [vmem:[#allocation30_spill] sm:$0xff] %v6659_v52  ;;  %v6661_v15 = vpop.f32.mrf.mxu0  ;;  %v2130_v18 = vld [vmem:[#allocation2 + $0xab] sm:$0xff]  ;;  %v2132_v62 = vld [vmem:[#allocation2 + $0xbb] sm:$0xff] }
 0x237   : > { %7809 = vst [vmem:[#allocation31_spill] sm:$0xff] %v6661_v15  ;;  %v4008_v59 = vld [vmem:[%s7767_s6 + $0x68] sm:$0xff]  ;;  %v4009_v13 = vld [vmem:[%s7767_s6 + $0x70] sm:$0xff] }
 0x238   : > { %v6671_v43 = vpop.f32.mrf.mxu0 }
 0x239   : > { %5556 = vmatpush3.bf16.msra.mxu1 %v5822_v7  ;;  %v4007_v7 = vld [vmem:[%s7767_s6 + $0x60] sm:$0xff]  ;;  %4088 = vperm.xlu1 %5731, %v4006_v49   ;;  %7811 = vst [vmem:[#allocation33_spill] sm:$0xff] %v6671_v43 }
 0x23a   : > { %5557 = vmatprep.subr.bf16.mxu1 %v5823_v47  ;;  %4093 = vperm.xlu0 %5730, %v4007_v7   ;;  %v6682_v49 = vpop.f32.mrf.mxu0  ;;  %v4011_v7 = vld [vmem:[%s7767_s6 + $0x80] sm:$0xff] }
 0x23b   : > { %5470 = vmatmul.mubr.bf16.gmra.mxu1 %v2154_v39  ;;  %5674 = vmatmul.mubr.bf16.gmra.mxu0 %v3480_v21  ;;  %v6666_v9 = vpop.f32.mrf.mxu1  ;;  %v2156_v21 = vpack.c.bf16 %v2130_v18, %v2129_v11  ;;  %7813 = vst [vmem:[#allocation35_spill] sm:$0xff] %v6682_v49  ;;  %v2133_v11 = vld [vmem:[#allocation2 + $0xc3] sm:$0xff]  ;;  %v2135_v49 = vld [vmem:[#allocation2 + $0xd3] sm:$0xff] }
 0x23c   : > { %5473 = vmatprep.mubr.bf16.mxu1 %v2155_v10  ;;  %7810 = vst [vmem:[#allocation32_spill] sm:$0xff] %v6666_v9  ;;  %v4010_v10 = vld [vmem:[%s7767_s6 + $0x78] sm:$0xff]  ;;  %v4015_v43 = vld [vmem:[%s7767_s6 + $0xa0] sm:$0xff] }
 0x23d   : > { %5558 = vmatpush3.bf16.msra.mxu1 %v5823_v47  ;;  %v6676_v39 = vpop.f32.mrf.mxu1  ;;  %v2131_v47 = vld [vmem:[#allocation2 + $0xb3] sm:$0xff]  ;;  %4098 = vperm.xlu1 %5731, %v4008_v59   ;;  %v2134_v59 = vld [vmem:[#allocation2 + $0xcb] sm:$0xff] }
 0x23e   : > { %5559 = vmatprep.subr.bf16.mxu1 %v5824_v42  ;;  %7812 = vst [vmem:[#allocation34_spill] sm:$0xff] %v6676_v39  ;;  %v2157_v63 = vpack.c.bf16 %v2132_v62, %v2131_v47  ;;  %4103 = vperm.xlu0 %5730, %v4009_v13   ;;  %v2136_v62 = vld [vmem:[#allocation2 + $0xdb] sm:$0xff]  ;;  %v4013_v13 = vld [vmem:[%s7767_s6 + $0x90] sm:$0xff] }
 0x23f   : > { %v6687_v18 = vpop.f32.mrf.mxu1 }
 0x240   : > { %7814 = vst [vmem:[#allocation36_spill] sm:$0xff] %v6687_v18 }
 0x241   : > { %5560 = vmatpush3.bf16.msra.mxu1 %v5824_v42  ;;  %4108 = vperm.xlu1 %5731, %v4010_v10   ;;  %v2159_v10 = vpack.c.bf16 %v2136_v62, %v2135_v49  ;;  %v4016_v49 = vld [vmem:[%s7767_s6 + $0xa8] sm:$0xff]  ;;  %v2140_v62 = vld [vmem:[#allocation2 + $0xfb] sm:$0xff] }
 0x242   : > { %5701 = vmatprep.subr.bf16.mxu1 %v6391_v26  ;;  %4113 = vperm.xlu0 %5730, %v4011_v7   ;;  %v4012_v26 = vld [vmem:[%s7767_s6 + $0x88] sm:$0xff]  ;;  %v4014_v7 = vld [vmem:[%s7767_s6 + $0x98] sm:$0xff] }
 0x243   : > { %5474 = vmatmul.mubr.bf16.gmra.mxu1 %v2156_v21  ;;  %v6697_v21 = vpop.f32.mrf.mxu1 }
 0x244   : > { %5477 = vmatprep.mubr.bf16.mxu1 %v2157_v63  ;;  %v6689_v42 = vpop.f32.mrf.mxu0  ;;  %7816 = vst [vmem:[#allocation38_spill] sm:$0xff] %v6697_v21  ;;  %v2158_v63 = vpack.c.bf16 %v2134_v59, %v2133_v11  ;;  %v2138_v59 = vld [vmem:[#allocation2 + $0xeb] sm:$0xff]  ;;  %v2137_v11 = vld [vmem:[#allocation2 + $0xe3] sm:$0xff] }
 0x245   : > { %7815 = vst [vmem:[#allocation37_spill] sm:$0xff] %v6689_v42  ;;  %4118 = vperm.xlu1 %5731, %v4012_v26  }
 0x246   : > { %v6699_v47 = vpop.f32.mrf.mxu0  ;;  %4123 = vperm.xlu0 %5730, %v4013_v13   ;;  %v4017_v13 = vld [vmem:[%s7767_s6 + $0xb0] sm:$0xff] }
 0x247   : > { %7817 = vst [vmem:[#allocation39_spill] sm:$0xff] %v6699_v47 }
 0x248   : > { %v6709_v15 = vpop.f32.mrf.mxu0 }
 0x249   : > { %7819 = vst [vmem:[#allocation41_spill] sm:$0xff] %v6709_v15  ;;  %4128 = vperm.xlu1 %5731, %v4014_v7   ;;  %v2160_v15 = vpack.c.bf16 %v2138_v59, %v2137_v11  ;;  %v2139_v7 = vld [vmem:[#allocation2 + $0xf3] sm:$0xff] }
 0x24a   : > { %4133 = vperm.xlu0 %5730, %v4015_v43   ;;  %v2161_v43 = vpack.c.bf16 %v2140_v62, %v2139_v7  ;;  %v4020_v62 = vld [vmem:[%s7767_s6 + $0xc8] sm:$0xff]  ;;  %v4021_v7 = vld [vmem:[%s7767_s6 + $0xd0] sm:$0xff] }
 0x24b   : > { %v6704_v42 = vpop.f32.mrf.mxu1  ;;  %5478 = vmatmul.mubr.bf16.gmra.mxu1 %v2158_v63  ;;  %v6721_v63 = vpop.f32.mrf.mxu0 }
 0x24c   : > { %7818 = vst [vmem:[#allocation40_spill] sm:$0xff] %v6704_v42  ;;  %5481 = vmatprep.mubr.bf16.mxu1 %v2159_v10  ;;  %7822 = vst [vmem:[#allocation44_spill] sm:$0xff] %v6721_v63  ;;  %v4019_v63 = vld [vmem:[%s7767_s6 + $0xc0] sm:$0xff]  ;;  %v5825_v42 = vld [vmem:[%s7763_s2 + $0x238] sm:$0xff]  }
 0x24d   : > { %v6711_v47 = vpop.f32.mrf.mxu1  ;;  %4138 = vperm.xlu1 %5731, %v4016_v49   ;;  %v2142_v49 = vld [vmem:[#allocation2 + $0x10b] sm:$0xff] }
 0x24e   : > { %7820 = vst [vmem:[#allocation42_spill] sm:$0xff] %v6711_v47  ;;  %4143 = vperm.xlu0 %5730, %v4017_v13  }
 0x24f   : > { %v6716_v26 = vpop.f32.mrf.mxu1 }
 0x250   : > { %7821 = vst [vmem:[#allocation43_spill] sm:$0xff] %v6716_v26  ;;  %v4030_v26 = vld [vmem:[%s7767_s6 + $0x118] sm:$0xff] }
 0x251   : > { %v6723_v10 = vpop.f32.mrf.mxu1  ;;  %4148 = vperm.xlu1 %5731, %v4018_v0  }
 0x252   : > { %7823 = vst [vmem:[#allocation45_spill] sm:$0xff] %v6723_v10  ;;  %4153 = vperm.xlu0 %5730, %v4019_v63   ;;  %v2143_v63 = vld [vmem:[#allocation2 + $0x113] sm:$0xff] }
 0x253   : > { %v6728_v12 = vpop.f32.mrf.mxu1  ;;  %v6730_v56 = vpop.f32.mrf.mxu0  ;;  %5482 = vmatmul.mubr.bf16.gmra.mxu1 %v2160_v15  ;;  %v2144_v15 = vld [vmem:[#allocation2 + $0x11b] sm:$0xff] }
 0x254   : > { %7824 = vst [vmem:[#allocation46_spill] sm:$0xff] %v6730_v56  ;;  %5485 = vmatprep.mubr.bf16.mxu1 %v2161_v43  ;;  %v2141_v43 = vld [vmem:[#allocation2 + $0x103] sm:$0xff]  ;;  %v2163_v17 = vpack.c.bf16 %v2144_v15, %v2143_v63 }
 0x255   : > { %v6735_v32 = vpop.f32.mrf.mxu1  ;;  %v6737_v59 = vpop.f32.mrf.mxu0  ;;  %v2162_v0 = vpack.c.bf16 %v2142_v49, %v2141_v43  ;;  %4158 = vperm.xlu1 %5731, %v4020_v62   ;;  %v2146_v62 = vld [vmem:[#allocation2 + $0x12b] sm:$0xff]  ;;  %v2145_v63 = vld [vmem:[#allocation2 + $0x123] sm:$0xff] }
 0x256   : > { %7825 = vst [vmem:[#allocation47_spill] sm:$0xff] %v6737_v59  ;;  %4163 = vperm.xlu0 %5730, %v4021_v7   ;;  %v4024_v15 = vld [vmem:[%s7767_s6 + $0xe8] sm:$0xff] }
 0x257   : > { %v6742_v13 = vpop.f32.mrf.mxu1  ;;  %v6744_v11 = vpop.f32.mrf.mxu0 }
 0x258   : > { %7826 = vst [vmem:[#allocation48_spill] sm:$0xff] %v6744_v11 }
 0x259   : > { %v6749_v56 = vpop.f32.mrf.mxu1  ;;  %v6751_v59 = vpop.f32.mrf.mxu0  ;;  %4168 = vperm.xlu1 %5731, %v4022_v29   ;;  %v2164_v29 = vpack.c.bf16 %v2146_v62, %v2145_v63 }
 0x25a   : > { %7827 = vst [vmem:[#allocation49_spill] sm:$0xff] %v6751_v59  ;;  %4173 = vperm.xlu0 %5730, %v4023_v34   ;;  %v2775_v34 = vld [vmem:[#allocation2 + $0x24] sm:$0xff] }
 0x25b   : > { %v6756_v11 = vpop.f32.mrf.mxu1  ;;  %5486 = vmatmul.mubr.bf16.gmra.mxu1 %v2162_v0  ;;  %v6758_v61 = vpop.f32.mrf.mxu0  ;;  %v2776_v0 = vld [vmem:[#allocation2 + $0x2c] sm:$0xff] }
 0x25c   : > { %7828 = vst [vmem:[#allocation50_spill] sm:$0xff] %v6758_v61  ;;  %5489 = vmatprep.mubr.bf16.mxu1 %v2163_v17  ;;  %v4025_v17 = vld [vmem:[%s7767_s6 + $0xf0] sm:$0xff]  ;;  %v2811_v22 = vpack.c.bf16 %v2776_v0, %v2775_v34  ;;  %v4028_v0 = vld [vmem:[%s7767_s6 + $0x108] sm:$0xff] }
 0x25d   : > { %v6763_v59 = vpop.f32.mrf.mxu1  ;;  %v6765_v49 = vpop.f32.mrf.mxu0  ;;  %4178 = vperm.xlu1 %5731, %v4024_v15   ;;  %v2778_v15 = vld [vmem:[#allocation2 + $0x3c] sm:$0xff]  ;;  %v2777_v34 = vld [vmem:[#allocation2 + $0x34] sm:$0xff] }
 0x25e   : > { %7829 = vst [vmem:[#allocation51_spill] sm:$0xff] %v6765_v49  ;;  %4183 = vperm.xlu0 %5730, %v4025_v17  }
 0x25f   : > { %v6770_v7 = vpop.f32.mrf.mxu1  ;;  %v6772_v43 = vpop.f32.mrf.mxu0 }
 0x260   : > { %7830 = vst [vmem:[#allocation52_spill] sm:$0xff] %v6772_v43 }
 0x261   : > { %v6777_v61 = vpop.f32.mrf.mxu1  ;;  %v6779_v49 = vpop.f32.mrf.mxu0  ;;  %4188 = vperm.xlu1 %5731, %v4026_v30   ;;  %v2812_v30 = vpack.c.bf16 %v2778_v15, %v2777_v34 }
 0x262   : > { %7831 = vst [vmem:[#allocation53_spill] sm:$0xff] %v6779_v49  ;;  %4193 = vperm.xlu0 %5730, %v4027_v36   ;;  %v2779_v36 = vld [vmem:[#allocation2 + $0x44] sm:$0xff] }
 0x263   : > { %v6784_v43 = vpop.f32.mrf.mxu1  ;;  %5490 = vmatmul.mubr.bf16.gmra.mxu1 %v2164_v29  ;;  %v6786_v54 = vpop.f32.mrf.mxu0  ;;  %v2780_v29 = vld [vmem:[#allocation2 + $0x4c] sm:$0xff] }
 0x264   : > { %7832 = vst [vmem:[#allocation54_spill] sm:$0xff] %v6786_v54  ;;  %5561 = vmatprep.mubr.bf16.mxu1 %v2811_v22  ;;  %v4029_v22 = vld [vmem:[%s7767_s6 + $0x110] sm:$0xff]  ;;  %v2813_v10 = vpack.c.bf16 %v2780_v29, %v2779_v36  ;;  %v2782_v29 = vld [vmem:[#allocation2 + $0x5c] sm:$0xff] }
 0x265   : > { %v6791_v49 = vpop.f32.mrf.mxu1  ;;  %v6793_v62 = vpop.f32.mrf.mxu0  ;;  %4198 = vperm.xlu1 %5731, %v4028_v0   ;;  %v2784_v36 = vld [vmem:[#allocation2 + $0x6c] sm:$0xff] }
 0x266   : > { %7833 = vst [vmem:[#allocation55_spill] sm:$0xff] %v6793_v62  ;;  %4203 = vperm.xlu0 %5730, %v4029_v22  }
 0x267   : > { %v6798_v17 = vpop.f32.mrf.mxu1  ;;  %v6800_v63 = vpop.f32.mrf.mxu0 }
 0x268   : > { %7834 = vst [vmem:[#allocation56_spill] sm:$0xff] %v6800_v63 }
 0x269   : > { %v6805_v54 = vpop.f32.mrf.mxu1  ;;  %v6807_v62 = vpop.f32.mrf.mxu0  ;;  %4208 = vperm.xlu1 %5731, %v4030_v26  }
 0x26a   : > { %7835 = vst [vmem:[#allocation57_spill] sm:$0xff] %v6807_v62  ;;  %v2783_v62 = vld [vmem:[#allocation2 + $0x64] sm:$0xff] }
 0x26b   : > { %v6812_v63 = vpop.f32.mrf.mxu1  ;;  %v6814_v47 = vpop.f32.mrf.mxu0  ;;  %5562 = vmatmul.mubr.bf16.vlgmr.msra.gmra.mxu1 %v2812_v30  ;;  %v2781_v30 = vld [vmem:[#allocation2 + $0x54] sm:$0xff] }
 0x26c   : > { %7836 = vst [vmem:[#allocation58_spill] sm:$0xff] %v6814_v47  ;;  %5709 = vmatpush3.bf16.msra.mxu1 %v5825_v42  ;;  %5565 = vmatprep.mubr.bf16.mxu1 %v2813_v10  ;;  %v2814_v10 = vpack.c.bf16 %v2782_v29, %v2781_v30 }
 0x26d   : > { %v6819_v15 = vpop.f32.mrf.mxu1  ;;  %v6821_v0 = vpop.f32.mrf.mxu0  ;;  %5702 = vmatprep.subr.bf16.mxu1 %v6432_v46 }
 0x26e   : > { %7837 = vst [vmem:[#allocation59_spill] sm:$0xff] %v6821_v0  ;;  %v2815_v0 = vpack.c.bf16 %v2784_v36, %v2783_v62  ;;  %v2788_v62 = vld [vmem:[#allocation2 + $0x8c] sm:$0xff]  ;;  %v2785_v36 = vld [vmem:[#allocation2 + $0x74] sm:$0xff] }
 0x26f   : > { %v6824_v22 = vpop.f32.mrf.mxu1  ;;  %v6826_v34 = vpop.f32.mrf.mxu0 }
 0x270   : > { %7838 = vst [vmem:[#allocation60_spill] sm:$0xff] %v6826_v34  ;;  %5710 = vmatpush3.bf16.msra.mxu1 %v6432_v46 }
 0x271   : > { %v6829_v47 = vpop.f32.mrf.mxu1  ;;  %v6831_v42 = vpop.f32.mrf.mxu0  ;;  %5703 = vmatprep.subr.bf16.mxu1 %v6446_v48 }
 0x272   : > { %7839 = vst [vmem:[#allocation61_spill] sm:$0xff] %v6831_v42  ;;  %v2786_v42 = vld [vmem:[#allocation2 + $0x7c] sm:$0xff] }
 0x273   : > { %v6834_v21 = vpop.f32.mrf.mxu1  ;;  %v6836_v26 = vpop.f32.mrf.mxu0  ;;  %5566 = vmatmul.mubr.bf16.gmra.mxu1 %v2814_v10  ;;  %v2787_v10 = vld [vmem:[#allocation2 + $0x84] sm:$0xff] }
 0x274   : > { %7840 = vst [vmem:[#allocation62_spill] sm:$0xff] %v6836_v26  ;;  %5569 = vmatprep.mubr.bf16.mxu1 %v2815_v0  ;;  %5711 = vmatpush3.bf16.msra.mxu1 %v6446_v48  ;;  %v2816_v48 = vpack.c.bf16 %v2786_v42, %v2785_v36 }
 0x275   : > { %v6839_v34 = vpop.f32.mrf.mxu1  ;;  %v6841_v46 = vpop.f32.mrf.mxu0  ;;  %5704 = vmatprep.subr.bf16.mxu1 %v6462_v14 }
 0x276   : > { %7841 = vst [vmem:[#allocation63_spill] sm:$0xff] %v6841_v46  ;;  %v2817_v46 = vpack.c.bf16 %v2788_v62, %v2787_v10  ;;  %v2792_v62 = vld [vmem:[#allocation2 + $0xac] sm:$0xff]  ;;  %v2789_v10 = vld [vmem:[#allocation2 + $0x94] sm:$0xff] }
 0x277   : > { %v6844_v29 = vpop.f32.mrf.mxu1  ;;  %v6846_v30 = vpop.f32.mrf.mxu0 }
 0x278   : > { %7842 = vst [vmem:[#allocation64_spill] sm:$0xff] %v6846_v30  ;;  %5712 = vmatpush3.bf16.msra.mxu1 %v6462_v14 }
 0x279   : > { %v6849_v26 = vpop.f32.mrf.mxu1  ;;  %v6851_v0 = vpop.f32.mrf.mxu0  ;;  %5705 = vmatprep.subr.bf16.mxu1 %v6476_v41 }
 0x27a   : > { %7843 = vst [vmem:[#allocation65_spill] sm:$0xff] %v6851_v0  ;;  %v2790_v0 = vld [vmem:[#allocation2 + $0x9c] sm:$0xff] }
 0x27b   : > { %v6854_v18 = vpop.f32.mrf.mxu1  ;;  %v6856_v39 = vpop.f32.mrf.mxu0  ;;  %5570 = vmatmul.mubr.bf16.gmra.mxu1 %v2816_v48  ;;  %v2791_v48 = vld [vmem:[#allocation2 + $0xa4] sm:$0xff] }
 0x27c   : > { %7844 = vst [vmem:[#allocation66_spill] sm:$0xff] %v6856_v39  ;;  %5573 = vmatprep.mubr.bf16.mxu1 %v2817_v46  ;;  %5713 = vmatpush3.bf16.msra.mxu1 %v6476_v41  ;;  %v2818_v41 = vpack.c.bf16 %v2790_v0, %v2789_v10 }
 0x27d   : > { %v6859_v30 = vpop.f32.mrf.mxu1  ;;  %v6861_v14 = vpop.f32.mrf.mxu0  ;;  %5706 = vmatprep.subr.bf16.mxu1 %v6492_v33 }
 0x27e   : > { %7845 = vst [vmem:[#allocation67_spill] sm:$0xff] %v6861_v14  ;;  %v2819_v14 = vpack.c.bf16 %v2792_v62, %v2791_v48  ;;  %v2796_v62 = vld [vmem:[#allocation2 + $0xcc] sm:$0xff]  ;;  %v2793_v48 = vld [vmem:[#allocation2 + $0xb4] sm:$0xff] }
 0x27f   : > { %v6864_v42 = vpop.f32.mrf.mxu1  ;;  %v6866_v36 = vpop.f32.mrf.mxu0 }
 0x280   : > { %7846 = vst [vmem:[#allocation68_spill] sm:$0xff] %v6866_v36  ;;  %5714 = vmatpush3.bf16.msra.mxu1 %v6492_v33 }
 0x281   : > { %v6869_v39 = vpop.f32.mrf.mxu1  ;;  %v6871_v46 = vpop.f32.mrf.mxu0  ;;  %5707 = vmatprep.subr.bf16.mxu1 %v6508_v23 }
 0x282   : > { %7847 = vst [vmem:[#allocation69_spill] sm:$0xff] %v6871_v46  ;;  %v2794_v46 = vld [vmem:[#allocation2 + $0xbc] sm:$0xff] }
 0x283   : > { %v6874_v9 = vpop.f32.mrf.mxu1  ;;  %v6876_v52 = vpop.f32.mrf.mxu0  ;;  %5574 = vmatmul.mubr.bf16.gmra.mxu1 %v2818_v41  ;;  %v2795_v41 = vld [vmem:[#allocation2 + $0xc4] sm:$0xff] }
 0x284   : > { %7848 = vst [vmem:[#allocation70_spill] sm:$0xff] %v6874_v9  ;;  %7849 = vst [vmem:[#allocation71_spill] sm:$0xff] %v6876_v52  ;;  %5577 = vmatprep.mubr.bf16.mxu1 %v2819_v14  ;;  %5715 = vmatpush3.bf16.msra.mxu1 %v6508_v23  ;;  %v2820_v23 = vpack.c.bf16 %v2794_v46, %v2793_v48  ;;  %v2821_v50 = vpack.c.bf16 %v2796_v62, %v2795_v41  ;;  %v2799_v41 = vld [vmem:[#allocation2 + $0xe4] sm:$0xff] }
 0x285   : > { %v6879_v36 = vpop.f32.mrf.mxu1  ;;  %v6881_v33 = vpop.f32.mrf.mxu0  ;;  %5708 = vmatprep.subr.bf16.mxu1 %v6520_v57 }
 0x286   : > { %7850 = vst [vmem:[#allocation72_spill] sm:$0xff] %v6879_v36  ;;  %7851 = vst [vmem:[#allocation73_spill] sm:$0xff] %v6881_v33 }
 0x287   : > { %v6884_v0 = vpop.f32.mrf.mxu1  ;;  %v6886_v10 = vpop.f32.mrf.mxu0 }
 0x288   : > { %7852 = vst [vmem:[#allocation74_spill] sm:$0xff] %v6884_v0  ;;  %7853 = vst [vmem:[#allocation75_spill] sm:$0xff] %v6886_v10  ;;  %5716 = vmatpush3.bf16.msra.mxu1 %v6520_v57 }
 0x289   : > { %v6889_v52 = vpop.f32.mrf.mxu1  ;;  %v6891_v14 = vpop.f32.mrf.mxu0 }
 0x28a   : > { %7854 = vst [vmem:[#allocation76_spill] sm:$0xff] %v6889_v52  ;;  %7855 = vst [vmem:[#allocation77_spill] sm:$0xff] %v6891_v14  ;;  %v2800_v52 = vld [vmem:[#allocation2 + $0xec] sm:$0xff]  ;;  %v2797_v14 = vld [vmem:[#allocation2 + $0xd4] sm:$0xff] }
 0x28b   : > { %v6893_v36 = vpop.f32.mrf.mxu1  ;;  %v6895_v33 = vpop.f32.mrf.mxu0  ;;  %5578 = vmatmul.mubr.bf16.gmra.mxu1 %v2820_v23  ;;  %v2822_v48 = vpack.c.bf16 %v2798_v45, %v2797_v14 }
 0x28c   : > { %7856 = vst [vmem:[#allocation78_spill] sm:$0xff] %v6893_v36  ;;  %7857 = vst [vmem:[#allocation79_spill] sm:$0xff] %v6895_v33  ;;  %5581 = vmatprep.mubr.bf16.mxu1 %v2821_v50  ;;  %v2823_v33 = vpack.c.bf16 %v2800_v52, %v2799_v41  ;;  %v2803_v41 = vld [vmem:[#allocation2 + $0x104] sm:$0xff] }
 0x28d   : > { %v6897_v0 = vpop.f32.mrf.mxu1  ;;  %v6899_v10 = vpop.f32.mrf.mxu0 }
 0x28e   : > { %7858 = vst [vmem:[#allocation80_spill] sm:$0xff] %v6897_v0  ;;  %7859 = vst [vmem:[#allocation81_spill] sm:$0xff] %v6899_v10 }
 0x28f   : > { %v6901_v9 = vpop.f32.mrf.mxu1  ;;  %v6903_v57 = vpop.f32.mrf.mxu0 }
 0x290   : > { %7860 = vst [vmem:[#allocation82_spill] sm:$0xff] %v6901_v9  ;;  %7861 = vst [vmem:[#allocation83_spill] sm:$0xff] %v6903_v57  ;;  %v2802_v57 = vld [vmem:[#allocation2 + $0xfc] sm:$0xff] }
 0x291   : > { %v6905_v46 = vpop.f32.mrf.mxu1  ;;  %v6907_v62 = vpop.f32.mrf.mxu0 }
 0x292   : > { %7862 = vst [vmem:[#allocation84_spill] sm:$0xff] %v6905_v46  ;;  %7863 = vst [vmem:[#allocation85_spill] sm:$0xff] %v6907_v62  ;;  %v2804_v46 = vld [vmem:[#allocation2 + $0x10c] sm:$0xff]  ;;  %v2801_v62 = vld [vmem:[#allocation2 + $0xf4] sm:$0xff] }
 0x293   : > { %v6909_v23 = vpop.f32.mrf.mxu1  ;;  %v6911_v50 = vpop.f32.mrf.mxu0  ;;  %5582 = vmatmul.mubr.bf16.gmra.mxu1 %v2822_v48  ;;  %v2824_v14 = vpack.c.bf16 %v2802_v57, %v2801_v62  ;;  %v2825_v48 = vpack.c.bf16 %v2804_v46, %v2803_v41  ;;  %v1316_v57 = vadd.f32 %v6742_v13, %v6434_v27  ;;  %v2808_v41 = vld [vmem:[#allocation2 + $0x12c] sm:$0xff]  ;;  %v1329_v27 = vadd.f32 %v6756_v11, %v6452_v25  ;;  %v2809_v11 = vld [vmem:[#allocation2 + $0x134] sm:$0xff] }
 0x294   : > { %7864 = vst [vmem:[#allocation86_spill] sm:$0xff] %v6911_v50  ;;  %5585 = vmatprep.mubr.bf16.mxu1 %v2823_v33  ;;  %v1313_v33 = vadd.f32 %v6728_v12, %v6418_v3  ;;  %v2806_v3 = vld [vmem:[#allocation2 + $0x11c] sm:$0xff] }
 0x295   : > { %v6913_v10 = vpop.f32.mrf.mxu1  ;;  %v6915_v9 = vpop.f32.mrf.mxu0 }
 0x296   : > { %7865 = vst [vmem:[#allocation87_spill] sm:$0xff] %v6913_v10  ;;  %7866 = vst [vmem:[#allocation88_spill] sm:$0xff] %v6915_v9  ;;  %v1305_v9 = vadd.f32 %v6735_v32, %v6424_v24  ;;  %v2805_v32 = vld [vmem:[#allocation2 + $0x114] sm:$0xff] }
 0x297   : > { %v6917_v0 = vpop.f32.mrf.mxu1  ;;  %v6919_v36 = vpop.f32.mrf.mxu0 }
 0x298   : > { %7867 = vst [vmem:[#allocation89_spill] sm:$0xff] %v6917_v0  ;;  %7868 = vst [vmem:[#allocation90_spill] sm:$0xff] %v6919_v36 }
 0x299   : > { %v6921_v45 = vpop.f32.mrf.mxu1  ;;  %v6923_v52 = vpop.f32.mrf.mxu0 }
 0x29a   : > { %7869 = vst [vmem:[#allocation91_spill] sm:$0xff] %v6921_v45  ;;  %7870 = vst [vmem:[#allocation92_spill] sm:$0xff] %v6923_v52 }
 0x29b   : > { %v5355_v50 = vpop.f32.mrf.mxu1  ;;  %v6927_v10 = vpop.f32.mrf.mxu0  ;;  %5586 = vmatmul.mubr.bf16.gmra.mxu1 %v2824_v14  ;;  %v1308_v14 = vadd.f32 %v6749_v56, %v6448_v53  ;;  %v1321_v53 = vadd.f32 %v6763_v59, %v6466_v16  ;;  %v1324_v16 = vadd.f32 %v6777_v61, %v6494_v20  ;;  %v1337_v20 = vadd.f32 %v6791_v49, %v6522_v5  ;;  %v3453_v49 = vld [vmem:[#allocation2 + $0x96] sm:$0xff] }
 0x29c   : > { %7871 = vst [vmem:[#allocation93_spill] sm:$0xff] %v6927_v10  ;;  %v6931_v36 = vadd.f32 %v5355_v50, %v1313_v33  ;;  %5589 = vmatprep.mubr.bf16.mxu1 %v2825_v48  ;;  %v2826_v48 = vpack.c.bf16 %v2806_v3, %v2805_v32  ;;  %v1332_v3 = vadd.f32 %v6770_v7, %v6480_v51  ;;  %v3452_v32 = vld [vmem:[#allocation2 + $0x8e] sm:$0xff] }
 0x29d   : > { %v1600_v0 = vpop.f32.mrf.mxu1  ;;  %v6933_v45 = vpop.f32.mrf.mxu0  ;;  %v1345_v51 = vadd.f32 %v6784_v43, %v6510_v38  ;;  %v3454_v43 = vld [vmem:[#allocation2 + $0x9e] sm:$0xff] }
 0x29e   : > { %7872 = vst [vmem:[#allocation94_spill] sm:$0xff] %v6933_v45  ;;  %v6937_v62 = vadd.f32 %v1600_v0, %v1305_v9  ;;  %v2807_v45 = vld [vmem:[#allocation2 + $0x124] sm:$0xff] }
 0x29f   : > { %v5356_v12 = vpop.f32.mrf.mxu1  ;;  %v6939_v46 = vpop.f32.mrf.mxu0  ;;  %v2827_v13 = vpack.c.bf16 %v2808_v41, %v2807_v45  ;;  %v2810_v45 = vld [vmem:[#allocation2 + $0x13c] sm:$0xff] }
 0x2a0   : > { %7873 = vst [vmem:[#allocation95_spill] sm:$0xff] %v6939_v46  ;;  %v6943_v24 = vadd.f32 %v5356_v12, %v1316_v57 }
 0x2a1   : > { %v1603_v50 = vpop.f32.mrf.mxu1  ;;  %v6945_v33 = vpop.f32.mrf.mxu0 }
 0x2a2   : > { %7874 = vst [vmem:[#allocation96_spill] sm:$0xff] %v6945_v33  ;;  %v6949_v9 = vadd.f32 %v1603_v50, %v1308_v14 }
 0x2a3   : > { %v5359_v0 = vpop.f32.mrf.mxu1  ;;  %5590 = vmatmul.mubr.bf16.gmra.mxu1 %v2826_v48  ;;  %v6951_v46 = vpop.f32.mrf.mxu0 }
 0x2a4   : > { %v6955_v56 = vadd.f32 %v5359_v0, %v1329_v27  ;;  %5593 = vmatprep.mubr.bf16.mxu1 %v2827_v13  ;;  %v2828_v27 = vpack.c.bf16 %v2810_v45, %v2809_v11  ;;  %v3451_v13 = vld [vmem:[#allocation2 + $0x86] sm:$0xff]  ;;  %v1348_v11 = vadd.f32 %v6798_v17, %v6528_v4  ;;  %v1361_v4 = vadd.f32 %v6812_v63, %v6537_v37  ;;  %v3458_v63 = vld [vmem:[#allocation2 + $0xbe] sm:$0xff] }
 0x2a5   : > { %v1616_v57 = vpop.f32.mrf.mxu1  ;;  %v6957_v12 = vpop.f32.mrf.mxu0  ;;  %v3481_v0 = vpack.c.bf16 %v3452_v32, %v3451_v13 }
 0x2a6   : > { %v6961_v25 = vadd.f32 %v1616_v57, %v1321_v53 }
 0x2a7   : > { %v5360_v41 = vpop.f32.mrf.mxu1  ;;  %v6963_v14 = vpop.f32.mrf.mxu0 }
 0x2a8   : > { %v6967_v59 = vadd.f32 %v5360_v41, %v1332_v3 }
 0x2a9   : > { %v1619_v50 = vpop.f32.mrf.mxu1  ;;  %v6969_v48 = vpop.f32.mrf.mxu0 }
 0x2aa   : > { %v6973_v7 = vadd.f32 %v1619_v50, %v1324_v16  ;;  %v3456_v16 = vld [vmem:[#allocation2 + $0xae] sm:$0xff]  ;;  %v1340_v50 = vadd.f32 %v6805_v54, %v6533_v8  ;;  %v1353_v54 = vadd.f32 %v6819_v15, %v6541_v40  ;;  %v3457_v15 = vld [vmem:[#allocation2 + $0xb6] sm:$0xff] }
 0x2ab   : > { %v5363_v53 = vpop.f32.mrf.mxu1  ;;  %5594 = vmatmul.mubr.bf16.gmra.mxu1 %v2828_v27  ;;  %v6975_v57 = vpop.f32.mrf.mxu0 }
 0x2ac   : > { %v6979_v61 = vadd.f32 %v5363_v53, %v1345_v51  ;;  %5677 = vmatprep.mubr.bf16.mxu1 %v3481_v0  ;;  %v3482_v51 = vpack.c.bf16 %v3454_v43, %v3453_v49  ;;  %v3455_v0 = vld [vmem:[#allocation2 + $0xa6] sm:$0xff]  ;;  %v1364_v43 = vadd.f32 %v6824_v22, %v6546_v44  ;;  %v3460_v49 = vld [vmem:[#allocation2 + $0xce] sm:$0xff] }
 0x2ad   : > { %v1632_v3 = vpop.f32.mrf.mxu1  ;;  %v6981_v41 = vpop.f32.mrf.mxu0  ;;  %v3483_v53 = vpack.c.bf16 %v3456_v16, %v3455_v0  ;;  %v3484_v0 = vpack.c.bf16 %v3458_v63, %v3457_v15 }
 0x2ae   : > { %v6985_v38 = vadd.f32 %v1632_v3, %v1337_v20 }
 0x2af   : > { %v5364_v45 = vpop.f32.mrf.mxu1  ;;  %v6987_v32 = vpop.f32.mrf.mxu0 }
 0x2b0   : > { %v6991_v5 = vadd.f32 %v5364_v45, %v1348_v11 }
 0x2b1   : > { %v1635_v27 = vpop.f32.mrf.mxu1  ;;  %v6993_v13 = vpop.f32.mrf.mxu0 }
 0x2b2   : > { %v6997_v17 = vadd.f32 %v1635_v27, %v1340_v50  ;;  %v1356_v27 = vadd.f32 %v6829_v47, %v6550_v2 }
 0x2b3   : > { %v5367_v20 = vpop.f32.mrf.mxu1  ;;  %v6999_v3 = vpop.f32.mrf.mxu0  ;;  %5678 = vmatmul.mubr.bf16.vlgmr.msra.gmra.mxu1 %v3482_v51 }
 0x2b4   : > { %v7003_v8 = vadd.f32 %v5367_v20, %v1361_v4  ;;  %5681 = vmatprep.mubr.bf16.mxu1 %v3483_v53  ;;  %v3459_v4 = vld [vmem:[#allocation2 + $0xc6] sm:$0xff]  ;;  %v1377_v53 = vadd.f32 %v6834_v21, %v6554_v60  ;;  %v3462_v60 = vld [vmem:[#allocation2 + $0xde] sm:$0xff] }
 0x2b5   : > { %v1648_v11 = vpop.f32.mrf.mxu1  ;;  %v7005_v45 = vpop.f32.mrf.mxu0  ;;  %v3485_v22 = vpack.c.bf16 %v3460_v49, %v3459_v4  ;;  %v3464_v49 = vld [vmem:[#allocation2 + $0xee] sm:$0xff]  ;;  %v1393_v4 = vadd.f32 %v6854_v18, %v6573_v19  ;;  %v3466_v19 = vld [vmem:[#allocation2 + $0xfe] sm:$0xff] }
 0x2b6   : > { %v7009_v37 = vadd.f32 %v1648_v11, %v1353_v54  ;;  %v1369_v11 = vadd.f32 %v6839_v34, %v6560_v31  ;;  %v3461_v31 = vld [vmem:[#allocation2 + $0xd6] sm:$0xff] }
 0x2b7   : > { %v5368_v16 = vpop.f32.mrf.mxu1  ;;  %v7011_v50 = vpop.f32.mrf.mxu0 }
 0x2b8   : > { %v7015_v40 = vadd.f32 %v5368_v16, %v1364_v43  ;;  %v1380_v43 = vadd.f32 %v6844_v29, %v6564_v28 }
 0x2b9   : > { %v1651_v51 = vpop.f32.mrf.mxu1  ;;  %v7021_v20 = vpop.f32.mrf.mxu0 }
 0x2ba   : > { %v7019_v44 = vadd.f32 %v1651_v51, %v1356_v27  ;;  %v1372_v27 = vadd.f32 %v6849_v26, %v6569_v55  ;;  %v3486_v51 = vpack.c.bf16 %v3462_v60, %v3461_v31  ;;  %v3468_v60 = vld [vmem:[#allocation2 + $0x10e] sm:$0xff]  ;;  %v3467_v31 = vld [vmem:[#allocation2 + $0x106] sm:$0xff] }
 0x2bb   : > { %v5371_v54 = vpop.f32.mrf.mxu1  ;;  %5682 = vmatmul.mubr.bf16.gmra.mxu1 %v3484_v0  ;;  %v7031_v21 = vpop.f32.mrf.mxu0  ;;  %v3463_v0 = vld [vmem:[#allocation2 + $0xe6] sm:$0xff] }
 0x2bc   : > { %v7025_v2 = vadd.f32 %v5371_v54, %v1377_v53  ;;  %5685 = vmatprep.mubr.bf16.mxu1 %v3485_v22  ;;  %7875 = vst [vmem:[#allocation97_spill] sm:$0xff] %v7031_v21  ;;  %v3487_v29 = vpack.c.bf16 %v3464_v49, %v3463_v0  ;;  %v1385_v54 = vadd.f32 %v6859_v30, %v6584_v1  ;;  %v3465_v1 = vld [vmem:[#allocation2 + $0xf6] sm:$0xff] }
 0x2bd   : > { %v1664_v47 = vpop.f32.mrf.mxu1  ;;  %v7041_v53 = vpop.f32.mrf.mxu0 }
 0x2be   : > { %v7029_v63 = vadd.f32 %v1664_v47, %v1369_v11  ;;  %7876 = vst [vmem:[#allocation98_spill] sm:$0xff] %v7041_v53  ;;  %v1396_v11 = vadd.f32 %v6864_v42, %v6597_v58  ;;  %v3489_v42 = vpack.c.bf16 %v3468_v60, %v3467_v31  ;;  %v7886_v31 = vld [vmem:[#allocation76_spill] sm:$0xff] }
 0x2bf   : > { %v5372_v16 = vpop.f32.mrf.mxu1  ;;  %v7051_v18 = vpop.f32.mrf.mxu0  ;;  %v7891_v53 = vld [vmem:[#allocation80_spill] sm:$0xff] }
 0x2c0   : > { %v7035_v15 = vadd.f32 %v5372_v16, %v1380_v43  ;;  %7877 = vst [vmem:[#allocation99_spill] sm:$0xff] %v7051_v18  ;;  %v1388_v16 = vadd.f32 %v6869_v39, %v6610_v35 }
 0x2c1   : > { %v1667_v34 = vpop.f32.mrf.mxu1  ;;  %v7061_v0 = vpop.f32.mrf.mxu0 }
 0x2c2   : > { %v7039_v28 = vadd.f32 %v1667_v34, %v1372_v27  ;;  %v3488_v27 = vpack.c.bf16 %v3466_v19, %v3465_v1  ;;  %v7878_v34 = vld [vmem:[#allocation70_spill] sm:$0xff]  ;;  %v3472_v1 = vld [vmem:[#allocation2 + $0x12e] sm:$0xff] }
 0x2c3   : > { %v5375_v22 = vpop.f32.mrf.mxu1  ;;  %5686 = vmatmul.mubr.bf16.gmra.mxu1 %v3486_v51  ;;  %v1409_v51 = vadd.f32 %v7878_v34, %v6620_v6  ;;  %7879 = vst [vmem:[#allocation70_spill] sm:$0xff] %v7061_v0  ;;  %v3470_v6 = vld [vmem:[#allocation2 + $0x11e] sm:$0xff] }
 0x2c4   : > { %v7045_v55 = vadd.f32 %v5375_v22, %v1393_v4  ;;  %5689 = vmatprep.mubr.bf16.mxu1 %v3487_v29  ;;  %v7880_v29 = vld [vmem:[#allocation26_spill] sm:$0xff]  ;;  %v7881_v22 = vld [vmem:[#allocation72_spill] sm:$0xff] }
 0x2c5   : > { %v1680_v26 = vpop.f32.mrf.mxu1  ;;  %v7888_v0 = vld [vmem:[#allocation78_spill] sm:$0xff] }
 0x2c6   : > { %v7049_v47 = vadd.f32 %v1680_v26, %v1385_v54  ;;  %v1401_v54 = vadd.f32 %v7881_v22, %v7880_v29  ;;  %v7882_v26 = vld [vmem:[#allocation28_spill] sm:$0xff] }
 0x2c7   : > { %v5376_v43 = vpop.f32.mrf.mxu1  ;;  %v3469_v29 = vld [vmem:[#allocation2 + $0x116] sm:$0xff] }
 0x2c8   : > { %v7055_v49 = vadd.f32 %v5376_v43, %v1396_v11  ;;  %v7883_v11 = vld [vmem:[#allocation74_spill] sm:$0xff]  ;;  %v7887_v22 = vld [vmem:[#allocation32_spill] sm:$0xff] }
 0x2c9   : > { %v1683_v30 = vpop.f32.mrf.mxu1  ;;  %v1412_v19 = vadd.f32 %v7883_v11, %v7882_v26  ;;  %v1425_v18 = vadd.f32 %v7888_v0, %v7887_v22  ;;  %v3473_v0 = vld [vmem:[#allocation2 + $0x136] sm:$0xff] }
 0x2ca   : > { %v7059_v58 = vadd.f32 %v1683_v30, %v1388_v16  ;;  %v7071_v16 = vpop.f32.mrf.mxu0  ;;  %v7885_v30 = vld [vmem:[#allocation30_spill] sm:$0xff]  ;;  %v7896_v22 = vld [vmem:[#allocation84_spill] sm:$0xff] }
 0x2cb   : > { %v5379_v4 = vpop.f32.mrf.mxu1  ;;  %5690 = vmatmul.mubr.bf16.gmra.mxu1 %v3488_v27  ;;  %7884 = vst [vmem:[#allocation26_spill] sm:$0xff] %v7071_v16  ;;  %v1404_v27 = vadd.f32 %v7886_v31, %v7885_v30  ;;  %v7890_v16 = vld [vmem:[#allocation34_spill] sm:$0xff] }
 0x2cc   : > { %v7065_v35 = vadd.f32 %v5379_v4, %v1409_v51  ;;  %5693 = vmatprep.mubr.bf16.mxu1 %v3489_v42  ;;  %v3490_v4 = vpack.c.bf16 %v3470_v6, %v3469_v29  ;;  %v3471_v42 = vld [vmem:[#allocation2 + $0x126] sm:$0xff]  ;;  %v1417_v21 = vadd.f32 %v7891_v53, %v7890_v16  ;;  %v7897_v16 = vld [vmem:[#allocation40_spill] sm:$0xff] }
 0x2cd   : > { %v1696_v39 = vpop.f32.mrf.mxu1  ;;  %v7893_v6 = vld [vmem:[#allocation82_spill] sm:$0xff] }
 0x2ce   : > { %v7069_v43 = vadd.f32 %v1696_v39, %v1401_v54  ;;  %v3491_v54 = vpack.c.bf16 %v3472_v1, %v3471_v42  ;;  %v7081_v39 = vpop.f32.mrf.mxu0  ;;  %v7895_v42 = vld [vmem:[#allocation38_spill] sm:$0xff] }
 0x2cf   : > { %v5380_v60 = vpop.f32.mrf.mxu1  ;;  %7889 = vst [vmem:[#allocation72_spill] sm:$0xff] %v7081_v39 }
 0x2d0   : > { %v7075_v34 = vadd.f32 %v5380_v60, %v1412_v19  ;;  %v7892_v60 = vld [vmem:[#allocation36_spill] sm:$0xff] }
 0x2d1   : > { %v1699_v51 = vpop.f32.mrf.mxu1  ;;  %v1428_v31 = vadd.f32 %v7893_v6, %v7892_v60  ;;  %v7900_v6 = vld [vmem:[#allocation87_spill] sm:$0xff] }
 0x2d2   : > { %v7079_v26 = vadd.f32 %v1699_v51, %v1404_v27  ;;  %v3474_v27 = vld [vmem:[#allocation2 + $0x13e] sm:$0xff]  ;;  %v7091_v51 = vpop.f32.mrf.mxu0 }
 0x2d3   : > { %v5383_v11 = vpop.f32.mrf.mxu1  ;;  %5694 = vmatmul.mubr.bf16.gmra.mxu1 %v3490_v4  ;;  %7894 = vst [vmem:[#allocation28_spill] sm:$0xff] %v7091_v51  ;;  %v1420_v4 = vadd.f32 %v7896_v22, %v7895_v42  ;;  %v7901_v42 = vld [vmem:[#allocation43_spill] sm:$0xff] }
 0x2d4   : > { %v7085_v30 = vadd.f32 %v5383_v11, %v1425_v18  ;;  %5697 = vmatprep.mubr.bf16.mxu1 %v3491_v54  ;;  %v3492_v18 = vpack.c.bf16 %v3474_v27, %v3473_v0  ;;  %v1441_v54 = vadd.f32 %v6909_v23, %v7897_v16  ;;  %v7101_v60 = vpop.f32.mrf.mxu0  ;;  %v7904_v27 = vld [vmem:[#allocation45_spill] sm:$0xff] }
 0x2d5   : > { %v1712_v19 = vpop.f32.mrf.mxu1  ;;  %7898 = vst [vmem:[#allocation74_spill] sm:$0xff] %v7101_v60 }
 0x2d6   : > { %v7089_v29 = vadd.f32 %v1712_v19, %v1417_v21  ;;  %v7899_v19 = vld [vmem:[#allocation42_spill] sm:$0xff]  ;;  %v7111_v0 = vpop.f32.mrf.mxu0 }
 0x2d7   : > { %v5384_v1 = vpop.f32.mrf.mxu1  ;;  %v1433_v51 = vadd.f32 %v7900_v6, %v7899_v19  ;;  %7903 = vst [vmem:[#allocation30_spill] sm:$0xff] %v7111_v0 }
 0x2d8   : > { %v7095_v39 = vadd.f32 %v5384_v1, %v1428_v31  ;;  %v7902_v31 = vld [vmem:[#allocation89_spill] sm:$0xff]  ;;  %v7121_v19 = vpop.f32.mrf.mxu0 }
 0x2d9   : > { %v1715_v53 = vpop.f32.mrf.mxu1  ;;  %v1444_v1 = vadd.f32 %v7902_v31, %v7901_v42  ;;  %7907 = vst [vmem:[#allocation76_spill] sm:$0xff] %v7121_v19 }
 0x2da   : > { %v7099_v11 = vadd.f32 %v1715_v53, %v1420_v4  ;;  %v7905_v4 = vld [vmem:[#allocation91_spill] sm:$0xff] }
 0x2db   : > { %v5387_v21 = vpop.f32.mrf.mxu1  ;;  %5698 = vmatmul.mubr.bf16.gmra.mxu1 %v3492_v18  ;;  %v1436_v53 = vadd.f32 %v7905_v4, %v7904_v27  ;;  %v7131_v27 = vpop.f32.mrf.mxu0 }
 0x2dc   : > { %v7105_v33 = vadd.f32 %v5387_v21, %v1441_v54  ;;  %v7906_v54 = vld [vmem:[#allocation3_spill] sm:$0xff]  ;;  %7910 = vst [vmem:[#allocation32_spill] sm:$0xff] %v7131_v27 }
 0x2dd   : > { %v1728_v10 = vpop.f32.mrf.mxu1  ;;  %v2077_v21 = vadd.f32 %v7906_v54, %v6931_v36  ;;  %v7911_v36 = vld [vmem:[#allocation6_spill] sm:$0xff] }
 0x2de   : > { %v7109_v22 = vadd.f32 %v1728_v10, %v1433_v51  ;;  %v7908_v10 = vld [vmem:[#allocation4_spill] sm:$0xff] }
 0x2df   : > { %v5388_v23 = vpop.f32.mrf.mxu1  ;;  %v2075_v51 = vadd.f32 %v7908_v10, %v6937_v62  ;;  %v7141_v10 = vpop.f32.mrf.mxu0 }
 0x2e0   : > { %v7115_v16 = vadd.f32 %v5388_v23, %v1444_v1  ;;  %v7909_v1 = vld [vmem:[#allocation5_spill] sm:$0xff]  ;;  %7913 = vst [vmem:[#allocation78_spill] sm:$0xff] %v7141_v10 }
 0x2e1   : > { %v1731_v18 = vpop.f32.mrf.mxu1  ;;  %v2078_v23 = vadd.f32 %v7909_v1, %v6943_v24  ;;  %v7914_v24 = vld [vmem:[#allocation8_spill] sm:$0xff] }
 0x2e2   : > { %v7117_v60 = vadd.f32 %v1731_v18, %v1436_v53  ;;  %v2076_v18 = vadd.f32 %v7911_v36, %v6949_v9  ;;  %v2079_v1 = vadd.f32 %v7914_v24, %v6961_v25  ;;  %v7151_v36 = vpop.f32.mrf.mxu0 }
 0x2e3   : > { %v5459_v6 = vpop.f32.mrf.mxu1  ;;  %7916 = vst [vmem:[#allocation34_spill] sm:$0xff] %v7151_v36 }
 0x2e4   : > { %v7123_v42 = vadd.f32 %v5459_v6, %v2077_v21  ;;  %v7912_v6 = vld [vmem:[#allocation7_spill] sm:$0xff]  ;;  %v7161_v24 = vpop.f32.mrf.mxu0 }
 0x2e5   : > { %v2264_v31 = vpop.f32.mrf.mxu1  ;;  %v2081_v62 = vadd.f32 %v7912_v6, %v6955_v56  ;;  %v7917_v56 = vld [vmem:[#allocation10_spill] sm:$0xff]  ;;  %7919 = vst [vmem:[#allocation80_spill] sm:$0xff] %v7161_v24 }
 0x2e6   : > { %v7127_v0 = vadd.f32 %v2264_v31, %v2075_v51  ;;  %v2080_v6 = vadd.f32 %v7917_v56, %v6973_v7  ;;  %v7171_v56 = vpop.f32.mrf.mxu0 }
 0x2e7   : > { %v5460_v4 = vpop.f32.mrf.mxu1  ;;  %7922 = vst [vmem:[#allocation36_spill] sm:$0xff] %v7171_v56 }
 0x2e8   : > { %v7133_v53 = vadd.f32 %v5460_v4, %v2078_v23  ;;  %v7915_v4 = vld [vmem:[#allocation9_spill] sm:$0xff] }
 0x2e9   : > { %v2267_v54 = vpop.f32.mrf.mxu1  ;;  %v2082_v9 = vadd.f32 %v7915_v4, %v6967_v59  ;;  %v7920_v59 = vld [vmem:[#allocation12_spill] sm:$0xff] }
 0x2ea   : > { %v7137_v21 = vadd.f32 %v2267_v54, %v2076_v18  ;;  %v2083_v4 = vadd.f32 %v7920_v59, %v6985_v38  ;;  %v7181_v59 = vpop.f32.mrf.mxu0 }
 0x2eb   : > { %v5463_v51 = vpop.f32.mrf.mxu1  ;;  %7925 = vst [vmem:[#allocation82_spill] sm:$0xff] %v7181_v59 }
 0x2ec   : > { %v7143_v31 = vadd.f32 %v5463_v51, %v2081_v62  ;;  %v7918_v51 = vld [vmem:[#allocation11_spill] sm:$0xff] }
 0x2ed   : > { %v2280_v27 = vpop.f32.mrf.mxu1  ;;  %v2085_v25 = vadd.f32 %v7918_v51, %v6979_v61  ;;  %v7923_v61 = vld [vmem:[#allocation14_spill] sm:$0xff] }
 0x2ee   : > { %v7147_v23 = vadd.f32 %v2280_v27, %v2079_v1  ;;  %v2084_v51 = vadd.f32 %v7923_v61, %v6997_v17  ;;  %v7191_v61 = vpop.f32.mrf.mxu0 }
 0x2ef   : > { %v5464_v18 = vpop.f32.mrf.mxu1  ;;  %7928 = vst [vmem:[#allocation38_spill] sm:$0xff] %v7191_v61 }
 0x2f0   : > { %v7153_v54 = vadd.f32 %v5464_v18, %v2082_v9  ;;  %v7921_v18 = vld [vmem:[#allocation13_spill] sm:$0xff] }
 0x2f1   : > { %v2283_v10 = vpop.f32.mrf.mxu1  ;;  %v2086_v7 = vadd.f32 %v7921_v18, %v6991_v5  ;;  %v7926_v5 = vld [vmem:[#allocation16_spill] sm:$0xff] }
 0x2f2   : > { %v7157_v62 = vadd.f32 %v2283_v10, %v2080_v6  ;;  %v2087_v18 = vadd.f32 %v7926_v5, %v7009_v37  ;;  %v7201_v5 = vpop.f32.mrf.mxu0 }
 0x2f3   : > { %v5467_v27 = vpop.f32.mrf.mxu1  ;;  %7931 = vst [vmem:[#allocation84_spill] sm:$0xff] %v7201_v5 }
 0x2f4   : > { %v7163_v1 = vadd.f32 %v5467_v27, %v2085_v25  ;;  %v7924_v27 = vld [vmem:[#allocation15_spill] sm:$0xff] }
 0x2f5   : > { %v2296_v36 = vpop.f32.mrf.mxu1  ;;  %v2089_v38 = vadd.f32 %v7924_v27, %v7003_v8  ;;  %v7929_v8 = vld [vmem:[#allocation18_spill] sm:$0xff] }
 0x2f6   : > { %v7167_v9 = vadd.f32 %v2296_v36, %v2083_v4  ;;  %v2088_v27 = vadd.f32 %v7929_v8, %v7019_v44  ;;  %v7211_v8 = vpop.f32.mrf.mxu0 }
 0x2f7   : > { %v5468_v10 = vpop.f32.mrf.mxu1  ;;  %7934 = vst [vmem:[#allocation40_spill] sm:$0xff] %v7211_v8 }
 0x2f8   : > { %v7173_v6 = vadd.f32 %v5468_v10, %v2086_v7  ;;  %v7927_v10 = vld [vmem:[#allocation17_spill] sm:$0xff] }
 0x2f9   : > { %v2299_v24 = vpop.f32.mrf.mxu1  ;;  %v2090_v17 = vadd.f32 %v7927_v10, %v7015_v40  ;;  %v7932_v40 = vld [vmem:[#allocation20_spill] sm:$0xff] }
 0x2fa   : > { %v7177_v25 = vadd.f32 %v2299_v24, %v2084_v51  ;;  %v2091_v10 = vadd.f32 %v7932_v40, %v7029_v63  ;;  %v7221_v40 = vpop.f32.mrf.mxu0 }
 0x2fb   : > { %v5471_v36 = vpop.f32.mrf.mxu1  ;;  %7937 = vst [vmem:[#allocation42_spill] sm:$0xff] %v7221_v40 }
 0x2fc   : > { %v7183_v4 = vadd.f32 %v5471_v36, %v2089_v38  ;;  %v7930_v36 = vld [vmem:[#allocation19_spill] sm:$0xff] }
 0x2fd   : > { %v2312_v56 = vpop.f32.mrf.mxu1  ;;  %v2093_v37 = vadd.f32 %v7930_v36, %v7025_v2  ;;  %v7935_v2 = vld [vmem:[#allocation22_spill] sm:$0xff] }
 0x2fe   : > { %v7187_v7 = vadd.f32 %v2312_v56, %v2087_v18  ;;  %v2092_v36 = vadd.f32 %v7935_v2, %v7039_v28  ;;  %v7231_v2 = vpop.f32.mrf.mxu0 }
 0x2ff   : > { %v5472_v24 = vpop.f32.mrf.mxu1  ;;  %7940 = vst [vmem:[#allocation87_spill] sm:$0xff] %v7231_v2 }
 0x300   : > { %v7193_v51 = vadd.f32 %v5472_v24, %v2090_v17  ;;  %v7933_v24 = vld [vmem:[#allocation21_spill] sm:$0xff] }
 0x301   : > { %v2315_v59 = vpop.f32.mrf.mxu1  ;;  %v2094_v44 = vadd.f32 %v7933_v24, %v7035_v15  ;;  %v7938_v15 = vld [vmem:[#allocation24_spill] sm:$0xff] }
 0x302   : > { %v7197_v38 = vadd.f32 %v2315_v59, %v2088_v27  ;;  %v2095_v24 = vadd.f32 %v7938_v15, %v7049_v47  ;;  %v7241_v15 = vpop.f32.mrf.mxu0 }
 0x303   : > { %v5475_v56 = vpop.f32.mrf.mxu1  ;;  %7943 = vst [vmem:[#allocation43_spill] sm:$0xff] %v7241_v15 }
 0x304   : > { %v7203_v18 = vadd.f32 %v5475_v56, %v2093_v37  ;;  %v7936_v56 = vld [vmem:[#allocation23_spill] sm:$0xff] }
 0x305   : > { %v2328_v61 = vpop.f32.mrf.mxu1  ;;  %v2097_v63 = vadd.f32 %v7936_v56, %v7045_v55  ;;  %v7941_v55 = vld [vmem:[#allocation27_spill] sm:$0xff] }
 0x306   : > { %v7207_v17 = vadd.f32 %v2328_v61, %v2091_v10  ;;  %v2096_v56 = vadd.f32 %v7941_v55, %v7059_v58  ;;  %v7251_v55 = vpop.f32.mrf.mxu0 }
 0x307   : > { %v5476_v59 = vpop.f32.mrf.mxu1  ;;  %7946 = vst [vmem:[#allocation89_spill] sm:$0xff] %v7251_v55 }
 0x308   : > { %v7213_v27 = vadd.f32 %v5476_v59, %v2094_v44  ;;  %v7939_v59 = vld [vmem:[#allocation25_spill] sm:$0xff] }
 0x309   : > { %v2331_v5 = vpop.f32.mrf.mxu1  ;;  %v2098_v28 = vadd.f32 %v7939_v59, %v7055_v49  ;;  %v7944_v49 = vld [vmem:[#allocation31_spill] sm:$0xff] }
 0x30a   : > { %v7217_v37 = vadd.f32 %v2331_v5, %v2092_v36  ;;  %v2099_v59 = vadd.f32 %v7944_v49, %v7069_v43  ;;  %v7261_v49 = vpop.f32.mrf.mxu0 }
 0x30b   : > { %v5479_v61 = vpop.f32.mrf.mxu1  ;;  %7949 = vst [vmem:[#allocation45_spill] sm:$0xff] %v7261_v49 }
 0x30c   : > { %v7223_v10 = vadd.f32 %v5479_v61, %v2097_v63  ;;  %v7942_v61 = vld [vmem:[#allocation29_spill] sm:$0xff] }
 0x30d   : > { %v2344_v8 = vpop.f32.mrf.mxu1  ;;  %v2101_v47 = vadd.f32 %v7942_v61, %v7065_v35  ;;  %v7947_v35 = vld [vmem:[#allocation35_spill] sm:$0xff] }
 0x30e   : > { %v7227_v44 = vadd.f32 %v2344_v8, %v2095_v24  ;;  %v2100_v61 = vadd.f32 %v7947_v35, %v7079_v26  ;;  %v5667_v35 = vpop.f32.mrf.mxu0 }
 0x30f   : > { %v5480_v5 = vpop.f32.mrf.mxu1 }
 0x310   : > { %v7233_v36 = vadd.f32 %v5480_v5, %v2098_v28  ;;  %v7945_v5 = vld [vmem:[#allocation33_spill] sm:$0xff] }
 0x311   : > { %v2347_v40 = vpop.f32.mrf.mxu1  ;;  %v2102_v58 = vadd.f32 %v7945_v5, %v7075_v34  ;;  %v7950_v34 = vld [vmem:[#allocation39_spill] sm:$0xff] }
 0x312   : > { %v7237_v63 = vadd.f32 %v2347_v40, %v2096_v56  ;;  %v2103_v5 = vadd.f32 %v7950_v34, %v7089_v29  ;;  %v3592_v29 = vpop.f32.mrf.mxu0 }
 0x313   : > { %v5483_v8 = vpop.f32.mrf.mxu1 }
 0x314   : > { %v7243_v24 = vadd.f32 %v5483_v8, %v2101_v47  ;;  %v7948_v8 = vld [vmem:[#allocation37_spill] sm:$0xff] }
 0x315   : > { %v2360_v2 = vpop.f32.mrf.mxu1  ;;  %v2105_v43 = vadd.f32 %v7948_v8, %v7085_v30  ;;  %v7952_v30 = vld [vmem:[#allocation44_spill] sm:$0xff] }
 0x316   : > { %v7247_v28 = vadd.f32 %v2360_v2, %v2099_v59  ;;  %v2104_v8 = vadd.f32 %v7952_v30, %v7099_v11  ;;  %v5668_v11 = vpop.f32.mrf.mxu0 }
 0x317   : > { %v5484_v40 = vpop.f32.mrf.mxu1 }
 0x318   : > { %v7253_v56 = vadd.f32 %v5484_v40, %v2102_v58  ;;  %v7951_v40 = vld [vmem:[#allocation41_spill] sm:$0xff] }
 0x319   : > { %v2363_v15 = vpop.f32.mrf.mxu1  ;;  %v2106_v26 = vadd.f32 %v7951_v40, %v7095_v39 }
 0x31a   : > { %v7257_v47 = vadd.f32 %v2363_v15, %v2100_v61 }
 0x31b   : > { %v5487_v2 = vpop.f32.mrf.mxu1 }
 0x31c   : > { %v7263_v59 = vadd.f32 %v5487_v2, %v2105_v43  ;;  %v7953_v43 = vld [vmem:[#allocation46_spill] sm:$0xff] }
 0x31d   : > { %v2376_v55 = vpop.f32.mrf.mxu1  ;;  %v2109_v2 = vadd.f32 %v7953_v43, %v7105_v33  ;;  %v7959_v33 = vld [vmem:[#allocation49_spill] sm:$0xff] }
 0x31e   : > { %v7267_v58 = vadd.f32 %v2376_v55, %v2103_v5  ;;  %v7955_v5 = vld [vmem:[#allocation47_spill] sm:$0xff] }
 0x31f   : > { %v5488_v15 = vpop.f32.mrf.mxu1  ;;  %v2107_v39 = vadd.f32 %v7955_v5, %v7109_v22  ;;  %v3595_v5 = vpop.f32.mrf.mxu0 }
 0x320   : > { %v7271_v61 = vadd.f32 %v5488_v15, %v2106_v26  ;;  %v7957_v26 = vld [vmem:[#allocation48_spill] sm:$0xff] }
 0x321   : > { %v2379_v49 = vpop.f32.mrf.mxu1  ;;  %v2110_v15 = vadd.f32 %v7957_v26, %v7115_v16  ;;  %v7962_v16 = vld [vmem:[#allocation51_spill] sm:$0xff] }
 0x322   : > { %v7275_v19 = vadd.f32 %v2379_v49, %v2104_v8  ;;  %v2108_v8 = vadd.f32 %v7959_v33, %v7117_v60  ;;  %v2739_v26 = vadd.f32 %v7962_v16, %v7127_v0  ;;  %v5671_v33 = vpop.f32.mrf.mxu0 }
 0x323   : > { %v5491_v34 = vpop.f32.mrf.mxu1 }
 0x324   : > { %v7279_v55 = vadd.f32 %v5491_v34, %v2109_v2  ;;  %v7961_v34 = vld [vmem:[#allocation50_spill] sm:$0xff] }
 0x325   : > { %v2392_v40 = vpop.f32.mrf.mxu1  ;;  %v2741_v22 = vadd.f32 %v7961_v34, %v7123_v42  ;;  %v7304_v42 = vld [vmem:[%s7764_s3] ss:$0 sm:$0xff] }
 0x326   : > { %7954 = vst [vmem:[#allocation91_spill] sm:$0xff] %v7279_v55  ;;  %v7283_v52 = vadd.f32 %v2392_v40, %v2107_v39  ;;  %v4034_v40 = vpop.permute.xlu0 %4033 }
 0x327   : > { %v5492_v49 = vpop.f32.mrf.mxu1 }
 0x328   : > { %7956 = vst [vmem:[#allocation3_spill] sm:$0xff] %v7283_v52  ;;  %v7287_v30 = vadd.f32 %v5492_v49, %v2110_v15 }
 0x329   : > { %v2395_v43 = vpop.f32.mrf.mxu1 }
 0x32a   : > { %7958 = vst [vmem:[#allocation4_spill] sm:$0xff] %v7287_v30  ;;  %v7291_v2 = vadd.f32 %v2395_v43, %v2108_v8  ;;  %v7963_v30 = vld [vmem:[#allocation52_spill] sm:$0xff]  ;;  %v4044_v43 = vpop.permute.xlu1 %4043 }
 0x32b   : > { %v5563_v39 = vpop.f32.mrf.mxu1  ;;  %v2742_v60 = vadd.f32 %v7963_v30, %v7133_v53 }
 0x32c   : > { %7960 = vst [vmem:[#allocation5_spill] sm:$0xff] %v7291_v2  ;;  %v3073_v52 = vadd.f32 %v5563_v39, %v2741_v22  ;;  %v7964_v39 = vld [vmem:[#allocation53_spill] sm:$0xff] }
 0x32d   : > { %v2928_v55 = vpop.f32.mrf.mxu1 }
 0x32e   : > { %v3405_v15 = vadd.f32 %v6951_v46, %v3073_v52  ;;  %v3071_v49 = vadd.f32 %v2928_v55, %v2739_v26  ;;  %v2740_v52 = vadd.f32 %v7964_v39, %v7137_v21  ;;  %v4039_v55 = vpop.permute.xlu0 %4038  ;;  %v4049_v2 = vpop.permute.xlu1 %4048 }
 0x32f   : > { %v5564_v8 = vpop.f32.mrf.mxu1 }
 0x330   : > { %v3737_v34 = vadd.f32 %v5667_v35, %v3405_v15  ;;  %v3403_v22 = vadd.f32 %v6957_v12, %v3071_v49  ;;  %v3074_v0 = vadd.f32 %v5564_v8, %v2742_v60  ;;  %v3608_v35 = vpop.f32.mrf.mxu0  ;;  %v7965_v12 = vld [vmem:[#allocation54_spill] sm:$0xff] }
 0x331   : > { %v2931_v46 = vpop.f32.mrf.mxu1  ;;  %v2745_v21 = vadd.f32 %v7965_v12, %v7143_v31 }
 0x332   : > { %v3780_v53 = vadd.f32 %v7304_v42, %v3737_v34  ;;  %v3735_v30 = vadd.f32 %v3592_v29, %v3403_v22  ;;  %v3406_v16 = vadd.f32 %v6963_v14, %v3074_v0  ;;  %v3072_v26 = vadd.f32 %v2931_v46, %v2740_v52  ;;  %v7966_v22 = vld [vmem:[#allocation55_spill] sm:$0xff]  ;;  %v7967_v52 = vld [vmem:[#allocation56_spill] sm:$0xff] }
 0x333   : > { %v5567_v15 = vpop.f32.mrf.mxu1  ;;  %v2743_v0 = vadd.f32 %v7966_v22, %v7147_v23  ;;  %v2746_v46 = vadd.f32 %v7967_v52, %v7153_v54  ;;  %v4054_v22 = vpop.permute.xlu0 %4053 }
 0x334   : > { %v4821_v49 = vpack.c.bf16 %v3780_v53, %v3780_v53  ;;  %v4213_v60 = vmul.f32 %v4044_v43, %v3780_v53  ;;  %v3778_v29 = vadd.f32 %v7304_v42, %v3735_v30  ;;  %v3738_v8 = vadd.f32 %v5668_v11, %v3406_v16  ;;  %v7968_v30 = vld [vmem:[#allocation57_spill] sm:$0xff]  ;;  %v5672_v16 = vpop.f32.mrf.mxu0 }
 0x335   : > { %v3404_v14 = vadd.f32 %v6969_v48, %v3072_v26  ;;  %v3077_v34 = vadd.f32 %v5567_v15, %v2745_v21  ;;  %v2944_v39 = vpop.f32.mrf.mxu1  ;;  %v2744_v11 = vadd.f32 %v7968_v30, %v7157_v62  ;;  %v7971_v62 = vld [vmem:[#allocation60_spill] sm:$0xff] }
 0x336   : > { %3961 = vst.msk [vmem:[%s7314_s20 + $0x8] sm:$0xf] %vm3958_vm12, %v4821_v49  ;;  %v4327_v31 = vmul.f32 %v4213_v60, %v3780_v53  ;;  %v4819_v12 = vpack.c.bf16 %v3778_v29, %v3778_v29  ;;  %v4211_v43 = vmul.f32 %v4034_v40, %v3778_v29  ;;  %v3781_v48 = vadd.f32 %v7304_v42, %v3738_v8  ;;  %v7969_v53 = vld [vmem:[#allocation58_spill] sm:$0xff]  ;;  %v7970_v40 = vld [vmem:[#allocation59_spill] sm:$0xff] }
 0x337   : > { %v3736_v26 = vadd.f32 %v3595_v5, %v3404_v14  ;;  %v3409_v23 = vadd.f32 %v6975_v57, %v3077_v34  ;;  %v3075_v21 = vadd.f32 %v2944_v39, %v2743_v0  ;;  %v5568_v15 = vpop.f32.mrf.mxu1  ;;  %v2749_v49 = vadd.f32 %v7969_v53, %v7163_v1 }
 0x338   : > { %3959 = vst.msk [vmem:[%s7314_s20] sm:$0xf] %vm3958_vm12, %v4819_v12  ;;  %v3078_v54 = vadd.f32 %v5568_v15, %v2746_v46  ;;  %v7336_v52 = vadd.f32 %v7970_v40, %v7167_v9  ;;  %v7340_v8 = vadd.f32 %v7971_v62, %v7173_v6  ;;  %v4251_v57 = vsel %vm4247_vm13, %v4213_v60, 0.0  ;;  %v3611_v9 = vpop.f32.mrf.mxu0  ;;  %v4059_v40 = vpop.permute.xlu1 %4058 }
 0x339   : > { %v4822_v5 = vpack.c.bf16 %v3781_v48, %v3781_v48  ;;  %v3779_v14 = vadd.f32 %v7304_v42, %v3736_v26  ;;  %v3741_v34 = vadd.f32 %v5671_v33, %v3409_v23  ;;  %v2947_v0 = vpop.f32.mrf.mxu1  ;;  %v4325_v39 = vmul.f32 %v4211_v43, %v3778_v29 }
 0x33a   : > { %v3407_v46 = vadd.f32 %v6981_v41, %v3075_v21  ;;  %v3410_v1 = vadd.f32 %v6987_v32, %v3078_v54  ;;  %v3076_v12 = vadd.f32 %v2947_v0, %v2744_v11  ;;  %v4364_v30 = vsel %vm4247_vm13, %v4327_v31, 0.0  ;;  %v4064_v21 = vpop.permute.xlu0 %4063 }
 0x33b   : > { %3962 = vst.msk [vmem:[%s7314_s20 + $0xc] sm:$0xf] %vm3958_vm12, %v4822_v5  ;;  %v4214_v6 = vmul.f32 %v4049_v2, %v3781_v48  ;;  %v4820_v15 = vpack.c.bf16 %v3779_v14, %v3779_v14  ;;  %v4212_v60 = vmul.f32 %v4039_v55, %v3779_v14  ;;  %v5571_v53 = vpop.f32.mrf.mxu1  ;;  %v3784_v33 = vadd.f32 %v7304_v42, %v3741_v34 }
 0x33c   : > { %v3739_v26 = vadd.f32 %v3608_v35, %v3407_v46  ;;  %v3742_v29 = vadd.f32 %v5672_v16, %v3410_v1  ;;  %v3408_v41 = vadd.f32 %v6993_v13, %v3076_v12  ;;  %v4248_v23 = vsel %vm4247_vm13, %v4211_v43, 0.0  ;;  %v5675_v16 = vpop.f32.mrf.mxu0 }
 0x33d   : > { %3960 = vst.msk [vmem:[%s7314_s20 + $0x4] sm:$0xf] %vm3958_vm12, %v4820_v15  ;;  %v4249_v32 = vsel %vm4247_vm13, %v4212_v60, 0.0  ;;  %v4326_v31 = vmul.f32 %v4212_v60, %v3779_v14  ;;  %v3081_v11 = vadd.f32 %v5571_v53, %v2749_v49  ;;  %v2960_v2 = vpop.f32.mrf.mxu1  ;;  %v4361_v55 = vsel %vm4247_vm13, %v4325_v39, 0.0  ;;  %v4069_v53 = vpop.permute.xlu1 %4068 }
 0x33e   : > { %v4250_v54 = vadd.f32 %v4249_v32, %v4248_v23  ;;  %v4825_v62 = vpack.c.bf16 %v3784_v33, %v3784_v33  ;;  %v3782_v35 = vadd.f32 %v7304_v42, %v3739_v26  ;;  %v4328_v5 = vmul.f32 %v4214_v6, %v3781_v48 }
 0x33f   : > { %v4362_v13 = vsel %vm4247_vm13, %v4326_v31, 0.0  ;;  %v3785_v43 = vadd.f32 %v7304_v42, %v3742_v29  ;;  %v3740_v34 = vadd.f32 %v3611_v9, %v3408_v41  ;;  %v5572_v0 = vpop.f32.mrf.mxu1  ;;  %v4253_v14 = vsel %vm4247_vm13, %v4214_v6, 0.0  ;;  %v7972_v6 = vld [vmem:[#allocation61_spill] sm:$0xff]  ;;  %v3624_v41 = vpop.f32.mrf.mxu0 }
 0x340   : > { %v4252_v49 = vadd.f32 %v4251_v57, %v4250_v54  ;;  %v4363_v46 = vadd.f32 %v4362_v13, %v4361_v55  ;;  %3965 = vst.msk [vmem:[%s7314_s20 + $0x18] sm:$0xf] %vm3958_vm12, %v4825_v62  ;;  %v4217_v39 = vmul.f32 %v4064_v21, %v3784_v33  ;;  %v4823_v1 = vpack.c.bf16 %v3782_v35, %v3782_v35 }
 0x341   : > { %v4215_v12 = vmul.f32 %v4054_v22, %v3782_v35  ;;  %v4826_v15 = vpack.c.bf16 %v3785_v43, %v3785_v43  ;;  %v3413_v48 = vadd.f32 %v6999_v3, %v3081_v11  ;;  %v2963_v60 = vpop.f32.mrf.mxu1  ;;  %v3783_v9 = vadd.f32 %v7304_v42, %v3740_v34 }
 0x342   : > { %v4365_v26 = vadd.f32 %v4364_v30, %v4363_v46  ;;  %v4254_v29 = vadd.f32 %v4253_v14, %v4252_v49  ;;  %v2748_v57 = vadd.f32 %v7972_v6, %v7177_v25  ;;  %v4366_v23 = vsel %vm4247_vm13, %v4328_v5, 0.0  ;;  %3963 = vst.msk [vmem:[%s7314_s20 + $0x10] sm:$0xf] %vm3958_vm12, %v4823_v1  ;;  %v5676_v46 = vpop.f32.mrf.mxu0 }
 0x343   : > { %v4255_v22 = vsel %vm4247_vm13, %v4215_v12, 0.0  ;;  %v4329_v32 = vmul.f32 %v4215_v12, %v3782_v35  ;;  %3966 = vst.msk [vmem:[%s7314_s20 + $0x1c] sm:$0xf] %vm3958_vm12, %v4826_v15  ;;  %v4218_v3 = vmul.f32 %v4069_v53, %v3785_v43  ;;  %v7372_v31 = vpop.f32.mrf.mxu1  ;;  %v4824_v21 = vpack.c.bf16 %v3783_v9, %v3783_v9 }
 0x344   : > { %v4256_v30 = vadd.f32 %v4255_v22, %v4254_v29  ;;  %v4367_v11 = vadd.f32 %v4366_v23, %v4365_v26  ;;  %v4216_v55 = vmul.f32 %v4059_v40, %v3783_v9  ;;  %v4331_v54 = vmul.f32 %v4217_v39, %v3784_v33  ;;  %v3627_v23 = vpop.f32.mrf.mxu0 }
 0x345   : > { %v4368_v25 = vsel %vm4247_vm13, %v4329_v32, 0.0  ;;  %v3745_v62 = vadd.f32 %v5675_v16, %v3413_v48  ;;  %v3079_v5 = vadd.f32 %v2960_v2, %v7336_v52  ;;  %v7376_v13 = vpop.f32.mrf.mxu1  ;;  %3964 = vst.msk [vmem:[%s7314_s20 + $0x14] sm:$0xf] %vm3958_vm12, %v4824_v21  ;;  %v3082_v49 = vadd.f32 %v5572_v0, %v7340_v8  ;;  %v4074_v52 = vpop.permute.xlu0 %4073 }
 0x346   : > { %v4369_v34 = vadd.f32 %v4368_v25, %v4367_v11  ;;  %v4257_v35 = vsel %vm4247_vm13, %v4216_v55, 0.0  ;;  %v4330_v14 = vmul.f32 %v4216_v55, %v3783_v9  ;;  %v3080_v12 = vadd.f32 %v2963_v60, %v2748_v57 }
 0x347   : > { %v4258_v1 = vadd.f32 %v4257_v35, %v4256_v30  ;;  %v3788_v40 = vadd.f32 %v7304_v42, %v3745_v62  ;;  %v3411_v33 = vadd.f32 %v7005_v45, %v3079_v5  ;;  %v7384_v16 = vpop.f32.mrf.mxu1  ;;  %v4259_v2 = vsel %vm4247_vm13, %v4217_v39, 0.0  ;;  %v4079_v45 = vpop.permute.xlu1 %4078 }
 0x348   : > { %v4332_v15 = vmul.f32 %v4218_v3, %v3785_v43  ;;  %v4370_v48 = vsel %vm4247_vm13, %v4330_v14, 0.0  ;;  %v3414_v53 = vadd.f32 %v7011_v50, %v3082_v49  ;;  %v4372_v8 = vsel %vm4247_vm13, %v4331_v54, 0.0 }
 0x349   : > { %v4260_v0 = vadd.f32 %v4259_v2, %v4258_v1  ;;  %v4371_v26 = vadd.f32 %v4370_v48, %v4369_v34  ;;  %v4829_v29 = vpack.c.bf16 %v3788_v40, %v3788_v40  ;;  %v7390_v9 = vpop.f32.mrf.mxu1  ;;  %v4261_v60 = vsel %vm4247_vm13, %v4218_v3, 0.0 }
 0x34a   : > { %v3743_v6 = vadd.f32 %v3624_v41, %v3411_v33  ;;  %v3746_v57 = vadd.f32 %v5676_v46, %v3414_v53  ;;  %v3412_v39 = vadd.f32 %v7021_v20, %v3080_v12  ;;  %v4374_v32 = vsel %vm4247_vm13, %v4332_v15, 0.0  ;;  %v4084_v20 = vpop.permute.xlu0 %4083 }
 0x34b   : > { %v4373_v43 = vadd.f32 %v4372_v8, %v4371_v26  ;;  %3969 = vst.msk [vmem:[%s7314_s20 + $0x28] sm:$0xf] %vm3958_vm12, %v4829_v29  ;;  %v4262_v22 = vadd.f32 %v4261_v60, %v4260_v0  ;;  %v7396_v50 = vpop.f32.mrf.mxu1  ;;  %v4221_v62 = vmul.f32 %v4084_v20, %v3788_v40  ;;  %v4089_v35 = vpop.permute.xlu1 %4088 }
 0x34c   : > { %v3786_v30 = vadd.f32 %v7304_v42, %v3743_v6  ;;  %v3789_v11 = vadd.f32 %v7304_v42, %v3746_v57  ;;  %v3744_v3 = vadd.f32 %v3627_v23, %v3412_v39 }
 0x34d   : > { %v4375_v41 = vadd.f32 %v4374_v32, %v4373_v43  ;;  %v7401_v21 = vpop.f32.mrf.mxu1  ;;  %v4335_v15 = vmul.f32 %v4221_v62, %v3788_v40  ;;  %v4267_v29 = vsel %vm4247_vm13, %v4221_v62, 0.0 }
 0x34e   : > { %v4827_v55 = vpack.c.bf16 %v3786_v30, %v3786_v30  ;;  %v4219_v54 = vmul.f32 %v4074_v52, %v3786_v30  ;;  %v4830_v25 = vpack.c.bf16 %v3789_v11, %v3789_v11  ;;  %v3787_v5 = vadd.f32 %v7304_v42, %v3744_v3 }
 0x34f   : > { %v7404_v34 = vpop.f32.mrf.mxu1  ;;  %v4222_v1 = vmul.f32 %v4089_v35, %v3789_v11  ;;  %v4380_v23 = vsel %vm4247_vm13, %v4335_v15, 0.0  ;;  %v7976_v15 = vld [vmem:[#allocation65_spill] sm:$0xff] }
 0x350   : > { %3967 = vst.msk [vmem:[%s7314_s20 + $0x20] sm:$0xf] %vm3958_vm12, %v4827_v55  ;;  %v4263_v14 = vsel %vm4247_vm13, %v4219_v54, 0.0  ;;  %v4333_v49 = vmul.f32 %v4219_v54, %v3786_v30  ;;  %3970 = vst.msk [vmem:[%s7314_s20 + $0x2c] sm:$0xf] %vm3958_vm12, %v4830_v25  ;;  %v4828_v33 = vpack.c.bf16 %v3787_v5, %v3787_v5  ;;  %v4220_v12 = vmul.f32 %v4079_v45, %v3787_v5 }
 0x351   : > { %v4264_v46 = vadd.f32 %v4263_v14, %v4262_v22  ;;  %v7411_v52 = vpop.f32.mrf.mxu1  ;;  %v4336_v60 = vmul.f32 %v4222_v1, %v3789_v11  ;;  %v4269_v43 = vsel %vm4247_vm13, %v4222_v1, 0.0  ;;  %v7442_v14 = vpop.permute.xlu1 %4098  ;;  %v7974_v1 = vld [vmem:[#allocation63_spill] sm:$0xff] }
 0x352   : > { %v4376_v2 = vsel %vm4247_vm13, %v4333_v49, 0.0  ;;  %3968 = vst.msk [vmem:[%s7314_s20 + $0x24] sm:$0xf] %vm3958_vm12, %v4828_v33  ;;  %v4265_v53 = vsel %vm4247_vm13, %v4220_v12, 0.0  ;;  %v4334_v8 = vmul.f32 %v4220_v12, %v3787_v5  ;;  %v7438_v5 = vpop.permute.xlu0 %4093  ;;  %v7973_v49 = vld [vmem:[#allocation62_spill] sm:$0xff]  ;;  %v2751_v33 = vadd.f32 %v7974_v1, %v7187_v7  ;;  %v7975_v12 = vld [vmem:[#allocation64_spill] sm:$0xff] }
 0x353   : > { %v4377_v48 = vadd.f32 %v4376_v2, %v4375_v41  ;;  %v5583_v0 = vpop.f32.mrf.mxu1  ;;  %v4266_v26 = vadd.f32 %v4265_v53, %v4264_v46  ;;  %v4382_v3 = vsel %vm4247_vm13, %v4336_v60, 0.0  ;;  %v2753_v46 = vadd.f32 %v7973_v49, %v7183_v4  ;;  %v7986_v1 = vld [vmem:[#allocation81_spill] sm:$0xff] }
 0x354   : > { %v4378_v6 = vsel %vm4247_vm13, %v4334_v8, 0.0  ;;  %v2754_v2 = vadd.f32 %v7975_v12, %v7193_v51  ;;  %v7977_v8 = vld [vmem:[#allocation66_spill] sm:$0xff]  ;;  %v7987_v12 = vld [vmem:[#allocation83_spill] sm:$0xff] }
 0x355   : > { %v7419_v57 = vpop.f32.mrf.mxu1  ;;  %v4379_v45 = vadd.f32 %v4378_v6, %v4377_v48  ;;  %v4268_v39 = vadd.f32 %v4267_v29, %v4266_v26  ;;  %v2752_v48 = vadd.f32 %v7976_v15, %v7197_v38  ;;  %v2757_v26 = vadd.f32 %v7977_v8, %v7203_v18  ;;  %v7978_v29 = vld [vmem:[#allocation67_spill] sm:$0xff]  ;;  %v7979_v6 = vld [vmem:[#allocation68_spill] sm:$0xff]  ;;  %v7984_v18 = vld [vmem:[#allocation77_spill] sm:$0xff] }
 0x356   : > { %v2755_v60 = vadd.f32 %v7978_v29, %v7207_v17  ;;  %v2758_v4 = vadd.f32 %v7979_v6, %v7213_v27  ;;  %v7985_v17 = vld [vmem:[#allocation79_spill] sm:$0xff]  ;;  %v7988_v15 = vld [vmem:[#allocation85_spill] sm:$0xff]  ;;  %v7480_v8 = vpop.permute.xlu0 %4103  ;;  %v3086_v29 = vadd.f32 %v7384_v16, %v2754_v2  ;;  %v7989_v6 = vld [vmem:[#allocation86_spill] sm:$0xff] }
 0x357   : > { %v7422_v40 = vpop.f32.mrf.mxu1  ;;  %v7425_v22 = vadd.f32 %v4269_v43, %v4268_v39  ;;  %v4381_v32 = vadd.f32 %v4380_v23, %v4379_v45  ;;  %v7980_v45 = vld [vmem:[#allocation69_spill] sm:$0xff]  ;;  %v7981_v39 = vld [vmem:[#allocation71_spill] sm:$0xff]  ;;  %v2765_v27 = vadd.f32 %v7985_v17, %v7243_v24  ;;  %v2769_v24 = vadd.f32 %v7989_v6, %v7263_v59  ;;  %v7991_v16 = vld [vmem:[#allocation90_spill] sm:$0xff] }
 0x358   : > { %v2756_v7 = vadd.f32 %v7980_v45, %v7217_v37  ;;  %v2761_v51 = vadd.f32 %v7981_v39, %v7223_v10  ;;  %v7982_v23 = vld [vmem:[#allocation73_spill] sm:$0xff]  ;;  %v7983_v43 = vld [vmem:[#allocation75_spill] sm:$0xff]  ;;  %v2763_v37 = vadd.f32 %v7986_v1, %v7247_v28  ;;  %v2766_v10 = vadd.f32 %v7987_v12, %v7253_v56  ;;  %v7489_v28 = vpop.permute.xlu1 %4108  ;;  %v7992_v59 = vld [vmem:[#allocation92_spill] sm:$0xff] }
 0x359   : > { %v3011_v30 = vpop.f32.mrf.mxu1  ;;  %v7428_v41 = vadd.f32 %v4382_v3, %v4381_v32  ;;  %v2759_v38 = vadd.f32 %v7982_v23, %v7227_v44  ;;  %v2762_v32 = vadd.f32 %v7983_v43, %v7233_v36  ;;  %v2760_v3 = vadd.f32 %v7984_v18, %v7237_v63  ;;  %v7990_v23 = vld [vmem:[#allocation88_spill] sm:$0xff]  ;;  %v7993_v2 = vld [vmem:[#allocation91_spill] sm:$0xff]  ;;  %v7994_v43 = vld [vmem:[#allocation93_spill] sm:$0xff] }
 0x35a   : > { %v2764_v44 = vadd.f32 %v7988_v15, %v7257_v47  ;;  %v3085_v36 = vadd.f32 %v7372_v31, %v2753_v46  ;;  %v3083_v63 = vadd.f32 %v7376_v13, %v2751_v33  ;;  %v3084_v56 = vadd.f32 %v7390_v9, %v2752_v48  ;;  %v7996_v48 = vld [vmem:[#allocation94_spill] sm:$0xff]  ;;  %v8001_v12 = vld [vmem:[#allocation97_spill] sm:$0xff] }
 0x35b   : > { %v5587_v11 = vpop.f32.mrf.mxu1  ;;  %v3089_v39 = vadd.f32 %v7396_v50, %v2757_v26  ;;  %v3087_v47 = vadd.f32 %v7401_v21, %v2755_v60  ;;  %v2767_v31 = vadd.f32 %v7990_v23, %v7267_v58  ;;  %v3090_v13 = vadd.f32 %v7404_v34, %v2758_v4  ;;  %v7995_v21 = vld [vmem:[#allocation3_spill] sm:$0xff]  ;;  %v7997_v58 = vld [vmem:[#allocation4_spill] sm:$0xff]  ;;  %v7999_v4 = vld [vmem:[#allocation5_spill] sm:$0xff] }
 0x35c   : > { %v2770_v46 = vadd.f32 %v7991_v16, %v7271_v61  ;;  %v2768_v33 = vadd.f32 %v7992_v59, %v7275_v19  ;;  %v2773_v18 = vadd.f32 %v7994_v43, %v7993_v2  ;;  %v3088_v9 = vadd.f32 %v7411_v52, %v2756_v7  ;;  %v7998_v60 = vld [vmem:[#allocation95_spill] sm:$0xff]  ;;  %v8000_v61 = vld [vmem:[#allocation96_spill] sm:$0xff]  ;;  %v8002_v6 = vld [vmem:[#allocation98_spill] sm:$0xff] }
 0x35d   : > { %v3024_v20 = vpop.f32.mrf.mxu1  ;;  %v3093_v50 = vadd.f32 %v5583_v0, %v2761_v51  ;;  %v2771_v26 = vadd.f32 %v7996_v48, %v7995_v21  ;;  %v7510_v34 = vadd.f32 %v7998_v60, %v7997_v58  ;;  %v7514_v1 = vadd.f32 %v8000_v61, %v7999_v4  ;;  %v8003_v16 = vld [vmem:[#allocation99_spill] sm:$0xff]  ;;  %v8004_v7 = vld [vmem:[#allocation70_spill] sm:$0xff]  ;;  %v8006_v43 = vld [vmem:[#allocation72_spill] sm:$0xff]  ;;  %v7525_v48 = vpop.permute.xlu0 %4113 }
 0x35e   : > { %v3417_v15 = vadd.f32 %v8001_v12, %v3085_v36  ;;  %v3415_v23 = vadd.f32 %v8002_v6, %v3083_v63  ;;  %v3418_v52 = vadd.f32 %v8003_v16, %v3086_v29  ;;  %v3091_v0 = vadd.f32 %v7419_v57, %v2759_v38  ;;  %v8005_v59 = vld [vmem:[#allocation26_spill] sm:$0xff]  ;;  %v8007_v36 = vld [vmem:[#allocation28_spill] sm:$0xff]  ;;  %v7531_v63 = vpop.permute.xlu1 %4118 }
 0x35f   : > { %v7430_v55 = vpop.f32.mrf.mxu1  ;;  %v3416_v51 = vadd.f32 %v8004_v7, %v3084_v56  ;;  %v3421_v2 = vadd.f32 %v8005_v59, %v3089_v39  ;;  %v3419_v21 = vadd.f32 %v8006_v43, %v3087_v47  ;;  %v3094_v58 = vadd.f32 %v7422_v40, %v2762_v32  ;;  %v8008_v38 = vld [vmem:[#allocation74_spill] sm:$0xff] }
 0x360   : > { %v3092_v60 = vadd.f32 %v3011_v30, %v2760_v3  ;;  %v3097_v4 = vadd.f32 %v5587_v11, %v2765_v27  ;;  %v7529_v12 = vadd.f32 %v8007_v36, %v3090_v13  ;;  %v3095_v29 = vadd.f32 %v3024_v20, %v2763_v37  ;;  %v8009_v39 = vld [vmem:[#allocation30_spill] sm:$0xff]  ;;  %v8010_v37 = vld [vmem:[#allocation76_spill] sm:$0xff] }
 0x361   : > { %v7432_v54 = vpop.f32.mrf.mxu1  ;;  %v7534_v56 = vadd.f32 %v8008_v38, %v3088_v9  ;;  %v7537_v6 = vadd.f32 %v8009_v39, %v3093_v50  ;;  %v3098_v47 = vadd.f32 %v7430_v55, %v2766_v10  ;;  %v7546_v13 = vadd.f32 %v8010_v37, %v3091_v0  ;;  %v8011_v55 = vld [vmem:[#allocation32_spill] sm:$0xff]  ;;  %v8016_v0 = vld [vmem:[#allocation82_spill] sm:$0xff] }
 0x362   : > { %v3096_v40 = vadd.f32 %v7432_v54, %v2764_v44  ;;  %v7550_v10 = vadd.f32 %v8011_v55, %v3094_v58  ;;  %v8012_v54 = vld [vmem:[#allocation78_spill] sm:$0xff]  ;;  %v8018_v58 = vld [vmem:[#allocation84_spill] sm:$0xff] }
 0x363   : > { %v7434_v25 = vpop.f32.mrf.mxu1  ;;  %v8017_v59 = vld [vmem:[#allocation38_spill] sm:$0xff] }
 0x364   : > { %v3101_v30 = vadd.f32 %v7434_v25, %v2769_v24  ;;  %v7553_v25 = vadd.f32 %v8012_v54, %v3092_v60  ;;  %v7566_v7 = vadd.f32 %v8016_v0, %v3096_v40 }
 0x365   : > { %v7436_v62 = vpop.f32.mrf.mxu1 }
 0x366   : > { %v3099_v11 = vadd.f32 %v7436_v62, %v2767_v31  ;;  %v8013_v62 = vld [vmem:[#allocation34_spill] sm:$0xff]  ;;  %v7569_v43 = vadd.f32 %v8017_v59, %v3101_v30 }
 0x367   : > { %v7440_v35 = vpop.f32.mrf.mxu1  ;;  %v7556_v44 = vadd.f32 %v8013_v62, %v3097_v4  ;;  %v7574_v4 = vpop.permute.xlu1 %4128  ;;  %v8020_v30 = vld [vmem:[#allocation42_spill] sm:$0xff]  ;;  %v8021_v62 = vld [vmem:[#allocation87_spill] sm:$0xff] }
 0x368   : > { %v3102_v3 = vadd.f32 %v7440_v35, %v2770_v46  ;;  %v8014_v46 = vld [vmem:[#allocation80_spill] sm:$0xff]  ;;  %v7572_v60 = vadd.f32 %v8018_v58, %v3099_v11 }
 0x369   : > { %v7452_v53 = vpop.f32.mrf.mxu1 }
 0x36a   : > { %v3100_v9 = vadd.f32 %v7452_v53, %v2768_v33  ;;  %v8015_v33 = vld [vmem:[#allocation36_spill] sm:$0xff] }
 0x36b   : > { %v7470_v49 = vpop.f32.mrf.mxu1  ;;  %v7563_v16 = vadd.f32 %v8015_v33, %v3098_v47  ;;  %v8022_v33 = vld [vmem:[#allocation43_spill] sm:$0xff] }
 0x36c   : > { %v3105_v38 = vadd.f32 %v7470_v49, %v2773_v18  ;;  %v7586_v11 = vadd.f32 %v8020_v30, %v3100_v9 }
 0x36d   : > { %v7487_v45 = vpop.f32.mrf.mxu1 }
 0x36f   : > { %v7503_v17 = vpop.f32.mrf.mxu1 }
 0x371   : > { %v7516_v19 = vpop.f32.mrf.mxu1 }
 0x373   : > { %v5679_v61 = vpop.f32.mrf.mxu1 }
 0x374   : > { %v3749_v57 = vadd.f32 %v5679_v61, %v3417_v15  ;;  %v7560_v15 = vadd.f32 %v8014_v46, %v3095_v29  ;;  %v8019_v29 = vld [vmem:[#allocation40_spill] sm:$0xff] }
 0x375   : > { %v3640_v32 = vpop.f32.mrf.mxu1 }
 0x376   : > { %v3792_v20 = vadd.f32 %v7304_v42, %v3749_v57  ;;  %v3747_v27 = vadd.f32 %v3640_v32, %v3415_v23  ;;  %v4124_v23 = vpop.permute.xlu0 %4123  ;;  %v7581_v57 = vadd.f32 %v8019_v29, %v3102_v3  ;;  %v3103_v32 = vadd.f32 %v7487_v45, %v2771_v26 }
 0x377   : > { %v5680_v50 = vpop.f32.mrf.mxu1 }
 0x378   : > { %v4833_v35 = vpack.c.bf16 %v3792_v20, %v3792_v20  ;;  %v3790_v24 = vadd.f32 %v7304_v42, %v3747_v27  ;;  %v3750_v31 = vadd.f32 %v5680_v50, %v3418_v52  ;;  %v4225_v52 = vmul.f32 %v7480_v8, %v3792_v20 }
 0x379   : > { %v3643_v53 = vpop.f32.mrf.mxu1  ;;  %v7618_v0 = vadd.f32 %v8022_v33, %v3103_v32 }
 0x37a   : > { %3973 = vst.msk [vmem:[%s7314_s20 + $0x38] sm:$0xf] %vm3958_vm12, %v4833_v35  ;;  %v4831_v61 = vpack.c.bf16 %v3790_v24, %v3790_v24  ;;  %v4223_v36 = vmul.f32 %v7438_v5, %v3790_v24  ;;  %v3793_v39 = vadd.f32 %v7304_v42, %v3750_v31  ;;  %v3748_v47 = vadd.f32 %v3643_v53, %v3416_v51  ;;  %v7597_v55 = vpop.permute.xlu0 %4133  ;;  %v7609_v35 = vpop.permute.xlu1 %4138 }
 0x37b   : > { %v5683_v40 = vpop.f32.mrf.mxu1  ;;  %v4339_v50 = vmul.f32 %v4225_v52, %v3792_v20  ;;  %v7607_v20 = vadd.f32 %v8021_v62, %v3105_v38 }
 0x37c   : > { %3971 = vst.msk [vmem:[%s7314_s20 + $0x30] sm:$0xf] %vm3958_vm12, %v4831_v61  ;;  %v4271_v8 = vsel %vm4247_vm13, %v4223_v36, 0.0  ;;  %v4337_v5 = vmul.f32 %v4223_v36, %v3790_v24  ;;  %v3753_v27 = vadd.f32 %v5683_v40, %v3421_v2  ;;  %v4834_v37 = vpack.c.bf16 %v3793_v39, %v3793_v39 }
 0x37d   : > { %v4272_v3 = vadd.f32 %v4271_v8, %v7425_v22  ;;  %v4226_v49 = vmul.f32 %v7489_v28, %v3793_v39  ;;  %v3791_v18 = vadd.f32 %v7304_v42, %v3748_v47  ;;  %v3656_v51 = vpop.f32.mrf.mxu1  ;;  %v7601_v2 = vadd.f32 %v7503_v17, %v7510_v34 }
 0x37e   : > { %v4384_v9 = vsel %vm4247_vm13, %v4337_v5, 0.0  ;;  %v3796_v45 = vadd.f32 %v7304_v42, %v3753_v27  ;;  %v3751_v26 = vadd.f32 %v3656_v51, %v3419_v21  ;;  %3974 = vst.msk [vmem:[%s7314_s20 + $0x3c] sm:$0xf] %vm3958_vm12, %v4834_v37  ;;  %v4275_v17 = vsel %vm4247_vm13, %v4225_v52, 0.0  ;;  %v4144_v30 = vpop.permute.xlu0 %4143 }
 0x37f   : > { %v4385_v22 = vadd.f32 %v4384_v9, %v7428_v41  ;;  %v4832_v28 = vpack.c.bf16 %v3791_v18, %v3791_v18  ;;  %v5684_v54 = vpop.f32.mrf.mxu1  ;;  %v4340_v24 = vmul.f32 %v4226_v49, %v3793_v39  ;;  %v4224_v21 = vmul.f32 %v7442_v14, %v3791_v18 }
 0x380   : > { %v4837_v31 = vpack.c.bf16 %v3796_v45, %v3796_v45  ;;  %v3794_v46 = vadd.f32 %v7304_v42, %v3751_v26  ;;  %v4229_v41 = vmul.f32 %v4124_v23, %v3796_v45  ;;  %v3754_v34 = vadd.f32 %v5684_v54, %v7529_v12 }
 0x381   : > { %3972 = vst.msk [vmem:[%s7314_s20 + $0x34] sm:$0xf] %vm3958_vm12, %v4832_v28  ;;  %v3659_v53 = vpop.f32.mrf.mxu1  ;;  %v4388_v59 = vsel %vm4247_vm13, %v4339_v50, 0.0  ;;  %v4277_v58 = vsel %vm4247_vm13, %v4226_v49, 0.0  ;;  %v4273_v14 = vsel %vm4247_vm13, %v4224_v21, 0.0  ;;  %v4338_v61 = vmul.f32 %v4224_v21, %v3791_v18 }
 0x382   : > { %3977 = vst.msk [vmem:[%s7314_s20 + $0x48] sm:$0xf] %vm3958_vm12, %v4837_v31  ;;  %v4274_v52 = vadd.f32 %v4273_v14, %v4272_v3  ;;  %v4835_v36 = vpack.c.bf16 %v3794_v46, %v3794_v46  ;;  %v4227_v23 = vmul.f32 %v7525_v48, %v3794_v46  ;;  %v3797_v12 = vadd.f32 %v7304_v42, %v3754_v34  ;;  %v4149_v3 = vpop.permute.xlu1 %4148  ;;  %v4154_v34 = vpop.permute.xlu0 %4153 }
 0x383   : > { %v5687_v29 = vpop.f32.mrf.mxu1  ;;  %v4390_v38 = vsel %vm4247_vm13, %v4340_v24, 0.0  ;;  %v4386_v39 = vsel %vm4247_vm13, %v4338_v61, 0.0  ;;  %v3752_v47 = vadd.f32 %v3659_v53, %v7534_v56  ;;  %v4283_v5 = vsel %vm4247_vm13, %v4229_v41, 0.0 }
 0x384   : > { %v3757_v40 = vadd.f32 %v5687_v29, %v7537_v6  ;;  %v4276_v32 = vadd.f32 %v4275_v17, %v4274_v52  ;;  %v4387_v8 = vadd.f32 %v4386_v39, %v4385_v22  ;;  %3975 = vst.msk [vmem:[%s7314_s20 + $0x40] sm:$0xf] %vm3958_vm12, %v4835_v36  ;;  %v4341_v48 = vmul.f32 %v4227_v23, %v3794_v46 }
 0x385   : > { %v3672_v27 = vpop.f32.mrf.mxu1  ;;  %v4838_v37 = vpack.c.bf16 %v3797_v12, %v3797_v12  ;;  %v4230_v49 = vmul.f32 %v7574_v4, %v3797_v12  ;;  %v3795_v18 = vadd.f32 %v7304_v42, %v3752_v47  ;;  %v4343_v51 = vmul.f32 %v4229_v41, %v3796_v45 }
 0x386   : > { %v3800_v56 = vadd.f32 %v7304_v42, %v3757_v40  ;;  %v4389_v6 = vadd.f32 %v4388_v59, %v4387_v8  ;;  %v4278_v50 = vadd.f32 %v4277_v58, %v4276_v32  ;;  %v3755_v9 = vadd.f32 %v3672_v27, %v7546_v13  ;;  %v7651_v14 = vpop.permute.xlu1 %4158 }
 0x387   : > { %v5688_v26 = vpop.f32.mrf.mxu1  ;;  %v4279_v22 = vsel %vm4247_vm13, %v4227_v23, 0.0  ;;  %v4392_v28 = vsel %vm4247_vm13, %v4341_v48, 0.0  ;;  %3978 = vst.msk [vmem:[%s7314_s20 + $0x4c] sm:$0xf] %vm3958_vm12, %v4838_v37  ;;  %v4836_v54 = vpack.c.bf16 %v3795_v18, %v3795_v18  ;;  %v4228_v4 = vmul.f32 %v7531_v63, %v3795_v18 }
 0x388   : > { %v4280_v62 = vadd.f32 %v4279_v22, %v4278_v50  ;;  %v4391_v24 = vadd.f32 %v4390_v38, %v4389_v6  ;;  %v4344_v21 = vmul.f32 %v4230_v49, %v3797_v12  ;;  %v4841_v31 = vpack.c.bf16 %v3800_v56, %v3800_v56 }
 0x389   : > { %v3675_v46 = vpop.f32.mrf.mxu1  ;;  %3976 = vst.msk [vmem:[%s7314_s20 + $0x44] sm:$0xf] %vm3958_vm12, %v4836_v54  ;;  %v4281_v13 = vsel %vm4247_vm13, %v4228_v4, 0.0  ;;  %v4342_v45 = vmul.f32 %v4228_v4, %v3795_v18  ;;  %v4233_v17 = vmul.f32 %v4144_v30, %v3800_v56  ;;  %v3798_v41 = vadd.f32 %v7304_v42, %v3755_v9 }
 0x38a   : > { %v4396_v53 = vsel %vm4247_vm13, %v4343_v51, 0.0  ;;  %v4393_v33 = vadd.f32 %v4392_v28, %v4391_v24  ;;  %v4285_v63 = vsel %vm4247_vm13, %v4230_v49, 0.0  ;;  %v4282_v59 = vadd.f32 %v4281_v13, %v4280_v62  ;;  %3981 = vst.msk [vmem:[%s7314_s20 + $0x58] sm:$0xf] %vm3958_vm12, %v4841_v31 }
 0x38b   : > { %v5691_v58 = vpop.f32.mrf.mxu1  ;;  %v4394_v61 = vsel %vm4247_vm13, %v4342_v45, 0.0  ;;  %v4839_v52 = vpack.c.bf16 %v3798_v41, %v3798_v41  ;;  %v4231_v36 = vmul.f32 %v7597_v55, %v3798_v41  ;;  %v3758_v23 = vadd.f32 %v5688_v26, %v7550_v10  ;;  %v4169_v26 = vpop.permute.xlu1 %4168 }
 0x38c   : > { %v4398_v12 = vsel %vm4247_vm13, %v4344_v21, 0.0  ;;  %v4284_v29 = vadd.f32 %v4283_v5, %v4282_v59  ;;  %v4395_v38 = vadd.f32 %v4394_v61, %v4393_v33  ;;  %v3756_v39 = vadd.f32 %v3675_v46, %v7553_v25 }
 0x38d   : > { %v3688_v47 = vpop.f32.mrf.mxu1  ;;  %v4347_v40 = vmul.f32 %v4233_v17, %v3800_v56  ;;  %3979 = vst.msk [vmem:[%s7314_s20 + $0x50] sm:$0xf] %vm3958_vm12, %v4839_v52  ;;  %v4345_v30 = vmul.f32 %v4231_v36, %v3798_v41  ;;  %v3801_v32 = vadd.f32 %v7304_v42, %v3758_v23  ;;  %v3761_v8 = vadd.f32 %v5691_v58, %v7556_v44  ;;  %v4164_v56 = vpop.permute.xlu0 %4163 }
 0x38e   : > { %v4397_v48 = vadd.f32 %v4396_v53, %v4395_v38  ;;  %v4286_v27 = vadd.f32 %v4285_v63, %v4284_v29  ;;  %v3799_v10 = vadd.f32 %v7304_v42, %v3756_v39  ;;  %v3759_v55 = vadd.f32 %v3688_v47, %v7560_v15 }
 0x38f   : > { %v5692_v5 = vpop.f32.mrf.mxu1  ;;  %v4287_v37 = vsel %vm4247_vm13, %v4231_v36, 0.0  ;;  %v4842_v25 = vpack.c.bf16 %v3801_v32, %v3801_v32  ;;  %v4234_v49 = vmul.f32 %v4149_v3, %v3801_v32  ;;  %v3804_v18 = vadd.f32 %v7304_v42, %v3761_v8 }
 0x390   : > { %v4288_v6 = vadd.f32 %v4287_v37, %v4286_v27  ;;  %v4399_v51 = vadd.f32 %v4398_v12, %v4397_v48  ;;  %v4840_v50 = vpack.c.bf16 %v3799_v10, %v3799_v10  ;;  %v4232_v44 = vmul.f32 %v7609_v35, %v3799_v10 }
 0x391   : > { %v3691_v9 = vpop.f32.mrf.mxu1  ;;  %v4400_v22 = vsel %vm4247_vm13, %v4345_v30, 0.0  ;;  %3982 = vst.msk [vmem:[%s7314_s20 + $0x5c] sm:$0xf] %vm3958_vm12, %v4842_v25  ;;  %v4348_v15 = vmul.f32 %v4234_v49, %v3801_v32  ;;  %v4845_v28 = vpack.c.bf16 %v3804_v18, %v3804_v18  ;;  %v4237_v54 = vmul.f32 %v4164_v56, %v3804_v18  ;;  %v4174_v52 = vpop.permute.xlu0 %4173 }
 0x392   : > { %v4401_v4 = vadd.f32 %v4400_v22, %v4399_v51  ;;  %3980 = vst.msk [vmem:[%s7314_s20 + $0x54] sm:$0xf] %vm3958_vm12, %v4840_v50  ;;  %v4289_v3 = vsel %vm4247_vm13, %v4232_v44, 0.0  ;;  %v4346_v62 = vmul.f32 %v4232_v44, %v3799_v10  ;;  %v3802_v24 = vadd.f32 %v7304_v42, %v3759_v55 }
 0x393   : > { %v5695_v21 = vpop.f32.mrf.mxu1  ;;  %v4291_v35 = vsel %vm4247_vm13, %v4233_v17, 0.0  ;;  %v4404_v31 = vsel %vm4247_vm13, %v4347_v40, 0.0  ;;  %v4293_v46 = vsel %vm4247_vm13, %v4234_v49, 0.0  ;;  %v4290_v13 = vadd.f32 %v4289_v3, %v4288_v6  ;;  %3985 = vst.msk [vmem:[%s7314_s20 + $0x68] sm:$0xf] %vm3958_vm12, %v4845_v28 }
 0x394   : > { %v4402_v45 = vsel %vm4247_vm13, %v4346_v62, 0.0  ;;  %v4843_v41 = vpack.c.bf16 %v3802_v24, %v3802_v24  ;;  %v4235_v53 = vmul.f32 %v4154_v34, %v3802_v24  ;;  %v3762_v33 = vadd.f32 %v5692_v5, %v7563_v16  ;;  %v4179_v34 = vpop.permute.xlu1 %4178 }
 0x395   : > { %v3704_v63 = vpop.f32.mrf.mxu1  ;;  %v4406_v59 = vsel %vm4247_vm13, %v4348_v15, 0.0  ;;  %v4292_v58 = vadd.f32 %v4291_v35, %v4290_v13  ;;  %v4403_v61 = vadd.f32 %v4402_v45, %v4401_v4  ;;  %v3760_v17 = vadd.f32 %v3691_v9, %v7566_v7  ;;  %v4184_v51 = vpop.permute.xlu0 %4183 }
 0x396   : > { %v4351_v36 = vmul.f32 %v4237_v54, %v3804_v18  ;;  %3983 = vst.msk [vmem:[%s7314_s20 + $0x60] sm:$0xf] %vm3958_vm12, %v4843_v41  ;;  %v4349_v23 = vmul.f32 %v4235_v53, %v3802_v24  ;;  %v3805_v12 = vadd.f32 %v7304_v42, %v3762_v33  ;;  %v3765_v29 = vadd.f32 %v5695_v21, %v7569_v43 }
 0x397   : > { %v5696_v38 = vpop.f32.mrf.mxu1  ;;  %v4405_v16 = vadd.f32 %v4404_v31, %v4403_v61  ;;  %v4294_v39 = vadd.f32 %v4293_v46, %v4292_v58  ;;  %v3803_v47 = vadd.f32 %v7304_v42, %v3760_v17  ;;  %v3763_v40 = vadd.f32 %v3704_v63, %v7572_v60 }
 0x398   : > { %v4295_v7 = vsel %vm4247_vm13, %v4235_v53, 0.0  ;;  %v4846_v30 = vpack.c.bf16 %v3805_v12, %v3805_v12  ;;  %v4238_v32 = vmul.f32 %v4169_v26, %v3805_v12  ;;  %v3808_v8 = vadd.f32 %v7304_v42, %v3765_v29  ;;  %v4189_v26 = vpop.permute.xlu1 %4188  ;;  %v8023_v29 = vld [vmem:[#allocation89_spill] sm:$0xff] }
 0x399   : > { %v3707_v48 = vpop.f32.mrf.mxu1  ;;  %v4296_v27 = vadd.f32 %v4295_v7, %v4294_v39  ;;  %v4407_v10 = vadd.f32 %v4406_v59, %v4405_v16  ;;  %v4844_v43 = vpack.c.bf16 %v3803_v47, %v3803_v47  ;;  %v4236_v55 = vmul.f32 %v7651_v14, %v3803_v47  ;;  %v4194_v58 = vpop.permute.xlu0 %4193 }
 0x39a   : > { %v7694_v5 = vadd.f32 %v7516_v19, %v7514_v1  ;;  %v4408_v60 = vsel %vm4247_vm13, %v4349_v23, 0.0  ;;  %3986 = vst.msk [vmem:[%s7314_s20 + $0x6c] sm:$0xf] %vm3958_vm12, %v4846_v30  ;;  %v4352_v37 = vmul.f32 %v4238_v32, %v3805_v12  ;;  %v4849_v25 = vpack.c.bf16 %v3808_v8, %v3808_v8 }
 0x39b   : > { %v5699_v49 = vpop.f32.mrf.mxu1  ;;  %v4409_v18 = vadd.f32 %v4408_v60, %v4407_v10  ;;  %3984 = vst.msk [vmem:[%s7314_s20 + $0x64] sm:$0xf] %vm3958_vm12, %v4844_v43  ;;  %v4297_v56 = vsel %vm4247_vm13, %v4236_v55, 0.0  ;;  %v4350_v6 = vmul.f32 %v4236_v55, %v3803_v47  ;;  %v3806_v14 = vadd.f32 %v7304_v42, %v3763_v40 }
 0x39c   : > { %v4299_v1 = vsel %vm4247_vm13, %v4237_v54, 0.0  ;;  %v4412_v19 = vsel %vm4247_vm13, %v4351_v36, 0.0  ;;  %v4301_v50 = vsel %vm4247_vm13, %v4238_v32, 0.0  ;;  %v4298_v44 = vadd.f32 %v4297_v56, %v4296_v27  ;;  %3989 = vst.msk [vmem:[%s7314_s20 + $0x78] sm:$0xf] %vm3958_vm12, %v4849_v25  ;;  %v4199_v36 = vpop.permute.xlu1 %4198 }
 0x39d   : > { %v3720_v9 = vpop.f32.mrf.mxu1  ;;  %v4410_v22 = vsel %vm4247_vm13, %v4350_v6, 0.0  ;;  %v4847_v15 = vpack.c.bf16 %v3806_v14, %v3806_v14  ;;  %v4239_v28 = vmul.f32 %v4174_v52, %v3806_v14  ;;  %v3766_v4 = vadd.f32 %v5696_v38, %v7581_v57  ;;  %v4204_v25 = vpop.permute.xlu0 %4203 }
 0x39e   : > { %v4300_v3 = vadd.f32 %v4299_v1, %v4298_v44  ;;  %v4411_v62 = vadd.f32 %v4410_v22, %v4409_v18  ;;  %v4241_v24 = vmul.f32 %v4184_v51, %v3808_v8  ;;  %v3764_v54 = vadd.f32 %v3707_v48, %v7586_v11 }
 0x39f   : > { %v4414_v21 = vsel %vm4247_vm13, %v4352_v37, 0.0  ;;  %3987 = vst.msk [vmem:[%s7314_s20 + $0x70] sm:$0xf] %vm3958_vm12, %v4847_v15  ;;  %v4353_v35 = vmul.f32 %v4239_v28, %v3806_v14  ;;  %v3809_v31 = vadd.f32 %v7304_v42, %v3766_v4  ;;  %v3769_v46 = vadd.f32 %v5699_v49, %v7607_v20  ;;  %v5700_v53 = vpop.f32.mrf.mxu1 }
 0x3a0   : > { %v4413_v13 = vadd.f32 %v4412_v19, %v4411_v62  ;;  %v4302_v45 = vadd.f32 %v4301_v50, %v4300_v3  ;;  %v3807_v41 = vadd.f32 %v7304_v42, %v3764_v54  ;;  %v3767_v57 = vadd.f32 %v3720_v9, %v7618_v0  ;;  %v4209_v14 = vpop.permute.xlu1 %4208 }
 0x3a1   : > { %v4303_v33 = vsel %vm4247_vm13, %v4239_v28, 0.0  ;;  %v4850_v11 = vpack.c.bf16 %v3809_v31, %v3809_v31  ;;  %v4242_v63 = vmul.f32 %v4189_v26, %v3809_v31  ;;  %v3812_v59 = vadd.f32 %v7304_v42, %v3769_v46  ;;  %v3723_v40 = vpop.f32.mrf.mxu1 }
 0x3a2   : > { %v4304_v61 = vadd.f32 %v4303_v33, %v4302_v45  ;;  %v4415_v17 = vadd.f32 %v4414_v21, %v4413_v13  ;;  %v4848_v52 = vpack.c.bf16 %v3807_v41, %v3807_v41  ;;  %v4240_v20 = vmul.f32 %v4179_v34, %v3807_v41  ;;  %v5826_v34 = vld [vmem:[%s7764_s3] ss:$0 sm:$0xff] }
 0x3a3   : > { %v4355_v23 = vmul.f32 %v4241_v24, %v3808_v8  ;;  %v4416_v12 = vsel %vm4247_vm13, %v4353_v35, 0.0  ;;  %3990 = vst.msk [vmem:[%s7314_s20 + $0x7c] sm:$0xf] %vm3958_vm12, %v4850_v11  ;;  %v4853_v0 = vpack.c.bf16 %v3812_v59, %v3812_v59  ;;  %v3438_v38 = vadd.f32 %v8023_v29, %v7601_v2  ;;  %v8024_v2 = vld [vmem:[#allocation45_spill] sm:$0xff] }
 0x3a4   : > { %v4417_v16 = vadd.f32 %v4416_v12, %v4415_v17  ;;  %3988 = vst.msk [vmem:[%s7314_s20 + $0x74] sm:$0xf] %vm3958_vm12, %v4848_v52  ;;  %v4305_v42 = vsel %vm4247_vm13, %v4240_v20, 0.0  ;;  %v4354_v39 = vmul.f32 %v4240_v20, %v3807_v41  ;;  %v3810_v47 = vadd.f32 %v5826_v34, %v3767_v57 }
 0x3a5   : > { %v4307_v7 = vsel %vm4247_vm13, %v4241_v24, 0.0  ;;  %v4356_v30 = vmul.f32 %v4242_v63, %v3809_v31  ;;  %v4306_v32 = vadd.f32 %v4305_v42, %v4304_v61  ;;  %3993 = vst.msk [vmem:[%s7314_s20 + $0x88] sm:$0xf] %vm3958_vm12, %v4853_v0  ;;  %v3436_v8 = vadd.f32 %v8024_v2, %v7694_v5 }
 0x3a6   : > { %v4418_v48 = vsel %vm4247_vm13, %v4354_v39, 0.0  ;;  %v4851_v27 = vpack.c.bf16 %v3810_v47, %v3810_v47  ;;  %v4243_v10 = vmul.f32 %v4194_v58, %v3810_v47  ;;  %v3770_v43 = vadd.f32 %v5700_v53, %v3438_v38 }
 0x3a7   : > { %v4308_v55 = vadd.f32 %v4307_v7, %v4306_v32  ;;  %v4419_v60 = vadd.f32 %v4418_v48, %v4417_v16  ;;  %v3768_v37 = vadd.f32 %v3723_v40, %v3436_v8  ;;  %v4420_v49 = vsel %vm4247_vm13, %v4355_v23, 0.0 }
 0x3a8   : > { %v4309_v18 = vsel %vm4247_vm13, %v4242_v63, 0.0  ;;  %3991 = vst.msk [vmem:[%s7314_s20 + $0x80] sm:$0xf] %vm3958_vm12, %v4851_v27  ;;  %v4357_v56 = vmul.f32 %v4243_v10, %v3810_v47  ;;  %v3813_v6 = vadd.f32 %v5826_v34, %v3770_v43  ;;  %v4245_v51 = vmul.f32 %v4204_v25, %v3812_v59 }
 0x3a9   : > { %v4421_v5 = vadd.f32 %v4420_v49, %v4419_v60  ;;  %v4310_v1 = vadd.f32 %v4309_v18, %v4308_v55  ;;  %v3811_v19 = vadd.f32 %v5826_v34, %v3768_v37  ;;  %v4422_v50 = vsel %vm4247_vm13, %v4356_v30, 0.0 }
 0x3aa   : > { %v4311_v44 = vsel %vm4247_vm13, %v4243_v10, 0.0  ;;  %v4854_v9 = vpack.c.bf16 %v3813_v6, %v3813_v6  ;;  %v4246_v26 = vmul.f32 %v4209_v14, %v3813_v6  ;;  %v4424_v3 = vsel %vm4247_vm13, %v4357_v56, 0.0 }
 0x3ab   : > { %v4312_v22 = vadd.f32 %v4311_v44, %v4310_v1  ;;  %v4423_v15 = vadd.f32 %v4422_v50, %v4421_v5  ;;  %v4852_v28 = vpack.c.bf16 %v3811_v19, %v3811_v19  ;;  %v4244_v4 = vmul.f32 %v4199_v36, %v3811_v19 }
 0x3ac   : > { %3994 = vst.msk [vmem:[%s7314_s20 + $0x8c] sm:$0xf] %vm3958_vm12, %v4854_v9  ;;  %v4359_v62 = vmul.f32 %v4245_v51, %v3812_v59  ;;  %v4315_v31 = vsel %vm4247_vm13, %v4245_v51, 0.0  ;;  %v4360_v46 = vmul.f32 %v4246_v26, %v3813_v6  ;;  %v4317_v53 = vsel %vm4247_vm13, %v4246_v26, 0.0 }
 0x3ad   : > { %v4425_v24 = vadd.f32 %v4424_v3, %v4423_v15  ;;  %3992 = vst.msk [vmem:[%s7314_s20 + $0x84] sm:$0xf] %vm3958_vm12, %v4852_v28  ;;  %v4313_v54 = vsel %vm4247_vm13, %v4244_v4, 0.0  ;;  %v4358_v21 = vmul.f32 %v4244_v4, %v3811_v19 }
 0x3ae   : > { %v4314_v35 = vadd.f32 %v4313_v54, %v4312_v22  ;;  %v4428_v57 = vsel %vm4247_vm13, %v4359_v62, 0.0  ;;  %v4430_v63 = vsel %vm4247_vm13, %v4360_v46, 0.0 }
 0x3af   : > { %v4426_v13 = vsel %vm4247_vm13, %v4358_v21, 0.0 }
 0x3b0   : > { %v4316_v45 = vadd.f32 %v4315_v31, %v4314_v35  ;;  %v4427_v41 = vadd.f32 %v4426_v13, %v4425_v24 }
 0x3b2   : > { %v4318_v33 = vadd.f32 %v4317_v53, %v4316_v45  ;;  %v4429_v11 = vadd.f32 %v4428_v57, %v4427_v41 }
 0x3b4   : > { %v4319_v59 = vrot.slane %v4318_v33, 4  ;;  %v4431_v58 = vadd.f32 %v4430_v63, %v4429_v11 }
 0x3b6   : > { %v4320_v61 = vadd.f32 %v4319_v59, %v4318_v33  ;;  %v4432_v17 = vrot.slane %v4431_v58, 4 }
 0x3b8   : > { %v4321_v52 = vrot.slane %v4320_v61, 2  ;;  %v4433_v20 = vadd.f32 %v4432_v17, %v4431_v58 }
 0x3ba   : > { %v4322_v36 = vadd.f32 %v4321_v52, %v4320_v61  ;;  %v4434_v23 = vrot.slane %v4433_v20, 2 }
 0x3bc   : > { %v4323_v12 = vrot.slane %v4322_v36, 1  ;;  %v4435_v0 = vadd.f32 %v4434_v23, %v4433_v20 }
 0x3be   : > { %v4436_v29 = vrot.slane %v4435_v0, 1  ;;  %v4324_v38 = vadd.f32 %v4323_v12, %v4322_v36 }
 0x3c0   : > { %v4437_v16 = vadd.f32 %v4436_v29, %v4435_v0 }
 0x3c2   : > { %v4439_v42 = vsel %vm4438_vm14, %v4324_v38, %v4437_v16 }
 0x3c3   : > { %4441 = vst.msk [vmem:[%s316_s26] sm:$0x3] %vm4440_vm15, %v4439_v42 }
 0x3c4 PF: > { %s19_s27 = sadd.s32 1, %s5833_s27  }
 0x3c5   : > { %p16_p4 = scmp.ge.s32.totalorder %s19_s27, 4  }
 0x3c7   :  { %18 = sbr.rel (!%p16_p4) target bundleno = 1 (0x1), region = 98 }

// kernel: generator_forward.7
= control target key start
LH: loop header
LB: loop body
LE: loop exit
PB: predicated region body
PF: predicated region fallthrough
CT: control target
= control target key end

     0   :  { %s6159_s24 = smov 0   ;;  %s7483_s0 = inlined_call_operand.vmem [shape: bf16[2,288,64], index: 0, kind: input, shape index: {}]   ;;  %s7484_s1 = inlined_call_operand.vmem [shape: bf16[328,288], index: 1, kind: input, shape index: {}]   ;;  %s7485_s2 = inlined_call_operand.vmem [shape: bf16[3,3,64,128], index: 2, kind: input, shape index: {}]   ;;  %s7486_s3 = inlined_call_operand.vmem [shape: f32[1,128], index: 3, kind: input, shape index: {}]   ;;  %s7487_s4 = inlined_call_operand.vmem [shape: f32[1,64], index: 4, kind: input, shape index: {}]   ;;  %s7488_s5 = inlined_call_operand.vmem [shape: f32[1,64], index: 5, kind: input, shape index: {}]   ;;  %s7489_s6 = inlined_call_operand.vmem [shape: f32[288,1], index: 6, kind: input, shape index: {}]   ;;  %s7490_s7 = inlined_call_operand.vmem [shape: f32[2,288,128], index: 7, kind: output, shape index: {}]  }
   0x1 LB: > { %s4745_s25 = sadd.s32 4294967295, %s6114_s24   ;;  %p4749_p0 = scmp.ge.s32.totalorder %s6114_s24, 1  ;;  %s6114_s24 = sphi %s6159_s24, %s17_s24  }
   0x2   : > { %p237_p1 = scmp.lt.s32.totalorder %s6114_s24, 3 }
   0x4   : > { %p238_p2 = pnand %p4749_p0, %p237_p1 }
   0x5   : > { %p269_p3 = scmp.lt.s32.totalorder (!%p238_p2), %s4745_s25, 1 }
   0x6   : > { %241 = sbr.rel (%p238_p2) target bundleno = 937 (0x3a9), region = 48 }
   0xb   : > { %v6116_v0 = vmov 0   ;;  %s7492_s25 = smov (!%p269_p3, %s4745_s25), 1  ;;  %v6117_v1 = vmov 0.0   ;;  %vm6118_vm0 = vmmov 0   ;;  %v5921_v2 = vld [vmem:[%s7484_s1 + $0x4] ss:$12 sps:$4 sm:$0xff]  }
   0xc   : > { %1020 = vmatprep.subr.bf16.mxu0 %v6116_v0  ;;  %5413 = vmatprep.subr.bf16.mxu1 %v6117_v1  ;;  %s5905_s27 = smul.u32 144, %s7492_s25  ;;  %v6185_v3 = vld [vmem:[%s7487_s4] ss:$0 sm:$0xff] }
   0xd   : > { %5417 = vmatprep.mubr.msk.bf16.mxu1 %vm6118_vm0, %v6117_v1  ;;  %1052 = vmatprep.mubr.bf16.mxu0 %v5921_v2  ;;  %v6194_v12 = vld [vmem:[%s7488_s5] ss:$0 sm:$0xff]  ;;  %s5906_s10 = smul.u32 288, %s7492_s25 }
   0xe   : > { %s6180_s30 = scalar_lea.vmem %s7483_s0, %s5905_s27 }
   0xf   : > { %v5181_v4 = vld [vmem:[%s6180_s30 + $0x38] sm:$0xff]   ;;  %v5180_v5 = vld [vmem:[%s6180_s30 + $0x30] sm:$0xff]   ;;  %v5179_v6 = vld [vmem:[%s6180_s30 + $0x28] sm:$0xff]   ;;  %s7389_s13 = scalar_lea.vmem %s7490_s7, %s5906_s10 }
  0x10   : > { %v5133_v7 = vunpack.c.l.bf16 %v5181_v4  ;;  %v5134_v8 = vunpack.c.h.bf16 %v5181_v4  ;;  %v5129_v9 = vunpack.c.l.bf16 %v5180_v5  ;;  %v5130_v10 = vunpack.c.h.bf16 %v5180_v5  ;;  %v5178_v11 = vld [vmem:[%s6180_s30 + $0x20] sm:$0xff]   ;;  %v5177_v39 = vld [vmem:[%s6180_s30 + $0x18] sm:$0xff]   ;;  %v5176_v44 = vld [vmem:[%s6180_s30 + $0x10] sm:$0xff]  }
  0x11   : > { %v5125_v13 = vunpack.c.l.bf16 %v5179_v6  ;;  %v5126_v14 = vunpack.c.h.bf16 %v5179_v6  ;;  %v5121_v15 = vunpack.c.l.bf16 %v5178_v11  ;;  %v5122_v16 = vunpack.c.h.bf16 %v5178_v11  ;;  %v5175_v51 = vld [vmem:[%s6180_s30 + $0x8] sm:$0xff]   ;;  %v5104_v56 = vld [vmem:[%s6180_s30] sm:$0xff]  }
  0x12   : > { %v373_v17 = vmul.f32 %v5133_v7, %v6185_v3  ;;  %v374_v18 = vmul.f32 %v5134_v8, %v6185_v3  ;;  %v371_v19 = vmul.f32 %v5129_v9, %v6185_v3  ;;  %v372_v20 = vmul.f32 %v5130_v10, %v6185_v3 }
  0x13   : > { %v369_v21 = vmul.f32 %v5125_v13, %v6185_v3  ;;  %v370_v22 = vmul.f32 %v5126_v14, %v6185_v3  ;;  %v367_v23 = vmul.f32 %v5121_v15, %v6185_v3  ;;  %v368_v24 = vmul.f32 %v5122_v16, %v6185_v3 }
  0x14   : > { %v416_v25 = vadd.f32 %v6194_v12, %v373_v17  ;;  %v417_v26 = vadd.f32 %v6194_v12, %v374_v18  ;;  %v414_v27 = vadd.f32 %v6194_v12, %v371_v19  ;;  %v415_v28 = vadd.f32 %v6194_v12, %v372_v20 }
  0x15   : > { %v412_v29 = vadd.f32 %v6194_v12, %v369_v21  ;;  %v413_v30 = vadd.f32 %v6194_v12, %v370_v22  ;;  %v410_v31 = vadd.f32 %v6194_v12, %v367_v23  ;;  %v411_v32 = vadd.f32 %v6194_v12, %v368_v24 }
  0x16   : > { %vm452_vm1 = vcmp.ge.f32.partialorder %v416_v25, 0.0  ;;  %vm453_vm2 = vcmp.ge.f32.partialorder %v417_v26, 0.0  ;;  %v488_v33 = vmul.f32 0.2, %v416_v25  ;;  %v489_v34 = vmul.f32 0.2, %v417_v26 }
  0x17   : > { %vm450_vm3 = vcmp.ge.f32.partialorder %v414_v27, 0.0  ;;  %vm451_vm4 = vcmp.ge.f32.partialorder %v415_v28, 0.0  ;;  %v486_v35 = vmul.f32 0.2, %v414_v27  ;;  %v487_v36 = vmul.f32 0.2, %v415_v28 }
  0x18   : > { %v524_v37 = vsel %vm452_vm1, %v416_v25, %v488_v33  ;;  %v525_v38 = vsel %vm453_vm2, %v417_v26, %v489_v34  ;;  %vm448_vm5 = vcmp.ge.f32.partialorder %v412_v29, 0.0  ;;  %vm449_vm6 = vcmp.ge.f32.partialorder %v413_v30, 0.0  ;;  %v5189_v25 = vld [vmem:[%s6180_s30 + $0x78] sm:$0xff]   ;;  %v5188_v26 = vld [vmem:[%s6180_s30 + $0x70] sm:$0xff]  }
  0x19   : > { %v553_v40 = vpack.c.bf16 %v525_v38, %v524_v37  ;;  %v522_v41 = vsel %vm450_vm3, %v414_v27, %v486_v35  ;;  %v523_v42 = vsel %vm451_vm4, %v415_v28, %v487_v36  ;;  %v484_v43 = vmul.f32 0.2, %v412_v29 }
  0x1a   : > { %v552_v45 = vpack.c.bf16 %v523_v42, %v522_v41  ;;  %v485_v46 = vmul.f32 0.2, %v413_v30  ;;  %vm446_vm7 = vcmp.ge.f32.partialorder %v410_v31, 0.0  ;;  %vm447_vm8 = vcmp.ge.f32.partialorder %v411_v32, 0.0 }
  0x1b   : > { %1021 = vmatpush1.bf16.msra.mxu0 %v553_v40  ;;  %v520_v47 = vsel %vm448_vm5, %v412_v29, %v484_v43  ;;  %v482_v48 = vmul.f32 0.2, %v410_v31  ;;  %v483_v49 = vmul.f32 0.2, %v411_v32  ;;  %v5117_v50 = vunpack.c.l.bf16 %v5177_v39 }
  0x1c   : > { %1022 = vmatprep.subr.bf16.mxu0 %v6116_v0  ;;  %v521_v52 = vsel %vm449_vm6, %v413_v30, %v485_v46  ;;  %v5118_v53 = vunpack.c.h.bf16 %v5177_v39  ;;  %v5113_v54 = vunpack.c.l.bf16 %v5176_v44  ;;  %v5114_v55 = vunpack.c.h.bf16 %v5176_v44  ;;  %v5187_v39 = vld [vmem:[%s6180_s30 + $0x68] sm:$0xff]  }
  0x1d   : > { %v551_v57 = vpack.c.bf16 %v521_v52, %v520_v47  ;;  %v518_v58 = vsel %vm446_vm7, %v410_v31, %v482_v48  ;;  %v519_v59 = vsel %vm447_vm8, %v411_v32, %v483_v49  ;;  %v365_v60 = vmul.f32 %v5117_v50, %v6185_v3 }
  0x1e   : > { %v550_v61 = vpack.c.bf16 %v519_v59, %v518_v58  ;;  %v366_v62 = vmul.f32 %v5118_v53, %v6185_v3  ;;  %v363_v63 = vmul.f32 %v5113_v54, %v6185_v3  ;;  %v364_v2 = vmul.f32 %v5114_v55, %v6185_v3  ;;  %v5186_v58 = vld [vmem:[%s6180_s30 + $0x60] sm:$0xff]  }
  0x1f   : > { %1023 = vmatpush1.bf16.msra.mxu0 %v552_v45  ;;  %v408_v4 = vadd.f32 %v6194_v12, %v365_v60  ;;  %v5109_v5 = vunpack.c.l.bf16 %v5175_v51  ;;  %v5110_v6 = vunpack.c.h.bf16 %v5175_v51  ;;  %v5105_v7 = vunpack.c.l.bf16 %v5104_v56 }
  0x20   : > { %1024 = vmatprep.subr.bf16.mxu0 %v6116_v0  ;;  %v409_v8 = vadd.f32 %v6194_v12, %v366_v62  ;;  %v406_v9 = vadd.f32 %v6194_v12, %v363_v63  ;;  %v407_v10 = vadd.f32 %v6194_v12, %v364_v2  ;;  %v5106_v11 = vunpack.c.h.bf16 %v5104_v56 }
  0x21   : > { %vm444_vm9 = vcmp.ge.f32.partialorder %v408_v4, 0.0  ;;  %v480_v13 = vmul.f32 0.2, %v408_v4  ;;  %v361_v14 = vmul.f32 %v5109_v5, %v6185_v3  ;;  %v362_v15 = vmul.f32 %v5110_v6, %v6185_v3  ;;  %v5185_v6 = vld [vmem:[%s6180_s30 + $0x58] sm:$0xff]  }
  0x22   : > { %vm445_vm10 = vcmp.ge.f32.partialorder %v409_v8, 0.0  ;;  %v481_v16 = vmul.f32 0.2, %v409_v8  ;;  %vm442_vm11 = vcmp.ge.f32.partialorder %v406_v9, 0.0  ;;  %vm443_vm12 = vcmp.ge.f32.partialorder %v407_v10, 0.0 }
  0x23   : > { %1025 = vmatpush1.bf16.msra.mxu0 %v551_v57  ;;  %v516_v17 = vsel %vm444_vm9, %v408_v4, %v480_v13  ;;  %v478_v18 = vmul.f32 0.2, %v406_v9  ;;  %v479_v19 = vmul.f32 0.2, %v407_v10  ;;  %v404_v20 = vadd.f32 %v6194_v12, %v361_v14 }
  0x24   : > { %1026 = vmatprep.subr.bf16.mxu0 %v6116_v0  ;;  %v517_v21 = vsel %vm445_vm10, %v409_v8, %v481_v16  ;;  %v405_v22 = vadd.f32 %v6194_v12, %v362_v15  ;;  %v359_v23 = vmul.f32 %v5105_v7, %v6185_v3  ;;  %v360_v24 = vmul.f32 %v5106_v11, %v6185_v3 }
  0x25   : > { %v514_v27 = vsel %vm442_vm11, %v406_v9, %v478_v18  ;;  %v515_v28 = vsel %vm443_vm12, %v407_v10, %v479_v19  ;;  %v549_v29 = vpack.c.bf16 %v517_v21, %v516_v17  ;;  %vm440_vm13 = vcmp.ge.f32.partialorder %v404_v20, 0.0  ;;  %v5191_v10 = vld [vmem:[%s6180_s30 + $0x88] sm:$0xff]  }
  0x26   : > { %v476_v30 = vmul.f32 0.2, %v404_v20  ;;  %v477_v31 = vmul.f32 0.2, %v405_v22  ;;  %v402_v32 = vadd.f32 %v6194_v12, %v359_v23  ;;  %v403_v33 = vadd.f32 %v6194_v12, %v360_v24 }
  0x27   : > { %1027 = vmatpush1.bf16.msra.mxu0 %v550_v61  ;;  %v5165_v34 = vunpack.c.l.bf16 %v5189_v25  ;;  %v5166_v35 = vunpack.c.h.bf16 %v5189_v25  ;;  %v548_v36 = vpack.c.bf16 %v515_v28, %v514_v27  ;;  %vm441_vm14 = vcmp.ge.f32.partialorder %v405_v22, 0.0 }
  0x28   : > { %1028 = vmatprep.subr.bf16.mxu0 %v6116_v0  ;;  %v5161_v37 = vunpack.c.l.bf16 %v5188_v26  ;;  %v5162_v38 = vunpack.c.h.bf16 %v5188_v26  ;;  %v512_v40 = vsel %vm440_vm13, %v404_v20, %v476_v30  ;;  %vm438_vm15 = vcmp.ge.f32.partialorder %v402_v32, 0.0  ;;  %v5184_v30 = vld [vmem:[%s6180_s30 + $0x50] sm:$0xff]  }
  0x29   : > { %vm439_vm1 = vcmp.ge.f32.partialorder %v403_v33, 0.0  ;;  %v474_v41 = vmul.f32 0.2, %v402_v32  ;;  %v475_v42 = vmul.f32 0.2, %v403_v33  ;;  %v389_v43 = vmul.f32 %v5165_v34, %v6185_v3 }
  0x2a   : > { %v390_v44 = vmul.f32 %v5166_v35, %v6185_v3  ;;  %v387_v45 = vmul.f32 %v5161_v37, %v6185_v3  ;;  %v513_v46 = vsel %vm441_vm14, %v405_v22, %v477_v31  ;;  %v388_v47 = vmul.f32 %v5162_v38, %v6185_v3 }
  0x2b   : > { %1029 = vmatpush1.bf16.msra.mxu0 %v549_v29  ;;  %v5157_v48 = vunpack.c.l.bf16 %v5187_v39  ;;  %v5158_v49 = vunpack.c.h.bf16 %v5187_v39  ;;  %v510_v50 = vsel %vm438_vm15, %v402_v32, %v474_v41  ;;  %v432_v51 = vadd.f32 %v6194_v12, %v389_v43 }
  0x2c   : > { %1030 = vmatprep.subr.bf16.mxu0 %v6116_v0  ;;  %v433_v52 = vadd.f32 %v6194_v12, %v390_v44  ;;  %v430_v53 = vadd.f32 %v6194_v12, %v387_v45  ;;  %v511_v54 = vsel %vm439_vm1, %v403_v33, %v475_v42  ;;  %v431_v55 = vadd.f32 %v6194_v12, %v388_v47  ;;  %v5190_v42 = vld [vmem:[%s6180_s30 + $0x80] sm:$0xff]  }
  0x2d   : > { %v385_v56 = vmul.f32 %v5157_v48, %v6185_v3  ;;  %v386_v57 = vmul.f32 %v5158_v49, %v6185_v3  ;;  %vm468_vm2 = vcmp.ge.f32.partialorder %v432_v51, 0.0  ;;  %v504_v59 = vmul.f32 0.2, %v432_v51  ;;  %v5183_v48 = vld [vmem:[%s6180_s30 + $0x48] sm:$0xff]   ;;  %v5182_v49 = vld [vmem:[%s6180_s30 + $0x40] sm:$0xff]  }
  0x2e   : > { %vm469_vm3 = vcmp.ge.f32.partialorder %v433_v52, 0.0  ;;  %v505_v60 = vmul.f32 0.2, %v433_v52  ;;  %v547_v61 = vpack.c.bf16 %v513_v46, %v512_v40  ;;  %vm466_vm4 = vcmp.ge.f32.partialorder %v430_v53, 0.0 }
  0x2f   : > { %1031 = vmatpush1.bf16.msra.mxu0 %v548_v36  ;;  %v502_v62 = vmul.f32 0.2, %v430_v53  ;;  %v540_v63 = vsel %vm468_vm2, %v432_v51, %v504_v59  ;;  %v428_v4 = vadd.f32 %v6194_v12, %v385_v56  ;;  %v429_v5 = vadd.f32 %v6194_v12, %v386_v57 }
  0x30   : > { %1032 = vmatprep.subr.bf16.mxu0 %v6116_v0  ;;  %v541_v2 = vsel %vm469_vm3, %v433_v52, %v505_v60  ;;  %v546_v7 = vpack.c.bf16 %v511_v54, %v510_v50  ;;  %vm467_vm5 = vcmp.ge.f32.partialorder %v431_v55, 0.0  ;;  %v503_v8 = vmul.f32 0.2, %v431_v55 }
  0x31   : > { %v5153_v9 = vunpack.c.l.bf16 %v5186_v58  ;;  %v561_v11 = vpack.c.bf16 %v541_v2, %v540_v63  ;;  %v538_v13 = vsel %vm466_vm4, %v430_v53, %v502_v62  ;;  %vm464_vm6 = vcmp.ge.f32.partialorder %v428_v4, 0.0 }
  0x32   : > { %v500_v14 = vmul.f32 0.2, %v428_v4  ;;  %v501_v15 = vmul.f32 0.2, %v429_v5  ;;  %v5154_v16 = vunpack.c.h.bf16 %v5186_v58  ;;  %v5149_v18 = vunpack.c.l.bf16 %v5185_v6 }
  0x33   : > { %1033 = vmatpush1.bf16.msra.mxu0 %v547_v61  ;;  %v383_v17 = vmul.f32 %v5153_v9, %v6185_v3  ;;  %vm465_vm7 = vcmp.ge.f32.partialorder %v429_v5, 0.0  ;;  %v5150_v19 = vunpack.c.h.bf16 %v5185_v6  ;;  %v5173_v20 = vunpack.c.l.bf16 %v5191_v10 }
  0x34   : > { %1034 = vmatprep.subr.bf16.mxu0 %v6116_v0  ;;  %v5174_v21 = vunpack.c.h.bf16 %v5191_v10  ;;  %v539_v22 = vsel %vm467_vm5, %v431_v55, %v503_v8  ;;  %v384_v23 = vmul.f32 %v5154_v16, %v6185_v3  ;;  %v381_v25 = vmul.f32 %v5149_v18, %v6185_v3 }
  0x35   : > { %v426_v24 = vadd.f32 %v6194_v12, %v383_v17  ;;  %v536_v26 = vsel %vm464_vm6, %v428_v4, %v500_v14  ;;  %v382_v27 = vmul.f32 %v5150_v19, %v6185_v3  ;;  %v393_v28 = vmul.f32 %v5173_v20, %v6185_v3 }
  0x36   : > { %v394_v29 = vmul.f32 %v5174_v21, %v6185_v3  ;;  %v537_v31 = vsel %vm465_vm7, %v429_v5, %v501_v15  ;;  %v427_v32 = vadd.f32 %v6194_v12, %v384_v23  ;;  %v424_v34 = vadd.f32 %v6194_v12, %v381_v25 }
  0x37   : > { %1035 = vmatpush1.bf16.msra.mxu0 %v546_v7  ;;  %vm462_vm8 = vcmp.ge.f32.partialorder %v426_v24, 0.0  ;;  %v498_v33 = vmul.f32 0.2, %v426_v24  ;;  %v425_v35 = vadd.f32 %v6194_v12, %v382_v27  ;;  %v436_v36 = vadd.f32 %v6194_v12, %v393_v28 }
  0x38   : > { %1036 = vmatprep.subr.bf16.mxu0 %v6116_v0  ;;  %v437_v37 = vadd.f32 %v6194_v12, %v394_v29  ;;  %v499_v38 = vmul.f32 0.2, %v427_v32  ;;  %v5145_v39 = vunpack.c.l.bf16 %v5184_v30  ;;  %v560_v40 = vpack.c.bf16 %v539_v22, %v538_v13 }
  0x39   : > { %v559_v41 = vpack.c.bf16 %v537_v31, %v536_v26  ;;  %vm463_vm9 = vcmp.ge.f32.partialorder %v427_v32, 0.0  ;;  %vm472_vm10 = vcmp.ge.f32.partialorder %v436_v36, 0.0  ;;  %v534_v43 = vsel %vm462_vm8, %v426_v24, %v498_v33  ;;  %v5979_v33 = vld [vmem:[%s7485_s2 + $0x38] sm:$0xff]  }
  0x3a   : > { %vm473_vm11 = vcmp.ge.f32.partialorder %v437_v37, 0.0  ;;  %v508_v44 = vmul.f32 0.2, %v436_v36  ;;  %v509_v45 = vmul.f32 0.2, %v437_v37  ;;  %vm460_vm12 = vcmp.ge.f32.partialorder %v424_v34, 0.0 }
  0x3b   : > { %1037 = vmatpush2.bf16.msra.mxu0 %v561_v11  ;;  %vm461_vm13 = vcmp.ge.f32.partialorder %v425_v35, 0.0  ;;  %v496_v46 = vmul.f32 0.2, %v424_v34  ;;  %v5146_v47 = vunpack.c.h.bf16 %v5184_v30  ;;  %v535_v50 = vsel %vm463_vm9, %v427_v32, %v499_v38  ;;  %v5918_v32 = vld [vmem:[%s7484_s1 + $0x8] ss:$12 sps:$4 sm:$0xff]  }
  0x3c   : > { %1038 = vmatprep.subr.bf16.mxu0 %v6116_v0  ;;  %v544_v51 = vsel %vm472_vm10, %v436_v36, %v508_v44  ;;  %v545_v52 = vsel %vm473_vm11, %v437_v37, %v509_v45  ;;  %v379_v53 = vmul.f32 %v5145_v39, %v6185_v3  ;;  %v5169_v56 = vunpack.c.l.bf16 %v5190_v42  ;;  %v5922_v38 = vld [vmem:[%s7484_s1 + $0x20] ss:$12 sps:$4 sm:$0xff]   ;;  %v5926_v44 = vld [vmem:[%s7484_s1 + $0x38] ss:$12 sps:$4 sm:$0xff]  }
  0x3d   : > { %v563_v54 = vpack.c.bf16 %v545_v52, %v544_v51  ;;  %v380_v55 = vmul.f32 %v5146_v47, %v6185_v3  ;;  %v5170_v57 = vunpack.c.h.bf16 %v5190_v42  ;;  %v5141_v59 = vunpack.c.l.bf16 %v5183_v48  ;;  %v5919_v42 = vld [vmem:[%s7484_s1] ss:$12 sps:$4 sm:$0xff]   ;;  %v5929_v47 = vld [vmem:[%s7484_s1 + $0x30] ss:$12 sps:$4 sm:$0xff]  }
  0x3e   : > { %v422_v58 = vadd.f32 %v6194_v12, %v379_v53  ;;  %v5142_v60 = vunpack.c.h.bf16 %v5183_v48  ;;  %v5137_v61 = vunpack.c.l.bf16 %v5182_v49  ;;  %v497_v62 = vmul.f32 0.2, %v425_v35  ;;  %v5927_v45 = vld [vmem:[%s7484_s1 + $0x34] ss:$12 sps:$4 sm:$0xff]   ;;  %v5931_v48 = vld [vmem:[%s7484_s1 + $0x4c] ss:$12 sps:$4 sm:$0xff]  }
  0x3f   : > { %1039 = vmatpush2.bf16.msra.mxu0 %v560_v40  ;;  %5414 = vmatpush3.bf16.msra.mxu1 %v563_v54  ;;  %v423_v63 = vadd.f32 %v6194_v12, %v380_v55  ;;  %v391_v2 = vmul.f32 %v5169_v56, %v6185_v3  ;;  %v392_v4 = vmul.f32 %v5170_v57, %v6185_v3  ;;  %v5138_v13 = vunpack.c.h.bf16 %v5182_v49  ;;  %v5934_v49 = vld [vmem:[%s7484_s1 + $0x68] ss:$12 sps:$4 sm:$0xff]   ;;  %v5935_v51 = vld [vmem:[%s7484_s1 + $0x64] ss:$12 sps:$4 sm:$0xff]   ;;  %v5938_v52 = vld [vmem:[%s7484_s1 + $0x80] ss:$12 sps:$4 sm:$0xff]  }
  0x40   : > { %1040 = vmatprep.subr.bf16.mxu0 %v6116_v0  ;;  %v558_v5 = vpack.c.bf16 %v535_v50, %v534_v43  ;;  %v532_v6 = vsel %vm460_vm12, %v424_v34, %v496_v46  ;;  %5415 = vmatprep.subr.bf16.mxu1 %v6117_v1  ;;  %v377_v7 = vmul.f32 %v5141_v59, %v6185_v3  ;;  %v494_v9 = vmul.f32 0.2, %v422_v58  ;;  %v5923_v43 = vld [vmem:[%s7484_s1 + $0x1c] ss:$12 sps:$4 sm:$0xff]   ;;  %v5999_v53 = vld [vmem:[%s7485_s2 + $0x30] sm:$0xff]  }
  0x41   : > { %v378_v8 = vmul.f32 %v5142_v60, %v6185_v3  ;;  %v434_v10 = vadd.f32 %v6194_v12, %v391_v2  ;;  %v435_v11 = vadd.f32 %v6194_v12, %v392_v4  ;;  %v495_v14 = vmul.f32 0.2, %v423_v63  ;;  %v5930_v46 = vld [vmem:[%s7484_s1 + $0x50] ss:$12 sps:$4 sm:$0xff]   ;;  %v5933_v50 = vld [vmem:[%s7484_s1 + $0x48] ss:$12 sps:$4 sm:$0xff]  }
  0x42   : > { %v420_v15 = vadd.f32 %v6194_v12, %v377_v7  ;;  %v375_v17 = vmul.f32 %v5137_v61, %v6185_v3  ;;  %v533_v18 = vsel %vm461_vm13, %v425_v35, %v497_v62  ;;  %vm458_vm1 = vcmp.ge.f32.partialorder %v422_v58, 0.0  ;;  %v6000_v54 = vld [vmem:[%s7485_s2 + $0x18] sm:$0xff]   ;;  %v5937_v55 = vld [vmem:[%s7484_s1 + $0x60] ss:$12 sps:$4 sm:$0xff]   ;;  %v5949_v2 = vld [vmem:[%s7484_s1 + $0xa8] ss:$12 sps:$4 sm:$0xff]  }
  0x43   : > { %1041 = vmatpush2.bf16.msra.mxu0 %v559_v41  ;;  %v421_v16 = vadd.f32 %v6194_v12, %v378_v8  ;;  %vm470_vm14 = vcmp.ge.f32.partialorder %v434_v10, 0.0  ;;  %vm471_vm15 = vcmp.ge.f32.partialorder %v435_v11, 0.0  ;;  %v506_v19 = vmul.f32 0.2, %v434_v10  ;;  %v5939_v56 = vld [vmem:[%s7484_s1 + $0x7c] ss:$12 sps:$4 sm:$0xff]  }
  0x44   : > { %1042 = vmatprep.subr.bf16.mxu0 %v6116_v0  ;;  %vm459_vm2 = vcmp.ge.f32.partialorder %v423_v63, 0.0  ;;  %v507_v20 = vmul.f32 0.2, %v435_v11  ;;  %v492_v22 = vmul.f32 0.2, %v420_v15  ;;  %v376_v24 = vmul.f32 %v5138_v13, %v6185_v3  ;;  %v6001_v13 = vld [vmem:[%s7485_s2 + $0x28] sm:$0xff]  }
  0x45   : > { %v542_v21 = vsel %vm470_vm14, %v434_v10, %v506_v19  ;;  %v493_v23 = vmul.f32 0.2, %v421_v16  ;;  %v557_v25 = vpack.c.bf16 %v533_v18, %v532_v6  ;;  %v418_v27 = vadd.f32 %v6194_v12, %v375_v17  ;;  %v5942_v57 = vld [vmem:[%s7484_s1 + $0x98] ss:$12 sps:$4 sm:$0xff]   ;;  %v5943_v59 = vld [vmem:[%s7484_s1 + $0x94] ss:$12 sps:$4 sm:$0xff]  }
  0x46   : > { %v543_v26 = vsel %vm471_vm15, %v435_v11, %v507_v20  ;;  %v530_v28 = vsel %vm458_vm1, %v422_v58, %v494_v9  ;;  %v531_v29 = vsel %vm459_vm2, %v423_v63, %v495_v14  ;;  %v419_v31 = vadd.f32 %v6194_v12, %v376_v24  ;;  %v5941_v58 = vld [vmem:[%s7484_s1 + $0x78] ss:$12 sps:$4 sm:$0xff]   ;;  %v5946_v60 = vld [vmem:[%s7484_s1 + $0xb0] ss:$12 sps:$4 sm:$0xff]   ;;  %v5950_v63 = vld [vmem:[%s7484_s1 + $0xc8] ss:$12 sps:$4 sm:$0xff]  }
  0x47   : > { %1043 = vmatpush2.bf16.msra.mxu0 %v558_v5  ;;  %v562_v30 = vpack.c.bf16 %v543_v26, %v542_v21  ;;  %vm456_vm3 = vcmp.ge.f32.partialorder %v420_v15, 0.0  ;;  %vm457_vm4 = vcmp.ge.f32.partialorder %v421_v16, 0.0  ;;  %vm956_vm5 = vcmask 261120   ;;  %v5945_v61 = vld [vmem:[%s7484_s1 + $0x90] ss:$12 sps:$4 sm:$0xff]   ;;  %v6004_v18 = vld [vmem:[%s7485_s2 + $0x8] sm:$0xff]  }
  0x48   : > { %1044 = vmatprep.subr.bf16.mxu0 %v6116_v0  ;;  %v490_v3 = vmul.f32 0.2, %v418_v27  ;;  %v556_v34 = vpack.c.bf16 %v531_v29, %v530_v28  ;;  %vm454_vm6 = vcmp.ge.f32.partialorder %v418_v27, 0.0  ;;  %vm455_vm7 = vcmp.ge.f32.partialorder %v419_v31, 0.0  ;;  %v5947_v62 = vld [vmem:[%s7484_s1 + $0xac] ss:$12 sps:$4 sm:$0xff]  }
  0x49   : > { %5416 = vmatpush3.bf16.msra.mxu1 %v562_v30  ;;  %v491_v35 = vmul.f32 0.2, %v419_v31  ;;  %v528_v12 = vsel %vm456_vm3, %v420_v15, %v492_v22  ;;  %v529_v36 = vsel %vm457_vm4, %v421_v16, %v493_v23  ;;  %v5951_v4 = vld [vmem:[%s7484_s1 + $0xc4] ss:$12 sps:$4 sm:$0xff]   ;;  %v5954_v5 = vld [vmem:[%s7484_s1 + $0xe0] ss:$12 sps:$4 sm:$0xff]  }
  0x4a   : > { %5501 = vmatprep.subr.bf16.mxu1 %v5979_v33  ;;  %v555_v37 = vpack.c.bf16 %v529_v36, %v528_v12  ;;  %v526_v39 = vsel %vm454_vm6, %v418_v27, %v490_v3  ;;  %v5953_v6 = vld [vmem:[%s7484_s1 + $0xc0] ss:$12 sps:$4 sm:$0xff]   ;;  %v5955_v7 = vld [vmem:[%s7484_s1 + $0xdc] ss:$12 sps:$4 sm:$0xff]   ;;  %v5958_v8 = vld [vmem:[%s7484_s1 + $0xf8] ss:$12 sps:$4 sm:$0xff]  }
  0x4b   : > { %1045 = vmatpush2.bf16.msra.mxu0 %v557_v25  ;;  %v527_v40 = vsel %vm455_vm7, %v419_v31, %v491_v35  ;;  %v5957_v9 = vld [vmem:[%s7484_s1 + $0xd8] ss:$12 sps:$4 sm:$0xff]   ;;  %v5959_v10 = vld [vmem:[%s7484_s1 + $0xf4] ss:$12 sps:$4 sm:$0xff]   ;;  %v5962_v11 = vld [vmem:[%s7484_s1 + $0x110] ss:$12 sps:$4 sm:$0xff]  }
  0x4c   : > { %1046 = vmatprep.subr.bf16.mxu0 %v6116_v0  ;;  %5418 = vmatmul.mubr.msk.bf16.vlgmr.msra.gmra.mxu1 %vm956_vm5, %v5918_v32  ;;  %v554_v41 = vpack.c.bf16 %v527_v40, %v526_v39  ;;  %v6002_v14 = vld [vmem:[%s7485_s2 + $0x10] sm:$0xff]   ;;  %v5963_v16 = vld [vmem:[%s7484_s1 + $0x10c] ss:$12 sps:$4 sm:$0xff]   ;;  %v6006_v19 = vld [vmem:[%s7485_s2] sm:$0xff]  }
  0x4d   : > { %5421 = vmatprep.mubr.msk.bf16.mxu1 %vm6118_vm0, %v6117_v1  ;;  %5502 = vmatpush3.bf16.msra.mxu1 %v5979_v33  ;;  %v5961_v15 = vld [vmem:[%s7484_s1 + $0xf0] ss:$12 sps:$4 sm:$0xff]   ;;  %v5966_v17 = vld [vmem:[%s7484_s1 + $0x128] ss:$12 sps:$4 sm:$0xff]   ;;  %v5970_v22 = vld [vmem:[%s7484_s1 + $0x140] ss:$12 sps:$4 sm:$0xff]  }
  0x4e   : > { %5503 = vmatprep.subr.bf16.mxu1 %v5999_v53  ;;  %v5965_v20 = vld [vmem:[%s7484_s1 + $0x108] ss:$12 sps:$4 sm:$0xff]   ;;  %v5967_v21 = vld [vmem:[%s7484_s1 + $0x124] ss:$12 sps:$4 sm:$0xff]   ;;  %v5969_v24 = vld [vmem:[%s7484_s1 + $0x120] ss:$12 sps:$4 sm:$0xff]  }
  0x4f   : > { %1047 = vmatpush2.bf16.msra.mxu0 %v556_v34  ;;  %v6007_v23 = vld [vmem:[%s7485_s2 + $0x20] sm:$0xff]   ;;  %v5971_v25 = vld [vmem:[%s7484_s1 + $0x13c] ss:$12 sps:$4 sm:$0xff]   ;;  %v5980_v31 = vld [vmem:[%s7484_s1 + $0x16c] ss:$12 sps:$4 sm:$0xff]  }
  0x50   : > { %1048 = vmatprep.subr.bf16.mxu0 %v6116_v0  ;;  %v5974_v26 = vld [vmem:[%s7484_s1 + $0x158] ss:$12 sps:$4 sm:$0xff]   ;;  %v5975_v28 = vld [vmem:[%s7484_s1 + $0x154] ss:$12 sps:$4 sm:$0xff]   ;;  %v5978_v29 = vld [vmem:[%s7484_s1 + $0x170] ss:$12 sps:$4 sm:$0xff]  }
  0x51   : > { %5504 = vmatpush3.bf16.msra.mxu1 %v5999_v53  ;;  %v5973_v27 = vld [vmem:[%s7484_s1 + $0x138] ss:$12 sps:$4 sm:$0xff]   ;;  %v5977_v30 = vld [vmem:[%s7484_s1 + $0x150] ss:$12 sps:$4 sm:$0xff]   ;;  %v5983_v32 = vld [vmem:[%s7484_s1 + $0x188] ss:$12 sps:$4 sm:$0xff]  }
  0x52   : > { %5505 = vmatprep.subr.bf16.mxu1 %v6001_v13  ;;  %v5982_v3 = vld [vmem:[%s7484_s1 + $0x168] ss:$12 sps:$4 sm:$0xff]   ;;  %v5984_v33 = vld [vmem:[%s7484_s1 + $0x184] ss:$12 sps:$4 sm:$0xff]   ;;  %v5987_v34 = vld [vmem:[%s7484_s1 + $0x1a0] ss:$12 sps:$4 sm:$0xff]  }
  0x53   : > { %1049 = vmatpush2.bf16.msra.mxu0 %v555_v37  ;;  %v5986_v35 = vld [vmem:[%s7484_s1 + $0x180] ss:$12 sps:$4 sm:$0xff]   ;;  %v5988_v12 = vld [vmem:[%s7484_s1 + $0x19c] ss:$12 sps:$4 sm:$0xff]   ;;  %v5991_v36 = vld [vmem:[%s7484_s1 + $0x1b8] ss:$12 sps:$4 sm:$0xff]  }
  0x54   : > { %1050 = vmatprep.subr.bf16.mxu0 %v6116_v0  ;;  %5422 = vmatmul.mubr.msk.bf16.gmra.mxu1 %vm956_vm5, %v5922_v38  ;;  %v5925_v0 = vld [vmem:[%s7484_s1 + $0x18] ss:$12 sps:$4 sm:$0xff]   ;;  %v5992_v38 = vld [vmem:[%s7484_s1 + $0x1b4] ss:$12 sps:$4 sm:$0xff]   ;;  %v5998_v39 = vld [vmem:[%s7484_s1 + $0x1d0] ss:$12 sps:$4 sm:$0xff]  }
  0x55   : > { %5425 = vmatprep.mubr.msk.bf16.mxu1 %vm6118_vm0, %v6117_v1  ;;  %5506 = vmatpush3.bf16.msra.mxu1 %v6001_v13  ;;  %v5990_v37 = vld [vmem:[%s7484_s1 + $0x198] ss:$12 sps:$4 sm:$0xff]   ;;  %v5994_v40 = vld [vmem:[%s7484_s1 + $0x1b0] ss:$12 sps:$4 sm:$0xff]  }
  0x56   : > { %5507 = vmatprep.subr.bf16.mxu1 %v6007_v23 }
  0x57   : > { %1051 = vmatpush2.bf16.msra.mxu0 %v554_v41  ;;  %v5995_v41 = vld [vmem:[%s7484_s1 + $0x1cc] ss:$12 sps:$4 sm:$0xff]  }
  0x58   : > { %5545 = vmatprep.subr.bf16.mxu0 %v6000_v54 }
  0x59   : > { %5508 = vmatpush3.bf16.msra.mxu1 %v6007_v23 }
  0x5a   : > { %1053 = vmatmul.mubr.bf16.vlgmr.msra.gmra.mxu0 %v5919_v42  ;;  %v6005_v42 = vld [vmem:[%s7484_s1 + $0x1e8] ss:$0 sps:$4 sm:$0xff]  }
  0x5b   : > { %1060 = vmatprep.mubr.bf16.mxu0 %v5923_v43  ;;  %5546 = vmatpush3.bf16.msra.mxu0 %v6000_v54  ;;  %v644_v43 = vld [vmem:[%s7484_s1 + $0x1e0] sm:$0xff] }
  0x5c   : > { %5426 = vmatmul.mubr.msk.bf16.gmra.mxu1 %vm956_vm5, %v5926_v44  ;;  %5547 = vmatprep.subr.bf16.mxu0 %v6002_v14  ;;  %v4815_v44 = vcombine.high %v644_v43, %v644_v43 }
  0x5d   : > { %5429 = vmatprep.mubr.msk.bf16.mxu1 %vm6118_vm0, %v6117_v1 }
  0x5f   : > { %5548 = vmatpush3.bf16.msra.mxu0 %v6002_v14 }
  0x60   : > { %5549 = vmatprep.subr.bf16.mxu0 %v6004_v18 }
  0x62   : > { %1061 = vmatmul.mubr.bf16.gmra.mxu0 %v5925_v0  ;;  %v4814_v0 = vcombine.low %v644_v43, %v644_v43 }
  0x63   : > { %1068 = vmatprep.mubr.bf16.mxu0 %v5927_v45  ;;  %5550 = vmatpush3.bf16.msra.mxu0 %v6004_v18  ;;  %v6575_v45 = vld [vmem:[%s7485_s2 + $0x58] sm:$0xff]  }
  0x64   : > { %5430 = vmatmul.mubr.msk.bf16.gmra.mxu1 %vm956_vm5, %v5930_v46  ;;  %5551 = vmatprep.subr.bf16.mxu0 %v6006_v19 }
  0x65   : > { %5433 = vmatprep.mubr.msk.bf16.mxu1 %vm6118_vm0, %v6117_v1  ;;  %5589 = vmatprep.subr.bf16.mxu1 %v6575_v45 }
  0x67   : > { %5552 = vmatpush3.bf16.msra.mxu0 %v6006_v19 }
  0x6a   : > { %1069 = vmatmul.mubr.bf16.gmra.mxu0 %v5929_v47 }
  0x6b   : > { %1076 = vmatprep.mubr.bf16.mxu0 %v5931_v48 }
  0x6c   : > { %5434 = vmatmul.mubr.msk.bf16.gmra.mxu1 %vm956_vm5, %v5934_v49 }
  0x6d   : > { %5437 = vmatprep.mubr.msk.bf16.mxu1 %vm6118_vm0, %v6117_v1 }
  0x72   : > { %1077 = vmatmul.mubr.bf16.gmra.mxu0 %v5933_v50 }
  0x73   : > { %1084 = vmatprep.mubr.bf16.mxu0 %v5935_v51 }
  0x74   : > { %5438 = vmatmul.mubr.msk.bf16.gmra.mxu1 %vm956_vm5, %v5938_v52 }
  0x75   : > { %5441 = vmatprep.mubr.msk.bf16.mxu1 %vm6118_vm0, %v6117_v1 }
  0x7a   : > { %1085 = vmatmul.mubr.bf16.gmra.mxu0 %v5937_v55 }
  0x7b   : > { %1092 = vmatprep.mubr.bf16.mxu0 %v5939_v56 }
  0x7c   : > { %5442 = vmatmul.mubr.msk.bf16.gmra.mxu1 %vm956_vm5, %v5942_v57 }
  0x7d   : > { %5445 = vmatprep.mubr.msk.bf16.mxu1 %vm6118_vm0, %v6117_v1 }
  0x82   : > { %1093 = vmatmul.mubr.bf16.gmra.mxu0 %v5941_v58 }
  0x83   : > { %1100 = vmatprep.mubr.bf16.mxu0 %v5943_v59 }
  0x84   : > { %5446 = vmatmul.mubr.msk.bf16.gmra.mxu1 %vm956_vm5, %v5946_v60 }
  0x85   : > { %5449 = vmatprep.mubr.msk.bf16.mxu1 %vm6118_vm0, %v6117_v1 }
  0x8a   : > { %1101 = vmatmul.mubr.bf16.gmra.mxu0 %v5945_v61 }
  0x8b   : > { %1108 = vmatprep.mubr.bf16.mxu0 %v5947_v62 }
  0x8c   : > { %5450 = vmatmul.mubr.msk.bf16.gmra.mxu1 %vm956_vm5, %v5950_v63 }
  0x8d   : > { %5453 = vmatprep.mubr.msk.bf16.mxu1 %vm6118_vm0, %v6117_v1 }
  0x92   : > { %1109 = vmatmul.mubr.bf16.gmra.mxu0 %v5949_v2 }
  0x93   : > { %1116 = vmatprep.mubr.bf16.mxu0 %v5951_v4 }
  0x94   : > { %5454 = vmatmul.mubr.msk.bf16.gmra.mxu1 %vm956_vm5, %v5954_v5 }
  0x95   : > { %5457 = vmatprep.mubr.msk.bf16.mxu1 %vm6118_vm0, %v6117_v1 }
  0x9a   : > { %1117 = vmatmul.mubr.bf16.gmra.mxu0 %v5953_v6 }
  0x9b   : > { %1124 = vmatprep.mubr.bf16.mxu0 %v5955_v7 }
  0x9c   : > { %5458 = vmatmul.mubr.msk.bf16.gmra.mxu1 %vm956_vm5, %v5958_v8 }
  0x9d   : > { %5461 = vmatprep.mubr.msk.bf16.mxu1 %vm6118_vm0, %v6117_v1 }
  0xa2   : > { %1125 = vmatmul.mubr.bf16.gmra.mxu0 %v5957_v9 }
  0xa3   : > { %1132 = vmatprep.mubr.bf16.mxu0 %v5959_v10 }
  0xa4   : > { %5462 = vmatmul.mubr.msk.bf16.gmra.mxu1 %vm956_vm5, %v5962_v11 }
  0xa5   : > { %5465 = vmatprep.mubr.msk.bf16.mxu1 %vm6118_vm0, %v6117_v1 }
  0xaa   : > { %1133 = vmatmul.mubr.bf16.gmra.mxu0 %v5961_v15 }
  0xab   : > { %1140 = vmatprep.mubr.bf16.mxu0 %v5963_v16  ;;  %v6011_v16 = vld [vmem:[%s7485_s2 + $0x78] sm:$0xff]  }
  0xac   : > { %5466 = vmatmul.mubr.msk.bf16.gmra.mxu1 %vm956_vm5, %v5966_v17  ;;  %5633 = vmatprep.subr.bf16.mxu0 %v6011_v16 }
  0xad   : > { %5469 = vmatprep.mubr.msk.bf16.mxu1 %vm6118_vm0, %v6117_v1 }
  0xb2   : > { %1141 = vmatmul.mubr.bf16.gmra.mxu0 %v5965_v20 }
  0xb3   : > { %1148 = vmatprep.mubr.bf16.mxu0 %v5967_v21 }
  0xb4   : > { %5470 = vmatmul.mubr.msk.bf16.gmra.mxu1 %vm956_vm5, %v5970_v22 }
  0xb5   : > { %5473 = vmatprep.mubr.msk.bf16.mxu1 %vm6118_vm0, %v6117_v1 }
  0xba   : > { %1149 = vmatmul.mubr.bf16.gmra.mxu0 %v5969_v24 }
  0xbb   : > { %1156 = vmatprep.mubr.bf16.mxu0 %v5971_v25 }
  0xbc   : > { %5474 = vmatmul.mubr.msk.bf16.gmra.mxu1 %vm956_vm5, %v5974_v26 }
  0xbd   : > { %5477 = vmatprep.mubr.msk.bf16.mxu1 %vm6118_vm0, %v6117_v1 }
  0xc2   : > { %1157 = vmatmul.mubr.bf16.gmra.mxu0 %v5973_v27 }
  0xc3   : > { %1164 = vmatprep.mubr.bf16.mxu0 %v5975_v28 }
  0xc4   : > { %5478 = vmatmul.mubr.msk.bf16.gmra.mxu1 %vm956_vm5, %v5978_v29 }
  0xc5   : > { %5481 = vmatprep.mubr.msk.bf16.mxu1 %vm6118_vm0, %v6117_v1 }
  0xca   : > { %1165 = vmatmul.mubr.bf16.gmra.mxu0 %v5977_v30 }
  0xcb   : > { %1172 = vmatprep.mubr.bf16.mxu0 %v5980_v31 }
  0xcc   : > { %5482 = vmatmul.mubr.msk.bf16.gmra.mxu1 %vm956_vm5, %v5983_v32 }
  0xcd   : > { %5485 = vmatprep.mubr.msk.bf16.mxu1 %vm6118_vm0, %v6117_v1 }
  0xd2   : > { %1173 = vmatmul.mubr.bf16.gmra.mxu0 %v5982_v3  ;;  %v6013_v3 = vld [vmem:[%s7485_s2 + $0x70] sm:$0xff]  }
  0xd3   : > { %1180 = vmatprep.mubr.bf16.mxu0 %v5984_v33 }
  0xd4   : > { %5486 = vmatmul.mubr.msk.bf16.gmra.mxu1 %vm956_vm5, %v5987_v34 }
  0xd5   : > { %5489 = vmatprep.mubr.msk.bf16.mxu1 %vm6118_vm0, %v6117_v1 }
  0xda   : > { %1181 = vmatmul.mubr.bf16.gmra.mxu0 %v5986_v35 }
  0xdb   : > { %1188 = vmatprep.mubr.bf16.mxu0 %v5988_v12 }
  0xdc   : > { %5490 = vmatmul.mubr.msk.bf16.gmra.mxu1 %vm956_vm5, %v5991_v36 }
  0xdd   : > { %5493 = vmatprep.mubr.msk.bf16.mxu1 %vm6118_vm0, %v6117_v1 }
  0xe2   : > { %1189 = vmatmul.mubr.bf16.gmra.mxu0 %v5990_v37 }
  0xe3   : > { %1196 = vmatprep.mubr.bf16.mxu0 %v5992_v38 }
  0xe4   : > { %5494 = vmatmul.mubr.msk.bf16.gmra.mxu1 %vm956_vm5, %v5998_v39 }
  0xe5   : > { %5497 = vmatprep.mubr.msk.bf16.mxu1 %vm6118_vm0, %v6117_v1  ;;  %v5997_v1 = vld [vmem:[%s7484_s1 + $0x1c8] ss:$12 sps:$4 sm:$0xff]   ;;  %vm1420_vm0 = vcmask 523264  }
  0xea   : > { %1197 = vmatmul.mubr.bf16.gmra.mxu0 %v5994_v40  ;;  %v6009_v40 = vld [vmem:[%s7485_s2 + $0x50] sm:$0xff]  }
  0xeb   : > { %1204 = vmatprep.mubr.bf16.mxu0 %v5995_v41  ;;  %v6014_v41 = vld [vmem:[%s7485_s2 + $0x68] sm:$0xff]  }
  0xec   : > { %5498 = vmatmul.mubr.msk.bf16.gmra.mxu1 %vm956_vm5, %v6005_v42 }
  0xf2   : > { %1205 = vmatmul.mubr.bf16.gmra.mxu0 %v5997_v1 }
  0xf3   : > { %1212 = vmatprep.mubr.bf16.mxu0 %v4815_v44 }
  0xfa   : > { %1213 = vmatmul.mubr.bf16.gmra.mxu0 %v4814_v0 }
 0x10c   : > { %v1254_v46 = vpop.f32.mrf.mxu1 }
 0x10e   : > { %v5419_v47 = vpop.f32.mrf.mxu1 }
 0x110   : > { %v1257_v48 = vpop.f32.mrf.mxu1 }
 0x112   : > { %v5420_v49 = vpop.f32.mrf.mxu1 }
 0x113   : > { %v6010_v49 = vld [vmem:[%s7485_s2 + $0x48] sm:$0xff]  }
 0x114   : > { %v1262_v50 = vpop.f32.mrf.mxu1 }
 0x116   : > { %v5423_v51 = vpop.f32.mrf.mxu1 }
 0x118   : > { %v1265_v52 = vpop.f32.mrf.mxu1 }
 0x11a   : > { %v1054_v53 = vpop.f32.mrf.mxu0  ;;  %v5424_v55 = vpop.f32.mrf.mxu1 }
 0x11b   : > { %v1255_v54 = vadd.f32 %v1254_v46, %v1054_v53 }
 0x11c   : > { %v1056_v56 = vpop.f32.mrf.mxu0  ;;  %v1270_v57 = vpop.f32.mrf.mxu1 }
 0x11d   : > { %1421 = vst.msk [vmem:[#allocation2] sm:$0xff] %vm1420_vm0, %v1255_v54 }
 0x11e   : > { %v1057_v58 = vpop.f32.mrf.mxu0  ;;  %v5427_v60 = vpop.f32.mrf.mxu1 }
 0x11f   : > { %v1258_v59 = vadd.f32 %v1257_v48, %v1057_v58  ;;  %v6012_v58 = vld [vmem:[%s7485_s2 + $0x40] sm:$0xff]  }
 0x120   : > { %v1059_v61 = vpop.f32.mrf.mxu0  ;;  %v1273_v62 = vpop.f32.mrf.mxu1 }
 0x121   : > { %1422 = vst.msk [vmem:[#allocation2 + $0x8] sm:$0xff] %vm1420_vm0, %v1258_v59 }
 0x122   : > { %v1062_v63 = vpop.f32.mrf.mxu0  ;;  %v5428_v4 = vpop.f32.mrf.mxu1 }
 0x123   : > { %v1263_v2 = vadd.f32 %v1262_v50, %v1062_v63  ;;  %v6015_v50 = vld [vmem:[%s7485_s2 + $0x60] sm:$0xff]  }
 0x124   : > { %v1064_v5 = vpop.f32.mrf.mxu0  ;;  %v1278_v6 = vpop.f32.mrf.mxu1  ;;  %v1462_v11 = vld [vmem:[#allocation2] sm:$0xff] }
 0x125   : > { %1423 = vst.msk [vmem:[#allocation2 + $0x10] sm:$0xff] %vm1420_vm0, %v1263_v2 }
 0x126   : > { %v1065_v7 = vpop.f32.mrf.mxu0  ;;  %v5431_v9 = vpop.f32.mrf.mxu1 }
 0x127   : > { %v1266_v8 = vadd.f32 %v1265_v52, %v1065_v7 }
 0x128   : > { %v1067_v10 = vpop.f32.mrf.mxu0  ;;  %v1463_v13 = vld [vmem:[#allocation2 + $0x8] sm:$0xff]  ;;  %v1281_v15 = vpop.f32.mrf.mxu1 }
 0x129   : > { %1424 = vst.msk [vmem:[#allocation2 + $0x18] sm:$0xff] %vm1420_vm0, %v1266_v8  ;;  %v1498_v14 = vpack.c.bf16 %v1463_v13, %v1462_v11  ;;  %v1524_v21 = vld [vmem:[#allocation2 + $0x1] sm:$0xff] }
 0x12a   : > { %v1070_v17 = vpop.f32.mrf.mxu0  ;;  %v5432_v19 = vpop.f32.mrf.mxu1 }
 0x12b   : > { %v1271_v18 = vadd.f32 %v1270_v57, %v1070_v17  ;;  %5553 = vmatprep.mubr.msk.bf16.mxu0 %vm1420_vm0, %v1498_v14 }
 0x12c   : > { %v1072_v20 = vpop.f32.mrf.mxu0  ;;  %v1525_v22 = vld [vmem:[#allocation2 + $0x9] sm:$0xff]  ;;  %v1286_v24 = vpop.f32.mrf.mxu1 }
 0x12d   : > { %1425 = vst.msk [vmem:[#allocation2 + $0x20] sm:$0xff] %vm1420_vm0, %v1271_v18  ;;  %v1560_v23 = vpack.c.bf16 %v1525_v22, %v1524_v21  ;;  %v1464_v29 = vld [vmem:[#allocation2 + $0x10] sm:$0xff] }
 0x12e   : > { %v1073_v25 = vpop.f32.mrf.mxu0  ;;  %v5435_v27 = vpop.f32.mrf.mxu1 }
 0x12f   : > { %v1274_v26 = vadd.f32 %v1273_v62, %v1073_v25  ;;  %5509 = vmatprep.mubr.msk.bf16.mxu1 %vm1420_vm0, %v1560_v23 }
 0x130   : > { %v1075_v28 = vpop.f32.mrf.mxu0  ;;  %v1465_v30 = vld [vmem:[#allocation2 + $0x18] sm:$0xff]  ;;  %v1289_v32 = vpop.f32.mrf.mxu1 }
 0x131   : > { %1426 = vst.msk [vmem:[#allocation2 + $0x28] sm:$0xff] %vm1420_vm0, %v1274_v26  ;;  %v1499_v31 = vpack.c.bf16 %v1465_v30, %v1464_v29  ;;  %v1526_v36 = vld [vmem:[#allocation2 + $0x11] sm:$0xff] }
 0x132   : > { %v1078_v33 = vpop.f32.mrf.mxu0  ;;  %v5436_v35 = vpop.f32.mrf.mxu1 }
 0x133   : > { %v1279_v34 = vadd.f32 %v1278_v6, %v1078_v33  ;;  %5554 = vmatmul.mubr.msk.bf16.vlgmr.msra.gmra.mxu0 %vm1420_vm0, %v1499_v31  ;;  %v6619_v6 = vld [vmem:[%s7485_s2 + $0x98] sm:$0xff]  }
 0x134   : > { %v1080_v12 = vpop.f32.mrf.mxu0  ;;  %v1527_v37 = vld [vmem:[#allocation2 + $0x19] sm:$0xff]  ;;  %5634 = vmatpush3.bf16.msra.mxu0 %v6011_v16  ;;  %v1294_v39 = vpop.f32.mrf.mxu1 }
 0x135   : > { %1427 = vst.msk [vmem:[#allocation2 + $0x30] sm:$0xff] %vm1420_vm0, %v1279_v34  ;;  %v1561_v38 = vpack.c.bf16 %v1527_v37, %v1526_v36  ;;  %5635 = vmatprep.subr.bf16.mxu0 %v6013_v3  ;;  %v1466_v0 = vld [vmem:[#allocation2 + $0x20] sm:$0xff] }
 0x136   : > { %v1081_v42 = vpop.f32.mrf.mxu0  ;;  %v5439_v1 = vpop.f32.mrf.mxu1 }
 0x137   : > { %v1282_v43 = vadd.f32 %v1281_v15, %v1081_v42  ;;  %5510 = vmatmul.mubr.msk.bf16.vlgmr.msra.gmra.mxu1 %vm1420_vm0, %v1561_v38 }
 0x138   : > { %v1083_v44 = vpop.f32.mrf.mxu0  ;;  %v1467_v46 = vld [vmem:[#allocation2 + $0x28] sm:$0xff]  ;;  %5590 = vmatpush3.bf16.msra.mxu1 %v6575_v45  ;;  %5636 = vmatpush3.bf16.msra.mxu0 %v6013_v3  ;;  %v1297_v48 = vpop.f32.mrf.mxu1 }
 0x139   : > { %1428 = vst.msk [vmem:[#allocation2 + $0x38] sm:$0xff] %vm1420_vm0, %v1282_v43  ;;  %v1500_v47 = vpack.c.bf16 %v1467_v46, %v1466_v0  ;;  %5591 = vmatprep.subr.bf16.mxu1 %v6009_v40  ;;  %5637 = vmatprep.subr.bf16.mxu0 %v6014_v41  ;;  %v1528_v54 = vld [vmem:[#allocation2 + $0x21] sm:$0xff] }
 0x13a   : > { %v1086_v51 = vpop.f32.mrf.mxu0  ;;  %v5440_v45 = vpop.f32.mrf.mxu1 }
 0x13b   : > { %v1287_v52 = vadd.f32 %v1286_v24, %v1086_v51  ;;  %5557 = vmatprep.mubr.msk.bf16.mxu0 %vm1420_vm0, %v1500_v47 }
 0x13c   : > { %v1088_v53 = vpop.f32.mrf.mxu0  ;;  %v1529_v55 = vld [vmem:[#allocation2 + $0x29] sm:$0xff]  ;;  %5592 = vmatpush3.bf16.msra.mxu1 %v6009_v40  ;;  %5638 = vmatpush3.bf16.msra.mxu0 %v6014_v41  ;;  %v1302_v57 = vpop.f32.mrf.mxu1 }
 0x13d   : > { %1429 = vst.msk [vmem:[#allocation2 + $0x40] sm:$0xff] %vm1420_vm0, %v1287_v52  ;;  %v1562_v56 = vpack.c.bf16 %v1529_v55, %v1528_v54  ;;  %5593 = vmatprep.subr.bf16.mxu1 %v6010_v49  ;;  %5639 = vmatprep.subr.bf16.mxu0 %v6015_v50  ;;  %v1468_v63 = vld [vmem:[#allocation2 + $0x30] sm:$0xff] }
 0x13e   : > { %v1089_v59 = vpop.f32.mrf.mxu0  ;;  %v5443_v61 = vpop.f32.mrf.mxu1 }
 0x13f   : > { %v1290_v60 = vadd.f32 %v1289_v32, %v1089_v59  ;;  %5513 = vmatprep.mubr.msk.bf16.mxu1 %vm1420_vm0, %v1562_v56 }
 0x140   : > { %v1091_v62 = vpop.f32.mrf.mxu0  ;;  %v1469_v2 = vld [vmem:[#allocation2 + $0x38] sm:$0xff]  ;;  %5594 = vmatpush3.bf16.msra.mxu1 %v6010_v49  ;;  %5640 = vmatpush3.bf16.msra.mxu0 %v6015_v50  ;;  %v1305_v5 = vpop.f32.mrf.mxu1 }
 0x141   : > { %1430 = vst.msk [vmem:[#allocation2 + $0x48] sm:$0xff] %vm1420_vm0, %v1290_v60  ;;  %v1501_v4 = vpack.c.bf16 %v1469_v2, %v1468_v63  ;;  %5595 = vmatprep.subr.bf16.mxu1 %v6012_v58  ;;  %v1530_v11 = vld [vmem:[#allocation2 + $0x31] sm:$0xff] }
 0x142   : > { %v1094_v7 = vpop.f32.mrf.mxu0  ;;  %v5444_v9 = vpop.f32.mrf.mxu1 }
 0x143   : > { %v1295_v8 = vadd.f32 %v1294_v39, %v1094_v7  ;;  %5558 = vmatmul.mubr.msk.bf16.gmra.mxu0 %vm1420_vm0, %v1501_v4 }
 0x144   : > { %v1096_v10 = vpop.f32.mrf.mxu0  ;;  %v1531_v13 = vld [vmem:[#allocation2 + $0x39] sm:$0xff]  ;;  %5596 = vmatpush3.bf16.msra.mxu1 %v6012_v58  ;;  %v1310_v15 = vpop.f32.mrf.mxu1 }
 0x145   : > { %1431 = vst.msk [vmem:[#allocation2 + $0x50] sm:$0xff] %vm1420_vm0, %v1295_v8  ;;  %v1563_v14 = vpack.c.bf16 %v1531_v13, %v1530_v11  ;;  %5677 = vmatprep.subr.bf16.mxu1 %v6619_v6  ;;  %v1470_v20 = vld [vmem:[#allocation2 + $0x40] sm:$0xff] }
 0x146   : > { %v1097_v16 = vpop.f32.mrf.mxu0  ;;  %v5447_v18 = vpop.f32.mrf.mxu1 }
 0x147   : > { %v1298_v17 = vadd.f32 %v1297_v48, %v1097_v16  ;;  %5514 = vmatmul.mubr.msk.bf16.gmra.mxu1 %vm1420_vm0, %v1563_v14 }
 0x148   : > { %v1099_v19 = vpop.f32.mrf.mxu0  ;;  %v1471_v21 = vld [vmem:[#allocation2 + $0x48] sm:$0xff]  ;;  %v1313_v23 = vpop.f32.mrf.mxu1 }
 0x149   : > { %1432 = vst.msk [vmem:[#allocation2 + $0x58] sm:$0xff] %vm1420_vm0, %v1298_v17  ;;  %v1502_v22 = vpack.c.bf16 %v1471_v21, %v1470_v20  ;;  %v1532_v28 = vld [vmem:[#allocation2 + $0x41] sm:$0xff] }
 0x14a   : > { %v1102_v24 = vpop.f32.mrf.mxu0  ;;  %v5448_v26 = vpop.f32.mrf.mxu1 }
 0x14b   : > { %v1303_v25 = vadd.f32 %v1302_v57, %v1102_v24  ;;  %5561 = vmatprep.mubr.msk.bf16.mxu0 %vm1420_vm0, %v1502_v22 }
 0x14c   : > { %v1104_v27 = vpop.f32.mrf.mxu0  ;;  %v1533_v29 = vld [vmem:[#allocation2 + $0x49] sm:$0xff]  ;;  %v1318_v31 = vpop.f32.mrf.mxu1 }
 0x14d   : > { %1433 = vst.msk [vmem:[#allocation2 + $0x60] sm:$0xff] %vm1420_vm0, %v1303_v25  ;;  %v1564_v30 = vpack.c.bf16 %v1533_v29, %v1532_v28  ;;  %v1472_v35 = vld [vmem:[#allocation2 + $0x50] sm:$0xff] }
 0x14e   : > { %v1105_v32 = vpop.f32.mrf.mxu0  ;;  %v5451_v33 = vpop.f32.mrf.mxu1 }
 0x14f   : > { %v1306_v3 = vadd.f32 %v1305_v5, %v1105_v32  ;;  %5517 = vmatprep.mubr.msk.bf16.mxu1 %vm1420_vm0, %v1564_v30 }
 0x150   : > { %v1107_v34 = vpop.f32.mrf.mxu0  ;;  %v1473_v12 = vld [vmem:[#allocation2 + $0x58] sm:$0xff]  ;;  %v1321_v37 = vpop.f32.mrf.mxu1 }
 0x151   : > { %1434 = vst.msk [vmem:[#allocation2 + $0x68] sm:$0xff] %vm1420_vm0, %v1306_v3  ;;  %v1503_v36 = vpack.c.bf16 %v1473_v12, %v1472_v35  ;;  %v1534_v42 = vld [vmem:[#allocation2 + $0x51] sm:$0xff] }
 0x152   : > { %v1110_v38 = vpop.f32.mrf.mxu0  ;;  %v5452_v40 = vpop.f32.mrf.mxu1 }
 0x153   : > { %v1311_v39 = vadd.f32 %v1310_v15, %v1110_v38  ;;  %5562 = vmatmul.mubr.msk.bf16.gmra.mxu0 %vm1420_vm0, %v1503_v36 }
 0x154   : > { %v1112_v41 = vpop.f32.mrf.mxu0  ;;  %v1535_v43 = vld [vmem:[#allocation2 + $0x59] sm:$0xff]  ;;  %v1326_v44 = vpop.f32.mrf.mxu1 }
 0x155   : > { %1435 = vst.msk [vmem:[#allocation2 + $0x70] sm:$0xff] %vm1420_vm0, %v1311_v39  ;;  %v1565_v1 = vpack.c.bf16 %v1535_v43, %v1534_v42  ;;  %v1474_v49 = vld [vmem:[#allocation2 + $0x60] sm:$0xff]  ;;  %v6649_v39 = vld [vmem:[%s7485_s2 + $0xb8] sm:$0xff]  }
 0x156   : > { %v1113_v0 = vpop.f32.mrf.mxu0  ;;  %v5455_v47 = vpop.f32.mrf.mxu1  ;;  %5721 = vmatprep.subr.bf16.mxu0 %v6649_v39 }
 0x157   : > { %v1314_v46 = vadd.f32 %v1313_v23, %v1113_v0  ;;  %5518 = vmatmul.mubr.msk.bf16.gmra.mxu1 %vm1420_vm0, %v1565_v1 }
 0x158   : > { %v1115_v48 = vpop.f32.mrf.mxu0  ;;  %v1475_v50 = vld [vmem:[#allocation2 + $0x68] sm:$0xff]  ;;  %v1329_v52 = vpop.f32.mrf.mxu1 }
 0x159   : > { %1436 = vst.msk [vmem:[#allocation2 + $0x78] sm:$0xff] %vm1420_vm0, %v1314_v46  ;;  %v1504_v51 = vpack.c.bf16 %v1475_v50, %v1474_v49  ;;  %v1536_v56 = vld [vmem:[#allocation2 + $0x61] sm:$0xff] }
 0x15a   : > { %v1118_v45 = vpop.f32.mrf.mxu0  ;;  %v5456_v54 = vpop.f32.mrf.mxu1 }
 0x15b   : > { %v1319_v53 = vadd.f32 %v1318_v31, %v1118_v45  ;;  %5565 = vmatprep.mubr.msk.bf16.mxu0 %vm1420_vm0, %v1504_v51 }
 0x15c   : > { %v1120_v55 = vpop.f32.mrf.mxu0  ;;  %v1537_v57 = vld [vmem:[#allocation2 + $0x69] sm:$0xff]  ;;  %v1334_v59 = vpop.f32.mrf.mxu1 }
 0x15d   : > { %1437 = vst.msk [vmem:[#allocation2 + $0x80] sm:$0xff] %vm1420_vm0, %v1319_v53  ;;  %v1566_v58 = vpack.c.bf16 %v1537_v57, %v1536_v56  ;;  %v1476_v2 = vld [vmem:[#allocation2 + $0x70] sm:$0xff] }
 0x15e   : > { %v1121_v60 = vpop.f32.mrf.mxu0  ;;  %v5459_v62 = vpop.f32.mrf.mxu1 }
 0x15f   : > { %v1322_v61 = vadd.f32 %v1321_v37, %v1121_v60  ;;  %5521 = vmatprep.mubr.msk.bf16.mxu1 %vm1420_vm0, %v1566_v58 }
 0x160   : > { %v1123_v63 = vpop.f32.mrf.mxu0  ;;  %v1477_v4 = vld [vmem:[#allocation2 + $0x78] sm:$0xff]  ;;  %v1337_v7 = vpop.f32.mrf.mxu1 }
 0x161   : > { %1438 = vst.msk [vmem:[#allocation2 + $0x88] sm:$0xff] %vm1420_vm0, %v1322_v61  ;;  %v1505_v5 = vpack.c.bf16 %v1477_v4, %v1476_v2  ;;  %v1538_v13 = vld [vmem:[#allocation2 + $0x71] sm:$0xff] }
 0x162   : > { %v1126_v8 = vpop.f32.mrf.mxu0  ;;  %v5460_v10 = vpop.f32.mrf.mxu1 }
 0x163   : > { %v1327_v9 = vadd.f32 %v1326_v44, %v1126_v8  ;;  %5566 = vmatmul.mubr.msk.bf16.gmra.mxu0 %vm1420_vm0, %v1505_v5 }
 0x164   : > { %v1128_v11 = vpop.f32.mrf.mxu0  ;;  %v1539_v14 = vld [vmem:[#allocation2 + $0x79] sm:$0xff]  ;;  %v1342_v16 = vpop.f32.mrf.mxu1 }
 0x165   : > { %1439 = vst.msk [vmem:[#allocation2 + $0x90] sm:$0xff] %vm1420_vm0, %v1327_v9  ;;  %v1567_v15 = vpack.c.bf16 %v1539_v14, %v1538_v13  ;;  %v1478_v21 = vld [vmem:[#allocation2 + $0x80] sm:$0xff] }
 0x166   : > { %v1129_v17 = vpop.f32.mrf.mxu0  ;;  %v5463_v19 = vpop.f32.mrf.mxu1 }
 0x167   : > { %v1330_v18 = vadd.f32 %v1329_v52, %v1129_v17  ;;  %5522 = vmatmul.mubr.msk.bf16.gmra.mxu1 %vm1420_vm0, %v1567_v15 }
 0x168   : > { %v1131_v20 = vpop.f32.mrf.mxu0  ;;  %v1479_v22 = vld [vmem:[#allocation2 + $0x88] sm:$0xff]  ;;  %v1345_v24 = vpop.f32.mrf.mxu1 }
 0x169   : > { %1440 = vst.msk [vmem:[#allocation2 + $0x98] sm:$0xff] %vm1420_vm0, %v1330_v18  ;;  %v1506_v23 = vpack.c.bf16 %v1479_v22, %v1478_v21  ;;  %v1540_v29 = vld [vmem:[#allocation2 + $0x81] sm:$0xff] }
 0x16a   : > { %v1134_v25 = vpop.f32.mrf.mxu0  ;;  %v5464_v27 = vpop.f32.mrf.mxu1 }
 0x16b   : > { %v1335_v26 = vadd.f32 %v1334_v59, %v1134_v25  ;;  %5569 = vmatprep.mubr.msk.bf16.mxu0 %vm1420_vm0, %v1506_v23 }
 0x16c   : > { %v1136_v28 = vpop.f32.mrf.mxu0  ;;  %v1541_v30 = vld [vmem:[#allocation2 + $0x89] sm:$0xff]  ;;  %v1350_v32 = vpop.f32.mrf.mxu1 }
 0x16d   : > { %1441 = vst.msk [vmem:[#allocation2 + $0xa0] sm:$0xff] %vm1420_vm0, %v1335_v26  ;;  %v1568_v31 = vpack.c.bf16 %v1541_v30, %v1540_v29  ;;  %v1480_v12 = vld [vmem:[#allocation2 + $0x90] sm:$0xff] }
 0x16e   : > { %v1137_v3 = vpop.f32.mrf.mxu0  ;;  %v5467_v34 = vpop.f32.mrf.mxu1 }
 0x16f   : > { %v1338_v33 = vadd.f32 %v1337_v7, %v1137_v3  ;;  %5525 = vmatprep.mubr.msk.bf16.mxu1 %vm1420_vm0, %v1568_v31 }
 0x170   : > { %v1139_v35 = vpop.f32.mrf.mxu0  ;;  %v1481_v36 = vld [vmem:[#allocation2 + $0x98] sm:$0xff]  ;;  %v1353_v38 = vpop.f32.mrf.mxu1 }
 0x171   : > { %1442 = vst.msk [vmem:[#allocation2 + $0xa8] sm:$0xff] %vm1420_vm0, %v1338_v33  ;;  %v1507_v37 = vpack.c.bf16 %v1481_v36, %v1480_v12  ;;  %v1542_v1 = vld [vmem:[#allocation2 + $0x91] sm:$0xff] }
 0x172   : > { %v1142_v40 = vpop.f32.mrf.mxu0  ;;  %v5468_v42 = vpop.f32.mrf.mxu1 }
 0x173   : > { %v1343_v41 = vadd.f32 %v1342_v16, %v1142_v40  ;;  %5570 = vmatmul.mubr.msk.bf16.gmra.mxu0 %vm1420_vm0, %v1507_v37 }
 0x174   : > { %v1144_v43 = vpop.f32.mrf.mxu0  ;;  %v1543_v44 = vld [vmem:[#allocation2 + $0x99] sm:$0xff]  ;;  %v1358_v46 = vpop.f32.mrf.mxu1 }
 0x175   : > { %1443 = vst.msk [vmem:[#allocation2 + $0xb0] sm:$0xff] %vm1420_vm0, %v1343_v41  ;;  %v1569_v0 = vpack.c.bf16 %v1543_v44, %v1542_v1  ;;  %v1482_v51 = vld [vmem:[#allocation2 + $0xa0] sm:$0xff] }
 0x176   : > { %v1145_v47 = vpop.f32.mrf.mxu0  ;;  %v5471_v49 = vpop.f32.mrf.mxu1 }
 0x177   : > { %v1346_v48 = vadd.f32 %v1345_v24, %v1145_v47  ;;  %5526 = vmatmul.mubr.msk.bf16.gmra.mxu1 %vm1420_vm0, %v1569_v0 }
 0x178   : > { %v1147_v50 = vpop.f32.mrf.mxu0  ;;  %v1483_v52 = vld [vmem:[#allocation2 + $0xa8] sm:$0xff]  ;;  %v1361_v53 = vpop.f32.mrf.mxu1 }
 0x179   : > { %1444 = vst.msk [vmem:[#allocation2 + $0xb8] sm:$0xff] %vm1420_vm0, %v1346_v48  ;;  %v1508_v45 = vpack.c.bf16 %v1483_v52, %v1482_v51  ;;  %v1544_v58 = vld [vmem:[#allocation2 + $0xa1] sm:$0xff] }
 0x17a   : > { %v1150_v54 = vpop.f32.mrf.mxu0  ;;  %v5472_v56 = vpop.f32.mrf.mxu1 }
 0x17b   : > { %v1351_v55 = vadd.f32 %v1350_v32, %v1150_v54  ;;  %5573 = vmatprep.mubr.msk.bf16.mxu0 %vm1420_vm0, %v1508_v45 }
 0x17c   : > { %v1152_v57 = vpop.f32.mrf.mxu0  ;;  %v1545_v59 = vld [vmem:[#allocation2 + $0xa9] sm:$0xff]  ;;  %v1366_v61 = vpop.f32.mrf.mxu1 }
 0x17d   : > { %1445 = vst.msk [vmem:[#allocation2 + $0xc0] sm:$0xff] %vm1420_vm0, %v1351_v55  ;;  %v1570_v60 = vpack.c.bf16 %v1545_v59, %v1544_v58  ;;  %v1484_v5 = vld [vmem:[#allocation2 + $0xb0] sm:$0xff] }
 0x17e   : > { %v1153_v62 = vpop.f32.mrf.mxu0  ;;  %v5475_v2 = vpop.f32.mrf.mxu1 }
 0x17f   : > { %v1354_v63 = vadd.f32 %v1353_v38, %v1153_v62  ;;  %5529 = vmatprep.mubr.msk.bf16.mxu1 %vm1420_vm0, %v1570_v60 }
 0x180   : > { %v1155_v4 = vpop.f32.mrf.mxu0  ;;  %v1485_v7 = vld [vmem:[#allocation2 + $0xb8] sm:$0xff]  ;;  %v1369_v9 = vpop.f32.mrf.mxu1 }
 0x181   : > { %1446 = vst.msk [vmem:[#allocation2 + $0xc8] sm:$0xff] %vm1420_vm0, %v1354_v63  ;;  %v1509_v8 = vpack.c.bf16 %v1485_v7, %v1484_v5  ;;  %v1546_v15 = vld [vmem:[#allocation2 + $0xb1] sm:$0xff] }
 0x182   : > { %v1158_v10 = vpop.f32.mrf.mxu0  ;;  %v5476_v13 = vpop.f32.mrf.mxu1 }
 0x183   : > { %v1359_v11 = vadd.f32 %v1358_v46, %v1158_v10  ;;  %5574 = vmatmul.mubr.msk.bf16.gmra.mxu0 %vm1420_vm0, %v1509_v8 }
 0x184   : > { %v1160_v14 = vpop.f32.mrf.mxu0  ;;  %v1547_v16 = vld [vmem:[#allocation2 + $0xb9] sm:$0xff]  ;;  %v1374_v18 = vpop.f32.mrf.mxu1 }
 0x185   : > { %1447 = vst.msk [vmem:[#allocation2 + $0xd0] sm:$0xff] %vm1420_vm0, %v1359_v11  ;;  %v1571_v17 = vpack.c.bf16 %v1547_v16, %v1546_v15  ;;  %v1486_v23 = vld [vmem:[#allocation2 + $0xc0] sm:$0xff] }
 0x186   : > { %v1161_v19 = vpop.f32.mrf.mxu0  ;;  %v5479_v21 = vpop.f32.mrf.mxu1 }
 0x187   : > { %v1362_v20 = vadd.f32 %v1361_v53, %v1161_v19  ;;  %5530 = vmatmul.mubr.msk.bf16.gmra.mxu1 %vm1420_vm0, %v1571_v17 }
 0x188   : > { %v1163_v22 = vpop.f32.mrf.mxu0  ;;  %v1487_v24 = vld [vmem:[#allocation2 + $0xc8] sm:$0xff]  ;;  %v1377_v26 = vpop.f32.mrf.mxu1 }
 0x189   : > { %1448 = vst.msk [vmem:[#allocation2 + $0xd8] sm:$0xff] %vm1420_vm0, %v1362_v20  ;;  %v1510_v25 = vpack.c.bf16 %v1487_v24, %v1486_v23  ;;  %v1548_v31 = vld [vmem:[#allocation2 + $0xc1] sm:$0xff] }
 0x18a   : > { %v1166_v27 = vpop.f32.mrf.mxu0  ;;  %v5480_v29 = vpop.f32.mrf.mxu1 }
 0x18b   : > { %v1367_v28 = vadd.f32 %v1366_v61, %v1166_v27  ;;  %5577 = vmatprep.mubr.msk.bf16.mxu0 %vm1420_vm0, %v1510_v25 }
 0x18c   : > { %v1168_v30 = vpop.f32.mrf.mxu0  ;;  %v1549_v32 = vld [vmem:[#allocation2 + $0xc9] sm:$0xff]  ;;  %v1382_v33 = vpop.f32.mrf.mxu1 }
 0x18d   : > { %1449 = vst.msk [vmem:[#allocation2 + $0xe0] sm:$0xff] %vm1420_vm0, %v1367_v28  ;;  %v1572_v3 = vpack.c.bf16 %v1549_v32, %v1548_v31  ;;  %v1488_v37 = vld [vmem:[#allocation2 + $0xd0] sm:$0xff] }
 0x18e   : > { %v1169_v34 = vpop.f32.mrf.mxu0  ;;  %v5483_v12 = vpop.f32.mrf.mxu1 }
 0x18f   : > { %v1370_v35 = vadd.f32 %v1369_v9, %v1169_v34  ;;  %5533 = vmatprep.mubr.msk.bf16.mxu1 %vm1420_vm0, %v1572_v3 }
 0x190   : > { %v1171_v36 = vpop.f32.mrf.mxu0  ;;  %v1489_v38 = vld [vmem:[#allocation2 + $0xd8] sm:$0xff]  ;;  %v1385_v41 = vpop.f32.mrf.mxu1 }
 0x191   : > { %1450 = vst.msk [vmem:[#allocation2 + $0xe8] sm:$0xff] %vm1420_vm0, %v1370_v35  ;;  %v1511_v40 = vpack.c.bf16 %v1489_v38, %v1488_v37  ;;  %v1550_v0 = vld [vmem:[#allocation2 + $0xd1] sm:$0xff]  ;;  %v2452_v37 = vld [vmem:[#allocation2 + $0x1a] sm:$0xff] }
 0x192   : > { %v1174_v42 = vpop.f32.mrf.mxu0  ;;  %v5484_v1 = vpop.f32.mrf.mxu1 }
 0x193   : > { %v1375_v43 = vadd.f32 %v1374_v18, %v1174_v42  ;;  %5578 = vmatmul.mubr.msk.bf16.gmra.mxu0 %vm1420_vm0, %v1511_v40  ;;  %v2451_v1 = vld [vmem:[#allocation2 + $0x12] sm:$0xff] }
 0x194   : > { %v1176_v44 = vpop.f32.mrf.mxu0  ;;  %v1551_v46 = vld [vmem:[#allocation2 + $0xd9] sm:$0xff]  ;;  %v1390_v48 = vpop.f32.mrf.mxu1 }
 0x195   : > { %1451 = vst.msk [vmem:[#allocation2 + $0xf0] sm:$0xff] %vm1420_vm0, %v1375_v43  ;;  %v1573_v47 = vpack.c.bf16 %v1551_v46, %v1550_v0  ;;  %v1490_v45 = vld [vmem:[#allocation2 + $0xe0] sm:$0xff]  ;;  %v2487_v46 = vpack.c.bf16 %v2452_v37, %v2451_v1 }
 0x196   : > { %v1177_v49 = vpop.f32.mrf.mxu0  ;;  %v5487_v51 = vpop.f32.mrf.mxu1 }
 0x197   : > { %v1378_v50 = vadd.f32 %v1377_v26, %v1177_v49  ;;  %5534 = vmatmul.mubr.msk.bf16.gmra.mxu1 %vm1420_vm0, %v1573_v47 }
 0x198   : > { %v1179_v52 = vpop.f32.mrf.mxu0  ;;  %v1491_v53 = vld [vmem:[#allocation2 + $0xe8] sm:$0xff]  ;;  %v1393_v55 = vpop.f32.mrf.mxu1 }
 0x199   : > { %1452 = vst.msk [vmem:[#allocation2 + $0xf8] sm:$0xff] %vm1420_vm0, %v1378_v50  ;;  %v1512_v54 = vpack.c.bf16 %v1491_v53, %v1490_v45  ;;  %v1552_v60 = vld [vmem:[#allocation2 + $0xe1] sm:$0xff] }
 0x19a   : > { %v1182_v56 = vpop.f32.mrf.mxu0  ;;  %v5488_v58 = vpop.f32.mrf.mxu1  ;;  %v2097_v53 = vld [vmem:[#allocation2 + $0x2] sm:$0xff] }
 0x19b   : > { %v1383_v57 = vadd.f32 %v1382_v33, %v1182_v56  ;;  %5581 = vmatprep.mubr.msk.bf16.mxu0 %vm1420_vm0, %v1512_v54 }
 0x19c   : > { %v1184_v59 = vpop.f32.mrf.mxu0  ;;  %v1553_v61 = vld [vmem:[#allocation2 + $0xe9] sm:$0xff]  ;;  %v1398_v63 = vpop.f32.mrf.mxu1 }
 0x19d   : > { %1453 = vst.msk [vmem:[#allocation2 + $0x100] sm:$0xff] %vm1420_vm0, %v1383_v57  ;;  %v1574_v62 = vpack.c.bf16 %v1553_v61, %v1552_v60  ;;  %v1492_v8 = vld [vmem:[#allocation2 + $0xf0] sm:$0xff]  ;;  %v2456_v57 = vld [vmem:[#allocation2 + $0x3a] sm:$0xff]  ;;  %v2453_v59 = vld [vmem:[#allocation2 + $0x22] sm:$0xff] }
 0x19e   : > { %v1185_v2 = vpop.f32.mrf.mxu0  ;;  %v5491_v5 = vpop.f32.mrf.mxu1 }
 0x19f   : > { %v1386_v4 = vadd.f32 %v1385_v41, %v1185_v2  ;;  %5537 = vmatprep.mubr.msk.bf16.mxu1 %vm1420_vm0, %v1574_v62  ;;  %v2455_v62 = vld [vmem:[#allocation2 + $0x32] sm:$0xff] }
 0x1a0   : > { %v1187_v7 = vpop.f32.mrf.mxu0  ;;  %v1493_v9 = vld [vmem:[#allocation2 + $0xf8] sm:$0xff]  ;;  %v1401_v11 = vpop.f32.mrf.mxu1  ;;  %v2489_v2 = vpack.c.bf16 %v2456_v57, %v2455_v62 }
 0x1a1   : > { %1454 = vst.msk [vmem:[#allocation2 + $0x108] sm:$0xff] %vm1420_vm0, %v1386_v4  ;;  %v1513_v10 = vpack.c.bf16 %v1493_v9, %v1492_v8  ;;  %v1554_v17 = vld [vmem:[#allocation2 + $0xf1] sm:$0xff] }
 0x1a2   : > { %v1190_v13 = vpop.f32.mrf.mxu0  ;;  %v5492_v15 = vpop.f32.mrf.mxu1  ;;  %v6017_v8 = vld [vmem:[%s7485_s2 + $0x90] sm:$0xff]  }
 0x1a3   : > { %v1391_v14 = vadd.f32 %v1390_v48, %v1190_v13  ;;  %5582 = vmatmul.mubr.msk.bf16.gmra.mxu0 %vm1420_vm0, %v1513_v10  ;;  %v2098_v48 = vld [vmem:[#allocation2 + $0xa] sm:$0xff]  ;;  %v2460_v13 = vld [vmem:[#allocation2 + $0x5a] sm:$0xff] }
 0x1a4   : > { %v1192_v16 = vpop.f32.mrf.mxu0  ;;  %v1555_v18 = vld [vmem:[#allocation2 + $0xf9] sm:$0xff]  ;;  %v1406_v20 = vpop.f32.mrf.mxu1  ;;  %v2133_v54 = vpack.c.bf16 %v2098_v48, %v2097_v53  ;;  %v2458_v9 = vld [vmem:[#allocation2 + $0x4a] sm:$0xff] }
 0x1a5   : > { %1455 = vst.msk [vmem:[#allocation2 + $0x110] sm:$0xff] %vm1420_vm0, %v1391_v14  ;;  %v1575_v19 = vpack.c.bf16 %v1555_v18, %v1554_v17  ;;  %v1494_v25 = vld [vmem:[#allocation2 + $0x100] sm:$0xff]  ;;  %v2459_v16 = vld [vmem:[#allocation2 + $0x52] sm:$0xff]  ;;  %v6018_v17 = vld [vmem:[%s7485_s2 + $0x88] sm:$0xff]  }
 0x1a6   : > { %v1193_v21 = vpop.f32.mrf.mxu0  ;;  %v5495_v23 = vpop.f32.mrf.mxu1  ;;  %v2491_v18 = vpack.c.bf16 %v2460_v13, %v2459_v16  ;;  %v2479_v48 = vld [vmem:[#allocation2 + $0xf2] sm:$0xff] }
 0x1a7   : > { %v1394_v22 = vadd.f32 %v1393_v55, %v1193_v21  ;;  %5538 = vmatmul.mubr.msk.bf16.gmra.mxu1 %vm1420_vm0, %v1575_v19  ;;  %v2454_v55 = vld [vmem:[#allocation2 + $0x2a] sm:$0xff]  ;;  %v6023_v19 = vld [vmem:[%s7485_s2 + $0xa0] sm:$0xff]   ;;  %v6720_v21 = vld [vmem:[%s7485_s2 + $0xf8] sm:$0xff]  }
 0x1a8   : > { %v1195_v24 = vpop.f32.mrf.mxu0  ;;  %v1495_v26 = vld [vmem:[#allocation2 + $0x108] sm:$0xff]  ;;  %v1409_v28 = vpop.f32.mrf.mxu1  ;;  %v2488_v61 = vpack.c.bf16 %v2454_v55, %v2453_v59  ;;  %v3160_v59 = vld [vmem:[#allocation2 + $0x1c] sm:$0xff] }
 0x1a9   : > { %1456 = vst.msk [vmem:[#allocation2 + $0x118] sm:$0xff] %vm1420_vm0, %v1394_v22  ;;  %v1514_v27 = vpack.c.bf16 %v1495_v26, %v1494_v25  ;;  %v1556_v3 = vld [vmem:[#allocation2 + $0x101] sm:$0xff]  ;;  %v2463_v25 = vld [vmem:[#allocation2 + $0x72] sm:$0xff] }
 0x1aa   : > { %v1198_v29 = vpop.f32.mrf.mxu0  ;;  %v5496_v31 = vpop.f32.mrf.mxu1  ;;  %v2464_v22 = vld [vmem:[#allocation2 + $0x7a] sm:$0xff]  ;;  %v2461_v23 = vld [vmem:[#allocation2 + $0x62] sm:$0xff] }
 0x1ab   : > { %v1399_v30 = vadd.f32 %v1398_v63, %v1198_v29  ;;  %5585 = vmatprep.mubr.msk.bf16.mxu0 %vm1420_vm0, %v1514_v27  ;;  %v6021_v63 = vld [vmem:[%s7485_s2 + $0xb0] sm:$0xff]   ;;  %v6727_v26 = vld [vmem:[%s7485_s2 + $0xd8] sm:$0xff]   ;;  %v2493_v27 = vpack.c.bf16 %v2464_v22, %v2463_v25 }
 0x1ac   : > { %v1200_v32 = vpop.f32.mrf.mxu0  ;;  %v1557_v33 = vld [vmem:[#allocation2 + $0x109] sm:$0xff]  ;;  %v1414_v35 = vpop.f32.mrf.mxu1  ;;  %v2468_v29 = vld [vmem:[#allocation2 + $0x9a] sm:$0xff] }
 0x1ad   : > { %1457 = vst.msk [vmem:[#allocation2 + $0x120] sm:$0xff] %vm1420_vm0, %v1399_v30  ;;  %v1576_v34 = vpack.c.bf16 %v1557_v33, %v1556_v3  ;;  %v1496_v41 = vld [vmem:[#allocation2 + $0x110] sm:$0xff]  ;;  %v2465_v30 = vld [vmem:[#allocation2 + $0x82] sm:$0xff] }
 0x1ae   : > { %v1201_v12 = vpop.f32.mrf.mxu0  ;;  %v5499_v38 = vpop.f32.mrf.mxu1  ;;  %v2467_v32 = vld [vmem:[#allocation2 + $0x92] sm:$0xff]  ;;  %v2470_v33 = vld [vmem:[#allocation2 + $0xaa] sm:$0xff] }
 0x1af   : > { %v1402_v36 = vadd.f32 %v1401_v11, %v1201_v12  ;;  %5541 = vmatprep.mubr.msk.bf16.mxu1 %vm1420_vm0, %v1576_v34  ;;  %v6022_v11 = vld [vmem:[%s7485_s2 + $0xa8] sm:$0xff]   ;;  %v2495_v3 = vpack.c.bf16 %v2468_v29, %v2467_v32  ;;  %v2472_v34 = vld [vmem:[#allocation2 + $0xba] sm:$0xff]  ;;  %v6025_v29 = vld [vmem:[%s7485_s2 + $0xd0] sm:$0xff]  }
 0x1b0   : > { %v1203_v40 = vpop.f32.mrf.mxu0  ;;  %v1497_v42 = vld [vmem:[#allocation2 + $0x118] sm:$0xff]  ;;  %v1417_v44 = vpop.f32.mrf.mxu1  ;;  %v2474_v38 = vld [vmem:[#allocation2 + $0xca] sm:$0xff] }
 0x1b1   : > { %1458 = vst.msk [vmem:[#allocation2 + $0x128] sm:$0xff] %vm1420_vm0, %v1402_v36  ;;  %v1515_v43 = vpack.c.bf16 %v1497_v42, %v1496_v41  ;;  %v1558_v50 = vld [vmem:[#allocation2 + $0x111] sm:$0xff]  ;;  %v2476_v40 = vld [vmem:[#allocation2 + $0xda] sm:$0xff]  ;;  %v2473_v41 = vld [vmem:[#allocation2 + $0xc2] sm:$0xff] }
 0x1b2   : > { %v1206_v0 = vpop.f32.mrf.mxu0  ;;  %v5500_v49 = vpop.f32.mrf.mxu1  ;;  %v2471_v36 = vld [vmem:[#allocation2 + $0xb2] sm:$0xff]  ;;  %v2498_v42 = vpack.c.bf16 %v2474_v38, %v2473_v41  ;;  %v2478_v44 = vld [vmem:[#allocation2 + $0xea] sm:$0xff] }
 0x1b3   : > { %v1407_v47 = vadd.f32 %v1406_v20, %v1206_v0  ;;  %5586 = vmatmul.mubr.msk.bf16.gmra.mxu0 %vm1420_vm0, %v1515_v43  ;;  %v2462_v20 = vld [vmem:[#allocation2 + $0x6a] sm:$0xff]  ;;  %v2497_v37 = vpack.c.bf16 %v2472_v34, %v2471_v36  ;;  %v2475_v43 = vld [vmem:[#allocation2 + $0xd2] sm:$0xff]  ;;  %v2480_v0 = vld [vmem:[#allocation2 + $0xfa] sm:$0xff] }
 0x1b4   : > { %5641 = vmatprep.mubr.msk.bf16.mxu0 %vm1420_vm0, %v2487_v46  ;;  %v1559_v51 = vld [vmem:[#allocation2 + $0x119] sm:$0xff]  ;;  %v1208_v52 = vpop.f32.mrf.mxu0  ;;  %v2492_v24 = vpack.c.bf16 %v2462_v20, %v2461_v23  ;;  %v2499_v1 = vpack.c.bf16 %v2476_v40, %v2475_v43  ;;  %v2501_v49 = vpack.c.bf16 %v2480_v0, %v2479_v48  ;;  %v2808_v20 = vld [vmem:[#allocation2 + $0x2b] sm:$0xff] }
 0x1b5   : > { %1459 = vst.msk [vmem:[#allocation2 + $0x130] sm:$0xff] %vm1420_vm0, %v1407_v47  ;;  %v1577_v45 = vpack.c.bf16 %v1559_v51, %v1558_v50  ;;  %v2482_v50 = vld [vmem:[#allocation2 + $0x10a] sm:$0xff]  ;;  %v2484_v51 = vld [vmem:[#allocation2 + $0x11a] sm:$0xff]  ;;  %v2481_v52 = vld [vmem:[#allocation2 + $0x102] sm:$0xff] }
 0x1b6   : > { %v1209_v56 = vpop.f32.mrf.mxu0  ;;  %v2483_v53 = vld [vmem:[#allocation2 + $0x112] sm:$0xff]  ;;  %v2810_v23 = vld [vmem:[#allocation2 + $0x3b] sm:$0xff]  ;;  %v6030_v32 = vld [vmem:[%s7485_s2 + $0xe8] sm:$0xff]  }
 0x1b7   : > { %5542 = vmatmul.mubr.msk.bf16.gmra.mxu1 %vm1420_vm0, %v1577_v45  ;;  %v1410_v58 = vadd.f32 %v1409_v28, %v1209_v56  ;;  %v2466_v28 = vld [vmem:[#allocation2 + $0x8a] sm:$0xff]  ;;  %v2502_v45 = vpack.c.bf16 %v2482_v50, %v2481_v52  ;;  %v2813_v48 = vld [vmem:[#allocation2 + $0x53] sm:$0xff] }
 0x1b8   : > { %5597 = vmatprep.mubr.msk.bf16.mxu1 %vm1420_vm0, %v2133_v54  ;;  %v1211_v60 = vpop.f32.mrf.mxu0  ;;  %v2494_v31 = vpack.c.bf16 %v2466_v28, %v2465_v30  ;;  %v2503_v54 = vpack.c.bf16 %v2484_v51, %v2483_v53  ;;  %v2809_v28 = vld [vmem:[#allocation2 + $0x33] sm:$0xff]  ;;  %v6026_v38 = vld [vmem:[%s7485_s2 + $0xc8] sm:$0xff]  }
 0x1b9   : > { %1460 = vst.msk [vmem:[#allocation2 + $0x138] sm:$0xff] %vm1420_vm0, %v1410_v58  ;;  %v2843_v30 = vpack.c.bf16 %v2810_v23, %v2809_v28  ;;  %v3170_v51 = vld [vmem:[#allocation2 + $0x6c] sm:$0xff]  ;;  %v6816_v52 = vld [vmem:[%s7485_s2 + $0x118] sm:$0xff]   ;;  %v3169_v53 = vld [vmem:[#allocation2 + $0x64] sm:$0xff] }
 0x1ba   : > { %v1214_v4 = vpop.f32.mrf.mxu0  ;;  %v2820_v23 = vld [vmem:[#allocation2 + $0x8b] sm:$0xff]  ;;  %v2822_v28 = vld [vmem:[#allocation2 + $0x9b] sm:$0xff] }
 0x1bb   : > { %5642 = vmatmul.mubr.msk.bf16.vlgmr.msra.gmra.mxu0 %vm1420_vm0, %v2488_v61  ;;  %v1415_v5 = vadd.f32 %v1414_v35, %v1214_v4  ;;  %v2469_v35 = vld [vmem:[#allocation2 + $0xa2] sm:$0xff] }
 0x1bc   : > { %5645 = vmatprep.mubr.msk.bf16.mxu0 %vm1420_vm0, %v2489_v2  ;;  %v1216_v7 = vpop.f32.mrf.mxu0  ;;  %5722 = vmatpush3.bf16.msra.mxu0 %v6649_v39  ;;  %v2457_v39 = vld [vmem:[#allocation2 + $0x42] sm:$0xff]  ;;  %v2496_v12 = vpack.c.bf16 %v2470_v33, %v2469_v35  ;;  %v2486_v56 = vld [vmem:[#allocation2 + $0x12a] sm:$0xff] }
 0x1bd   : > { %1461 = vst.msk [vmem:[#allocation2 + $0x140] sm:$0xff] %vm1420_vm0, %v1415_v5  ;;  %5723 = vmatprep.subr.bf16.mxu0 %v6021_v63  ;;  %v2490_v15 = vpack.c.bf16 %v2458_v9, %v2457_v39  ;;  %v2806_v9 = vld [vmem:[#allocation2 + $0x1b] sm:$0xff]  ;;  %v3162_v39 = vld [vmem:[#allocation2 + $0x2c] sm:$0xff]  ;;  %v3165_v35 = vld [vmem:[#allocation2 + $0x44] sm:$0xff] }
 0x1be   : > { %v1217_v10 = vpop.f32.mrf.mxu0 }
 0x1bf   : > { %5598 = vmatmul.mubr.msk.bf16.vlgmr.msra.gmra.mxu1 %vm1420_vm0, %v2487_v46  ;;  %v2477_v46 = vld [vmem:[#allocation2 + $0xe2] sm:$0xff] }
 0x1c0   : > { %5678 = vmatpush3.bf16.msra.mxu1 %v6619_v6  ;;  %5601 = vmatprep.mubr.msk.bf16.mxu1 %vm1420_vm0, %v2488_v61  ;;  %v1218_v14 = vpop.f32.mrf.mxu0  ;;  %v6020_v6 = vld [vmem:[%s7485_s2 + $0x80] sm:$0xff]   ;;  %v2500_v47 = vpack.c.bf16 %v2478_v44, %v2477_v46 }
 0x1c1   : > { %5679 = vmatprep.subr.bf16.mxu1 %v6017_v8  ;;  %5724 = vmatpush3.bf16.msra.mxu0 %v6021_v63  ;;  %v2485_v61 = vld [vmem:[#allocation2 + $0x122] sm:$0xff] }
 0x1c2   : > { %5725 = vmatprep.subr.bf16.mxu0 %v6022_v11  ;;  %v2504_v63 = vpack.c.bf16 %v2486_v56, %v2485_v61  ;;  %v3164_v14 = vld [vmem:[#allocation2 + $0x3c] sm:$0xff]  ;;  %v3171_v56 = vld [vmem:[#allocation2 + $0x74] sm:$0xff] }
 0x1c3   : > { %5646 = vmatmul.mubr.msk.bf16.gmra.mxu0 %vm1420_vm0, %v2490_v15  ;;  %v2814_v44 = vld [vmem:[#allocation2 + $0x5b] sm:$0xff]  ;;  %v2811_v46 = vld [vmem:[#allocation2 + $0x43] sm:$0xff] }
 0x1c4   : > { %5649 = vmatprep.mubr.msk.bf16.mxu0 %vm1420_vm0, %v2491_v18  ;;  %5680 = vmatpush3.bf16.msra.mxu1 %v6017_v8  ;;  %v2845_v50 = vpack.c.bf16 %v2814_v44, %v2813_v48  ;;  %v2818_v61 = vld [vmem:[#allocation2 + $0x7b] sm:$0xff]  ;;  %v2823_v44 = vld [vmem:[#allocation2 + $0xa3] sm:$0xff]  ;;  %v2825_v48 = vld [vmem:[#allocation2 + $0xb3] sm:$0xff] }
 0x1c5   : > { %5681 = vmatprep.subr.bf16.mxu1 %v6018_v17  ;;  %5726 = vmatpush3.bf16.msra.mxu0 %v6022_v11  ;;  %v2805_v11 = vld [vmem:[#allocation2 + $0x13] sm:$0xff] }
 0x1c6   : > { %5727 = vmatprep.subr.bf16.mxu0 %v6023_v19  ;;  %v2841_v13 = vpack.c.bf16 %v2806_v9, %v2805_v11 }
 0x1c7   : > { %5602 = vmatmul.mubr.msk.bf16.gmra.mxu1 %vm1420_vm0, %v2489_v2  ;;  %v3159_v2 = vld [vmem:[#allocation2 + $0x14] sm:$0xff] }
 0x1c8   : > { %5605 = vmatprep.mubr.msk.bf16.mxu1 %vm1420_vm0, %v2490_v15  ;;  %5682 = vmatpush3.bf16.msra.mxu1 %v6018_v17  ;;  %v3195_v5 = vpack.c.bf16 %v3160_v59, %v3159_v2  ;;  %v3161_v15 = vld [vmem:[#allocation2 + $0x24] sm:$0xff] }
 0x1c9   : > { %5683 = vmatprep.subr.bf16.mxu1 %v6020_v6  ;;  %5728 = vmatpush3.bf16.msra.mxu0 %v6023_v19  ;;  %v6767_v17 = vpack.c.bf16 %v3162_v39, %v3161_v15  ;;  %v6029_v19 = vld [vmem:[%s7485_s2 + $0xf0] sm:$0xff]  }
 0x1ca   : > { %5809 = vmatprep.subr.bf16.mxu0 %v6720_v21 }
 0x1cb   : > { %5650 = vmatmul.mubr.msk.bf16.gmra.mxu0 %vm1420_vm0, %v2492_v24 }
 0x1cc   : > { %5653 = vmatprep.mubr.msk.bf16.mxu0 %vm1420_vm0, %v2493_v27  ;;  %5684 = vmatpush3.bf16.msra.mxu1 %v6020_v6 }
 0x1cd   : > { %5765 = vmatprep.subr.bf16.mxu1 %v6727_v26 }
 0x1cf   : > { %5606 = vmatmul.mubr.msk.bf16.gmra.mxu1 %vm1420_vm0, %v2491_v18  ;;  %v3163_v18 = vld [vmem:[#allocation2 + $0x34] sm:$0xff] }
 0x1d0   : > { %5609 = vmatprep.mubr.msk.bf16.mxu1 %vm1420_vm0, %v2492_v24  ;;  %v6772_v6 = vpack.c.bf16 %v3164_v14, %v3163_v18  ;;  %v2807_v24 = vld [vmem:[#allocation2 + $0x23] sm:$0xff] }
 0x1d1   : > { %v3173_v14 = vld [vmem:[#allocation2 + $0x84] sm:$0xff] }
 0x1d3   : > { %5654 = vmatmul.mubr.msk.bf16.gmra.mxu0 %vm1420_vm0, %v2494_v31 }
 0x1d4   : > { %5657 = vmatprep.mubr.msk.bf16.mxu0 %vm1420_vm0, %v2495_v3 }
 0x1d7   : > { %5610 = vmatmul.mubr.msk.bf16.gmra.mxu1 %vm1420_vm0, %v2493_v27  ;;  %v2842_v27 = vpack.c.bf16 %v2808_v20, %v2807_v24 }
 0x1d8   : > { %5613 = vmatprep.mubr.msk.bf16.mxu1 %vm1420_vm0, %v2494_v31  ;;  %v3166_v31 = vld [vmem:[#allocation2 + $0x4c] sm:$0xff] }
 0x1d9   : > { %v6792_v36 = vpack.c.bf16 %v3166_v31, %v3165_v35  ;;  %v3177_v35 = vld [vmem:[#allocation2 + $0xa4] sm:$0xff] }
 0x1db   : > { %5658 = vmatmul.mubr.msk.bf16.gmra.mxu0 %vm1420_vm0, %v2496_v12 }
 0x1dc   : > { %5661 = vmatprep.mubr.msk.bf16.mxu0 %vm1420_vm0, %v2497_v37 }
 0x1df   : > { %5614 = vmatmul.mubr.msk.bf16.gmra.mxu1 %vm1420_vm0, %v2495_v3 }
 0x1e0   : > { %5617 = vmatprep.mubr.msk.bf16.mxu1 %vm1420_vm0, %v2496_v12 }
 0x1e3   : > { %5662 = vmatmul.mubr.msk.bf16.gmra.mxu0 %vm1420_vm0, %v2498_v42 }
 0x1e4   : > { %5665 = vmatprep.mubr.msk.bf16.mxu0 %vm1420_vm0, %v2499_v1 }
 0x1e7   : > { %5618 = vmatmul.mubr.msk.bf16.gmra.mxu1 %vm1420_vm0, %v2497_v37  ;;  %v3167_v37 = vld [vmem:[#allocation2 + $0x54] sm:$0xff] }
 0x1e8   : > { %5621 = vmatprep.mubr.msk.bf16.mxu1 %vm1420_vm0, %v2498_v42  ;;  %v2812_v42 = vld [vmem:[#allocation2 + $0x4b] sm:$0xff] }
 0x1eb   : > { %5666 = vmatmul.mubr.msk.bf16.gmra.mxu0 %vm1420_vm0, %v2500_v47 }
 0x1ec   : > { %5669 = vmatprep.mubr.msk.bf16.mxu0 %vm1420_vm0, %v2501_v49 }
 0x1ef   : > { %5622 = vmatmul.mubr.msk.bf16.gmra.mxu1 %vm1420_vm0, %v2499_v1 }
 0x1f0   : > { %5625 = vmatprep.mubr.msk.bf16.mxu1 %vm1420_vm0, %v2500_v47  ;;  %v2844_v47 = vpack.c.bf16 %v2812_v42, %v2811_v46 }
 0x1f3   : > { %v5555_v55 = vpop.f32.mrf.mxu0  ;;  %5670 = vmatmul.mubr.msk.bf16.gmra.mxu0 %vm1420_vm0, %v2502_v45 }
 0x1f4   : > { %5673 = vmatprep.mubr.msk.bf16.mxu0 %vm1420_vm0, %v2503_v54 }
 0x1f5   : > { %v1954_v57 = vpop.f32.mrf.mxu0 }
 0x1f7   : > { %v5511_v58 = vpop.f32.mrf.mxu1  ;;  %5626 = vmatmul.mubr.msk.bf16.gmra.mxu1 %vm1420_vm0, %v2501_v49  ;;  %v5556_v7 = vpop.f32.mrf.mxu0  ;;  %v6028_v49 = vld [vmem:[%s7485_s2 + $0xc0] sm:$0xff]  }
 0x1f8   : > { %v6754_v60 = vadd.f32 %v5555_v55, %v5511_v58  ;;  %5629 = vmatprep.mubr.msk.bf16.mxu1 %vm1420_vm0, %v2502_v45  ;;  %v3172_v45 = vld [vmem:[#allocation2 + $0x7c] sm:$0xff]  ;;  %v6822_v55 = vpack.c.bf16 %v3170_v51, %v3169_v53  ;;  %v2816_v58 = vld [vmem:[#allocation2 + $0x6b] sm:$0xff] }
 0x1f9   : > { %v1699_v62 = vpop.f32.mrf.mxu1  ;;  %v6765_v16 = vpop.f32.mrf.mxu0  ;;  %v3184_v53 = vld [vmem:[#allocation2 + $0xdc] sm:$0xff] }
 0x1fa   : > { %v6757_v4 = vadd.f32 %v1954_v57, %v1699_v62  ;;  %v6824_v57 = vpack.c.bf16 %v3172_v45, %v3171_v56  ;;  %v2815_v62 = vld [vmem:[#allocation2 + $0x63] sm:$0xff] }
 0x1fb   : > { %v5512_v8 = vpop.f32.mrf.mxu1  ;;  %5674 = vmatmul.mubr.msk.bf16.gmra.mxu0 %vm1420_vm0, %v2504_v63  ;;  %v2846_v2 = vpack.c.bf16 %v2816_v58, %v2815_v62  ;;  %v3181_v58 = vld [vmem:[#allocation2 + $0xc4] sm:$0xff]  ;;  %v3183_v62 = vld [vmem:[#allocation2 + $0xd4] sm:$0xff] }
 0x1fc   : > { %v6760_v10 = vadd.f32 %v5556_v7, %v5512_v8  ;;  %5729 = vmatprep.mubr.msk.bf16.mxu0 %vm1420_vm0, %v3195_v5  ;;  %v2817_v5 = vld [vmem:[#allocation2 + $0x73] sm:$0xff] }
 0x1fd   : > { %v6779_v25 = vpop.f32.mrf.mxu1  ;;  %v2847_v7 = vpack.c.bf16 %v2818_v61, %v2817_v5  ;;  %v3174_v8 = vld [vmem:[#allocation2 + $0x8c] sm:$0xff]  ;;  %v6872_v5 = vpack.c.bf16 %v3184_v53, %v3183_v62  ;;  %v3191_v62 = vld [vmem:[#allocation2 + $0x114] sm:$0xff] }
 0x1fe   : > { %v6838_v18 = vpack.c.bf16 %v3174_v8, %v3173_v14  ;;  %v2827_v14 = vld [vmem:[#allocation2 + $0xc3] sm:$0xff] }
 0x1ff   : > { %5630 = vmatmul.mubr.msk.bf16.gmra.mxu1 %vm1420_vm0, %v2503_v54 }
 0x200   : > { %5685 = vmatprep.mubr.msk.bf16.mxu1 %vm1420_vm0, %v2841_v13  ;;  %v3176_v13 = vld [vmem:[#allocation2 + $0x9c] sm:$0xff] }
 0x203   : > { %v5559_v22 = vpop.f32.mrf.mxu0  ;;  %5730 = vmatmul.mubr.msk.bf16.vlgmr.msra.gmra.mxu0 %vm1420_vm0, %v6767_v17 }
 0x204   : > { %5733 = vmatprep.mubr.msk.bf16.mxu0 %vm1420_vm0, %v6772_v6  ;;  %5810 = vmatpush3.bf16.msra.mxu0 %v6720_v21  ;;  %v3168_v21 = vld [vmem:[#allocation2 + $0x5c] sm:$0xff] }
 0x205   : > { %5811 = vmatprep.subr.bf16.mxu0 %v6029_v19  ;;  %v1970_v3 = vpop.f32.mrf.mxu0  ;;  %v6799_v41 = vpack.c.bf16 %v3168_v21, %v3167_v37  ;;  %v3180_v21 = vld [vmem:[#allocation2 + $0xbc] sm:$0xff] }
 0x207   : > { %v5515_v33 = vpop.f32.mrf.mxu1  ;;  %5686 = vmatmul.mubr.msk.bf16.vlgmr.msra.gmra.mxu1 %vm1420_vm0, %v2842_v27  ;;  %v5560_v43 = vpop.f32.mrf.mxu0 }
 0x208   : > { %v6788_v34 = vadd.f32 %v5559_v22, %v5515_v33  ;;  %5766 = vmatpush3.bf16.msra.mxu1 %v6727_v26  ;;  %5689 = vmatprep.mubr.msk.bf16.mxu1 %vm1420_vm0, %v2843_v30  ;;  %v6031_v26 = vld [vmem:[%s7485_s2 + $0xe0] sm:$0xff]   ;;  %v3178_v33 = vld [vmem:[#allocation2 + $0xac] sm:$0xff] }
 0x209   : > { %v1715_v12 = vpop.f32.mrf.mxu1  ;;  %5767 = vmatprep.subr.bf16.mxu1 %v6025_v29  ;;  %5812 = vmatpush3.bf16.msra.mxu0 %v6029_v19  ;;  %v6820_v54 = vpop.f32.mrf.mxu0  ;;  %v3175_v19 = vld [vmem:[#allocation2 + $0x94] sm:$0xff]  ;;  %v2819_v30 = vld [vmem:[#allocation2 + $0x83] sm:$0xff]  ;;  %v6854_v37 = vpack.c.bf16 %v3178_v33, %v3177_v35  ;;  %v2832_v33 = vld [vmem:[#allocation2 + $0xeb] sm:$0xff] }
 0x20a   : > { %v6797_v40 = vadd.f32 %v1970_v3, %v1715_v12  ;;  %5813 = vmatprep.subr.bf16.mxu0 %v6030_v32  ;;  %v6842_v22 = vpack.c.bf16 %v3176_v13, %v3175_v19  ;;  %v2848_v31 = vpack.c.bf16 %v2820_v23, %v2819_v30  ;;  %v2829_v19 = vld [vmem:[#allocation2 + $0xd3] sm:$0xff]  ;;  %v2834_v35 = vld [vmem:[#allocation2 + $0xfb] sm:$0xff] }
 0x20b   : > { %v5516_v1 = vpop.f32.mrf.mxu1  ;;  %5734 = vmatmul.mubr.msk.bf16.gmra.mxu0 %vm1420_vm0, %v6792_v36 }
 0x20c   : > { %v6806_v0 = vadd.f32 %v5560_v43, %v5516_v1  ;;  %5737 = vmatprep.mubr.msk.bf16.mxu0 %vm1420_vm0, %v6799_v41  ;;  %5768 = vmatpush3.bf16.msra.mxu1 %v6025_v29  ;;  %v2826_v1 = vld [vmem:[#allocation2 + $0xbb] sm:$0xff] }
 0x20d   : > { %5769 = vmatprep.subr.bf16.mxu1 %v6026_v38  ;;  %5814 = vmatpush3.bf16.msra.mxu0 %v6030_v32  ;;  %v6831_v63 = vpop.f32.mrf.mxu1  ;;  %v2821_v32 = vld [vmem:[#allocation2 + $0x93] sm:$0xff] }
 0x20e   : > { %5815 = vmatprep.subr.bf16.mxu0 %v6031_v26  ;;  %v2849_v3 = vpack.c.bf16 %v2822_v28, %v2821_v32  ;;  %v3185_v28 = vld [vmem:[#allocation2 + $0xe4] sm:$0xff]  ;;  %v3187_v32 = vld [vmem:[#allocation2 + $0xf4] sm:$0xff] }
 0x20f   : > { %5690 = vmatmul.mubr.msk.bf16.gmra.mxu1 %vm1420_vm0, %v2844_v47 }
 0x210   : > { %5693 = vmatprep.mubr.msk.bf16.mxu1 %vm1420_vm0, %v2845_v50  ;;  %5770 = vmatpush3.bf16.msra.mxu1 %v6026_v38  ;;  %v3179_v38 = vld [vmem:[#allocation2 + $0xb4] sm:$0xff]  ;;  %v3182_v50 = vld [vmem:[#allocation2 + $0xcc] sm:$0xff] }
 0x211   : > { %5771 = vmatprep.subr.bf16.mxu1 %v6028_v49  ;;  %5816 = vmatpush3.bf16.msra.mxu0 %v6031_v26  ;;  %v6856_v42 = vpack.c.bf16 %v3180_v21, %v3179_v38  ;;  %v2824_v26 = vld [vmem:[#allocation2 + $0xab] sm:$0xff]  ;;  %v6868_v61 = vpack.c.bf16 %v3182_v50, %v3181_v58  ;;  %v2831_v38 = vld [vmem:[#allocation2 + $0xe3] sm:$0xff] }
 0x212   : > { %5853 = vmatprep.subr.bf16.mxu0 %v6816_v52  ;;  %v2850_v47 = vpack.c.bf16 %v2824_v26, %v2823_v44  ;;  %v2833_v44 = vld [vmem:[#allocation2 + $0xf3] sm:$0xff]  ;;  %v3192_v50 = vld [vmem:[#allocation2 + $0x11c] sm:$0xff] }
 0x213   : > { %v5563_v59 = vpop.f32.mrf.mxu0  ;;  %5738 = vmatmul.mubr.msk.bf16.gmra.mxu0 %vm1420_vm0, %v6822_v55 }
 0x214   : > { %5741 = vmatprep.mubr.msk.bf16.mxu0 %vm1420_vm0, %v6824_v57  ;;  %5772 = vmatpush3.bf16.msra.mxu1 %v6028_v49  ;;  %v2851_v49 = vpack.c.bf16 %v2826_v1, %v2825_v48  ;;  %v2854_v1 = vpack.c.bf16 %v2832_v33, %v2831_v38  ;;  %v3190_v48 = vld [vmem:[#allocation2 + $0x10c] sm:$0xff]  ;;  %v3193_v38 = vld [vmem:[#allocation2 + $0x124] sm:$0xff] }
 0x215   : > { %5897 = vmatprep.subr.bf16.mxu1 %v6816_v52  ;;  %v1986_v9 = vpop.f32.mrf.mxu0 }
 0x217   : > { %v5519_v11 = vpop.f32.mrf.mxu1  ;;  %5694 = vmatmul.mubr.msk.bf16.gmra.mxu1 %vm1420_vm0, %v2846_v2  ;;  %v5564_v24 = vpop.f32.mrf.mxu0 }
 0x218   : > { %v6835_v39 = vadd.f32 %v5563_v59, %v5519_v11  ;;  %5697 = vmatprep.mubr.msk.bf16.mxu1 %vm1420_vm0, %v2847_v7  ;;  %v2828_v7 = vld [vmem:[#allocation2 + $0xcb] sm:$0xff]  ;;  %v2830_v11 = vld [vmem:[#allocation2 + $0xdb] sm:$0xff] }
 0x219   : > { %v1731_v15 = vpop.f32.mrf.mxu1  ;;  %v6852_v12 = vpop.f32.mrf.mxu0  ;;  %v2853_v23 = vpack.c.bf16 %v2830_v11, %v2829_v19  ;;  %v2835_v19 = vld [vmem:[#allocation2 + $0x103] sm:$0xff] }
 0x21a   : > { %v6840_v20 = vadd.f32 %v1986_v9, %v1731_v15  ;;  %v2852_v15 = vpack.c.bf16 %v2828_v7, %v2827_v14  ;;  %v2838_v14 = vld [vmem:[#allocation2 + $0x11b] sm:$0xff] }
 0x21b   : > { %v5520_v27 = vpop.f32.mrf.mxu1  ;;  %5742 = vmatmul.mubr.msk.bf16.gmra.mxu0 %vm1420_vm0, %v6838_v18 }
 0x21c   : > { %v6846_v29 = vadd.f32 %v5564_v24, %v5520_v27  ;;  %5745 = vmatprep.mubr.msk.bf16.mxu0 %vm1420_vm0, %v6842_v22  ;;  %v3186_v24 = vld [vmem:[#allocation2 + $0xec] sm:$0xff]  ;;  %v3188_v27 = vld [vmem:[#allocation2 + $0xfc] sm:$0xff] }
 0x21d   : > { %v6862_v46 = vpop.f32.mrf.mxu1 }
 0x21f   : > { %5698 = vmatmul.mubr.msk.bf16.gmra.mxu1 %vm1420_vm0, %v2848_v31  ;;  %v6884_v31 = vpack.c.bf16 %v3186_v24, %v3185_v28  ;;  %v2837_v28 = vld [vmem:[#allocation2 + $0x113] sm:$0xff] }
 0x220   : > { %5701 = vmatprep.mubr.msk.bf16.mxu1 %vm1420_vm0, %v2849_v3  ;;  %v6886_v3 = vpack.c.bf16 %v3188_v27, %v3187_v32  ;;  %v2857_v33 = vpack.c.bf16 %v2838_v14, %v2837_v28 }
 0x223   : > { %v5567_v43 = vpop.f32.mrf.mxu0  ;;  %5746 = vmatmul.mubr.msk.bf16.gmra.mxu0 %vm1420_vm0, %v6854_v37 }
 0x224   : > { %5749 = vmatprep.mubr.msk.bf16.mxu0 %vm1420_vm0, %v6856_v42 }
 0x225   : > { %v2002_v51 = vpop.f32.mrf.mxu0 }
 0x227   : > { %v5523_v45 = vpop.f32.mrf.mxu1  ;;  %5702 = vmatmul.mubr.msk.bf16.gmra.mxu1 %vm1420_vm0, %v2850_v47  ;;  %v5568_v8 = vpop.f32.mrf.mxu0  ;;  %v2855_v47 = vpack.c.bf16 %v2834_v35, %v2833_v44  ;;  %v3868_v35 = vld [vmem:[#allocation2 + $0x2d] sm:$0xff] }
 0x228   : > { %v6865_v56 = vadd.f32 %v5567_v43, %v5523_v45  ;;  %5705 = vmatprep.mubr.msk.bf16.mxu1 %vm1420_vm0, %v2851_v49  ;;  %v3189_v45 = vld [vmem:[#allocation2 + $0x104] sm:$0xff] }
 0x229   : > { %v1747_v59 = vpop.f32.mrf.mxu1  ;;  %v6882_v30 = vpop.f32.mrf.mxu0 }
 0x22a   : > { %v6870_v2 = vadd.f32 %v2002_v51, %v1747_v59  ;;  %v6898_v59 = vpack.c.bf16 %v3190_v48, %v3189_v45 }
 0x22b   : > { %v5524_v9 = vpop.f32.mrf.mxu1  ;;  %5750 = vmatmul.mubr.msk.bf16.gmra.mxu0 %vm1420_vm0, %v6868_v61 }
 0x22c   : > { %v6876_v13 = vadd.f32 %v5568_v8, %v5524_v9  ;;  %5753 = vmatprep.mubr.msk.bf16.mxu0 %vm1420_vm0, %v6872_v5  ;;  %v6902_v8 = vpack.c.bf16 %v3192_v50, %v3191_v62  ;;  %v2836_v9 = vld [vmem:[#allocation2 + $0x10b] sm:$0xff] }
 0x22d   : > { %v6892_v26 = vpop.f32.mrf.mxu1  ;;  %v2856_v27 = vpack.c.bf16 %v2836_v9, %v2835_v19  ;;  %v3872_v62 = vld [vmem:[#allocation2 + $0x4d] sm:$0xff] }
 0x22f   : > { %5706 = vmatmul.mubr.msk.bf16.gmra.mxu1 %vm1420_vm0, %v2852_v15 }
 0x230   : > { %5709 = vmatprep.mubr.msk.bf16.mxu1 %vm1420_vm0, %v2853_v23 }
 0x233   : > { %v5571_v21 = vpop.f32.mrf.mxu0  ;;  %5754 = vmatmul.mubr.msk.bf16.gmra.mxu0 %vm1420_vm0, %v6884_v31 }
 0x234   : > { %5757 = vmatprep.mubr.msk.bf16.mxu0 %vm1420_vm0, %v6886_v3 }
 0x235   : > { %v2018_v43 = vpop.f32.mrf.mxu0 }
 0x237   : > { %v5527_v49 = vpop.f32.mrf.mxu1  ;;  %5710 = vmatmul.mubr.msk.bf16.gmra.mxu1 %vm1420_vm0, %v2854_v1  ;;  %v5572_v53 = vpop.f32.mrf.mxu0  ;;  %v3867_v1 = vld [vmem:[#allocation2 + $0x25] sm:$0xff] }
 0x238   : > { %v6895_v51 = vadd.f32 %v5571_v21, %v5527_v49  ;;  %5713 = vmatprep.mubr.msk.bf16.mxu1 %vm1420_vm0, %v2855_v47  ;;  %v3194_v21 = vld [vmem:[#allocation2 + $0x12c] sm:$0xff]  ;;  %v3903_v44 = vpack.c.bf16 %v3868_v35, %v3867_v1  ;;  %v2839_v49 = vld [vmem:[#allocation2 + $0x123] sm:$0xff] }
 0x239   : > { %v1763_v58 = vpop.f32.mrf.mxu1  ;;  %v2021_v23 = vpop.f32.mrf.mxu0  ;;  %v2840_v47 = vld [vmem:[#allocation2 + $0x12b] sm:$0xff] }
 0x23a   : > { %v6900_v7 = vadd.f32 %v2018_v43, %v1763_v58  ;;  %v6914_v43 = vpack.c.bf16 %v3194_v21, %v3193_v38  ;;  %v2858_v45 = vpack.c.bf16 %v2840_v47, %v2839_v49  ;;  %v6034_v47 = vld [vmem:[%s7485_s2 + $0x108] sm:$0xff]   ;;  %v3873_v49 = vld [vmem:[#allocation2 + $0x55] sm:$0xff] }
 0x23b   : > { %v5528_v11 = vpop.f32.mrf.mxu1  ;;  %5758 = vmatmul.mubr.msk.bf16.gmra.mxu0 %vm1420_vm0, %v6898_v59 }
 0x23c   : > { %v6906_v15 = vadd.f32 %v5572_v53, %v5528_v11  ;;  %5761 = vmatprep.mubr.msk.bf16.mxu0 %vm1420_vm0, %v6902_v8  ;;  %v3870_v53 = vld [vmem:[#allocation2 + $0x3d] sm:$0xff]  ;;  %v3869_v11 = vld [vmem:[#allocation2 + $0x35] sm:$0xff] }
 0x23d   : > { %v1766_v24 = vpop.f32.mrf.mxu1 }
 0x23e   : > { %v6910_v32 = vadd.f32 %v2021_v23, %v1766_v24  ;;  %v3904_v23 = vpack.c.bf16 %v3870_v53, %v3869_v11  ;;  %v3871_v24 = vld [vmem:[#allocation2 + $0x45] sm:$0xff]  ;;  %v3880_v11 = vld [vmem:[#allocation2 + $0x8d] sm:$0xff] }
 0x23f   : > { %5714 = vmatmul.mubr.msk.bf16.gmra.mxu1 %vm1420_vm0, %v2856_v27  ;;  %v6033_v27 = vld [vmem:[%s7485_s2 + $0x110] sm:$0xff]  }
 0x240   : > { %5717 = vmatprep.mubr.msk.bf16.mxu1 %vm1420_vm0, %v2857_v33  ;;  %v3905_v33 = vpack.c.bf16 %v3872_v62, %v3871_v24 }
 0x243   : > { %v5575_v48 = vpop.f32.mrf.mxu0  ;;  %5762 = vmatmul.mubr.msk.bf16.gmra.mxu0 %vm1420_vm0, %v6914_v43 }
 0x244   : > { %5817 = vmatprep.mubr.msk.bf16.mxu0 %vm1420_vm0, %v3903_v44  ;;  %v3874_v44 = vld [vmem:[#allocation2 + $0x5d] sm:$0xff] }
 0x245   : > { %v2034_v50 = vpop.f32.mrf.mxu0 }
 0x247   : > { %v5531_v58 = vpop.f32.mrf.mxu1  ;;  %5718 = vmatmul.mubr.msk.bf16.gmra.mxu1 %vm1420_vm0, %v2858_v45  ;;  %v5576_v14 = vpop.f32.mrf.mxu0  ;;  %v3875_v45 = vld [vmem:[#allocation2 + $0x65] sm:$0xff] }
 0x248   : > { %v6920_v9 = vadd.f32 %v5575_v48, %v5531_v58  ;;  %5773 = vmatprep.mubr.msk.bf16.mxu1 %vm1420_vm0, %v6767_v17  ;;  %v3876_v48 = vld [vmem:[#allocation2 + $0x6d] sm:$0xff]  ;;  %v6035_v58 = vld [vmem:[%s7485_s2 + $0x100] sm:$0xff]  }
 0x249   : > { %v1779_v19 = vpop.f32.mrf.mxu1  ;;  %v2037_v17 = vpop.f32.mrf.mxu0  ;;  %v3907_v53 = vpack.c.bf16 %v3876_v48, %v3875_v45  ;;  %v3882_v48 = vld [vmem:[#allocation2 + $0x9d] sm:$0xff] }
 0x24a   : > { %v6927_v28 = vadd.f32 %v2034_v50, %v1779_v19  ;;  %v3906_v50 = vpack.c.bf16 %v3874_v44, %v3873_v49  ;;  %v3877_v19 = vld [vmem:[#allocation2 + $0x75] sm:$0xff]  ;;  %v3884_v49 = vld [vmem:[#allocation2 + $0xad] sm:$0xff] }
 0x24b   : > { %v5532_v21 = vpop.f32.mrf.mxu1  ;;  %5818 = vmatmul.mubr.msk.bf16.vlgmr.msra.gmra.mxu0 %vm1420_vm0, %v3904_v23 }
 0x24c   : > { %v6930_v35 = vadd.f32 %v5576_v14, %v5532_v21  ;;  %5821 = vmatprep.mubr.msk.bf16.mxu0 %vm1420_vm0, %v3905_v33  ;;  %5854 = vmatpush3.bf16.msra.mxu0 %v6816_v52  ;;  %v3879_v33 = vld [vmem:[#allocation2 + $0x85] sm:$0xff] }
 0x24d   : > { %v1782_v38 = vpop.f32.mrf.mxu1  ;;  %5855 = vmatprep.subr.bf16.mxu0 %v6033_v27 }
 0x24e   : > { %v6934_v1 = vadd.f32 %v2037_v17, %v1782_v38  ;;  %v3909_v17 = vpack.c.bf16 %v3880_v11, %v3879_v33 }
 0x24f   : > { %5774 = vmatmul.mubr.msk.bf16.vlgmr.msra.gmra.mxu1 %vm1420_vm0, %v6772_v6 }
 0x250   : > { %5901 = vmatpush3.bf16.msra.mxu1 %v6816_v52  ;;  %5777 = vmatprep.mubr.msk.bf16.mxu1 %vm1420_vm0, %v6792_v36  ;;  %v3878_v36 = vld [vmem:[#allocation2 + $0x7d] sm:$0xff] }
 0x251   : > { %5898 = vmatprep.subr.bf16.mxu1 %v6033_v27  ;;  %5856 = vmatpush3.bf16.msra.mxu0 %v6033_v27 }
 0x252   : > { %5857 = vmatprep.subr.bf16.mxu0 %v6034_v47 }
 0x253   : > { %v5579_v62 = vpop.f32.mrf.mxu0  ;;  %5822 = vmatmul.mubr.msk.bf16.gmra.mxu0 %vm1420_vm0, %v3906_v50  ;;  %v3881_v50 = vld [vmem:[#allocation2 + $0x95] sm:$0xff] }
 0x254   : > { %5825 = vmatprep.mubr.msk.bf16.mxu0 %vm1420_vm0, %v3907_v53  ;;  %5902 = vmatpush3.bf16.msra.mxu1 %v6033_v27  ;;  %v3908_v27 = vpack.c.bf16 %v3878_v36, %v3877_v19  ;;  %v3910_v45 = vpack.c.bf16 %v3882_v48, %v3881_v50  ;;  %v3883_v53 = vld [vmem:[#allocation2 + $0xa5] sm:$0xff]  ;;  %v3886_v36 = vld [vmem:[#allocation2 + $0xbd] sm:$0xff]  ;;  %v3889_v50 = vld [vmem:[#allocation2 + $0xd5] sm:$0xff] }
 0x255   : > { %v2050_v6 = vpop.f32.mrf.mxu0  ;;  %5899 = vmatprep.subr.bf16.mxu1 %v6034_v47  ;;  %5858 = vmatpush3.bf16.msra.mxu0 %v6034_v47 }
 0x256   : > { %5859 = vmatprep.subr.bf16.mxu0 %v6035_v58 }
 0x257   : > { %v5535_v52 = vpop.f32.mrf.mxu1  ;;  %5778 = vmatmul.mubr.msk.bf16.gmra.mxu1 %vm1420_vm0, %v6799_v41  ;;  %v5580_v23 = vpop.f32.mrf.mxu0 }
 0x258   : > { %v6951_v14 = vadd.f32 %v5579_v62, %v5535_v52  ;;  %5781 = vmatprep.mubr.msk.bf16.mxu1 %vm1420_vm0, %v6822_v55  ;;  %5903 = vmatpush3.bf16.msra.mxu1 %v6034_v47  ;;  %v3911_v62 = vpack.c.bf16 %v3884_v49, %v3883_v53  ;;  %v3892_v49 = vld [vmem:[#allocation2 + $0xed] sm:$0xff]  ;;  %v3891_v53 = vld [vmem:[#allocation2 + $0xe5] sm:$0xff] }
 0x259   : > { %v1795_v24 = vpop.f32.mrf.mxu1  ;;  %5900 = vmatprep.subr.bf16.mxu1 %v6035_v58  ;;  %5860 = vmatpush3.bf16.msra.mxu0 %v6035_v58  ;;  %v2053_v55 = vpop.f32.mrf.mxu0 }
 0x25a   : > { %v6955_v21 = vadd.f32 %v2050_v6, %v1795_v24 }
 0x25b   : > { %v5536_v38 = vpop.f32.mrf.mxu1  ;;  %5826 = vmatmul.mubr.msk.bf16.gmra.mxu0 %vm1420_vm0, %v3908_v27  ;;  %v3887_v27 = vld [vmem:[#allocation2 + $0xc5] sm:$0xff] }
 0x25c   : > { %v6958_v41 = vadd.f32 %v5580_v23, %v5536_v38  ;;  %5829 = vmatprep.mubr.msk.bf16.mxu0 %vm1420_vm0, %v3909_v17  ;;  %5904 = vmatpush3.bf16.msra.mxu1 %v6035_v58 }
 0x25d   : > { %v1798_v44 = vpop.f32.mrf.mxu1 }
 0x25e   : > { %v6961_v47 = vadd.f32 %v2053_v55, %v1798_v44 }
 0x25f   : > { %5782 = vmatmul.mubr.msk.bf16.gmra.mxu1 %vm1420_vm0, %v6824_v57  ;;  %v3888_v57 = vld [vmem:[#allocation2 + $0xcd] sm:$0xff] }
 0x260   : > { %5785 = vmatprep.mubr.msk.bf16.mxu1 %vm1420_vm0, %v6838_v18  ;;  %v3885_v18 = vld [vmem:[#allocation2 + $0xb5] sm:$0xff]  ;;  %v3913_v17 = vpack.c.bf16 %v3888_v57, %v3887_v27  ;;  %v3895_v27 = vld [vmem:[#allocation2 + $0x105] sm:$0xff] }
 0x261   : > { %v3912_v24 = vpack.c.bf16 %v3886_v36, %v3885_v18  ;;  %v3894_v36 = vld [vmem:[#allocation2 + $0xfd] sm:$0xff] }
 0x263   : > { %v5583_v6 = vpop.f32.mrf.mxu0  ;;  %5830 = vmatmul.mubr.msk.bf16.gmra.mxu0 %vm1420_vm0, %v3910_v45 }
 0x264   : > { %5833 = vmatprep.mubr.msk.bf16.mxu0 %vm1420_vm0, %v3911_v62  ;;  %v3915_v62 = vpack.c.bf16 %v3892_v49, %v3891_v53 }
 0x265   : > { %v2066_v58 = vpop.f32.mrf.mxu0 }
 0x267   : > { %v5539_v52 = vpop.f32.mrf.mxu1  ;;  %5786 = vmatmul.mubr.msk.bf16.gmra.mxu1 %vm1420_vm0, %v6842_v22  ;;  %v5584_v19 = vpop.f32.mrf.mxu0 }
 0x268   : > { %v6971_v11 = vadd.f32 %v5583_v6, %v5539_v52  ;;  %5789 = vmatprep.mubr.msk.bf16.mxu1 %vm1420_vm0, %v6854_v37  ;;  %v3890_v37 = vld [vmem:[#allocation2 + $0xdd] sm:$0xff] }
 0x269   : > { %v1811_v23 = vpop.f32.mrf.mxu1  ;;  %v2069_v22 = vpop.f32.mrf.mxu0  ;;  %v3914_v45 = vpack.c.bf16 %v3890_v37, %v3889_v50 }
 0x26a   : > { %v6975_v33 = vadd.f32 %v2066_v58, %v1811_v23 }
 0x26b   : > { %v5540_v38 = vpop.f32.mrf.mxu1  ;;  %5834 = vmatmul.mubr.msk.bf16.gmra.mxu0 %vm1420_vm0, %v3912_v24 }
 0x26c   : > { %v6978_v55 = vadd.f32 %v5584_v19, %v5540_v38  ;;  %5837 = vmatprep.mubr.msk.bf16.mxu0 %vm1420_vm0, %v3913_v17 }
 0x26d   : > { %v1814_v44 = vpop.f32.mrf.mxu1 }
 0x26e   : > { %v6981_v48 = vadd.f32 %v2069_v22, %v1814_v44 }
 0x26f   : > { %5790 = vmatmul.mubr.msk.bf16.gmra.mxu1 %vm1420_vm0, %v6856_v42  ;;  %v3896_v42 = vld [vmem:[#allocation2 + $0x10d] sm:$0xff] }
 0x270   : > { %5793 = vmatprep.mubr.msk.bf16.mxu1 %vm1420_vm0, %v6868_v61  ;;  %v3893_v61 = vld [vmem:[#allocation2 + $0xf5] sm:$0xff]  ;;  %v3917_v38 = vpack.c.bf16 %v3896_v42, %v3895_v27  ;;  %v3899_v42 = vld [vmem:[#allocation2 + $0x125] sm:$0xff] }
 0x271   : > { %v3916_v24 = vpack.c.bf16 %v3894_v36, %v3893_v61 }
 0x273   : > { %v5587_v6 = vpop.f32.mrf.mxu0  ;;  %5838 = vmatmul.mubr.msk.bf16.gmra.mxu0 %vm1420_vm0, %v3914_v45 }
 0x274   : > { %5841 = vmatprep.mubr.msk.bf16.mxu0 %vm1420_vm0, %v3915_v62  ;;  %v3900_v62 = vld [vmem:[#allocation2 + $0x12d] sm:$0xff] }
 0x275   : > { %v2082_v58 = vpop.f32.mrf.mxu0 }
 0x277   : > { %v5543_v52 = vpop.f32.mrf.mxu1  ;;  %v5588_v57 = vpop.f32.mrf.mxu0  ;;  %5794 = vmatmul.mubr.msk.bf16.gmra.mxu1 %vm1420_vm0, %v6872_v5 }
 0x278   : > { %v6991_v18 = vadd.f32 %v5587_v6, %v5543_v52  ;;  %5797 = vmatprep.mubr.msk.bf16.mxu1 %vm1420_vm0, %v6884_v31  ;;  %v3898_v31 = vld [vmem:[#allocation2 + $0x11d] sm:$0xff] }
 0x279   : > { %v1827_v19 = vpop.f32.mrf.mxu1  ;;  %v2085_v23 = vpop.f32.mrf.mxu0 }
 0x27a   : > { %v6995_v17 = vadd.f32 %v2082_v58, %v1827_v19  ;;  %v3897_v58 = vld [vmem:[#allocation2 + $0x115] sm:$0xff]  ;;  %v3919_v19 = vpack.c.bf16 %v3900_v62, %v3899_v42 }
 0x27b   : > { %v5544_v22 = vpop.f32.mrf.mxu1  ;;  %v5643_v44 = vpop.f32.mrf.mxu0  ;;  %5842 = vmatmul.mubr.msk.bf16.gmra.mxu0 %vm1420_vm0, %v3916_v24  ;;  %v3547_v42 = vld [vmem:[#allocation2 + $0x134] sm:$0xff] }
 0x27c   : > { %v6998_v37 = vadd.f32 %v5588_v57, %v5544_v22  ;;  %5845 = vmatprep.mubr.msk.bf16.mxu0 %vm1420_vm0, %v3917_v38  ;;  %v3918_v57 = vpack.c.bf16 %v3898_v31, %v3897_v58  ;;  %v3902_v31 = vld [vmem:[#allocation2 + $0x13d] sm:$0xff] }
 0x27d   : > { %v1830_v5 = vpop.f32.mrf.mxu1  ;;  %v2626_v49 = vpop.f32.mrf.mxu0 }
 0x27e   : > { %v7001_v50 = vadd.f32 %v2085_v23, %v1830_v5 }
 0x27f   : > { %v5599_v45 = vpop.f32.mrf.mxu1  ;;  %v5644_v53 = vpop.f32.mrf.mxu0  ;;  %5798 = vmatmul.mubr.msk.bf16.gmra.mxu1 %vm1420_vm0, %v6886_v3 }
 0x280   : > { %v2417_v6 = vadd.f32 %v5599_v45, %v6754_v60  ;;  %5801 = vmatprep.mubr.msk.bf16.mxu1 %vm1420_vm0, %v6898_v59  ;;  %v1958_v60 = vadd.f32 %v6765_v16, %v6779_v25 }
 0x281   : > { %v2272_v36 = vpop.f32.mrf.mxu1  ;;  %v2629_v52 = vpop.f32.mrf.mxu0 }
 0x282   : > { %v2415_v61 = vadd.f32 %v2272_v36, %v6757_v4  ;;  %v7009_v23 = vadd.f32 %v5643_v44, %v2417_v6  ;;  %v3901_v4 = vld [vmem:[#allocation2 + $0x135] sm:$0xff]  ;;  %v4221_v36 = vld [vmem:[#allocation2 + $0x26] sm:$0xff] }
 0x283   : > { %v5600_v24 = vpop.f32.mrf.mxu1  ;;  %v5647_v27 = vpop.f32.mrf.mxu0  ;;  %5846 = vmatmul.mubr.msk.bf16.gmra.mxu0 %vm1420_vm0, %v3918_v57  ;;  %v4222_v6 = vld [vmem:[#allocation2 + $0x2e] sm:$0xff]  ;;  %v3920_v58 = vpack.c.bf16 %v3902_v31, %v3901_v4  ;;  %v4224_v31 = vld [vmem:[#allocation2 + $0x3e] sm:$0xff] }
 0x284   : > { %v2418_v3 = vadd.f32 %v5600_v24, %v6760_v10  ;;  %5849 = vmatprep.mubr.msk.bf16.mxu0 %vm1420_vm0, %v3919_v19  ;;  %v7016_v59 = vadd.f32 %v2626_v49, %v2415_v61  ;;  %v4257_v57 = vpack.c.bf16 %v4222_v6, %v4221_v36  ;;  %v3548_v61 = vld [vmem:[#allocation2 + $0x13c] sm:$0xff] }
 0x285   : > { %v2275_v38 = vpop.f32.mrf.mxu1  ;;  %v2642_v22 = vpop.f32.mrf.mxu0 }
 0x286   : > { %v2416_v5 = vadd.f32 %v2275_v38, %v1958_v60  ;;  %v7018_v44 = vadd.f32 %v5644_v53, %v2418_v3  ;;  %v3566_v38 = vpack.c.bf16 %v3548_v61, %v3547_v42  ;;  %v4230_v61 = vld [vmem:[#allocation2 + $0x6e] sm:$0xff] }
 0x287   : > { %v5603_v45 = vpop.f32.mrf.mxu1  ;;  %v5648_v62 = vpop.f32.mrf.mxu0  ;;  %5802 = vmatmul.mubr.msk.bf16.gmra.mxu1 %vm1420_vm0, %v6902_v8 }
 0x288   : > { %v2421_v16 = vadd.f32 %v5603_v45, %v6788_v34  ;;  %5805 = vmatprep.mubr.msk.bf16.mxu1 %vm1420_vm0, %v6914_v43  ;;  %v7025_v10 = vadd.f32 %v2629_v52, %v2416_v5  ;;  %v4226_v34 = vld [vmem:[#allocation2 + $0x4e] sm:$0xff]  ;;  %v1974_v43 = vadd.f32 %v6820_v54, %v6831_v63  ;;  %v4225_v5 = vld [vmem:[#allocation2 + $0x46] sm:$0xff] }
 0x289   : > { %v2288_v25 = vpop.f32.mrf.mxu1  ;;  %v2645_v49 = vpop.f32.mrf.mxu0  ;;  %v4259_v4 = vpack.c.bf16 %v4226_v34, %v4225_v5 }
 0x28a   : > { %v2419_v53 = vadd.f32 %v2288_v25, %v6797_v40  ;;  %v7028_v19 = vadd.f32 %v5647_v27, %v2421_v16 }
 0x28b   : > { %v5604_v8 = vpop.f32.mrf.mxu1  ;;  %v5651_v24 = vpop.f32.mrf.mxu0  ;;  %5850 = vmatmul.mubr.msk.bf16.gmra.mxu0 %vm1420_vm0, %v3920_v58 }
 0x28c   : > { %v2422_v52 = vadd.f32 %v5604_v8, %v6806_v0  ;;  %5861 = vmatprep.mubr.msk.bf16.mxu0 %vm1420_vm0, %v4257_v57  ;;  %v7035_v60 = vadd.f32 %v2642_v22, %v2419_v53  ;;  %v4223_v0 = vld [vmem:[#allocation2 + $0x36] sm:$0xff]  ;;  %v4228_v53 = vld [vmem:[#allocation2 + $0x5e] sm:$0xff] }
 0x28d   : > { %v2291_v40 = vpop.f32.mrf.mxu1  ;;  %v2658_v3 = vpop.f32.mrf.mxu0  ;;  %v4258_v58 = vpack.c.bf16 %v4224_v31, %v4223_v0 }
 0x28e   : > { %v2420_v27 = vadd.f32 %v2291_v40, %v1974_v43  ;;  %v7037_v45 = vadd.f32 %v5648_v62, %v2422_v52 }
 0x28f   : > { %v5607_v6 = vpop.f32.mrf.mxu1  ;;  %v5652_v16 = vpop.f32.mrf.mxu0  ;;  %5806 = vmatmul.mubr.msk.bf16.gmra.mxu1 %vm1420_vm0, %v3566_v38 }
 0x290   : > { %v2425_v54 = vadd.f32 %v5607_v6, %v6835_v39  ;;  %5865 = vmatprep.mubr.msk.bf16.mxu1 %vm1420_vm0, %v4259_v4  ;;  %v7042_v63 = vadd.f32 %v2645_v49, %v2420_v27  ;;  %v1990_v39 = vadd.f32 %v6852_v12, %v6862_v46  ;;  %v4227_v49 = vld [vmem:[#allocation2 + $0x56] sm:$0xff]  ;;  %v4232_v6 = vld [vmem:[#allocation2 + $0x7e] sm:$0xff] }
 0x291   : > { %v2304_v22 = vpop.f32.mrf.mxu1  ;;  %v2661_v25 = vpop.f32.mrf.mxu0  ;;  %v4260_v40 = vpack.c.bf16 %v4228_v53, %v4227_v49 }
 0x292   : > { %v2423_v36 = vadd.f32 %v2304_v22, %v6840_v20  ;;  %v7045_v57 = vadd.f32 %v5651_v24, %v2425_v54  ;;  %v4229_v20 = vld [vmem:[#allocation2 + $0x66] sm:$0xff]  ;;  %v4234_v22 = vld [vmem:[#allocation2 + $0x8e] sm:$0xff] }
 0x293   : > { %v5608_v62 = vpop.f32.mrf.mxu1  ;;  %v5655_v42 = vpop.f32.mrf.mxu0  ;;  %5862 = vmatmul.mubr.msk.bf16.vlgmr.msra.gmra.mxu0 %vm1420_vm0, %v4258_v58  ;;  %v4261_v24 = vpack.c.bf16 %v4230_v61, %v4229_v20  ;;  %v2006_v58 = vadd.f32 %v6882_v30, %v6892_v26  ;;  %v4236_v20 = vld [vmem:[#allocation2 + $0x9e] sm:$0xff] }
 0x294   : > { %v2426_v8 = vadd.f32 %v5608_v62, %v6846_v29  ;;  %v7051_v34 = vadd.f32 %v2658_v3, %v2423_v36 }
 0x295   : > { %v2307_v43 = vpop.f32.mrf.mxu1  ;;  %v2674_v52 = vpop.f32.mrf.mxu0 }
 0x296   : > { %v2424_v38 = vadd.f32 %v2307_v43, %v1990_v39  ;;  %v7053_v5 = vadd.f32 %v5652_v16, %v2426_v8  ;;  %v4233_v39 = vld [vmem:[#allocation2 + $0x86] sm:$0xff] }
 0x297   : > { %v5611_v27 = vpop.f32.mrf.mxu1  ;;  %v5656_v4 = vpop.f32.mrf.mxu0  ;;  %5866 = vmatmul.mubr.msk.bf16.vlgmr.msra.gmra.mxu1 %vm1420_vm0, %v4260_v40 }
 0x298   : > { %v2429_v31 = vadd.f32 %v5611_v27, %v6865_v56  ;;  %5869 = vmatprep.mubr.msk.bf16.mxu1 %vm1420_vm0, %v4261_v24  ;;  %v7058_v29 = vadd.f32 %v2661_v25, %v2424_v38  ;;  %v4231_v56 = vld [vmem:[#allocation2 + $0x76] sm:$0xff] }
 0x299   : > { %v2320_v12 = vpop.f32.mrf.mxu1  ;;  %v2677_v46 = vpop.f32.mrf.mxu0  ;;  %v4262_v61 = vpack.c.bf16 %v4232_v6, %v4231_v56 }
 0x29a   : > { %v2427_v3 = vadd.f32 %v2320_v12, %v6870_v2  ;;  %v7061_v54 = vadd.f32 %v5655_v42, %v2429_v31  ;;  %v4263_v2 = vpack.c.bf16 %v4234_v22, %v4233_v39  ;;  %v4235_v12 = vld [vmem:[#allocation2 + $0x96] sm:$0xff]  ;;  %v4240_v39 = vld [vmem:[#allocation2 + $0xbe] sm:$0xff] }
 0x29b   : > { %v5612_v0 = vpop.f32.mrf.mxu1  ;;  %v5659_v16 = vpop.f32.mrf.mxu0 }
 0x29c   : > { %v2430_v36 = vadd.f32 %v5612_v0, %v6876_v13  ;;  %v7066_v53 = vadd.f32 %v2674_v52, %v2427_v3  ;;  %v4264_v0 = vpack.c.bf16 %v4236_v20, %v4235_v12 }
 0x29d   : > { %v2323_v25 = vpop.f32.mrf.mxu1  ;;  %v2690_v62 = vpop.f32.mrf.mxu0 }
 0x29e   : > { %v2428_v8 = vadd.f32 %v2323_v25, %v2006_v58  ;;  %v7068_v49 = vadd.f32 %v5656_v4, %v2430_v36  ;;  %v4238_v4 = vld [vmem:[#allocation2 + $0xae] sm:$0xff] }
 0x29f   : > { %v5615_v42 = vpop.f32.mrf.mxu1  ;;  %v5660_v43 = vpop.f32.mrf.mxu0  ;;  %5870 = vmatmul.mubr.msk.bf16.gmra.mxu1 %vm1420_vm0, %v4262_v61 }
 0x2a0   : > { %v2433_v40 = vadd.f32 %v5615_v42, %v6895_v51  ;;  %5873 = vmatprep.mubr.msk.bf16.mxu1 %vm1420_vm0, %v4263_v2  ;;  %v7073_v13 = vadd.f32 %v2677_v46, %v2428_v8  ;;  %v4237_v46 = vld [vmem:[#allocation2 + $0xa6] sm:$0xff]  ;;  %v4242_v42 = vld [vmem:[#allocation2 + $0xce] sm:$0xff] }
 0x2a1   : > { %v2336_v30 = vpop.f32.mrf.mxu1  ;;  %v2693_v26 = vpop.f32.mrf.mxu0  ;;  %v4265_v58 = vpack.c.bf16 %v4238_v4, %v4237_v46  ;;  %v4244_v46 = vld [vmem:[#allocation2 + $0xde] sm:$0xff] }
 0x2a2   : > { %v2431_v52 = vadd.f32 %v2336_v30, %v6900_v7  ;;  %v7076_v38 = vadd.f32 %v5659_v16, %v2433_v40  ;;  %v4239_v40 = vld [vmem:[#allocation2 + $0xb6] sm:$0xff] }
 0x2a3   : > { %v5616_v24 = vpop.f32.mrf.mxu1  ;;  %v5663_v27 = vpop.f32.mrf.mxu0  ;;  %v4266_v20 = vpack.c.bf16 %v4240_v39, %v4239_v40 }
 0x2a4   : > { %v2434_v31 = vadd.f32 %v5616_v24, %v6906_v15  ;;  %v7079_v3 = vadd.f32 %v2690_v62, %v2431_v52 }
 0x2a5   : > { %v2339_v51 = vpop.f32.mrf.mxu1  ;;  %v2706_v6 = vpop.f32.mrf.mxu0 }
 0x2a6   : > { %v2432_v22 = vadd.f32 %v2339_v51, %v6910_v32  ;;  %v7082_v36 = vadd.f32 %v5660_v43, %v2434_v31 }
 0x2a7   : > { %v5619_v7 = vpop.f32.mrf.mxu1  ;;  %v5664_v16 = vpop.f32.mrf.mxu0  ;;  %5874 = vmatmul.mubr.msk.bf16.gmra.mxu1 %vm1420_vm0, %v4264_v0 }
 0x2a8   : > { %v2437_v56 = vadd.f32 %v5619_v7, %v6920_v9  ;;  %5877 = vmatprep.mubr.msk.bf16.mxu1 %vm1420_vm0, %v4265_v58  ;;  %v7087_v15 = vadd.f32 %v2693_v26, %v2432_v22  ;;  %v4241_v26 = vld [vmem:[#allocation2 + $0xc6] sm:$0xff]  ;;  %v4246_v7 = vld [vmem:[#allocation2 + $0xee] sm:$0xff] }
 0x2a9   : > { %v2352_v25 = vpop.f32.mrf.mxu1  ;;  %v2709_v62 = vpop.f32.mrf.mxu0  ;;  %v4267_v4 = vpack.c.bf16 %v4242_v42, %v4241_v26  ;;  %v4248_v26 = vld [vmem:[#allocation2 + $0xfe] sm:$0xff] }
 0x2aa   : > { %v2435_v61 = vadd.f32 %v2352_v25, %v6927_v28  ;;  %v7090_v8 = vadd.f32 %v5663_v27, %v2437_v56  ;;  %v4243_v56 = vld [vmem:[#allocation2 + $0xd6] sm:$0xff] }
 0x2ab   : > { %v5620_v32 = vpop.f32.mrf.mxu1  ;;  %v5667_v2 = vpop.f32.mrf.mxu0  ;;  %v4268_v39 = vpack.c.bf16 %v4244_v46, %v4243_v56 }
 0x2ac   : > { %v2438_v43 = vadd.f32 %v5620_v32, %v6930_v35  ;;  %v7093_v30 = vadd.f32 %v2706_v6, %v2435_v61 }
 0x2ad   : > { %v2355_v9 = vpop.f32.mrf.mxu1  ;;  %v2722_v52 = vpop.f32.mrf.mxu0 }
 0x2ae   : > { %v2436_v24 = vadd.f32 %v2355_v9, %v6934_v1  ;;  %v7096_v31 = vadd.f32 %v5664_v16, %v2438_v43 }
 0x2af   : > { %v5623_v28 = vpop.f32.mrf.mxu1  ;;  %v5668_v27 = vpop.f32.mrf.mxu0  ;;  %5878 = vmatmul.mubr.msk.bf16.gmra.mxu1 %vm1420_vm0, %v4266_v20 }
 0x2b0   : > { %v2441_v12 = vadd.f32 %v5623_v28, %v6951_v14  ;;  %5881 = vmatprep.mubr.msk.bf16.mxu1 %vm1420_vm0, %v4267_v4  ;;  %v7101_v35 = vadd.f32 %v2709_v62, %v2436_v24  ;;  %v4245_v62 = vld [vmem:[#allocation2 + $0xe6] sm:$0xff]  ;;  %v4250_v28 = vld [vmem:[#allocation2 + $0x10e] sm:$0xff] }
 0x2b1   : > { %v2368_v51 = vpop.f32.mrf.mxu1  ;;  %v2725_v6 = vpop.f32.mrf.mxu0  ;;  %v4269_v42 = vpack.c.bf16 %v4246_v7, %v4245_v62  ;;  %v4252_v62 = vld [vmem:[#allocation2 + $0x11e] sm:$0xff] }
 0x2b2   : > { %v2439_v0 = vadd.f32 %v2368_v51, %v6955_v21  ;;  %v7104_v22 = vadd.f32 %v5667_v2, %v2441_v12  ;;  %v4247_v12 = vld [vmem:[#allocation2 + $0xf6] sm:$0xff] }
 0x2b3   : > { %v5624_v1 = vpop.f32.mrf.mxu1  ;;  %v5671_v58 = vpop.f32.mrf.mxu0  ;;  %v4270_v46 = vpack.c.bf16 %v4248_v26, %v4247_v12 }
 0x2b4   : > { %v2442_v16 = vadd.f32 %v5624_v1, %v6958_v41  ;;  %v7107_v25 = vadd.f32 %v2722_v52, %v2439_v0 }
 0x2b5   : > { %v2371_v14 = vpop.f32.mrf.mxu1  ;;  %v2738_v61 = vpop.f32.mrf.mxu0 }
 0x2b6   : > { %v2440_v32 = vadd.f32 %v2371_v14, %v6961_v47  ;;  %v7110_v43 = vadd.f32 %v5668_v27, %v2442_v16 }
 0x2b7   : > { %v5627_v21 = vpop.f32.mrf.mxu1  ;;  %v5672_v2 = vpop.f32.mrf.mxu0  ;;  %5882 = vmatmul.mubr.msk.bf16.gmra.mxu1 %vm1420_vm0, %v4268_v39 }
 0x2b8   : > { %v2445_v40 = vadd.f32 %v5627_v21, %v6971_v11  ;;  %5885 = vmatprep.mubr.msk.bf16.mxu1 %vm1420_vm0, %v4269_v42  ;;  %v7115_v41 = vadd.f32 %v2725_v6, %v2440_v32  ;;  %v4249_v6 = vld [vmem:[#allocation2 + $0x106] sm:$0xff]  ;;  %v4254_v21 = vld [vmem:[#allocation2 + $0x12e] sm:$0xff] }
 0x2b9   : > { %v2384_v9 = vpop.f32.mrf.mxu1  ;;  %v2741_v52 = vpop.f32.mrf.mxu0  ;;  %v4271_v7 = vpack.c.bf16 %v4250_v28, %v4249_v6  ;;  %v4255_v6 = vld [vmem:[#allocation2 + $0x136] sm:$0xff] }
 0x2ba   : > { %v2443_v20 = vadd.f32 %v2384_v9, %v6975_v33  ;;  %v7118_v24 = vadd.f32 %v5671_v58, %v2445_v40  ;;  %v4251_v40 = vld [vmem:[#allocation2 + $0x116] sm:$0xff] }
 0x2bb   : > { %v5628_v47 = vpop.f32.mrf.mxu1  ;;  %v5675_v4 = vpop.f32.mrf.mxu0  ;;  %v4272_v26 = vpack.c.bf16 %v4252_v62, %v4251_v40 }
 0x2bc   : > { %v2446_v27 = vadd.f32 %v5628_v47, %v6978_v55  ;;  %v7121_v51 = vadd.f32 %v2738_v61, %v2443_v20 }
 0x2bd   : > { %v2387_v11 = vpop.f32.mrf.mxu1  ;;  %v2754_v0 = vpop.f32.mrf.mxu0 }
 0x2be   : > { %v2444_v1 = vadd.f32 %v2387_v11, %v6981_v48  ;;  %v7124_v16 = vadd.f32 %v5672_v2, %v2446_v27 }
 0x2bf   : > { %v5631_v33 = vpop.f32.mrf.mxu1  ;;  %v5676_v58 = vpop.f32.mrf.mxu0  ;;  %5886 = vmatmul.mubr.msk.bf16.gmra.mxu1 %vm1420_vm0, %v4270_v46 }
 0x2c0   : > { %v2449_v56 = vadd.f32 %v5631_v33, %v6991_v18  ;;  %5889 = vmatprep.mubr.msk.bf16.mxu1 %vm1420_vm0, %v4271_v7  ;;  %v7129_v55 = vadd.f32 %v2741_v52, %v2444_v1  ;;  %v4253_v52 = vld [vmem:[#allocation2 + $0x126] sm:$0xff]  ;;  %v4256_v1 = vld [vmem:[#allocation2 + $0x13e] sm:$0xff] }
 0x2c1   : > { %v2400_v14 = vpop.f32.mrf.mxu1  ;;  %v2757_v61 = vpop.f32.mrf.mxu0  ;;  %v4273_v28 = vpack.c.bf16 %v4254_v21, %v4253_v52 }
 0x2c2   : > { %v2447_v39 = vadd.f32 %v2400_v14, %v6995_v17  ;;  %v7132_v32 = vadd.f32 %v5675_v4, %v2449_v56 }
 0x2c3   : > { %v5632_v48 = vpop.f32.mrf.mxu1  ;;  %v5731_v42 = vpop.f32.mrf.mxu0 }
 0x2c4   : > { %v2450_v2 = vadd.f32 %v5632_v48, %v6998_v37  ;;  %v7135_v9 = vadd.f32 %v2754_v0, %v2447_v39  ;;  %v4274_v39 = vpack.c.bf16 %v4256_v1, %v4255_v6 }
 0x2c5   : > { %v2403_v18 = vpop.f32.mrf.mxu1  ;;  %v3334_v20 = vpop.f32.mrf.mxu0 }
 0x2c6   : > { %v2448_v47 = vadd.f32 %v2403_v18, %v7001_v50  ;;  %v7138_v27 = vadd.f32 %v5676_v58, %v2450_v2 }
 0x2c7   : > { %v5687_v17 = vpop.f32.mrf.mxu1  ;;  %v5732_v4 = vpop.f32.mrf.mxu0  ;;  %5890 = vmatmul.mubr.msk.bf16.gmra.mxu1 %vm1420_vm0, %v4272_v26 }
 0x2c8   : > { %v3125_v12 = vadd.f32 %v5687_v17, %v7009_v23  ;;  %5893 = vmatprep.mubr.msk.bf16.mxu1 %vm1420_vm0, %v4273_v28  ;;  %v7143_v37 = vadd.f32 %v2757_v61, %v2448_v47 }
 0x2c9   : > { %v2980_v11 = vpop.f32.mrf.mxu1  ;;  %v3337_v0 = vpop.f32.mrf.mxu0 }
 0x2ca   : > { %v3123_v46 = vadd.f32 %v2980_v11, %v7016_v59  ;;  %v7146_v50 = vadd.f32 %v5731_v42, %v3125_v12 }
 0x2cb   : > { %v5688_v7 = vpop.f32.mrf.mxu1  ;;  %v5735_v33 = vpop.f32.mrf.mxu0 }
 0x2cc   : > { %v3126_v58 = vadd.f32 %v5688_v7, %v7018_v44  ;;  %v7149_v56 = vadd.f32 %v3334_v20, %v3123_v46 }
 0x2cd   : > { %v2983_v14 = vpop.f32.mrf.mxu1  ;;  %v3350_v23 = vpop.f32.mrf.mxu0 }
 0x2ce   : > { %v3124_v61 = vadd.f32 %v2983_v14, %v7025_v10  ;;  %v7152_v62 = vadd.f32 %v5732_v4, %v3126_v58 }
 0x2cf   : > { %v5691_v48 = vpop.f32.mrf.mxu1  ;;  %v5736_v21 = vpop.f32.mrf.mxu0  ;;  %5894 = vmatmul.mubr.msk.bf16.gmra.mxu1 %vm1420_vm0, %v4274_v39 }
 0x2d0   : > { %v3129_v59 = vadd.f32 %v5691_v48, %v7028_v19  ;;  %v7156_v42 = vadd.f32 %v3337_v0, %v3124_v61 }
 0x2d1   : > { %v2996_v2 = vpop.f32.mrf.mxu1  ;;  %v3353_v40 = vpop.f32.mrf.mxu0 }
 0x2d2   : > { %v3127_v44 = vadd.f32 %v2996_v2, %v7035_v60  ;;  %v7159_v18 = vadd.f32 %v5735_v33, %v3129_v59 }
 0x2d3   : > { %v5692_v20 = vpop.f32.mrf.mxu1  ;;  %v5739_v26 = vpop.f32.mrf.mxu0 }
 0x2d4   : > { %v3130_v10 = vadd.f32 %v5692_v20, %v7037_v45  ;;  %v7162_v52 = vadd.f32 %v3350_v23, %v3127_v44 }
 0x2d5   : > { %v2999_v47 = vpop.f32.mrf.mxu1  ;;  %v3366_v28 = vpop.f32.mrf.mxu0 }
 0x2d6   : > { %v3128_v17 = vadd.f32 %v2999_v47, %v7042_v63  ;;  %v7165_v4 = vadd.f32 %v5736_v21, %v3130_v10 }
 0x2d7   : > { %v5695_v19 = vpop.f32.mrf.mxu1  ;;  %v5740_v12 = vpop.f32.mrf.mxu0 }
 0x2d8   : > { %v3133_v11 = vadd.f32 %v5695_v19, %v7045_v57  ;;  %v7168_v0 = vadd.f32 %v3353_v40, %v3128_v17 }
 0x2d9   : > { %v3012_v60 = vpop.f32.mrf.mxu1  ;;  %v3369_v46 = vpop.f32.mrf.mxu0 }
 0x2da   : > { %v3131_v6 = vadd.f32 %v3012_v60, %v7051_v34  ;;  %v7171_v1 = vadd.f32 %v5739_v26, %v3133_v11 }
 0x2db   : > { %v5696_v45 = vpop.f32.mrf.mxu1  ;;  %v5743_v7 = vpop.f32.mrf.mxu0 }
 0x2dc   : > { %v3134_v33 = vadd.f32 %v5696_v45, %v7053_v5  ;;  %v7174_v58 = vadd.f32 %v3366_v28, %v3131_v6 }
 0x2dd   : > { %v3015_v63 = vpop.f32.mrf.mxu1  ;;  %v3382_v14 = vpop.f32.mrf.mxu0 }
 0x2de   : > { %v3132_v23 = vadd.f32 %v3015_v63, %v7058_v29  ;;  %v7177_v39 = vadd.f32 %v5740_v12, %v3134_v33 }
 0x2df   : > { %v5699_v57 = vpop.f32.mrf.mxu1  ;;  %v5744_v61 = vpop.f32.mrf.mxu0 }
 0x2e0   : > { %v3137_v48 = vadd.f32 %v5699_v57, %v7061_v54  ;;  %v7180_v21 = vadd.f32 %v3369_v46, %v3132_v23 }
 0x2e1   : > { %v3028_v34 = vpop.f32.mrf.mxu1  ;;  %v3385_v59 = vpop.f32.mrf.mxu0 }
 0x2e2   : > { %v3135_v2 = vadd.f32 %v3028_v34, %v7066_v53  ;;  %v7183_v40 = vadd.f32 %v5743_v7, %v3137_v48 }
 0x2e3   : > { %v5700_v5 = vpop.f32.mrf.mxu1  ;;  %v5747_v44 = vpop.f32.mrf.mxu0 }
 0x2e4   : > { %v3138_v20 = vadd.f32 %v5700_v5, %v7068_v49  ;;  %v7186_v26 = vadd.f32 %v3382_v14, %v3135_v2 }
 0x2e5   : > { %v3031_v29 = vpop.f32.mrf.mxu1  ;;  %v3398_v10 = vpop.f32.mrf.mxu0 }
 0x2e6   : > { %v3136_v47 = vadd.f32 %v3031_v29, %v7073_v13  ;;  %v7189_v28 = vadd.f32 %v5744_v61, %v3138_v20 }
 0x2e7   : > { %v5703_v54 = vpop.f32.mrf.mxu1  ;;  %v5748_v17 = vpop.f32.mrf.mxu0 }
 0x2e8   : > { %v3141_v19 = vadd.f32 %v5703_v54, %v7076_v38  ;;  %v7192_v12 = vadd.f32 %v3385_v59, %v3136_v47 }
 0x2e9   : > { %v3044_v53 = vpop.f32.mrf.mxu1  ;;  %v3401_v11 = vpop.f32.mrf.mxu0 }
 0x2ea   : > { %v3139_v60 = vadd.f32 %v3044_v53, %v7079_v3  ;;  %v7195_v46 = vadd.f32 %v5747_v44, %v3141_v19 }
 0x2eb   : > { %v5704_v49 = vpop.f32.mrf.mxu1  ;;  %v5751_v6 = vpop.f32.mrf.mxu0 }
 0x2ec   : > { %v3142_v45 = vadd.f32 %v5704_v49, %v7082_v36  ;;  %v7198_v7 = vadd.f32 %v3398_v10, %v3139_v60 }
 0x2ed   : > { %v3047_v13 = vpop.f32.mrf.mxu1  ;;  %v3414_v33 = vpop.f32.mrf.mxu0 }
 0x2ee   : > { %v3140_v63 = vadd.f32 %v3047_v13, %v7087_v15  ;;  %v7201_v14 = vadd.f32 %v5748_v17, %v3142_v45 }
 0x2ef   : > { %v5707_v38 = vpop.f32.mrf.mxu1  ;;  %v5752_v23 = vpop.f32.mrf.mxu0 }
 0x2f0   : > { %v3145_v57 = vadd.f32 %v5707_v38, %v7090_v8  ;;  %v7204_v61 = vadd.f32 %v3401_v11, %v3140_v63 }
 0x2f1   : > { %v3060_v3 = vpop.f32.mrf.mxu1  ;;  %v3417_v48 = vpop.f32.mrf.mxu0 }
 0x2f2   : > { %v3143_v34 = vadd.f32 %v3060_v3, %v7093_v30  ;;  %v7207_v59 = vadd.f32 %v5751_v6, %v3145_v57 }
 0x2f3   : > { %v5708_v36 = vpop.f32.mrf.mxu1  ;;  %v5755_v2 = vpop.f32.mrf.mxu0 }
 0x2f4   : > { %v3146_v5 = vadd.f32 %v5708_v36, %v7096_v31  ;;  %v7210_v44 = vadd.f32 %v3414_v33, %v3143_v34 }
 0x2f5   : > { %v3063_v15 = vpop.f32.mrf.mxu1  ;;  %v3430_v20 = vpop.f32.mrf.mxu0 }
 0x2f6   : > { %v3144_v29 = vadd.f32 %v3063_v15, %v7101_v35  ;;  %v7213_v10 = vadd.f32 %v5752_v23, %v3146_v5 }
 0x2f7   : > { %v5711_v8 = vpop.f32.mrf.mxu1  ;;  %v5756_v47 = vpop.f32.mrf.mxu0 }
 0x2f8   : > { %v3149_v54 = vadd.f32 %v5711_v8, %v7104_v22  ;;  %v7216_v17 = vadd.f32 %v3417_v48, %v3144_v29 }
 0x2f9   : > { %v3076_v30 = vpop.f32.mrf.mxu1  ;;  %v3433_v19 = vpop.f32.mrf.mxu0 }
 0x2fa   : > { %v3147_v53 = vadd.f32 %v3076_v30, %v7107_v25  ;;  %v7219_v11 = vadd.f32 %v5755_v2, %v3149_v54 }
 0x2fb   : > { %v5712_v31 = vpop.f32.mrf.mxu1  ;;  %v5759_v60 = vpop.f32.mrf.mxu0 }
 0x2fc   : > { %v3150_v49 = vadd.f32 %v5712_v31, %v7110_v43  ;;  %v7222_v6 = vadd.f32 %v3430_v20, %v3147_v53 }
 0x2fd   : > { %v3079_v35 = vpop.f32.mrf.mxu1  ;;  %v3446_v45 = vpop.f32.mrf.mxu0 }
 0x2fe   : > { %v3148_v13 = vadd.f32 %v3079_v35, %v7115_v41  ;;  %v7225_v33 = vadd.f32 %v5756_v47, %v3150_v49 }
 0x2ff   : > { %v5715_v22 = vpop.f32.mrf.mxu1  ;;  %v5760_v63 = vpop.f32.mrf.mxu0 }
 0x300   : > { %v3153_v38 = vadd.f32 %v5715_v22, %v7118_v24  ;;  %v7228_v23 = vadd.f32 %v3433_v19, %v3148_v13 }
 0x301   : > { %v3092_v25 = vpop.f32.mrf.mxu1  ;;  %v3449_v57 = vpop.f32.mrf.mxu0 }
 0x302   : > { %v3151_v3 = vadd.f32 %v3092_v25, %v7121_v51  ;;  %v7231_v48 = vadd.f32 %v5759_v60, %v3153_v38 }
 0x303   : > { %v5716_v43 = vpop.f32.mrf.mxu1  ;;  %v5763_v34 = vpop.f32.mrf.mxu0 }
 0x304   : > { %v3154_v36 = vadd.f32 %v5716_v43, %v7124_v16  ;;  %v7234_v2 = vadd.f32 %v3446_v45, %v3151_v3 }
 0x305   : > { %v3095_v41 = vpop.f32.mrf.mxu1  ;;  %v3462_v5 = vpop.f32.mrf.mxu0 }
 0x306   : > { %v3152_v15 = vadd.f32 %v3095_v41, %v7129_v55  ;;  %v7237_v20 = vadd.f32 %v5760_v63, %v3154_v36 }
 0x307   : > { %v5719_v24 = vpop.f32.mrf.mxu1  ;;  %v5764_v29 = vpop.f32.mrf.mxu0 }
 0x308   : > { %v3157_v8 = vadd.f32 %v5719_v24, %v7132_v32  ;;  %v7240_v47 = vadd.f32 %v3449_v57, %v3152_v15 }
 0x309   : > { %v3108_v51 = vpop.f32.mrf.mxu1  ;;  %v3465_v54 = vpop.f32.mrf.mxu0 }
 0x30a   : > { %v3155_v30 = vadd.f32 %v3108_v51, %v7135_v9  ;;  %v7243_v19 = vadd.f32 %v5763_v34, %v3157_v8 }
 0x30b   : > { %v5720_v16 = vpop.f32.mrf.mxu1  ;;  %v5819_v53 = vpop.f32.mrf.mxu0 }
 0x30c   : > { %v3158_v31 = vadd.f32 %v5720_v16, %v7138_v27  ;;  %v7246_v60 = vadd.f32 %v3462_v5, %v3155_v30 }
 0x30d   : > { %v3111_v55 = vpop.f32.mrf.mxu1  ;;  %v4042_v49 = vpop.f32.mrf.mxu0 }
 0x30e   : > { %v3156_v35 = vadd.f32 %v3111_v55, %v7143_v37  ;;  %v7249_v45 = vadd.f32 %v5764_v29, %v3158_v31 }
 0x30f   : > { %v5775_v32 = vpop.f32.mrf.mxu1  ;;  %v5820_v13 = vpop.f32.mrf.mxu0 }
 0x310   : > { %v3833_v22 = vadd.f32 %v5775_v32, %v7146_v50  ;;  %v7252_v63 = vadd.f32 %v3465_v54, %v3156_v35 }
 0x311   : > { %v3688_v9 = vpop.f32.mrf.mxu1  ;;  %v4045_v38 = vpop.f32.mrf.mxu0 }
 0x312   : > { %v3831_v25 = vadd.f32 %v3688_v9, %v7149_v56  ;;  %v7255_v57 = vadd.f32 %v5819_v53, %v3833_v22 }
 0x313   : > { %v5776_v27 = vpop.f32.mrf.mxu1  ;;  %v5823_v3 = vpop.f32.mrf.mxu0 }
 0x314   : > { %v3834_v43 = vadd.f32 %v5776_v27, %v7152_v62  ;;  %v7258_v34 = vadd.f32 %v4042_v49, %v3831_v25 }
 0x315   : > { %v3691_v37 = vpop.f32.mrf.mxu1  ;;  %v4058_v36 = vpop.f32.mrf.mxu0 }
 0x316   : > { %v3832_v41 = vadd.f32 %v3691_v37, %v7156_v42  ;;  %v7261_v5 = vadd.f32 %v5820_v13, %v3834_v43 }
 0x317   : > { %v5779_v50 = vpop.f32.mrf.mxu1  ;;  %v5824_v15 = vpop.f32.mrf.mxu0 }
 0x318   : > { %v3837_v24 = vadd.f32 %v5779_v50, %v7159_v18  ;;  %v7264_v29 = vadd.f32 %v4045_v38, %v3832_v41 }
 0x319   : > { %v3704_v56 = vpop.f32.mrf.mxu1  ;;  %v4061_v8 = vpop.f32.mrf.mxu0 }
 0x31a   : > { %v3835_v51 = vadd.f32 %v3704_v56, %v7162_v52  ;;  %v7267_v54 = vadd.f32 %v5823_v3, %v3837_v24 }
 0x31b   : > { %v5780_v62 = vpop.f32.mrf.mxu1  ;;  %v5827_v30 = vpop.f32.mrf.mxu0 }
 0x31c   : > { %v3838_v16 = vadd.f32 %v5780_v62, %v7165_v4  ;;  %v7270_v53 = vadd.f32 %v4058_v36, %v3835_v51 }
 0x31d   : > { %v3707_v42 = vpop.f32.mrf.mxu1  ;;  %v4074_v31 = vpop.f32.mrf.mxu0 }
 0x31e   : > { %v3836_v55 = vadd.f32 %v3707_v42, %v7168_v0  ;;  %v7273_v49 = vadd.f32 %v5824_v15, %v3838_v16 }
 0x31f   : > { %v5783_v18 = vpop.f32.mrf.mxu1  ;;  %v5828_v35 = vpop.f32.mrf.mxu0 }
 0x320   : > { %v3841_v32 = vadd.f32 %v5783_v18, %v7171_v1  ;;  %v7276_v13 = vadd.f32 %v4061_v8, %v3836_v55 }
 0x321   : > { %v3720_v52 = vpop.f32.mrf.mxu1  ;;  %v4077_v22 = vpop.f32.mrf.mxu0 }
 0x322   : > { %v3839_v9 = vadd.f32 %v3720_v52, %v7174_v58  ;;  %v7279_v38 = vadd.f32 %v5827_v30, %v3841_v32 }
 0x323   : > { %v5784_v4 = vpop.f32.mrf.mxu1  ;;  %v5831_v25 = vpop.f32.mrf.mxu0 }
 0x324   : > { %v3842_v27 = vadd.f32 %v5784_v4, %v7177_v39  ;;  %v7282_v3 = vadd.f32 %v4074_v31, %v3839_v9 }
 0x325   : > { %v3723_v0 = vpop.f32.mrf.mxu1  ;;  %v4090_v43 = vpop.f32.mrf.mxu0 }
 0x326   : > { %v3840_v37 = vadd.f32 %v3723_v0, %v7180_v21  ;;  %v7285_v36 = vadd.f32 %v5828_v35, %v3842_v27 }
 0x327   : > { %v5787_v1 = vpop.f32.mrf.mxu1  ;;  %v5832_v41 = vpop.f32.mrf.mxu0 }
 0x328   : > { %v3845_v50 = vadd.f32 %v5787_v1, %v7183_v40  ;;  %v7288_v15 = vadd.f32 %v4077_v22, %v3840_v37 }
 0x329   : > { %v3736_v58 = vpop.f32.mrf.mxu1  ;;  %v4093_v24 = vpop.f32.mrf.mxu0 }
 0x32a   : > { %v3843_v56 = vadd.f32 %v3736_v58, %v7186_v26  ;;  %v7291_v8 = vadd.f32 %v5831_v25, %v3845_v50 }
 0x32b   : > { %v5788_v39 = vpop.f32.mrf.mxu1  ;;  %v5835_v51 = vpop.f32.mrf.mxu0 }
 0x32c   : > { %v3846_v62 = vadd.f32 %v5788_v39, %v7189_v28  ;;  %v7294_v30 = vadd.f32 %v4090_v43, %v3843_v56 }
 0x32d   : > { %v3739_v21 = vpop.f32.mrf.mxu1  ;;  %v4106_v16 = vpop.f32.mrf.mxu0 }
 0x32e   : > { %v3844_v42 = vadd.f32 %v3739_v21, %v7192_v12  ;;  %v7297_v31 = vadd.f32 %v5832_v41, %v3846_v62 }
 0x32f   : > { %v5791_v40 = vpop.f32.mrf.mxu1  ;;  %v5836_v55 = vpop.f32.mrf.mxu0 }
 0x330   : > { %v3849_v18 = vadd.f32 %v5791_v40, %v7195_v46  ;;  %v7300_v35 = vadd.f32 %v4093_v24, %v3844_v42 }
 0x331   : > { %v3752_v26 = vpop.f32.mrf.mxu1  ;;  %v4109_v32 = vpop.f32.mrf.mxu0 }
 0x332   : > { %v3847_v52 = vadd.f32 %v3752_v26, %v7198_v7  ;;  %v7303_v22 = vadd.f32 %v5835_v51, %v3849_v18 }
 0x333   : > { %v5792_v28 = vpop.f32.mrf.mxu1  ;;  %v5839_v9 = vpop.f32.mrf.mxu0 }
 0x334   : > { %v3850_v4 = vadd.f32 %v5792_v28, %v7201_v14  ;;  %v7306_v25 = vadd.f32 %v4106_v16, %v3847_v52 }
 0x335   : > { %v3755_v12 = vpop.f32.mrf.mxu1  ;;  %v4122_v27 = vpop.f32.mrf.mxu0 }
 0x336   : > { %v3848_v0 = vadd.f32 %v3755_v12, %v7204_v61  ;;  %v7309_v43 = vadd.f32 %v5836_v55, %v3850_v4 }
 0x337   : > { %v5795_v46 = vpop.f32.mrf.mxu1  ;;  %v5840_v37 = vpop.f32.mrf.mxu0 }
 0x338   : > { %v3853_v1 = vadd.f32 %v5795_v46, %v7207_v59  ;;  %v7312_v41 = vadd.f32 %v4109_v32, %v3848_v0 }
 0x339   : > { %v3768_v7 = vpop.f32.mrf.mxu1  ;;  %v4125_v50 = vpop.f32.mrf.mxu0 }
 0x33a   : > { %v3851_v58 = vadd.f32 %v3768_v7, %v7210_v44  ;;  %v7315_v24 = vadd.f32 %v5839_v9, %v3853_v1 }
 0x33b   : > { %v5796_v14 = vpop.f32.mrf.mxu1  ;;  %v5843_v56 = vpop.f32.mrf.mxu0 }
 0x33c   : > { %v3854_v39 = vadd.f32 %v5796_v14, %v7213_v10  ;;  %v7318_v51 = vadd.f32 %v4122_v27, %v3851_v58 }
 0x33d   : > { %v3771_v61 = vpop.f32.mrf.mxu1  ;;  %v4138_v62 = vpop.f32.mrf.mxu0 }
 0x33e   : > { %v3852_v21 = vadd.f32 %v3771_v61, %v7216_v17  ;;  %v7321_v16 = vadd.f32 %v5840_v37, %v3854_v39 }
 0x33f   : > { %v5799_v59 = vpop.f32.mrf.mxu1  ;;  %v5844_v42 = vpop.f32.mrf.mxu0 }
 0x340   : > { %v3857_v40 = vadd.f32 %v5799_v59, %v7219_v11  ;;  %v7324_v55 = vadd.f32 %v4125_v50, %v3852_v21 }
 0x341   : > { %v3784_v44 = vpop.f32.mrf.mxu1  ;;  %v4141_v18 = vpop.f32.mrf.mxu0 }
 0x342   : > { %v3855_v26 = vadd.f32 %v3784_v44, %v7222_v6  ;;  %v7327_v32 = vadd.f32 %v5843_v56, %v3857_v40 }
 0x343   : > { %v5800_v10 = vpop.f32.mrf.mxu1  ;;  %v5847_v52 = vpop.f32.mrf.mxu0 }
 0x344   : > { %v3858_v28 = vadd.f32 %v5800_v10, %v7225_v33  ;;  %v7330_v9 = vadd.f32 %v4138_v62, %v3855_v26 }
 0x345   : > { %v3787_v17 = vpop.f32.mrf.mxu1  ;;  %v4154_v4 = vpop.f32.mrf.mxu0 }
 0x346   : > { %v3856_v12 = vadd.f32 %v3787_v17, %v7228_v23  ;;  %v7333_v27 = vadd.f32 %v5844_v42, %v3858_v28 }
 0x347   : > { %v5803_v11 = vpop.f32.mrf.mxu1  ;;  %v5848_v0 = vpop.f32.mrf.mxu0 }
 0x348   : > { %v3861_v46 = vadd.f32 %v5803_v11, %v7231_v48  ;;  %v7336_v37 = vadd.f32 %v4141_v18, %v3856_v12 }
 0x349   : > { %v3800_v6 = vpop.f32.mrf.mxu1  ;;  %v4157_v1 = vpop.f32.mrf.mxu0 }
 0x34a   : > { %v3859_v7 = vadd.f32 %v3800_v6, %v7234_v2  ;;  %v7339_v50 = vadd.f32 %v5847_v52, %v3861_v46 }
 0x34b   : > { %v5804_v33 = vpop.f32.mrf.mxu1  ;;  %v5851_v58 = vpop.f32.mrf.mxu0 }
 0x34c   : > { %v3862_v14 = vadd.f32 %v5804_v33, %v7237_v20  ;;  %v7342_v56 = vadd.f32 %v4154_v4, %v3859_v7 }
 0x34d   : > { %v3803_v23 = vpop.f32.mrf.mxu1  ;;  %v4170_v39 = vpop.f32.mrf.mxu0 }
 0x34e   : > { %v3860_v61 = vadd.f32 %v3803_v23, %v7240_v47  ;;  %v7345_v62 = vadd.f32 %v5848_v0, %v3862_v14  ;;  %v7356_v47 = vld [vmem:[%s7486_s3] ss:$0 sm:$0xff] }
 0x34f   : > { %v5807_v48 = vpop.f32.mrf.mxu1  ;;  %v5852_v21 = vpop.f32.mrf.mxu0 }
 0x350   : > { %v3865_v59 = vadd.f32 %v5807_v48, %v7243_v19  ;;  %v7348_v42 = vadd.f32 %v4157_v1, %v3860_v61 }
 0x351   : > { %v3816_v2 = vpop.f32.mrf.mxu1  ;;  %v4173_v40 = vpop.f32.mrf.mxu0 }
 0x352   : > { %v3863_v44 = vadd.f32 %v3816_v2, %v7246_v60  ;;  %v7351_v18 = vadd.f32 %v5851_v58, %v3865_v59 }
 0x353   : > { %v5808_v20 = vpop.f32.mrf.mxu1  ;;  %v5863_v26 = vpop.f32.mrf.mxu0 }
 0x354   : > { %v3866_v10 = vadd.f32 %v5808_v20, %v7249_v45  ;;  %v4541_v52 = vadd.f32 %v5863_v26, %v7255_v57  ;;  %v7360_v19 = vadd.f32 %v4170_v39, %v3863_v44 }
 0x355   : > { %v3819_v28 = vpop.f32.mrf.mxu1  ;;  %v4396_v17 = vpop.f32.mrf.mxu0 }
 0x356   : > { %v4584_v4 = vadd.f32 %v7356_v47, %v4541_v52  ;;  %v3864_v60 = vadd.f32 %v3819_v28, %v7252_v63  ;;  %v4539_v12 = vadd.f32 %v4396_v17, %v7258_v34  ;;  %v7365_v11 = vadd.f32 %v5852_v21, %v3866_v10 }
 0x357   : > { %v5864_v0 = vpop.f32.mrf.mxu0  ;;  %v5867_v46 = vpop.f32.mrf.mxu1 }
 0x358   : > { %6036 = vtanh.f32 %v4584_v4  ;;  %v4582_v6 = vadd.f32 %v7356_v47, %v4539_v12  ;;  %v4542_v45 = vadd.f32 %v5864_v0, %v7261_v5  ;;  %v4545_v57 = vadd.f32 %v5867_v46, %v7267_v54 }
 0x359   : > { %v4399_v1 = vpop.f32.mrf.mxu0  ;;  %v4412_v7 = vpop.f32.mrf.mxu1  ;;  %v7370_v33 = vadd.f32 %v4173_v40, %v3864_v60 }
 0x35a   : > { %6038 = vtanh.f32 %v4582_v6  ;;  %v4585_v63 = vadd.f32 %v7356_v47, %v4542_v45  ;;  %v4588_v34 = vadd.f32 %v7356_v47, %v4545_v57  ;;  %v4540_v58 = vadd.f32 %v4399_v1, %v7264_v29 }
 0x35b   : > { %v4543_v14 = vadd.f32 %v4412_v7, %v7270_v53  ;;  %v5868_v23 = vpop.f32.mrf.mxu1 }
 0x35c   : > { %6040 = vtanh.f32 %v4585_v63  ;;  %v4583_v5 = vadd.f32 %v7356_v47, %v4540_v58  ;;  %v4546_v54 = vadd.f32 %v5868_v23, %v7273_v49 }
 0x35d   : > { %6042 = vtanh.f32 %v4588_v34  ;;  %v4586_v39 = vadd.f32 %v7356_v47, %v4543_v14  ;;  %v4415_v61 = vpop.f32.mrf.mxu1 }
 0x35e   : > { %6044 = vtanh.f32 %v4583_v5  ;;  %v4589_v48 = vadd.f32 %v7356_v47, %v4546_v54  ;;  %v4544_v21 = vadd.f32 %v4415_v61, %v7276_v13 }
 0x35f   : > { %6046 = vtanh.f32 %v4586_v39  ;;  %v5871_v29 = vpop.f32.mrf.mxu1 }
 0x360   : > { %6048 = vtanh.f32 %v4589_v48  ;;  %v4587_v53 = vadd.f32 %v7356_v47, %v4544_v21  ;;  %v4549_v59 = vadd.f32 %v5871_v29, %v7279_v38 }
 0x361   : > { %v4428_v2 = vpop.f32.mrf.mxu1 }
 0x362   : > { %6050 = vtanh.f32 %v4587_v53  ;;  %v4592_v49 = vadd.f32 %v7356_v47, %v4549_v59  ;;  %v4547_v40 = vadd.f32 %v4428_v2, %v7282_v3 }
 0x363   : > { %v5872_v13 = vpop.f32.mrf.mxu1 }
 0x364   : > { %6052 = vtanh.f32 %v4592_v49  ;;  %v4590_v44 = vadd.f32 %v7356_v47, %v4547_v40  ;;  %v4550_v20 = vadd.f32 %v5872_v13, %v7285_v36 }
 0x365   : > { %v6037_v38 = vpop.eup %6036  ;;  %v4431_v26 = vpop.f32.mrf.mxu1 }
 0x366   : > { %4656 = vst [vmem:[%s7389_s13 + $0x10] sm:$0xff] %v6037_v38  ;;  %6054 = vtanh.f32 %v4590_v44  ;;  %v4593_v3 = vadd.f32 %v7356_v47, %v4550_v20  ;;  %v4548_v10 = vadd.f32 %v4431_v26, %v7288_v15 }
 0x367   : > { %v6039_v52 = vpop.eup %6038  ;;  %v5875_v28 = vpop.f32.mrf.mxu1 }
 0x368   : > { %4654 = vst [vmem:[%s7389_s13] sm:$0xff] %v6039_v52  ;;  %6056 = vtanh.f32 %v4593_v3  ;;  %v4591_v17 = vadd.f32 %v7356_v47, %v4548_v10  ;;  %v4553_v4 = vadd.f32 %v5875_v28, %v7291_v8 }
 0x369   : > { %v6041_v36 = vpop.eup %6040  ;;  %v4444_v60 = vpop.f32.mrf.mxu1 }
 0x36a   : > { %v6043_v12 = vpop.eup %6042  ;;  %4657 = vst [vmem:[%s7389_s13 + $0x18] sm:$0xff] %v6041_v36  ;;  %6058 = vtanh.f32 %v4591_v17  ;;  %v4596_v0 = vadd.f32 %v7356_v47, %v4553_v4  ;;  %v4551_v15 = vadd.f32 %v4444_v60, %v7294_v30 }
 0x36b   : > { %v6045_v46 = vpop.eup %6044  ;;  %4660 = vst [vmem:[%s7389_s13 + $0x30] sm:$0xff] %v6043_v12  ;;  %v5876_v6 = vpop.f32.mrf.mxu1 }
 0x36c   : > { %v6047_v45 = vpop.eup %6046  ;;  %4655 = vst [vmem:[%s7389_s13 + $0x8] sm:$0xff] %v6045_v46  ;;  %6060 = vtanh.f32 %v4596_v0  ;;  %v4594_v8 = vadd.f32 %v7356_v47, %v4551_v15  ;;  %v4554_v57 = vadd.f32 %v5876_v6, %v7297_v31 }
 0x36d   : > { %v6049_v1 = vpop.eup %6048  ;;  %4658 = vst [vmem:[%s7389_s13 + $0x20] sm:$0xff] %v6047_v45  ;;  %v4447_v7 = vpop.f32.mrf.mxu1 }
 0x36e   : > { %4661 = vst [vmem:[%s7389_s13 + $0x38] sm:$0xff] %v6049_v1  ;;  %6062 = vtanh.f32 %v4594_v8  ;;  %v4597_v63 = vadd.f32 %v7356_v47, %v4554_v57  ;;  %v4552_v30 = vadd.f32 %v4447_v7, %v7300_v35 }
 0x36f   : > { %v6051_v34 = vpop.eup %6050  ;;  %v5879_v58 = vpop.f32.mrf.mxu1 }
 0x370   : > { %4659 = vst [vmem:[%s7389_s13 + $0x28] sm:$0xff] %v6051_v34  ;;  %6064 = vtanh.f32 %v4597_v63  ;;  %v4595_v14 = vadd.f32 %v7356_v47, %v4552_v30  ;;  %v4557_v31 = vadd.f32 %v5879_v58, %v7303_v22 }
 0x371   : > { %v6053_v23 = vpop.eup %6052  ;;  %v4460_v5 = vpop.f32.mrf.mxu1 }
 0x372   : > { %4664 = vst [vmem:[%s7389_s13 + $0x50] sm:$0xff] %v6053_v23  ;;  %6066 = vtanh.f32 %v4595_v14  ;;  %v4600_v54 = vadd.f32 %v7356_v47, %v4557_v31  ;;  %v4555_v39 = vadd.f32 %v4460_v5, %v7306_v25 }
 0x373   : > { %v6055_v61 = vpop.eup %6054  ;;  %v5880_v35 = vpop.f32.mrf.mxu1 }
 0x374   : > { %4662 = vst [vmem:[%s7389_s13 + $0x40] sm:$0xff] %v6055_v61  ;;  %6068 = vtanh.f32 %v4600_v54  ;;  %v4598_v48 = vadd.f32 %v7356_v47, %v4555_v39  ;;  %v4558_v21 = vadd.f32 %v5880_v35, %v7309_v43 }
 0x375   : > { %v6057_v29 = vpop.eup %6056  ;;  %v4463_v22 = vpop.f32.mrf.mxu1 }
 0x376   : > { %4665 = vst [vmem:[%s7389_s13 + $0x58] sm:$0xff] %v6057_v29  ;;  %6070 = vtanh.f32 %v4598_v48  ;;  %v4601_v53 = vadd.f32 %v7356_v47, %v4558_v21  ;;  %v4556_v59 = vadd.f32 %v4463_v22, %v7312_v41 }
 0x377   : > { %v6059_v2 = vpop.eup %6058  ;;  %v5883_v25 = vpop.f32.mrf.mxu1 }
 0x378   : > { %4663 = vst [vmem:[%s7389_s13 + $0x48] sm:$0xff] %v6059_v2  ;;  %6072 = vtanh.f32 %v4601_v53  ;;  %v4599_v49 = vadd.f32 %v7356_v47, %v4556_v59  ;;  %v4561_v40 = vadd.f32 %v5883_v25, %v7315_v24 }
 0x379   : > { %v6061_v13 = vpop.eup %6060  ;;  %v4476_v43 = vpop.f32.mrf.mxu1 }
 0x37a   : > { %4668 = vst [vmem:[%s7389_s13 + $0x70] sm:$0xff] %v6061_v13  ;;  %6074 = vtanh.f32 %v4599_v49  ;;  %v4604_v44 = vadd.f32 %v7356_v47, %v4561_v40  ;;  %v4559_v20 = vadd.f32 %v4476_v43, %v7318_v51 }
 0x37b   : > { %v6063_v38 = vpop.eup %6062  ;;  %v5884_v41 = vpop.f32.mrf.mxu1 }
 0x37c   : > { %4666 = vst [vmem:[%s7389_s13 + $0x60] sm:$0xff] %v6063_v38  ;;  %6076 = vtanh.f32 %v4604_v44  ;;  %v4602_v26 = vadd.f32 %v7356_v47, %v4559_v20  ;;  %v4562_v3 = vadd.f32 %v5884_v41, %v7321_v16 }
 0x37d   : > { %v6065_v10 = vpop.eup %6064  ;;  %v4479_v24 = vpop.f32.mrf.mxu1 }
 0x37e   : > { %4669 = vst [vmem:[%s7389_s13 + $0x78] sm:$0xff] %v6065_v10  ;;  %6078 = vtanh.f32 %v4602_v26  ;;  %v4605_v52 = vadd.f32 %v7356_v47, %v4562_v3  ;;  %v4560_v28 = vadd.f32 %v4479_v24, %v7324_v55 }
 0x37f   : > { %v6067_v17 = vpop.eup %6066  ;;  %v5887_v51 = vpop.f32.mrf.mxu1 }
 0x380   : > { %4667 = vst [vmem:[%s7389_s13 + $0x68] sm:$0xff] %v6067_v17  ;;  %6080 = vtanh.f32 %v4605_v52  ;;  %v4603_v4 = vadd.f32 %v7356_v47, %v4560_v28  ;;  %v4565_v36 = vadd.f32 %v5887_v51, %v7327_v32 }
 0x381   : > { %v6069_v60 = vpop.eup %6068  ;;  %v4492_v16 = vpop.f32.mrf.mxu1 }
 0x382   : > { %4672 = vst [vmem:[%s7389_s13 + $0x90] sm:$0xff] %v6069_v60  ;;  %6082 = vtanh.f32 %v4603_v4  ;;  %v4608_v12 = vadd.f32 %v7356_v47, %v4565_v36  ;;  %v4563_v0 = vadd.f32 %v4492_v16, %v7330_v9 }
 0x383   : > { %v6071_v15 = vpop.eup %6070  ;;  %v5888_v55 = vpop.f32.mrf.mxu1 }
 0x384   : > { %4670 = vst [vmem:[%s7389_s13 + $0x80] sm:$0xff] %v6071_v15  ;;  %6084 = vtanh.f32 %v4608_v12  ;;  %v4606_v46 = vadd.f32 %v7356_v47, %v4563_v0  ;;  %v4566_v6 = vadd.f32 %v5888_v55, %v7333_v27 }
 0x385   : > { %v6073_v45 = vpop.eup %6072  ;;  %v4495_v32 = vpop.f32.mrf.mxu1 }
 0x386   : > { %4673 = vst [vmem:[%s7389_s13 + $0x98] sm:$0xff] %v6073_v45  ;;  %6086 = vtanh.f32 %v4606_v46  ;;  %v4609_v8 = vadd.f32 %v7356_v47, %v4566_v6  ;;  %v4564_v57 = vadd.f32 %v4495_v32, %v7336_v37 }
 0x387   : > { %v6075_v1 = vpop.eup %6074  ;;  %v5891_v9 = vpop.f32.mrf.mxu1 }
 0x388   : > { %4671 = vst [vmem:[%s7389_s13 + $0x88] sm:$0xff] %v6075_v1  ;;  %6088 = vtanh.f32 %v4609_v8  ;;  %v4607_v7 = vadd.f32 %v7356_v47, %v4564_v57  ;;  %v4569_v63 = vadd.f32 %v5891_v9, %v7339_v50 }
 0x389   : > { %v6077_v30 = vpop.eup %6076  ;;  %v4508_v27 = vpop.f32.mrf.mxu1 }
 0x38a   : > { %4676 = vst [vmem:[%s7389_s13 + $0xb0] sm:$0xff] %v6077_v30  ;;  %6090 = vtanh.f32 %v4607_v7  ;;  %v4612_v34 = vadd.f32 %v7356_v47, %v4569_v63  ;;  %v4567_v58 = vadd.f32 %v4508_v27, %v7342_v56 }
 0x38b   : > { %v6079_v14 = vpop.eup %6078  ;;  %v5892_v37 = vpop.f32.mrf.mxu1 }
 0x38c   : > { %4674 = vst [vmem:[%s7389_s13 + $0xa0] sm:$0xff] %v6079_v14  ;;  %6092 = vtanh.f32 %v4612_v34  ;;  %v4610_v31 = vadd.f32 %v7356_v47, %v4567_v58  ;;  %v4570_v23 = vadd.f32 %v5892_v37, %v7345_v62 }
 0x38d   : > { %v6081_v5 = vpop.eup %6080  ;;  %v4511_v50 = vpop.f32.mrf.mxu1 }
 0x38e   : > { %4677 = vst [vmem:[%s7389_s13 + $0xb8] sm:$0xff] %v6081_v5  ;;  %6094 = vtanh.f32 %v4610_v31  ;;  %v4613_v54 = vadd.f32 %v7356_v47, %v4570_v23  ;;  %v4568_v39 = vadd.f32 %v4511_v50, %v7348_v42 }
 0x38f   : > { %v6083_v61 = vpop.eup %6082  ;;  %v5895_v56 = vpop.f32.mrf.mxu1 }
 0x390   : > { %4675 = vst [vmem:[%s7389_s13 + $0xa8] sm:$0xff] %v6083_v61  ;;  %6096 = vtanh.f32 %v4613_v54  ;;  %v4611_v35 = vadd.f32 %v7356_v47, %v4568_v39  ;;  %v4573_v48 = vadd.f32 %v5895_v56, %v7351_v18 }
 0x391   : > { %v6085_v21 = vpop.eup %6084  ;;  %v4524_v62 = vpop.f32.mrf.mxu1 }
 0x392   : > { %4680 = vst [vmem:[%s7389_s13 + $0xd0] sm:$0xff] %v6085_v21  ;;  %6098 = vtanh.f32 %v4611_v35  ;;  %v4616_v29 = vadd.f32 %v7356_v47, %v4573_v48  ;;  %v4571_v22 = vadd.f32 %v4524_v62, %v7360_v19 }
 0x393   : > { %v6087_v53 = vpop.eup %6086  ;;  %v5896_v42 = vpop.f32.mrf.mxu1 }
 0x394   : > { %4678 = vst [vmem:[%s7389_s13 + $0xc0] sm:$0xff] %v6087_v53  ;;  %6100 = vtanh.f32 %v4616_v29  ;;  %v4614_v59 = vadd.f32 %v7356_v47, %v4571_v22  ;;  %v4574_v2 = vadd.f32 %v5896_v42, %v7365_v11 }
 0x395   : > { %v6089_v18 = vpop.eup %6088  ;;  %v4527_v25 = vpop.f32.mrf.mxu1 }
 0x396   : > { %4681 = vst [vmem:[%s7389_s13 + $0xd8] sm:$0xff] %v6089_v18  ;;  %6102 = vtanh.f32 %v4614_v59  ;;  %v4617_v49 = vadd.f32 %v7356_v47, %v4574_v2  ;;  %v4572_v19 = vadd.f32 %v4527_v25, %v7370_v33 }
 0x397   : > { %v6091_v40 = vpop.eup %6090 }
 0x398   : > { %4679 = vst [vmem:[%s7389_s13 + $0xc8] sm:$0xff] %v6091_v40  ;;  %6104 = vtanh.f32 %v4617_v49  ;;  %v4615_v13 = vadd.f32 %v7356_v47, %v4572_v19 }
 0x399   : > { %v6093_v43 = vpop.eup %6092 }
 0x39a   : > { %4684 = vst [vmem:[%s7389_s13 + $0xf0] sm:$0xff] %v6093_v43  ;;  %6106 = vtanh.f32 %v4615_v13 }
 0x39b   : > { %v6095_v11 = vpop.eup %6094 }
 0x39c   : > { %4682 = vst [vmem:[%s7389_s13 + $0xe0] sm:$0xff] %v6095_v11 }
 0x39d   : > { %v6097_v44 = vpop.eup %6096 }
 0x39e   : > { %4685 = vst [vmem:[%s7389_s13 + $0xf8] sm:$0xff] %v6097_v44 }
 0x39f   : > { %v6099_v20 = vpop.eup %6098 }
 0x3a0   : > { %4683 = vst [vmem:[%s7389_s13 + $0xe8] sm:$0xff] %v6099_v20 }
 0x3a1   : > { %v6101_v38 = vpop.eup %6100 }
 0x3a2   : > { %4688 = vst [vmem:[%s7389_s13 + $0x110] sm:$0xff] %v6101_v38 }
 0x3a3   : > { %v6103_v33 = vpop.eup %6102 }
 0x3a4   : > { %4686 = vst [vmem:[%s7389_s13 + $0x100] sm:$0xff] %v6103_v33 }
 0x3a5   : > { %v6105_v41 = vpop.eup %6104 }
 0x3a6   : > { %4689 = vst [vmem:[%s7389_s13 + $0x118] sm:$0xff] %v6105_v41 }
 0x3a7   : > { %v6107_v26 = vpop.eup %6106 }
 0x3a8   : > { %4687 = vst [vmem:[%s7389_s13 + $0x108] sm:$0xff] %v6107_v26 }
 0x3a9 PF: > { %s17_s24 = sadd.s32 1, %s6114_s24  }
 0x3aa   : > { %p14_p4 = scmp.ge.s32.totalorder %s17_s24, 4  }
 0x3ac   :  { %16 = sbr.rel (!%p14_p4) target bundleno = 1 (0x1), region = 86 }

</bundles_post_ra>
